<compile_context>
chip_gen: v7x
topology: tpu7x:2x2x1
jax: 0.10.0
libtpu: 0.0.40
codegen_flags: <defaults>
</compile_context>

<pallas_src>
import jax
import jax.numpy as jnp
import numpy as np
from jax.experimental import pallas as pl
from jax.experimental.pallas import tpu as pltpu

BN_EPS = 1e-5
LANE = 128
VMEM_LIMIT = 32 * 1024 * 1024


# ----------------------------------------------------------------------------
# Pallas kernels
# ----------------------------------------------------------------------------
def _conv_mm_kernel(x_ref, w_ref, shift_ref, o_ref):
    """relu(x @ w + shift) -> o_ref.  Single K block, no scratch."""
    y = jnp.dot(x_ref[...], w_ref[...], preferred_element_type=jnp.float32)
    o_ref[...] = jnp.maximum(y + shift_ref[...], 0.0).astype(o_ref.dtype)


def conv_mm(x, w, shift, *, m_tiles=1):
    """Fused im2col-conv matmul: relu((x @ w) + shift), bf16 in / bf16 out."""
    M, K = x.shape
    Kw, N = w.shape
    assert K == Kw and M % m_tiles == 0
    tm = M // m_tiles
    assert tm == M or tm % 8 == 0
    return pl.pallas_call(
        _conv_mm_kernel,
        out_shape=jax.ShapeDtypeStruct((M, N), jnp.bfloat16),
        grid_spec=pltpu.PrefetchScalarGridSpec(
            num_scalar_prefetch=0,
            grid=(m_tiles,),
            in_specs=[
                pl.BlockSpec((tm, K), lambda i: (i, 0)),
                pl.BlockSpec((K, N), lambda i: (0, 0)),
                pl.BlockSpec((1, N), lambda i: (0, 0)),
            ],
            out_specs=pl.BlockSpec((tm, N), lambda i: (i, 0)),
        ),
        compiler_params=pltpu.CompilerParams(
            dimension_semantics=("parallel",),
            vmem_limit_bytes=VMEM_LIMIT,
        ),
    )(x, w, shift)


def _maxpool_kernel(x_ref, o_ref):
    """MaxPool2d(2,2) on a lane-dense (1, H/2, 2, W/2, 2*C) view; emits only
    the first out_c (real) channels so the downstream flatten is a free
    reshape."""
    x = x_ref[...]
    m = jnp.maximum(x[:, :, 0], x[:, :, 1])            # pool over the H pair
    c = x.shape[-1] // 2                               # = 128 (padded channels)
    m = jnp.maximum(m[..., :c], m[..., c:])            # pool over the W pair
    o_ref[...] = m[..., :o_ref.shape[-1]]              # keep real channels


def maxpool2x2(x, out_c):
    """x: (B, H, W, C) NHWC bf16, H/W even, C multiple of 128.  Returns
    (B, H/2, W/2, out_c)."""
    B, H, W, C = x.shape
    xr = x.reshape(B, H // 2, 2, W // 2, 2 * C)        # contiguous view (free)
    return pl.pallas_call(
        _maxpool_kernel,
        grid=(B,),
        in_specs=[pl.BlockSpec((1, H // 2, 2, W // 2, 2 * C),
                               lambda b: (b, 0, 0, 0, 0))],
        out_specs=pl.BlockSpec((1, H // 2, W // 2, out_c),
                               lambda b: (b, 0, 0, 0)),
        out_shape=jax.ShapeDtypeStruct((B, H // 2, W // 2, out_c), x.dtype),
        compiler_params=pltpu.CompilerParams(
            dimension_semantics=("parallel",),
            vmem_limit_bytes=VMEM_LIMIT),
    )(xr)


def _fc_head_kernel(x_ref, w1_ref, b1_ref, w2_ref, b2_ref, o_ref):
    """Fused fc1 + ReLU + fc2 + log_softmax in a single grid step."""
    h = jnp.dot(x_ref[...], w1_ref[...], preferred_element_type=jnp.float32)
    h = jnp.maximum(h + b1_ref[...], 0.0)              # (B, 512) f32
    # dropout2: eval mode -> identity
    y = jnp.dot(h.astype(jnp.bfloat16), w2_ref[...],
                preferred_element_type=jnp.float32)
    y = y + b2_ref[...]                                # (B, 10)
    m = jnp.max(y, axis=-1, keepdims=True)
    z = y - m
    o_ref[...] = z - jnp.log(jnp.sum(jnp.exp(z), axis=-1, keepdims=True))


def fc_head(x, w1, b1, w2, b2):
    """log_softmax(relu(x @ w1 + b1) @ w2 + b2).  Single pallas_call, single
    grid step; the 6.4 MB bf16 fc1 weight stays resident in VMEM.
    NOTE: on v7x this pins the head to one TensorCore — an N-split of fc1
    across cores is mutually exclusive with the fc2 fusion; at B=2 the fusion
    (one fewer launch) wins."""
    B, K = x.shape
    _, H = w1.shape
    _, N = w2.shape
    return pl.pallas_call(
        _fc_head_kernel,
        out_shape=jax.ShapeDtypeStruct((B, N), jnp.float32),
        grid_spec=pltpu.PrefetchScalarGridSpec(
            num_scalar_prefetch=0,
            grid=(1,),
            in_specs=[
                pl.BlockSpec((B, K), lambda i: (0, 0)),
                pl.BlockSpec((K, H), lambda i: (0, 0)),
                pl.BlockSpec((1, H), lambda i: (0, 0)),
                pl.BlockSpec((H, N), lambda i: (0, 0)),
                pl.BlockSpec((1, N), lambda i: (0, 0)),
            ],
            out_specs=pl.BlockSpec((B, N), lambda i: (0, 0)),
        ),
        compiler_params=pltpu.CompilerParams(
            dimension_semantics=("arbitrary",),
            vmem_limit_bytes=VMEM_LIMIT,
        ),
    )(x, w1, b1, w2, b2)


# ----------------------------------------------------------------------------
# Glue: im2col, one-time parameter folding, full forward
# ----------------------------------------------------------------------------
def im2col(x, kh, kw, in_c):
    """NHWC valid-conv patches, flattened (kh, kw, c) order; keeps the first
    in_c channels (drops lane padding from the previous layer for free)."""
    B, H, W, _ = x.shape
    Ho, Wo = H - kh + 1, W - kw + 1
    cols = [x[:, i:i + Ho, j:j + Wo, :in_c] for i in range(kh) for j in range(kw)]
    patches = jnp.concatenate(cols, axis=-1)           # (B, Ho, Wo, kh*kw*in_c)
    return patches.reshape(B * Ho * Wo, kh * kw * in_c), (B, Ho, Wo)


def bn_fold(conv_bias, gamma, beta, mean, var):
    """Fold conv bias + eval-mode BatchNorm into per-channel (scale, shift)."""
    s = gamma / jnp.sqrt(var + BN_EPS)
    return s, (conv_bias - mean) * s + beta


def conv_w_to_mat(w_oikk, scale, n_pad):
    """(O, I, kh, kw) torch conv weight -> (kh*kw*I, n_pad) matmul weight with
    the BN scale folded in and output channels zero-padded to n_pad lanes."""
    O, I, kh, kw = w_oikk.shape
    wm = jnp.transpose(w_oikk, (2, 3, 1, 0)).reshape(kh * kw * I, O)
    wm = wm * scale[None, :]
    return jnp.pad(wm, ((0, 0), (0, n_pad - O)))


def prepare_params(p):
    """One-time folding of BN stats / biases / layouts into kernel-ready bf16
    weights and f32 shifts.  Runs once, outside the jitted forward."""
    s1, sh1 = bn_fold(p["conv1_b"], p["bn1_gamma"], p["bn1_beta"],
                      p["bn1_mean"], p["bn1_var"])
    s2, sh2 = bn_fold(p["conv2_b"], p["bn2_gamma"], p["bn2_beta"],
                      p["bn2_mean"], p["bn2_var"])
    prep = {
        "w1c": conv_w_to_mat(p["conv1_w"], s1, LANE).astype(jnp.bfloat16),
        "sh1": jnp.pad(sh1, (0, LANE - 16)).reshape(1, LANE).astype(jnp.float32),
        "w2c": conv_w_to_mat(p["conv2_w"], s2, LANE).astype(jnp.bfloat16),
        "sh2": jnp.pad(sh2, (0, LANE - 32)).reshape(1, LANE).astype(jnp.float32),
        # fc1 weight rows permuted from torch NCHW-flatten order (c, h, w) to
        # NHWC order (h, w, c) so the activation flatten is a plain reshape.
        "w_fc1": jnp.transpose(p["fc1_w"].reshape(32, 14, 14, 512),
                               (1, 2, 0, 3)).reshape(6272, 512).astype(jnp.bfloat16),
        "b_fc1": p["fc1_b"].reshape(1, 512).astype(jnp.float32),
        "w_fc2": p["fc2_w"].astype(jnp.bfloat16),
        "b_fc2": p["fc2_b"].reshape(1, 10).astype(jnp.float32),
    }
    return jax.tree_util.tree_map(jnp.asarray, prep)


def net_forward(x_nchw, prep):
    x = jnp.transpose(x_nchw, (0, 2, 3, 1)).astype(jnp.bfloat16)  # NCHW -> NHWC

    # conv1 + bn1 + relu (im2col + fused matmul; single grid step; output
    # channels padded 16 -> 128 for lane-dense stores)
    patches, (B, Ho, Wo) = im2col(x, 3, 3, 3)
    y = conv_mm(patches, prep["w1c"], prep["sh1"], m_tiles=1)
    x = y.reshape(B, Ho, Wo, LANE)                     # (B, 30, 30, 128)

    # conv2 + bn2 + relu (two parallel M tiles -> one per v7x TensorCore)
    patches, (B, Ho, Wo) = im2col(x, 3, 3, 16)
    y = conv_mm(patches, prep["w2c"], prep["sh2"], m_tiles=2)
    x = y.reshape(B, Ho, Wo, LANE)                     # (B, 28, 28, 128)

    # maxpool 2x2; emits only the 32 real channels so the flatten below is a
    # free NHWC reshape (fc1 weight rows were permuted to match).
    x = maxpool2x2(x, out_c=32)                        # (B, 14, 14, 32)

    # dropout1: eval mode -> identity
    x = x.reshape(x.shape[0], -1)                      # (B, 6272), free reshape

    # fc1 + relu + (dropout2 identity) + fc2 + log_softmax, fused in one call
    return fc_head(x, prep["w_fc1"], prep["b_fc1"],
                   prep["w_fc2"], prep["b_fc2"])       # (B, 10) f32


def init_params(key):
    ks = jax.random.split(key, 16)
    p = {}
    p["conv1_w"] = jax.random.normal(ks[0], (16, 3, 3, 3), jnp.float32) / np.sqrt(3 * 9)
    p["conv1_b"] = 0.05 * jax.random.normal(ks[1], (16,), jnp.float32)
    p["conv2_w"] = jax.random.normal(ks[2], (32, 16, 3, 3), jnp.float32) / np.sqrt(16 * 9)
    p["conv2_b"] = 0.05 * jax.random.normal(ks[3], (32,), jnp.float32)
    p["bn1_gamma"] = 1.0 + 0.1 * jax.random.normal(ks[4], (16,), jnp.float32)
    p["bn1_beta"] = 0.1 * jax.random.normal(ks[5], (16,), jnp.float32)
    p["bn1_mean"] = 0.1 * jax.random.normal(ks[6], (16,), jnp.float32)
    p["bn1_var"] = 1.0 + 0.2 * jax.random.uniform(ks[7], (16,), jnp.float32)
    p["bn2_gamma"] = 1.0 + 0.1 * jax.random.normal(ks[8], (32,), jnp.float32)
    p["bn2_beta"] = 0.1 * jax.random.normal(ks[9], (32,), jnp.float32)
    p["bn2_mean"] = 0.1 * jax.random.normal(ks[10], (32,), jnp.float32)
    p["bn2_var"] = 1.0 + 0.2 * jax.random.uniform(ks[11], (32,), jnp.float32)
    # fc weights stored as (in, out) == torch .weight.T
    p["fc1_w"] = jax.random.normal(ks[12], (6272, 512), jnp.float32) / np.sqrt(6272)
    p["fc1_b"] = 0.05 * jax.random.normal(ks[13], (512,), jnp.float32)
    p["fc2_w"] = jax.random.normal(ks[14], (512, 10), jnp.float32) / np.sqrt(512)
    p["fc2_b"] = 0.05 * jax.random.normal(ks[15], (10,), jnp.float32)
    return p


# Pure-JAX f32 reference (mirrors the PyTorch forward in eval mode)
def reference_forward(x_nchw, p):
    x = jnp.transpose(x_nchw, (0, 2, 3, 1))
    for wk, bk, g, b, m, v in (("conv1_w", "conv1_b", "bn1_gamma", "bn1_beta",
                                "bn1_mean", "bn1_var"),
                               ("conv2_w", "conv2_b", "bn2_gamma", "bn2_beta",
                                "bn2_mean", "bn2_var")):
        w = jnp.transpose(p[wk], (2, 3, 1, 0))                    # OIHW -> HWIO
        x = jax.lax.conv_general_dilated(
            x, w, (1, 1), "VALID",
            dimension_numbers=("NHWC", "HWIO", "NHWC")) + p[bk]
        x = (x - p[m]) / jnp.sqrt(p[v] + BN_EPS) * p[g] + p[b]
        x = jnp.maximum(x, 0.0)
    B, H, W, C = x.shape
    x = x.reshape(B, H // 2, 2, W // 2, 2, C).max(axis=(2, 4))
    x = jnp.transpose(x, (0, 3, 1, 2)).reshape(B, -1)             # torch flatten
    x = jnp.maximum(x @ p["fc1_w"] + p["fc1_b"], 0.0)
    x = x @ p["fc2_w"] + p["fc2_b"]
    return jax.nn.log_softmax(x, axis=1)


if __name__ == "__main__":
    key = jax.random.PRNGKey(0)
    k_in, k_par = jax.random.split(key)
    x = jax.random.normal(k_in, (2, 3, 32, 32), jnp.float32)      # NCHW input
    params = init_params(k_par)
    prep = prepare_params(params)                                 # one-time fold

    fwd = jax.jit(net_forward)
    out = jax.block_until_ready(fwd(x, prep))

    ref = jax.block_until_ready(reference_forward(x, params))
    # bf16 matmul operands (f32 MXU accumulation) -> slightly looser tolerance.
    np.testing.assert_allclose(np.asarray(out), np.asarray(ref),
                               rtol=5e-2, atol=5e-2)
    assert out.shape == (2, 10)
    assert np.all(np.isfinite(np.asarray(out)))
    print("KERNEL_OK")
</pallas_src>

<mosaic_0001>
module attributes {stable_mosaic.version = 11 : i64} {
  func.func @_conv_mm_kernel(%arg0: i32, %arg1: memref<1800x27xbf16, #tpu.memory_space<vmem>>, %arg2: memref<27x128xbf16, #tpu.memory_space<vmem>>, %arg3: memref<1x128xf32, #tpu.memory_space<vmem>>, %arg4: memref<1800x128xbf16, #tpu.memory_space<vmem>>) attributes {dimension_semantics = [#tpu.dimension_semantics<parallel>], iteration_bounds = array<i64: 1>, scalar_prefetch = 0 : i64, scratch_operands = 0 : i64, tpu.core_type = #tpu.core_type<tc>, window_params = [{transform_indices = @transform_0, window_bounds = array<i64: 1800, 27>}, {pipeline_mode = #tpu.pipeline_mode<synchronous>, transform_indices = @transform_1, window_bounds = array<i64: 27, 128>}, {pipeline_mode = #tpu.pipeline_mode<synchronous>, transform_indices = @transform_2, window_bounds = array<i64: 1, 128>}, {transform_indices = @transform_3, window_bounds = array<i64: 1800, 128>}]} {
    %c0 = arith.constant 0 : index
    %c0_0 = arith.constant 0 : index
    %0 = vector.load %arg1[%c0, %c0_0] : memref<1800x27xbf16, #tpu.memory_space<vmem>>, vector<1800x27xbf16>
    %c0_1 = arith.constant 0 : index
    %c0_2 = arith.constant 0 : index
    %1 = vector.load %arg2[%c0_1, %c0_2] : memref<27x128xbf16, #tpu.memory_space<vmem>>, vector<27x128xbf16>
    %cst = arith.constant dense<0.000000e+00> : vector<1800x128xf32>
    %2 = tpu.matmul %0, %1, %cst {dimension_numbers = #tpu.dot_dimension_numbers<[1], [0], [0], [1], [0, 0, 1, 1], [], []>} : vector<1800x27xbf16>, vector<27x128xbf16>, vector<1800x128xf32> -> vector<1800x128xf32>
    %c0_3 = arith.constant 0 : index
    %c0_4 = arith.constant 0 : index
    %3 = vector.load %arg3[%c0_3, %c0_4] : memref<1x128xf32, #tpu.memory_space<vmem>>, vector<1x128xf32>
    %4 = vector.broadcast %3 : vector<1x128xf32> to vector<1800x128xf32>
    %5 = arith.addf %2, %4 : vector<1800x128xf32>
    %cst_5 = arith.constant 0.000000e+00 : f32
    %6 = vector.broadcast %cst_5 : f32 to vector<1800x128xf32>
    %7 = arith.maximumf %5, %6 : vector<1800x128xf32>
    %8 = arith.truncf %7 : vector<1800x128xf32> to vector<1800x128xbf16>
    %c0_6 = arith.constant 0 : index
    %c0_7 = arith.constant 0 : index
    %9 = vector.load %arg4[%c0_6, %c0_7] : memref<1800x128xbf16, #tpu.memory_space<vmem>>, vector<1800x128xbf16>
    tpu.vector_store %arg4[%c0_6, %c0_7], %8 {strides = array<i32>} : memref<1800x128xbf16, #tpu.memory_space<vmem>>, vector<1800x128xbf16>,
    return
  }
  func.func @transform_0(%arg0: i32) -> (i32, i32) {
    %c0_i32 = arith.constant 0 : i32
    %c0_i32_0 = arith.constant 0 : i32
    return %arg0, %c0_i32 : i32, i32
  }
  func.func @transform_1(%arg0: i32) -> (i32, i32) {
    %c0_i32 = arith.constant 0 : i32
    %c0_i32_0 = arith.constant 0 : i32
    %c0_i32_1 = arith.constant 0 : i32
    return %c0_i32, %c0_i32_0 : i32, i32
  }
  func.func @transform_2(%arg0: i32) -> (i32, i32) {
    %c0_i32 = arith.constant 0 : i32
    %c0_i32_0 = arith.constant 0 : i32
    %c0_i32_1 = arith.constant 0 : i32
    return %c0_i32, %c0_i32_0 : i32, i32
  }
  func.func @transform_3(%arg0: i32) -> (i32, i32) {
    %c0_i32 = arith.constant 0 : i32
    %c0_i32_0 = arith.constant 0 : i32
    return %arg0, %c0_i32 : i32, i32
  }
}

module attributes {stable_mosaic.version = 11 : i64} {
  func.func @_conv_mm_kernel(%arg0: i32, %arg1: memref<784x144xbf16, #tpu.memory_space<vmem>>, %arg2: memref<144x128xbf16, #tpu.memory_space<vmem>>, %arg3: memref<1x128xf32, #tpu.memory_space<vmem>>, %arg4: memref<784x128xbf16, #tpu.memory_space<vmem>>) attributes {dimension_semantics = [#tpu.dimension_semantics<parallel>], iteration_bounds = array<i64: 2>, scalar_prefetch = 0 : i64, scratch_operands = 0 : i64, tpu.core_type = #tpu.core_type<tc>, window_params = [{transform_indices = @transform_0, window_bounds = array<i64: 784, 144>}, {pipeline_mode = #tpu.pipeline_mode<synchronous>, transform_indices = @transform_1, window_bounds = array<i64: 144, 128>}, {pipeline_mode = #tpu.pipeline_mode<synchronous>, transform_indices = @transform_2, window_bounds = array<i64: 1, 128>}, {transform_indices = @transform_3, window_bounds = array<i64: 784, 128>}]} {
    %c0 = arith.constant 0 : index
    %c0_0 = arith.constant 0 : index
    %0 = vector.load %arg1[%c0, %c0_0] : memref<784x144xbf16, #tpu.memory_space<vmem>>, vector<784x144xbf16>
    %c0_1 = arith.constant 0 : index
    %c0_2 = arith.constant 0 : index
    %1 = vector.load %arg2[%c0_1, %c0_2] : memref<144x128xbf16, #tpu.memory_space<vmem>>, vector<144x128xbf16>
    %cst = arith.constant dense<0.000000e+00> : vector<784x128xf32>
    %2 = tpu.matmul %0, %1, %cst {dimension_numbers = #tpu.dot_dimension_numbers<[1], [0], [0], [1], [0, 0, 1, 1], [], []>} : vector<784x144xbf16>, vector<144x128xbf16>, vector<784x128xf32> -> vector<784x128xf32>
    %c0_3 = arith.constant 0 : index
    %c0_4 = arith.constant 0 : index
    %3 = vector.load %arg3[%c0_3, %c0_4] : memref<1x128xf32, #tpu.memory_space<vmem>>, vector<1x128xf32>
    %4 = vector.broadcast %3 : vector<1x128xf32> to vector<784x128xf32>
    %5 = arith.addf %2, %4 : vector<784x128xf32>
    %cst_5 = arith.constant 0.000000e+00 : f32
    %6 = vector.broadcast %cst_5 : f32 to vector<784x128xf32>
    %7 = arith.maximumf %5, %6 : vector<784x128xf32>
    %8 = arith.truncf %7 : vector<784x128xf32> to vector<784x128xbf16>
    %c0_6 = arith.constant 0 : index
    %c0_7 = arith.constant 0 : index
    %9 = vector.load %arg4[%c0_6, %c0_7] : memref<784x128xbf16, #tpu.memory_space<vmem>>, vector<784x128xbf16>
    tpu.vector_store %arg4[%c0_6, %c0_7], %8 {strides = array<i32>} : memref<784x128xbf16, #tpu.memory_space<vmem>>, vector<784x128xbf16>,
    return
  }
  func.func @transform_0(%arg0: i32) -> (i32, i32) {
    %c0_i32 = arith.constant 0 : i32
    %c0_i32_0 = arith.constant 0 : i32
    return %arg0, %c0_i32 : i32, i32
  }
  func.func @transform_1(%arg0: i32) -> (i32, i32) {
    %c0_i32 = arith.constant 0 : i32
    %c0_i32_0 = arith.constant 0 : i32
    %c0_i32_1 = arith.constant 0 : i32
    return %c0_i32, %c0_i32_0 : i32, i32
  }
  func.func @transform_2(%arg0: i32) -> (i32, i32) {
    %c0_i32 = arith.constant 0 : i32
    %c0_i32_0 = arith.constant 0 : i32
    %c0_i32_1 = arith.constant 0 : i32
    return %c0_i32, %c0_i32_0 : i32, i32
  }
  func.func @transform_3(%arg0: i32) -> (i32, i32) {
    %c0_i32 = arith.constant 0 : i32
    %c0_i32_0 = arith.constant 0 : i32
    return %arg0, %c0_i32 : i32, i32
  }
}

module attributes {stable_mosaic.version = 11 : i64} {
  func.func @_maxpool_kernel(%arg0: i32, %arg1: memref<1x14x2x14x256xbf16, #tpu.memory_space<vmem>>, %arg2: memref<1x14x14x32xbf16, #tpu.memory_space<vmem>>) attributes {dimension_semantics = [#tpu.dimension_semantics<parallel>], iteration_bounds = array<i64: 2>, scalar_prefetch = 0 : i64, scratch_operands = 0 : i64, tpu.core_type = #tpu.core_type<tc>, window_params = [{transform_indices = @transform_0, window_bounds = array<i64: 1, 14, 2, 14, 256>}, {transform_indices = @transform_1, window_bounds = array<i64: 1, 14, 14, 32>}]} {
    %c0 = arith.constant 0 : index
    %c0_0 = arith.constant 0 : index
    %c0_1 = arith.constant 0 : index
    %c0_2 = arith.constant 0 : index
    %c0_3 = arith.constant 0 : index
    %0 = vector.load %arg1[%c0, %c0_0, %c0_1, %c0_2, %c0_3] : memref<1x14x2x14x256xbf16, #tpu.memory_space<vmem>>, vector<1x14x2x14x256xbf16>
    %1 = vector.extract_strided_slice %0 {offsets = [0, 0, 0, 0, 0], sizes = [1, 14, 1, 14, 256], strides = [1, 1, 1, 1, 1]} : vector<1x14x2x14x256xbf16> to vector<1x14x1x14x256xbf16>
    %2 = vector.shape_cast %1 : vector<1x14x1x14x256xbf16> to vector<1x14x14x256xbf16>
    %3 = vector.extract_strided_slice %0 {offsets = [0, 0, 1, 0, 0], sizes = [1, 14, 1, 14, 256], strides = [1, 1, 1, 1, 1]} : vector<1x14x2x14x256xbf16> to vector<1x14x1x14x256xbf16>
    %4 = vector.shape_cast %3 : vector<1x14x1x14x256xbf16> to vector<1x14x14x256xbf16>
    %5 = arith.maximumf %2, %4 : vector<1x14x14x256xbf16>
    %6 = vector.extract_strided_slice %5 {offsets = [0, 0, 0, 0], sizes = [1, 14, 14, 128], strides = [1, 1, 1, 1]} : vector<1x14x14x256xbf16> to vector<1x14x14x128xbf16>
    %7 = vector.extract_strided_slice %5 {offsets = [0, 0, 0, 128], sizes = [1, 14, 14, 128], strides = [1, 1, 1, 1]} : vector<1x14x14x256xbf16> to vector<1x14x14x128xbf16>
    %8 = arith.maximumf %6, %7 : vector<1x14x14x128xbf16>
    %9 = vector.extract_strided_slice %8 {offsets = [0, 0, 0, 0], sizes = [1, 14, 14, 32], strides = [1, 1, 1, 1]} : vector<1x14x14x128xbf16> to vector<1x14x14x32xbf16>
    %c0_4 = arith.constant 0 : index
    %c0_5 = arith.constant 0 : index
    %c0_6 = arith.constant 0 : index
    %c0_7 = arith.constant 0 : index
    %10 = vector.load %arg2[%c0_4, %c0_5, %c0_6, %c0_7] : memref<1x14x14x32xbf16, #tpu.memory_space<vmem>>, vector<1x14x14x32xbf16>
    tpu.vector_store %arg2[%c0_4, %c0_5, %c0_6, %c0_7], %9 {strides = array<i32>} : memref<1x14x14x32xbf16, #tpu.memory_space<vmem>>, vector<1x14x14x32xbf16>,
    return
  }
  func.func @transform_0(%arg0: i32) -> (i32, i32, i32, i32, i32) {
    %c0_i32 = arith.constant 0 : i32
    %c0_i32_0 = arith.constant 0 : i32
    %c0_i32_1 = arith.constant 0 : i32
    %c0_i32_2 = arith.constant 0 : i32
    %c0_i32_3 = arith.constant 0 : i32
    return %arg0, %c0_i32, %c0_i32_0, %c0_i32_1, %c0_i32_2 : i32, i32, i32, i32, i32
  }
  func.func @transform_1(%arg0: i32) -> (i32, i32, i32, i32) {
    %c0_i32 = arith.constant 0 : i32
    %c0_i32_0 = arith.constant 0 : i32
    %c0_i32_1 = arith.constant 0 : i32
    %c0_i32_2 = arith.constant 0 : i32
    return %arg0, %c0_i32, %c0_i32_0, %c0_i32_1 : i32, i32, i32, i32
  }
}

module attributes {stable_mosaic.version = 11 : i64} {
  func.func @_fc_head_kernel(%arg0: i32, %arg1: memref<2x6272xbf16, #tpu.memory_space<vmem>>, %arg2: memref<6272x512xbf16, #tpu.memory_space<vmem>>, %arg3: memref<1x512xf32, #tpu.memory_space<vmem>>, %arg4: memref<512x10xbf16, #tpu.memory_space<vmem>>, %arg5: memref<1x10xf32, #tpu.memory_space<vmem>>, %arg6: memref<2x10xf32, #tpu.memory_space<vmem>>) attributes {dimension_semantics = [#tpu.dimension_semantics<arbitrary>], iteration_bounds = array<i64: 1>, scalar_prefetch = 0 : i64, scratch_operands = 0 : i64, tpu.core_type = #tpu.core_type<tc>, window_params = [{pipeline_mode = #tpu.pipeline_mode<synchronous>, transform_indices = @transform_0, window_bounds = array<i64: 2, 6272>}, {pipeline_mode = #tpu.pipeline_mode<synchronous>, transform_indices = @transform_1, window_bounds = array<i64: 6272, 512>}, {pipeline_mode = #tpu.pipeline_mode<synchronous>, transform_indices = @transform_2, window_bounds = array<i64: 1, 512>}, {pipeline_mode = #tpu.pipeline_mode<synchronous>, transform_indices = @transform_3, window_bounds = array<i64: 512, 10>}, {pipeline_mode = #tpu.pipeline_mode<synchronous>, transform_indices = @transform_4, window_bounds = array<i64: 1, 10>}, {pipeline_mode = #tpu.pipeline_mode<synchronous>, transform_indices = @transform_5, window_bounds = array<i64: 2, 10>}]} {
    %c0 = arith.constant 0 : index
    %c0_0 = arith.constant 0 : index
    %0 = vector.load %arg1[%c0, %c0_0] : memref<2x6272xbf16, #tpu.memory_space<vmem>>, vector<2x6272xbf16>
    %c0_1 = arith.constant 0 : index
    %c0_2 = arith.constant 0 : index
    %1 = vector.load %arg2[%c0_1, %c0_2] : memref<6272x512xbf16, #tpu.memory_space<vmem>>, vector<6272x512xbf16>
    %cst = arith.constant dense<0.000000e+00> : vector<2x512xf32>
    %2 = tpu.matmul %0, %1, %cst {dimension_numbers = #tpu.dot_dimension_numbers<[1], [0], [0], [1], [0, 0, 1, 1], [], []>} : vector<2x6272xbf16>, vector<6272x512xbf16>, vector<2x512xf32> -> vector<2x512xf32>
    %c0_3 = arith.constant 0 : index
    %c0_4 = arith.constant 0 : index
    %3 = vector.load %arg3[%c0_3, %c0_4] : memref<1x512xf32, #tpu.memory_space<vmem>>, vector<1x512xf32>
    %4 = vector.broadcast %3 : vector<1x512xf32> to vector<2x512xf32>
    %5 = arith.addf %2, %4 : vector<2x512xf32>
    %cst_5 = arith.constant 0.000000e+00 : f32
    %6 = vector.broadcast %cst_5 : f32 to vector<2x512xf32>
    %7 = arith.maximumf %5, %6 : vector<2x512xf32>
    %8 = arith.truncf %7 : vector<2x512xf32> to vector<2x512xbf16>
    %c0_6 = arith.constant 0 : index
    %c0_7 = arith.constant 0 : index
    %9 = vector.load %arg4[%c0_6, %c0_7] : memref<512x10xbf16, #tpu.memory_space<vmem>>, vector<512x10xbf16>
    %cst_8 = arith.constant dense<0.000000e+00> : vector<2x10xf32>
    %10 = tpu.matmul %8, %9, %cst_8 {dimension_numbers = #tpu.dot_dimension_numbers<[1], [0], [0], [1], [0, 0, 1, 1], [], []>} : vector<2x512xbf16>, vector<512x10xbf16>, vector<2x10xf32> -> vector<2x10xf32>
    %c0_9 = arith.constant 0 : index
    %c0_10 = arith.constant 0 : index
    %11 = vector.load %arg5[%c0_9, %c0_10] : memref<1x10xf32, #tpu.memory_space<vmem>>, vector<1x10xf32>
    %12 = vector.broadcast %11 : vector<1x10xf32> to vector<2x10xf32>
    %13 = arith.addf %10, %12 : vector<2x10xf32>
    %cst_11 = arith.constant dense<0xFF800000> : vector<2xf32>
    %14 = vector.multi_reduction <maximumf>, %13, %cst_11 [1] : vector<2x10xf32> to vector<2xf32>
    %15 = vector.shape_cast %14 : vector<2xf32> to vector<2x1xf32>
    %16 = vector.broadcast %15 : vector<2x1xf32> to vector<2x10xf32>
    %17 = arith.subf %13, %16 : vector<2x10xf32>
    %18 = math.exp %17 : vector<2x10xf32>
    %cst_12 = arith.constant dense<0.000000e+00> : vector<2xf32>
    %19 = vector.multi_reduction <add>, %18, %cst_12 [1] : vector<2x10xf32> to vector<2xf32>
    %20 = vector.shape_cast %19 : vector<2xf32> to vector<2x1xf32>
    %21 = math.log %20 : vector<2x1xf32>
    %22 = vector.broadcast %21 : vector<2x1xf32> to vector<2x10xf32>
    %23 = arith.subf %17, %22 : vector<2x10xf32>
    %c0_13 = arith.constant 0 : index
    %c0_14 = arith.constant 0 : index
    %24 = vector.load %arg6[%c0_13, %c0_14] : memref<2x10xf32, #tpu.memory_space<vmem>>, vector<2x10xf32>
    tpu.vector_store %arg6[%c0_13, %c0_14], %23 {strides = array<i32>} : memref<2x10xf32, #tpu.memory_space<vmem>>, vector<2x10xf32>,
    return
  }
  func.func @transform_0(%arg0: i32) -> (i32, i32) {
    %c0_i32 = arith.constant 0 : i32
    %c0_i32_0 = arith.constant 0 : i32
    %c0_i32_1 = arith.constant 0 : i32
    return %c0_i32, %c0_i32_0 : i32, i32
  }
  func.func @transform_1(%arg0: i32) -> (i32, i32) {
    %c0_i32 = arith.constant 0 : i32
    %c0_i32_0 = arith.constant 0 : i32
    %c0_i32_1 = arith.constant 0 : i32
    return %c0_i32, %c0_i32_0 : i32, i32
  }
  func.func @transform_2(%arg0: i32) -> (i32, i32) {
    %c0_i32 = arith.constant 0 : i32
    %c0_i32_0 = arith.constant 0 : i32
    %c0_i32_1 = arith.constant 0 : i32
    return %c0_i32, %c0_i32_0 : i32, i32
  }
  func.func @transform_3(%arg0: i32) -> (i32, i32) {
    %c0_i32 = arith.constant 0 : i32
    %c0_i32_0 = arith.constant 0 : i32
    %c0_i32_1 = arith.constant 0 : i32
    return %c0_i32, %c0_i32_0 : i32, i32
  }
  func.func @transform_4(%arg0: i32) -> (i32, i32) {
    %c0_i32 = arith.constant 0 : i32
    %c0_i32_0 = arith.constant 0 : i32
    %c0_i32_1 = arith.constant 0 : i32
    return %c0_i32, %c0_i32_0 : i32, i32
  }
  func.func @transform_5(%arg0: i32) -> (i32, i32) {
    %c0_i32 = arith.constant 0 : i32
    %c0_i32_0 = arith.constant 0 : i32
    %c0_i32_1 = arith.constant 0 : i32
    return %c0_i32, %c0_i32_0 : i32, i32
  }
}

</mosaic_0001>

<bundles_post_ra>
// kernel: net_forward.4
= control target key start
LH: loop header
LB: loop body
LE: loop exit
PB: predicated region body
PF: predicated region fallthrough
CT: control target
= control target key end

     0   :  { %8 = vsyncpa [#allocation3], 0  ;;  %s6891_s0 = inlined_call_operand.vmem [shape: bf16[1800,27], index: 0, kind: input, shape index: {}]   ;;  %s6892_s1 = inlined_call_operand.hbm [shape: bf16[27,128], index: 1, kind: input, shape index: {}]   ;;  %s6893_s2 = inlined_call_operand.hbm [shape: f32[1,128], index: 2, kind: input, shape index: {}]   ;;  %s6894_s3 = inlined_call_operand.vmem [shape: bf16[1800,128], index: 3, kind: output, shape index: {}]  }
   0x1   :  { %9 = vsyncpa [#allocation5], 0  ;;  %s5588_s12 = smov [#allocation2]   ;;  %s5540_s16 = scalar_lea.hbm %s6892_s1, 256 }
   0x2   :  { %s17_s13 = sshll.u32 %s5588_s12, 4  ;;  %p5541_p0 = scmp.ne.s32.totalorder %s6892_s1, %s5540_s16  ;;  %s18_s13 = int_to_ptr.vmem [resolvable:$true] %s17_s13 }
   0x3   :  { %p5544_p1 = scmp.lt.u32.totalorder %s5540_s16, %s6892_s1 }
   0x5   :  { %p5546_p2 = pnand %p5544_p1, %p5541_p0 }
   0x7   :  { %5549 = shalt.err (!%p5546_p2)
}
   0x8   :  { %s5550_s21 = scalar_lea.vmem %s18_s13, 256  ;;  %p5555_p4 = scmp.lt.s32.totalorder %s18_s13, %s18_s13 }
   0x9   :  { %p5551_p3 = scmp.ne.s32.totalorder %s18_s13, %s5550_s21  ;;  %p5556_p5 = scmp.lt.s32.totalorder %s5550_s21, %s5550_s21 }
   0xb   :  { %p5557_p6 = por %p5556_p5, %p5555_p4 }
   0xd   :  { %p5558_p7 = pnand %p5557_p6, %p5551_p3 }
   0xf   :  { %5561 = shalt.err (!%p5558_p7)
}
  0x10   :  { %s5589_s22 = smov 64   ;;  %s5590_s23 = smov 4  }
  0x11   :  { %23 = dma.hbm_to_vmem [thread:$0]  %s6892_s1, 256, %s18_s13, [#allocation3], %s5589_s22, %s5589_s22, %s5590_s23  }
  0x12   :  { %s5591_s26 = smov [#allocation4]   ;;  %s5562_s30 = scalar_lea.hbm %s6893_s2, 16 }
  0x13   :  { %s30_s27 = sshll.u32 %s5591_s26, 4  ;;  %p5563_p8 = scmp.ne.s32.totalorder %s6893_s2, %s5562_s30  ;;  %s31_s27 = int_to_ptr.vmem [resolvable:$true] %s30_s27 }
  0x14   :  { %p5566_p9 = scmp.lt.u32.totalorder %s5562_s30, %s6893_s2 }
  0x16   :  { %p5568_p10 = pnand %p5566_p9, %p5563_p8 }
  0x18   :  { %5571 = shalt.err (!%p5568_p10)
}
  0x19   :  { %s5572_s8 = scalar_lea.vmem %s31_s27, 16  ;;  %s5576_s1 = scalar_lea.vmem %s31_s27, 32 }
  0x1a   :  { %p5573_p11 = scmp.ne.s32.totalorder %s31_s27, %s5572_s8  ;;  %p5577_p12 = scmp.lt.s32.totalorder %s31_s27, %s31_s27 }
  0x1b   :  { %p5578_p13 = scmp.lt.s32.totalorder %s5576_s1, %s5572_s8 }
  0x1d   :  { %p5579_p0 = por %p5578_p13, %p5577_p12 }
  0x1f   :  { %p5580_p1 = pnand %p5579_p0, %p5573_p11 }
  0x21   :  { %5583 = shalt.err (!%p5580_p1)
}
  0x22   :  { %33 = dma.hbm_to_vmem [thread:$0]  %s6893_s2, 16, %s31_s27, [#allocation5]  }
  0x23   :  { %5584 = dma.done.wait [#allocation3], 256  }
  0x24   :  { %5585 = vsyncadd [#allocation3], 4294967040 }
  0x25   :  { %5586 = dma.done.wait [#allocation5], 16  }
  0x26   :  { %5587 = vsyncadd [#allocation5], 4294967280  ;;  %v5592_v0 = vmov 0.0   ;;  %vm1191_vm0 = vcmask 1044480   ;;  %vm5593_vm1 = vmmov 0   ;;  %vm1192_vm2 = vcmask 1045504  }
  0x27   :  { %4956 = vmatprep.subr.bf16.mxu0 %v5592_v0  ;;  %5412 = vmatprep.subr.bf16.mxu1 %v5592_v0  ;;  %v5594_v1 = vmov 65535   ;;  %v5423_v3 = vld [vmem:[#allocation2] sm:$0xff]   ;;  %v5424_v5 = vld [vmem:[#allocation2 + $0x8] sm:$0x3f]   ;;  %vm851_vm3 = vcmask 220160   ;;  %v5428_v10 = vld [vmem:[%s6891_s0 + $0x1d0] sm:$0xff]  }
  0x28   :  { %4960 = vmatprep.mubr.msk.bf16.mxu0 %vm5593_vm1, %v5592_v0  ;;  %5188 = vmatprep.mubr.msk.bf16.mxu1 %vm5593_vm1, %v5592_v0  ;;  %v1193_v2 = vsel %vm1191_vm0, 4294967295, %v5594_v1  ;;  %v5425_v7 = vld [vmem:[%s6891_s0] sm:$0xff]   ;;  %v5426_v8 = vld [vmem:[%s6891_s0 + $0x1c8] sm:$0xff]   ;;  %v5429_v11 = vld [vmem:[%s6891_s0 + $0x10] sm:$0xff]  }
  0x29   :  { %v1194_v4 = vsel %vm1192_vm2, %v1193_v2, 0  ;;  %4957 = vmatpush3.bf16.msra.mxu0 %v5423_v3  ;;  %5414 = vmatpush3.bf16.msra.mxu1 %v5423_v3  ;;  %v5427_v9 = vld [vmem:[%s6891_s0 + $0x8] sm:$0xff]   ;;  %v5430_v12 = vld [vmem:[%s6891_s0 + $0x1d8] sm:$0xff]   ;;  %v5432_v14 = vld [vmem:[%s6891_s0 + $0x1e0] sm:$0xff]  }
  0x2a   :  { %4958 = vmatprep.subr.bf16.mxu0 %v5592_v0  ;;  %v1196_v6 = vand.u32 %v5424_v5, %v1194_v4  ;;  %5413 = vmatprep.subr.bf16.mxu1 %v5592_v0  ;;  %v5431_v13 = vld [vmem:[%s6891_s0 + $0x18] sm:$0xff]   ;;  %v5433_v15 = vld [vmem:[%s6891_s0 + $0x20] sm:$0xff]   ;;  %v5434_v16 = vld [vmem:[%s6891_s0 + $0x1e8] sm:$0xff]  }
  0x2b   :  { %v5435_v17 = vld [vmem:[%s6891_s0 + $0x28] sm:$0xff]   ;;  %v5436_v18 = vld [vmem:[%s6891_s0 + $0x1f0] sm:$0xff]   ;;  %v5438_v20 = vld [vmem:[%s6891_s0 + $0x1f8] sm:$0xff]  }
  0x2c   :  { %v5437_v19 = vld [vmem:[%s6891_s0 + $0x30] sm:$0xff]   ;;  %v5439_v21 = vld [vmem:[%s6891_s0 + $0x38] sm:$0xff]   ;;  %v5440_v22 = vld [vmem:[%s6891_s0 + $0x200] sm:$0xff]  }
  0x2d   :  { %4959 = vmatpush3.bf16.msra.mxu0 %v1196_v6  ;;  %5415 = vmatpush3.bf16.msra.mxu1 %v1196_v6  ;;  %v5441_v23 = vld [vmem:[%s6891_s0 + $0x40] sm:$0xff]   ;;  %v5442_v24 = vld [vmem:[%s6891_s0 + $0x208] sm:$0xff]   ;;  %v5444_v26 = vld [vmem:[%s6891_s0 + $0x210] sm:$0xff]  }
  0x2e   :  { %v5443_v25 = vld [vmem:[%s6891_s0 + $0x48] sm:$0xff]   ;;  %v5445_v27 = vld [vmem:[%s6891_s0 + $0x50] sm:$0xff]   ;;  %v5446_v28 = vld [vmem:[%s6891_s0 + $0x218] sm:$0xff]  }
  0x2f   :  { %v5447_v29 = vld [vmem:[%s6891_s0 + $0x58] sm:$0xff]   ;;  %v5448_v30 = vld [vmem:[%s6891_s0 + $0x220] sm:$0xff]   ;;  %v5450_v32 = vld [vmem:[%s6891_s0 + $0x228] sm:$0xff]  }
  0x30   :  { %4961 = vmatmul.mubr.msk.bf16.vlgmr.msra.gmra.mrb[0].mxu0 %vm851_vm3, %v5425_v7  ;;  %5189 = vmatmul.mubr.msk.bf16.vlgmr.msra.gmra.mrb[0].mxu1 %vm851_vm3, %v5426_v8  ;;  %v5449_v31 = vld [vmem:[%s6891_s0 + $0x60] sm:$0xff]   ;;  %v5451_v33 = vld [vmem:[%s6891_s0 + $0x68] sm:$0xff]   ;;  %v5452_v34 = vld [vmem:[%s6891_s0 + $0x230] sm:$0xff]  }
  0x31   :  { %4964 = vmatprep.mubr.msk.bf16.mxu0 %vm5593_vm1, %v5592_v0  ;;  %5192 = vmatprep.mubr.msk.bf16.mxu1 %vm5593_vm1, %v5592_v0  ;;  %v5453_v35 = vld [vmem:[%s6891_s0 + $0x70] sm:$0xff]   ;;  %v5454_v36 = vld [vmem:[%s6891_s0 + $0x238] sm:$0xff]   ;;  %v5456_v38 = vld [vmem:[%s6891_s0 + $0x240] sm:$0xff]  }
  0x32   :  { %v5455_v37 = vld [vmem:[%s6891_s0 + $0x78] sm:$0xff]   ;;  %v5457_v39 = vld [vmem:[%s6891_s0 + $0x80] sm:$0xff]   ;;  %v5458_v40 = vld [vmem:[%s6891_s0 + $0x248] sm:$0xff]  }
  0x33   :  { %v5459_v41 = vld [vmem:[%s6891_s0 + $0x88] sm:$0xff]   ;;  %v5460_v42 = vld [vmem:[%s6891_s0 + $0x250] sm:$0xff]   ;;  %v5462_v44 = vld [vmem:[%s6891_s0 + $0x258] sm:$0xff]  }
  0x34   :  { %v5461_v43 = vld [vmem:[%s6891_s0 + $0x90] sm:$0xff]   ;;  %v5463_v45 = vld [vmem:[%s6891_s0 + $0x98] sm:$0xff]   ;;  %v5464_v46 = vld [vmem:[%s6891_s0 + $0x260] sm:$0xff]  }
  0x35   :  { %v5465_v47 = vld [vmem:[%s6891_s0 + $0xa0] sm:$0xff]   ;;  %v5466_v48 = vld [vmem:[%s6891_s0 + $0x268] sm:$0xff]   ;;  %v5468_v50 = vld [vmem:[%s6891_s0 + $0x270] sm:$0xff]  }
  0x36   :  { %v5467_v49 = vld [vmem:[%s6891_s0 + $0xa8] sm:$0xff]   ;;  %v5469_v51 = vld [vmem:[%s6891_s0 + $0xb0] sm:$0xff]   ;;  %v5470_v52 = vld [vmem:[%s6891_s0 + $0x278] sm:$0xff]  }
  0x37   :  { %v5471_v53 = vld [vmem:[%s6891_s0 + $0xb8] sm:$0xff]   ;;  %v5472_v54 = vld [vmem:[%s6891_s0 + $0x280] sm:$0xff]   ;;  %v5474_v56 = vld [vmem:[%s6891_s0 + $0x288] sm:$0xff]  }
  0x38   :  { %4965 = vmatmul.mubr.msk.bf16.gmra.mrb[4].mxu0 %vm851_vm3, %v5427_v9  ;;  %5193 = vmatmul.mubr.msk.bf16.gmra.mrb[4].mxu1 %vm851_vm3, %v5428_v10  ;;  %v5473_v55 = vld [vmem:[%s6891_s0 + $0xc0] sm:$0xff]   ;;  %v5475_v57 = vld [vmem:[%s6891_s0 + $0xc8] sm:$0xff]   ;;  %v5476_v58 = vld [vmem:[%s6891_s0 + $0x290] sm:$0xff]  }
  0x39   :  { %4968 = vmatprep.mubr.msk.bf16.mxu0 %vm5593_vm1, %v5592_v0  ;;  %5196 = vmatprep.mubr.msk.bf16.mxu1 %vm5593_vm1, %v5592_v0  ;;  %v5477_v59 = vld [vmem:[%s6891_s0 + $0xd0] sm:$0xff]   ;;  %v5478_v60 = vld [vmem:[%s6891_s0 + $0x298] sm:$0xff]   ;;  %v5480_v6 = vld [vmem:[%s6891_s0 + $0x2a0] sm:$0xff]  }
  0x3a   :  { %v5967_v61 = vld [vmem:[#allocation4] ss:$0 sm:$0xff]  ;;  %v5479_v3 = vld [vmem:[%s6891_s0 + $0xd8] sm:$0xff]  }
  0x40   :  { %4969 = vmatmul.mubr.msk.bf16.gmra.mrb[8].mxu0 %vm851_vm3, %v5429_v11  ;;  %5197 = vmatmul.mubr.msk.bf16.gmra.mrb[8].mxu1 %vm851_vm3, %v5430_v12 }
  0x41   :  { %4972 = vmatprep.mubr.msk.bf16.mxu0 %vm5593_vm1, %v5592_v0  ;;  %5200 = vmatprep.mubr.msk.bf16.mxu1 %vm5593_vm1, %v5592_v0 }
  0x48   :  { %4973 = vmatmul.mubr.msk.bf16.gmra.mrb[12].mxu0 %vm851_vm3, %v5431_v13  ;;  %5201 = vmatmul.mubr.msk.bf16.gmra.mrb[12].mxu1 %vm851_vm3, %v5432_v14 }
  0x49   :  { %4976 = vmatprep.mubr.msk.bf16.mxu0 %vm5593_vm1, %v5592_v0  ;;  %5204 = vmatprep.mubr.msk.bf16.mxu1 %vm5593_vm1, %v5592_v0 }
  0x50   :  { %4977 = vmatmul.mubr.msk.bf16.gmra.mrb[16].mxu0 %vm851_vm3, %v5433_v15  ;;  %5205 = vmatmul.mubr.msk.bf16.gmra.mrb[16].mxu1 %vm851_vm3, %v5434_v16 }
  0x51   :  { %4980 = vmatprep.mubr.msk.bf16.mxu0 %vm5593_vm1, %v5592_v0  ;;  %5208 = vmatprep.mubr.msk.bf16.mxu1 %vm5593_vm1, %v5592_v0 }
  0x58   :  { %4981 = vmatmul.mubr.msk.bf16.gmra.mrb[20].mxu0 %vm851_vm3, %v5435_v17  ;;  %5209 = vmatmul.mubr.msk.bf16.gmra.mrb[20].mxu1 %vm851_vm3, %v5436_v18 }
  0x59   :  { %4984 = vmatprep.mubr.msk.bf16.mxu0 %vm5593_vm1, %v5592_v0  ;;  %5212 = vmatprep.mubr.msk.bf16.mxu1 %vm5593_vm1, %v5592_v0 }
  0x60   :  { %4985 = vmatmul.mubr.msk.bf16.gmra.mrb[24].mxu0 %vm851_vm3, %v5437_v19  ;;  %5213 = vmatmul.mubr.msk.bf16.gmra.mrb[24].mxu1 %vm851_vm3, %v5438_v20 }
  0x61   :  { %4988 = vmatprep.mubr.msk.bf16.mxu0 %vm5593_vm1, %v5592_v0  ;;  %5216 = vmatprep.mubr.msk.bf16.mxu1 %vm5593_vm1, %v5592_v0 }
  0x68   :  { %4989 = vmatmul.mubr.msk.bf16.gmra.mrb[28].mxu0 %vm851_vm3, %v5439_v21  ;;  %5217 = vmatmul.mubr.msk.bf16.gmra.mrb[28].mxu1 %vm851_vm3, %v5440_v22 }
  0x69   :  { %4992 = vmatprep.mubr.msk.bf16.mxu0 %vm5593_vm1, %v5592_v0  ;;  %5220 = vmatprep.mubr.msk.bf16.mxu1 %vm5593_vm1, %v5592_v0 }
  0x70   :  { %4993 = vmatmul.mubr.msk.bf16.gmra.mrb[32].mxu0 %vm851_vm3, %v5441_v23  ;;  %5221 = vmatmul.mubr.msk.bf16.gmra.mrb[32].mxu1 %vm851_vm3, %v5442_v24  ;;  %v5481_v23 = vld [vmem:[%s6891_s0 + $0xe0] sm:$0xff]  }
  0x71   :  { %4996 = vmatprep.mubr.msk.bf16.mxu0 %vm5593_vm1, %v5592_v0  ;;  %5224 = vmatprep.mubr.msk.bf16.mxu1 %vm5593_vm1, %v5592_v0 }
  0x78   :  { %4997 = vmatmul.mubr.msk.bf16.gmra.mrb[36].mxu0 %vm851_vm3, %v5443_v25  ;;  %5225 = vmatmul.mubr.msk.bf16.gmra.mrb[36].mxu1 %vm851_vm3, %v5444_v26  ;;  %v5482_v26 = vld [vmem:[%s6891_s0 + $0x2a8] sm:$0xff]  }
  0x79   :  { %5000 = vmatprep.mubr.msk.bf16.mxu0 %vm5593_vm1, %v5592_v0  ;;  %5228 = vmatprep.mubr.msk.bf16.mxu1 %vm5593_vm1, %v5592_v0 }
  0x80   :  { %5001 = vmatmul.mubr.msk.bf16.gmra.mrb[40].mxu0 %vm851_vm3, %v5445_v27  ;;  %5229 = vmatmul.mubr.msk.bf16.gmra.mrb[40].mxu1 %vm851_vm3, %v5446_v28 }
  0x81   :  { %5004 = vmatprep.mubr.msk.bf16.mxu0 %vm5593_vm1, %v5592_v0  ;;  %5232 = vmatprep.mubr.msk.bf16.mxu1 %vm5593_vm1, %v5592_v0 }
  0x88   :  { %5005 = vmatmul.mubr.msk.bf16.gmra.mrb[44].mxu0 %vm851_vm3, %v5447_v29  ;;  %5233 = vmatmul.mubr.msk.bf16.gmra.mrb[44].mxu1 %vm851_vm3, %v5448_v30 }
  0x89   :  { %5008 = vmatprep.mubr.msk.bf16.mxu0 %vm5593_vm1, %v5592_v0  ;;  %5236 = vmatprep.mubr.msk.bf16.mxu1 %vm5593_vm1, %v5592_v0 }
  0x90   :  { %5009 = vmatmul.mubr.msk.bf16.gmra.mrb[48].mxu0 %vm851_vm3, %v5449_v31  ;;  %5237 = vmatmul.mubr.msk.bf16.gmra.mrb[48].mxu1 %vm851_vm3, %v5450_v32 }
  0x91   :  { %5012 = vmatprep.mubr.msk.bf16.mxu0 %vm5593_vm1, %v5592_v0  ;;  %5240 = vmatprep.mubr.msk.bf16.mxu1 %vm5593_vm1, %v5592_v0 }
  0x98   :  { %5013 = vmatmul.mubr.msk.bf16.gmra.mrb[52].mxu0 %vm851_vm3, %v5451_v33  ;;  %5241 = vmatmul.mubr.msk.bf16.gmra.mrb[52].mxu1 %vm851_vm3, %v5452_v34 }
  0x99   :  { %5016 = vmatprep.mubr.msk.bf16.mxu0 %vm5593_vm1, %v5592_v0  ;;  %5244 = vmatprep.mubr.msk.bf16.mxu1 %vm5593_vm1, %v5592_v0 }
  0xa0   :  { %5017 = vmatmul.mubr.msk.bf16.gmra.mrb[56].mxu0 %vm851_vm3, %v5453_v35  ;;  %5245 = vmatmul.mubr.msk.bf16.gmra.mrb[56].mxu1 %vm851_vm3, %v5454_v36 }
  0xa1   :  { %5020 = vmatprep.mubr.msk.bf16.mxu0 %vm5593_vm1, %v5592_v0  ;;  %5248 = vmatprep.mubr.msk.bf16.mxu1 %vm5593_vm1, %v5592_v0 }
  0xa8   :  { %5021 = vmatmul.mubr.msk.bf16.gmra.mrb[60].mxu0 %vm851_vm3, %v5455_v37  ;;  %5249 = vmatmul.mubr.msk.bf16.gmra.mrb[60].mxu1 %vm851_vm3, %v5456_v38 }
  0xa9   :  { %5024 = vmatprep.mubr.msk.bf16.mxu0 %vm5593_vm1, %v5592_v0  ;;  %5252 = vmatprep.mubr.msk.bf16.mxu1 %vm5593_vm1, %v5592_v0 }
  0xb0   :  { %5025 = vmatmul.mubr.msk.bf16.gmra.mrb[64].mxu0 %vm851_vm3, %v5457_v39  ;;  %5253 = vmatmul.mubr.msk.bf16.gmra.mrb[64].mxu1 %vm851_vm3, %v5458_v40 }
  0xb1   :  { %5028 = vmatprep.mubr.msk.bf16.mxu0 %vm5593_vm1, %v5592_v0  ;;  %5256 = vmatprep.mubr.msk.bf16.mxu1 %vm5593_vm1, %v5592_v0 }
  0xb8   :  { %5029 = vmatmul.mubr.msk.bf16.gmra.mrb[68].mxu0 %vm851_vm3, %v5459_v41  ;;  %5257 = vmatmul.mubr.msk.bf16.gmra.mrb[68].mxu1 %vm851_vm3, %v5460_v42 }
  0xb9   :  { %5032 = vmatprep.mubr.msk.bf16.mxu0 %vm5593_vm1, %v5592_v0  ;;  %5260 = vmatprep.mubr.msk.bf16.mxu1 %vm5593_vm1, %v5592_v0 }
  0xc0   :  { %5033 = vmatmul.mubr.msk.bf16.gmra.mrb[72].mxu0 %vm851_vm3, %v5461_v43  ;;  %5261 = vmatmul.mubr.msk.bf16.gmra.mrb[72].mxu1 %vm851_vm3, %v5462_v44  ;;  %v5483_v43 = vld [vmem:[%s6891_s0 + $0xe8] sm:$0xff]  }
  0xc1   :  { %5036 = vmatprep.mubr.msk.bf16.mxu0 %vm5593_vm1, %v5592_v0  ;;  %5264 = vmatprep.mubr.msk.bf16.mxu1 %vm5593_vm1, %v5592_v0 }
  0xc8   :  { %5037 = vmatmul.mubr.msk.bf16.gmra.mrb[76].mxu0 %vm851_vm3, %v5463_v45  ;;  %5265 = vmatmul.mubr.msk.bf16.gmra.mrb[76].mxu1 %vm851_vm3, %v5464_v46  ;;  %v5484_v46 = vld [vmem:[%s6891_s0 + $0x2b0] sm:$0xff]  }
  0xc9   :  { %5040 = vmatprep.mubr.msk.bf16.mxu0 %vm5593_vm1, %v5592_v0  ;;  %5268 = vmatprep.mubr.msk.bf16.mxu1 %vm5593_vm1, %v5592_v0 }
  0xd0   :  { %5041 = vmatmul.mubr.msk.bf16.gmra.mrb[80].mxu0 %vm851_vm3, %v5465_v47  ;;  %5269 = vmatmul.mubr.msk.bf16.gmra.mrb[80].mxu1 %vm851_vm3, %v5466_v48 }
  0xd1   :  { %5044 = vmatprep.mubr.msk.bf16.mxu0 %vm5593_vm1, %v5592_v0  ;;  %5272 = vmatprep.mubr.msk.bf16.mxu1 %vm5593_vm1, %v5592_v0 }
  0xd8   :  { %5045 = vmatmul.mubr.msk.bf16.gmra.mrb[84].mxu0 %vm851_vm3, %v5467_v49  ;;  %5273 = vmatmul.mubr.msk.bf16.gmra.mrb[84].mxu1 %vm851_vm3, %v5468_v50 }
  0xd9   :  { %5048 = vmatprep.mubr.msk.bf16.mxu0 %vm5593_vm1, %v5592_v0  ;;  %5276 = vmatprep.mubr.msk.bf16.mxu1 %vm5593_vm1, %v5592_v0 }
  0xe0   :  { %5049 = vmatmul.mubr.msk.bf16.gmra.mrb[88].mxu0 %vm851_vm3, %v5469_v51  ;;  %5277 = vmatmul.mubr.msk.bf16.gmra.mrb[88].mxu1 %vm851_vm3, %v5470_v52 }
  0xe1   :  { %5052 = vmatprep.mubr.msk.bf16.mxu0 %vm5593_vm1, %v5592_v0  ;;  %5280 = vmatprep.mubr.msk.bf16.mxu1 %vm5593_vm1, %v5592_v0 }
  0xe8   :  { %5053 = vmatmul.mubr.msk.bf16.gmra.mrb[92].mxu0 %vm851_vm3, %v5471_v53  ;;  %5281 = vmatmul.mubr.msk.bf16.gmra.mrb[92].mxu1 %vm851_vm3, %v5472_v54 }
  0xe9   :  { %5056 = vmatprep.mubr.msk.bf16.mxu0 %vm5593_vm1, %v5592_v0  ;;  %5284 = vmatprep.mubr.msk.bf16.mxu1 %vm5593_vm1, %v5592_v0 }
  0xf0   :  { %5057 = vmatmul.mubr.msk.bf16.gmra.mrb[96].mxu0 %vm851_vm3, %v5473_v55  ;;  %5285 = vmatmul.mubr.msk.bf16.gmra.mrb[96].mxu1 %vm851_vm3, %v5474_v56 }
  0xf1   :  { %5060 = vmatprep.mubr.msk.bf16.mxu0 %vm5593_vm1, %v5592_v0  ;;  %5288 = vmatprep.mubr.msk.bf16.mxu1 %vm5593_vm1, %v5592_v0 }
  0xf8   :  { %5061 = vmatmul.mubr.msk.bf16.gmra.mrb[100].mxu0 %vm851_vm3, %v5475_v57  ;;  %5289 = vmatmul.mubr.msk.bf16.gmra.mrb[100].mxu1 %vm851_vm3, %v5476_v58 }
  0xf9   :  { %5064 = vmatprep.mubr.msk.bf16.mxu0 %vm5593_vm1, %v5592_v0  ;;  %5292 = vmatprep.mubr.msk.bf16.mxu1 %vm5593_vm1, %v5592_v0 }
 0x100   :  { %5065 = vmatmul.mubr.msk.bf16.gmra.mrb[104].mxu0 %vm851_vm3, %v5477_v59  ;;  %5293 = vmatmul.mubr.msk.bf16.gmra.mrb[104].mxu1 %vm851_vm3, %v5478_v60 }
 0x101   :  { %5068 = vmatprep.mubr.msk.bf16.mxu0 %vm5593_vm1, %v5592_v0  ;;  %5296 = vmatprep.mubr.msk.bf16.mxu1 %vm5593_vm1, %v5592_v0 }
 0x103   :  { %v1232_v62 = vpop.f32.mrb[0].mxu0  ;;  %v1688_v63 = vpop.f32.mrb[0].mxu1 }
 0x104   :  { %v1233_v1 = vadd.f32 %v5967_v61, %v1232_v62  ;;  %v4962_v2 = vpop.f32.mrb[1].mxu0  ;;  %v1689_v4 = vadd.f32 %v5967_v61, %v1688_v63  ;;  %v5190_v5 = vpop.f32.mrb[1].mxu1 }
 0x105   :  { %v1235_v7 = vpop.f32.mrb[2].mxu0  ;;  %v1691_v8 = vpop.f32.mrb[2].mxu1 }
 0x106   :  { %v1236_v9 = vadd.f32 %v5967_v61, %v1235_v7  ;;  %v4963_v10 = vpop.f32.mrb[3].mxu0  ;;  %v2248_v11 = vmax.f32 %v1689_v4, 0.0  ;;  %v1692_v12 = vadd.f32 %v5967_v61, %v1691_v8  ;;  %v5191_v13 = vpop.f32.mrb[3].mxu1  ;;  %v2134_v14 = vmax.f32 %v1233_v1, 0.0  ;;  %v5485_v1 = vld [vmem:[%s6891_s0 + $0xf0] sm:$0xff]   ;;  %v5486_v4 = vld [vmem:[%s6891_s0 + $0x2b8] sm:$0xff]  }
 0x108   :  { %v2135_v15 = vmax.f32 %v1236_v9, 0.0  ;;  %5069 = vmatmul.mubr.msk.bf16.gmra.mrb[108].mxu0 %vm851_vm3, %v5479_v3  ;;  %v2249_v16 = vmax.f32 %v1692_v12, 0.0  ;;  %5297 = vmatmul.mubr.msk.bf16.gmra.mrb[108].mxu1 %vm851_vm3, %v5480_v6 }
 0x109   :  { %5072 = vmatprep.mubr.msk.bf16.mxu0 %vm5593_vm1, %v5592_v0  ;;  %5300 = vmatprep.mubr.msk.bf16.mxu1 %vm5593_vm1, %v5592_v0 }
 0x10a   :  { %v4173_v17 = vpack.c.bf16 %v2135_v15, %v2134_v14  ;;  %v4458_v18 = vpack.c.bf16 %v2249_v16, %v2248_v11 }
 0x10b   :  { %v1240_v19 = vpop.f32.mrb[4].mxu0  ;;  %v1696_v20 = vpop.f32.mrb[4].mxu1 }
 0x10c   :  { %4174 = vst [vmem:[%s6894_s3] sm:$0xff] %v4173_v17   ;;  %v1241_v21 = vadd.f32 %v5967_v61, %v1240_v19  ;;  %v4966_v22 = vpop.f32.mrb[5].mxu0  ;;  %4786 = vst [vmem:[%s6894_s3 + $0x1c8] sm:$0xff] %v4458_v18   ;;  %v1697_v24 = vadd.f32 %v5967_v61, %v1696_v20  ;;  %v5194_v25 = vpop.f32.mrb[5].mxu1 }
 0x10d   :  { %v1243_v27 = vpop.f32.mrb[6].mxu0  ;;  %v1699_v28 = vpop.f32.mrb[6].mxu1 }
 0x10e   :  { %v1244_v29 = vadd.f32 %v5967_v61, %v1243_v27  ;;  %v4967_v30 = vpop.f32.mrb[7].mxu0  ;;  %v2250_v31 = vmax.f32 %v1697_v24, 0.0  ;;  %v1700_v32 = vadd.f32 %v5967_v61, %v1699_v28  ;;  %v5195_v33 = vpop.f32.mrb[7].mxu1  ;;  %v2136_v34 = vmax.f32 %v1241_v21, 0.0  ;;  %v5487_v21 = vld [vmem:[%s6891_s0 + $0xf8] sm:$0xff]   ;;  %v5488_v24 = vld [vmem:[%s6891_s0 + $0x2c0] sm:$0xff]  }
 0x110   :  { %v2137_v35 = vmax.f32 %v1244_v29, 0.0  ;;  %5073 = vmatmul.mubr.msk.bf16.gmra.mrb[112].mxu0 %vm851_vm3, %v5481_v23  ;;  %v2251_v36 = vmax.f32 %v1700_v32, 0.0  ;;  %5301 = vmatmul.mubr.msk.bf16.gmra.mrb[112].mxu1 %vm851_vm3, %v5482_v26 }
 0x111   :  { %5076 = vmatprep.mubr.msk.bf16.mxu0 %vm5593_vm1, %v5592_v0  ;;  %5304 = vmatprep.mubr.msk.bf16.mxu1 %vm5593_vm1, %v5592_v0 }
 0x112   :  { %v4178_v37 = vpack.c.bf16 %v2137_v35, %v2136_v34  ;;  %v4463_v38 = vpack.c.bf16 %v2251_v36, %v2250_v31 }
 0x113   :  { %v1248_v39 = vpop.f32.mrb[8].mxu0  ;;  %v1704_v40 = vpop.f32.mrb[8].mxu1 }
 0x114   :  { %4730 = vst [vmem:[%s6894_s3 + $0x8] sm:$0xff] %v4178_v37   ;;  %v1249_v41 = vadd.f32 %v5967_v61, %v1248_v39  ;;  %v4970_v42 = vpop.f32.mrb[9].mxu0  ;;  %4787 = vst [vmem:[%s6894_s3 + $0x1d0] sm:$0xff] %v4463_v38   ;;  %v1705_v44 = vadd.f32 %v5967_v61, %v1704_v40  ;;  %v5198_v45 = vpop.f32.mrb[9].mxu1 }
 0x115   :  { %v1251_v47 = vpop.f32.mrb[10].mxu0  ;;  %v1707_v48 = vpop.f32.mrb[10].mxu1 }
 0x116   :  { %v1252_v49 = vadd.f32 %v5967_v61, %v1251_v47  ;;  %v4971_v50 = vpop.f32.mrb[11].mxu0  ;;  %v2252_v51 = vmax.f32 %v1705_v44, 0.0  ;;  %v1708_v52 = vadd.f32 %v5967_v61, %v1707_v48  ;;  %v5199_v53 = vpop.f32.mrb[11].mxu1  ;;  %v2138_v54 = vmax.f32 %v1249_v41, 0.0  ;;  %v5489_v41 = vld [vmem:[%s6891_s0 + $0x100] sm:$0xff]   ;;  %v5490_v44 = vld [vmem:[%s6891_s0 + $0x2c8] sm:$0xff]  }
 0x118   :  { %v2139_v55 = vmax.f32 %v1252_v49, 0.0  ;;  %5077 = vmatmul.mubr.msk.bf16.gmra.mrb[116].mxu0 %vm851_vm3, %v5483_v43  ;;  %v2253_v56 = vmax.f32 %v1708_v52, 0.0  ;;  %5305 = vmatmul.mubr.msk.bf16.gmra.mrb[116].mxu1 %vm851_vm3, %v5484_v46 }
 0x119   :  { %5080 = vmatprep.mubr.msk.bf16.mxu0 %vm5593_vm1, %v5592_v0  ;;  %5308 = vmatprep.mubr.msk.bf16.mxu1 %vm5593_vm1, %v5592_v0 }
 0x11a   :  { %v4183_v57 = vpack.c.bf16 %v2139_v55, %v2138_v54  ;;  %v4468_v58 = vpack.c.bf16 %v2253_v56, %v2252_v51 }
 0x11b   :  { %v1256_v59 = vpop.f32.mrb[12].mxu0  ;;  %v1712_v60 = vpop.f32.mrb[12].mxu1 }
 0x11c   :  { %4731 = vst [vmem:[%s6894_s3 + $0x10] sm:$0xff] %v4183_v57   ;;  %v1257_v62 = vadd.f32 %v5967_v61, %v1256_v59  ;;  %v4974_v63 = vpop.f32.mrb[13].mxu0  ;;  %4788 = vst [vmem:[%s6894_s3 + $0x1d8] sm:$0xff] %v4468_v58   ;;  %v1713_v2 = vadd.f32 %v5967_v61, %v1712_v60  ;;  %v5202_v3 = vpop.f32.mrb[13].mxu1 }
 0x11d   :  { %v1259_v5 = vpop.f32.mrb[14].mxu0  ;;  %v1715_v6 = vpop.f32.mrb[14].mxu1 }
 0x11e   :  { %v1260_v7 = vadd.f32 %v5967_v61, %v1259_v5  ;;  %v4975_v8 = vpop.f32.mrb[15].mxu0  ;;  %v2254_v9 = vmax.f32 %v1713_v2, 0.0  ;;  %v1716_v10 = vadd.f32 %v5967_v61, %v1715_v6  ;;  %v5203_v11 = vpop.f32.mrb[15].mxu1  ;;  %v2140_v12 = vmax.f32 %v1257_v62, 0.0  ;;  %v5491_v62 = vld [vmem:[%s6891_s0 + $0x108] sm:$0xff]   ;;  %v5492_v2 = vld [vmem:[%s6891_s0 + $0x2d0] sm:$0xff]  }
 0x120   :  { %v2141_v13 = vmax.f32 %v1260_v7, 0.0  ;;  %5081 = vmatmul.mubr.msk.bf16.gmra.mrb[120].mxu0 %vm851_vm3, %v5485_v1  ;;  %v2255_v14 = vmax.f32 %v1716_v10, 0.0  ;;  %5309 = vmatmul.mubr.msk.bf16.gmra.mrb[120].mxu1 %vm851_vm3, %v5486_v4 }
 0x121   :  { %5084 = vmatprep.mubr.msk.bf16.mxu0 %vm5593_vm1, %v5592_v0  ;;  %5312 = vmatprep.mubr.msk.bf16.mxu1 %vm5593_vm1, %v5592_v0 }
 0x122   :  { %v4188_v15 = vpack.c.bf16 %v2141_v13, %v2140_v12  ;;  %v4473_v16 = vpack.c.bf16 %v2255_v14, %v2254_v9 }
 0x123   :  { %v1264_v17 = vpop.f32.mrb[16].mxu0  ;;  %v1720_v18 = vpop.f32.mrb[16].mxu1 }
 0x124   :  { %4732 = vst [vmem:[%s6894_s3 + $0x18] sm:$0xff] %v4188_v15   ;;  %v1265_v19 = vadd.f32 %v5967_v61, %v1264_v17  ;;  %v4978_v20 = vpop.f32.mrb[17].mxu0  ;;  %4789 = vst [vmem:[%s6894_s3 + $0x1e0] sm:$0xff] %v4473_v16   ;;  %v1721_v22 = vadd.f32 %v5967_v61, %v1720_v18  ;;  %v5206_v23 = vpop.f32.mrb[17].mxu1 }
 0x125   :  { %v1267_v25 = vpop.f32.mrb[18].mxu0  ;;  %v1723_v26 = vpop.f32.mrb[18].mxu1 }
 0x126   :  { %v1268_v27 = vadd.f32 %v5967_v61, %v1267_v25  ;;  %v4979_v28 = vpop.f32.mrb[19].mxu0  ;;  %v2256_v29 = vmax.f32 %v1721_v22, 0.0  ;;  %v1724_v30 = vadd.f32 %v5967_v61, %v1723_v26  ;;  %v5207_v31 = vpop.f32.mrb[19].mxu1  ;;  %v2142_v32 = vmax.f32 %v1265_v19, 0.0  ;;  %v5493_v19 = vld [vmem:[%s6891_s0 + $0x110] sm:$0xff]   ;;  %v5494_v22 = vld [vmem:[%s6891_s0 + $0x2d8] sm:$0xff]  }
 0x128   :  { %v2143_v33 = vmax.f32 %v1268_v27, 0.0  ;;  %5085 = vmatmul.mubr.msk.bf16.gmra.mrb[124].mxu0 %vm851_vm3, %v5487_v21  ;;  %v2257_v34 = vmax.f32 %v1724_v30, 0.0  ;;  %5313 = vmatmul.mubr.msk.bf16.gmra.mrb[124].mxu1 %vm851_vm3, %v5488_v24 }
 0x129   :  { %5088 = vmatprep.mubr.msk.bf16.mxu0 %vm5593_vm1, %v5592_v0  ;;  %5316 = vmatprep.mubr.msk.bf16.mxu1 %vm5593_vm1, %v5592_v0 }
 0x12a   :  { %v4193_v35 = vpack.c.bf16 %v2143_v33, %v2142_v32  ;;  %v4478_v36 = vpack.c.bf16 %v2257_v34, %v2256_v29 }
 0x12b   :  { %v1272_v37 = vpop.f32.mrb[20].mxu0  ;;  %v1728_v38 = vpop.f32.mrb[20].mxu1 }
 0x12c   :  { %4733 = vst [vmem:[%s6894_s3 + $0x20] sm:$0xff] %v4193_v35   ;;  %v1273_v39 = vadd.f32 %v5967_v61, %v1272_v37  ;;  %v4982_v40 = vpop.f32.mrb[21].mxu0  ;;  %4790 = vst [vmem:[%s6894_s3 + $0x1e8] sm:$0xff] %v4478_v36   ;;  %v1729_v42 = vadd.f32 %v5967_v61, %v1728_v38  ;;  %v5210_v43 = vpop.f32.mrb[21].mxu1 }
 0x12d   :  { %v1275_v45 = vpop.f32.mrb[22].mxu0  ;;  %v1731_v46 = vpop.f32.mrb[22].mxu1 }
 0x12e   :  { %v1276_v47 = vadd.f32 %v5967_v61, %v1275_v45  ;;  %v4983_v48 = vpop.f32.mrb[23].mxu0  ;;  %v2258_v49 = vmax.f32 %v1729_v42, 0.0  ;;  %v1732_v50 = vadd.f32 %v5967_v61, %v1731_v46  ;;  %v5211_v51 = vpop.f32.mrb[23].mxu1  ;;  %v2144_v52 = vmax.f32 %v1273_v39, 0.0  ;;  %v5495_v39 = vld [vmem:[%s6891_s0 + $0x118] sm:$0xff]   ;;  %v5496_v42 = vld [vmem:[%s6891_s0 + $0x2e0] sm:$0xff]  }
 0x130   :  { %v2145_v53 = vmax.f32 %v1276_v47, 0.0  ;;  %5089 = vmatmul.mubr.msk.bf16.gmra.mrb[128].mxu0 %vm851_vm3, %v5489_v41  ;;  %v2259_v54 = vmax.f32 %v1732_v50, 0.0  ;;  %5317 = vmatmul.mubr.msk.bf16.gmra.mrb[128].mxu1 %vm851_vm3, %v5490_v44 }
 0x131   :  { %5092 = vmatprep.mubr.msk.bf16.mxu0 %vm5593_vm1, %v5592_v0  ;;  %5320 = vmatprep.mubr.msk.bf16.mxu1 %vm5593_vm1, %v5592_v0 }
 0x132   :  { %v4198_v55 = vpack.c.bf16 %v2145_v53, %v2144_v52  ;;  %v4483_v56 = vpack.c.bf16 %v2259_v54, %v2258_v49 }
 0x133   :  { %v1280_v57 = vpop.f32.mrb[24].mxu0  ;;  %v1736_v58 = vpop.f32.mrb[24].mxu1 }
 0x134   :  { %4734 = vst [vmem:[%s6894_s3 + $0x28] sm:$0xff] %v4198_v55   ;;  %v1281_v59 = vadd.f32 %v5967_v61, %v1280_v57  ;;  %v4986_v60 = vpop.f32.mrb[25].mxu0  ;;  %4791 = vst [vmem:[%s6894_s3 + $0x1f0] sm:$0xff] %v4483_v56   ;;  %v1737_v63 = vadd.f32 %v5967_v61, %v1736_v58  ;;  %v5214_v1 = vpop.f32.mrb[25].mxu1 }
 0x135   :  { %v1283_v3 = vpop.f32.mrb[26].mxu0  ;;  %v1739_v4 = vpop.f32.mrb[26].mxu1 }
 0x136   :  { %v1284_v5 = vadd.f32 %v5967_v61, %v1283_v3  ;;  %v4987_v6 = vpop.f32.mrb[27].mxu0  ;;  %v2260_v7 = vmax.f32 %v1737_v63, 0.0  ;;  %v1740_v8 = vadd.f32 %v5967_v61, %v1739_v4  ;;  %v5215_v9 = vpop.f32.mrb[27].mxu1  ;;  %v2146_v10 = vmax.f32 %v1281_v59, 0.0  ;;  %v5497_v59 = vld [vmem:[%s6891_s0 + $0x120] sm:$0xff]   ;;  %v5498_v63 = vld [vmem:[%s6891_s0 + $0x2e8] sm:$0xff]  }
 0x138   :  { %v2147_v11 = vmax.f32 %v1284_v5, 0.0  ;;  %5093 = vmatmul.mubr.msk.bf16.gmra.mrb[132].mxu0 %vm851_vm3, %v5491_v62  ;;  %v2261_v12 = vmax.f32 %v1740_v8, 0.0  ;;  %5321 = vmatmul.mubr.msk.bf16.gmra.mrb[132].mxu1 %vm851_vm3, %v5492_v2 }
 0x139   :  { %5096 = vmatprep.mubr.msk.bf16.mxu0 %vm5593_vm1, %v5592_v0  ;;  %5324 = vmatprep.mubr.msk.bf16.mxu1 %vm5593_vm1, %v5592_v0 }
 0x13a   :  { %v4203_v13 = vpack.c.bf16 %v2147_v11, %v2146_v10  ;;  %v4488_v14 = vpack.c.bf16 %v2261_v12, %v2260_v7 }
 0x13b   :  { %v1288_v15 = vpop.f32.mrb[28].mxu0  ;;  %v1744_v16 = vpop.f32.mrb[28].mxu1 }
 0x13c   :  { %4735 = vst [vmem:[%s6894_s3 + $0x30] sm:$0xff] %v4203_v13   ;;  %v1289_v17 = vadd.f32 %v5967_v61, %v1288_v15  ;;  %v4990_v18 = vpop.f32.mrb[29].mxu0  ;;  %4792 = vst [vmem:[%s6894_s3 + $0x1f8] sm:$0xff] %v4488_v14   ;;  %v1745_v20 = vadd.f32 %v5967_v61, %v1744_v16  ;;  %v5218_v21 = vpop.f32.mrb[29].mxu1 }
 0x13d   :  { %v1291_v23 = vpop.f32.mrb[30].mxu0  ;;  %v1747_v24 = vpop.f32.mrb[30].mxu1 }
 0x13e   :  { %v1292_v25 = vadd.f32 %v5967_v61, %v1291_v23  ;;  %v4991_v26 = vpop.f32.mrb[31].mxu0  ;;  %v2262_v27 = vmax.f32 %v1745_v20, 0.0  ;;  %v1748_v28 = vadd.f32 %v5967_v61, %v1747_v24  ;;  %v5219_v29 = vpop.f32.mrb[31].mxu1  ;;  %v2148_v30 = vmax.f32 %v1289_v17, 0.0  ;;  %v5499_v17 = vld [vmem:[%s6891_s0 + $0x128] sm:$0xff]   ;;  %v5500_v20 = vld [vmem:[%s6891_s0 + $0x2f0] sm:$0xff]  }
 0x140   :  { %v2149_v31 = vmax.f32 %v1292_v25, 0.0  ;;  %5097 = vmatmul.mubr.msk.bf16.gmra.mrb[136].mxu0 %vm851_vm3, %v5493_v19  ;;  %v2263_v32 = vmax.f32 %v1748_v28, 0.0  ;;  %5325 = vmatmul.mubr.msk.bf16.gmra.mrb[136].mxu1 %vm851_vm3, %v5494_v22 }
 0x141   :  { %5100 = vmatprep.mubr.msk.bf16.mxu0 %vm5593_vm1, %v5592_v0  ;;  %5328 = vmatprep.mubr.msk.bf16.mxu1 %vm5593_vm1, %v5592_v0 }
 0x142   :  { %v4208_v33 = vpack.c.bf16 %v2149_v31, %v2148_v30  ;;  %v4493_v34 = vpack.c.bf16 %v2263_v32, %v2262_v27 }
 0x143   :  { %v1296_v35 = vpop.f32.mrb[32].mxu0  ;;  %v1752_v36 = vpop.f32.mrb[32].mxu1 }
 0x144   :  { %4736 = vst [vmem:[%s6894_s3 + $0x38] sm:$0xff] %v4208_v33   ;;  %v1297_v37 = vadd.f32 %v5967_v61, %v1296_v35  ;;  %v4994_v38 = vpop.f32.mrb[33].mxu0  ;;  %4793 = vst [vmem:[%s6894_s3 + $0x200] sm:$0xff] %v4493_v34   ;;  %v1753_v40 = vadd.f32 %v5967_v61, %v1752_v36  ;;  %v5222_v41 = vpop.f32.mrb[33].mxu1 }
 0x145   :  { %v1299_v43 = vpop.f32.mrb[34].mxu0  ;;  %v1755_v44 = vpop.f32.mrb[34].mxu1 }
 0x146   :  { %v1300_v45 = vadd.f32 %v5967_v61, %v1299_v43  ;;  %v4995_v46 = vpop.f32.mrb[35].mxu0  ;;  %v2264_v47 = vmax.f32 %v1753_v40, 0.0  ;;  %v1756_v48 = vadd.f32 %v5967_v61, %v1755_v44  ;;  %v5223_v49 = vpop.f32.mrb[35].mxu1  ;;  %v2150_v50 = vmax.f32 %v1297_v37, 0.0  ;;  %v5501_v37 = vld [vmem:[%s6891_s0 + $0x130] sm:$0xff]   ;;  %v5502_v40 = vld [vmem:[%s6891_s0 + $0x2f8] sm:$0xff]  }
 0x148   :  { %v2151_v51 = vmax.f32 %v1300_v45, 0.0  ;;  %5101 = vmatmul.mubr.msk.bf16.gmra.mrb[140].mxu0 %vm851_vm3, %v5495_v39  ;;  %v2265_v52 = vmax.f32 %v1756_v48, 0.0  ;;  %5329 = vmatmul.mubr.msk.bf16.gmra.mrb[140].mxu1 %vm851_vm3, %v5496_v42 }
 0x149   :  { %5104 = vmatprep.mubr.msk.bf16.mxu0 %vm5593_vm1, %v5592_v0  ;;  %5332 = vmatprep.mubr.msk.bf16.mxu1 %vm5593_vm1, %v5592_v0 }
 0x14a   :  { %v4213_v53 = vpack.c.bf16 %v2151_v51, %v2150_v50  ;;  %v4498_v54 = vpack.c.bf16 %v2265_v52, %v2264_v47 }
 0x14b   :  { %v1304_v55 = vpop.f32.mrb[36].mxu0  ;;  %v1760_v56 = vpop.f32.mrb[36].mxu1 }
 0x14c   :  { %4737 = vst [vmem:[%s6894_s3 + $0x40] sm:$0xff] %v4213_v53   ;;  %v1305_v57 = vadd.f32 %v5967_v61, %v1304_v55  ;;  %v4998_v58 = vpop.f32.mrb[37].mxu0  ;;  %4794 = vst [vmem:[%s6894_s3 + $0x208] sm:$0xff] %v4498_v54   ;;  %v1761_v60 = vadd.f32 %v5967_v61, %v1760_v56  ;;  %v5226_v62 = vpop.f32.mrb[37].mxu1 }
 0x14d   :  { %v1307_v1 = vpop.f32.mrb[38].mxu0  ;;  %v1763_v2 = vpop.f32.mrb[38].mxu1 }
 0x14e   :  { %v1308_v3 = vadd.f32 %v5967_v61, %v1307_v1  ;;  %v4999_v4 = vpop.f32.mrb[39].mxu0  ;;  %v2266_v5 = vmax.f32 %v1761_v60, 0.0  ;;  %v1764_v6 = vadd.f32 %v5967_v61, %v1763_v2  ;;  %v5227_v7 = vpop.f32.mrb[39].mxu1  ;;  %v2152_v8 = vmax.f32 %v1305_v57, 0.0  ;;  %v5503_v57 = vld [vmem:[%s6891_s0 + $0x138] sm:$0xff]   ;;  %v5504_v60 = vld [vmem:[%s6891_s0 + $0x300] sm:$0xff]  }
 0x150   :  { %v2153_v9 = vmax.f32 %v1308_v3, 0.0  ;;  %5105 = vmatmul.mubr.msk.bf16.gmra.mrb[144].mxu0 %vm851_vm3, %v5497_v59  ;;  %v2267_v10 = vmax.f32 %v1764_v6, 0.0  ;;  %5333 = vmatmul.mubr.msk.bf16.gmra.mrb[144].mxu1 %vm851_vm3, %v5498_v63 }
 0x151   :  { %5108 = vmatprep.mubr.msk.bf16.mxu0 %vm5593_vm1, %v5592_v0  ;;  %5336 = vmatprep.mubr.msk.bf16.mxu1 %vm5593_vm1, %v5592_v0 }
 0x152   :  { %v4218_v11 = vpack.c.bf16 %v2153_v9, %v2152_v8  ;;  %v4503_v12 = vpack.c.bf16 %v2267_v10, %v2266_v5 }
 0x153   :  { %v1312_v13 = vpop.f32.mrb[40].mxu0  ;;  %v1768_v14 = vpop.f32.mrb[40].mxu1 }
 0x154   :  { %4738 = vst [vmem:[%s6894_s3 + $0x48] sm:$0xff] %v4218_v11   ;;  %v1313_v15 = vadd.f32 %v5967_v61, %v1312_v13  ;;  %v5002_v16 = vpop.f32.mrb[41].mxu0  ;;  %4795 = vst [vmem:[%s6894_s3 + $0x210] sm:$0xff] %v4503_v12   ;;  %v1769_v18 = vadd.f32 %v5967_v61, %v1768_v14  ;;  %v5230_v19 = vpop.f32.mrb[41].mxu1 }
 0x155   :  { %v1315_v21 = vpop.f32.mrb[42].mxu0  ;;  %v1771_v22 = vpop.f32.mrb[42].mxu1 }
 0x156   :  { %v1316_v23 = vadd.f32 %v5967_v61, %v1315_v21  ;;  %v5003_v24 = vpop.f32.mrb[43].mxu0  ;;  %v2268_v25 = vmax.f32 %v1769_v18, 0.0  ;;  %v1772_v26 = vadd.f32 %v5967_v61, %v1771_v22  ;;  %v5231_v27 = vpop.f32.mrb[43].mxu1  ;;  %v2154_v28 = vmax.f32 %v1313_v15, 0.0  ;;  %v5505_v15 = vld [vmem:[%s6891_s0 + $0x140] sm:$0xff]   ;;  %v5506_v18 = vld [vmem:[%s6891_s0 + $0x308] sm:$0xff]  }
 0x158   :  { %v2155_v29 = vmax.f32 %v1316_v23, 0.0  ;;  %5109 = vmatmul.mubr.msk.bf16.gmra.mrb[148].mxu0 %vm851_vm3, %v5499_v17  ;;  %v2269_v30 = vmax.f32 %v1772_v26, 0.0  ;;  %5337 = vmatmul.mubr.msk.bf16.gmra.mrb[148].mxu1 %vm851_vm3, %v5500_v20 }
 0x159   :  { %5112 = vmatprep.mubr.msk.bf16.mxu0 %vm5593_vm1, %v5592_v0  ;;  %5340 = vmatprep.mubr.msk.bf16.mxu1 %vm5593_vm1, %v5592_v0 }
 0x15a   :  { %v4223_v31 = vpack.c.bf16 %v2155_v29, %v2154_v28  ;;  %v4508_v32 = vpack.c.bf16 %v2269_v30, %v2268_v25 }
 0x15b   :  { %v1320_v33 = vpop.f32.mrb[44].mxu0  ;;  %v1776_v34 = vpop.f32.mrb[44].mxu1 }
 0x15c   :  { %4739 = vst [vmem:[%s6894_s3 + $0x50] sm:$0xff] %v4223_v31   ;;  %v1321_v35 = vadd.f32 %v5967_v61, %v1320_v33  ;;  %v5006_v36 = vpop.f32.mrb[45].mxu0  ;;  %4796 = vst [vmem:[%s6894_s3 + $0x218] sm:$0xff] %v4508_v32   ;;  %v1777_v38 = vadd.f32 %v5967_v61, %v1776_v34  ;;  %v5234_v39 = vpop.f32.mrb[45].mxu1 }
 0x15d   :  { %v1323_v41 = vpop.f32.mrb[46].mxu0  ;;  %v1779_v42 = vpop.f32.mrb[46].mxu1 }
 0x15e   :  { %v1324_v43 = vadd.f32 %v5967_v61, %v1323_v41  ;;  %v5007_v44 = vpop.f32.mrb[47].mxu0  ;;  %v2270_v45 = vmax.f32 %v1777_v38, 0.0  ;;  %v1780_v46 = vadd.f32 %v5967_v61, %v1779_v42  ;;  %v5235_v47 = vpop.f32.mrb[47].mxu1  ;;  %v2156_v48 = vmax.f32 %v1321_v35, 0.0  ;;  %v5507_v35 = vld [vmem:[%s6891_s0 + $0x148] sm:$0xff]   ;;  %v5508_v38 = vld [vmem:[%s6891_s0 + $0x310] sm:$0xff]  }
 0x160   :  { %v2157_v49 = vmax.f32 %v1324_v43, 0.0  ;;  %5113 = vmatmul.mubr.msk.bf16.gmra.mrb[152].mxu0 %vm851_vm3, %v5501_v37  ;;  %v2271_v50 = vmax.f32 %v1780_v46, 0.0  ;;  %5341 = vmatmul.mubr.msk.bf16.gmra.mrb[152].mxu1 %vm851_vm3, %v5502_v40 }
 0x161   :  { %5116 = vmatprep.mubr.msk.bf16.mxu0 %vm5593_vm1, %v5592_v0  ;;  %5344 = vmatprep.mubr.msk.bf16.mxu1 %vm5593_vm1, %v5592_v0 }
 0x162   :  { %v4228_v51 = vpack.c.bf16 %v2157_v49, %v2156_v48  ;;  %v4513_v52 = vpack.c.bf16 %v2271_v50, %v2270_v45 }
 0x163   :  { %v1328_v53 = vpop.f32.mrb[48].mxu0  ;;  %v1784_v54 = vpop.f32.mrb[48].mxu1 }
 0x164   :  { %4740 = vst [vmem:[%s6894_s3 + $0x58] sm:$0xff] %v4228_v51   ;;  %v1329_v55 = vadd.f32 %v5967_v61, %v1328_v53  ;;  %v5010_v56 = vpop.f32.mrb[49].mxu0  ;;  %4797 = vst [vmem:[%s6894_s3 + $0x220] sm:$0xff] %v4513_v52   ;;  %v1785_v58 = vadd.f32 %v5967_v61, %v1784_v54  ;;  %v5238_v59 = vpop.f32.mrb[49].mxu1 }
 0x165   :  { %v1331_v62 = vpop.f32.mrb[50].mxu0  ;;  %v1787_v63 = vpop.f32.mrb[50].mxu1 }
 0x166   :  { %v1332_v1 = vadd.f32 %v5967_v61, %v1331_v62  ;;  %v5011_v2 = vpop.f32.mrb[51].mxu0  ;;  %v2272_v3 = vmax.f32 %v1785_v58, 0.0  ;;  %v1788_v4 = vadd.f32 %v5967_v61, %v1787_v63  ;;  %v5239_v5 = vpop.f32.mrb[51].mxu1  ;;  %v2158_v6 = vmax.f32 %v1329_v55, 0.0  ;;  %v5509_v55 = vld [vmem:[%s6891_s0 + $0x150] sm:$0xff]   ;;  %v5510_v58 = vld [vmem:[%s6891_s0 + $0x318] sm:$0xff]  }
 0x168   :  { %v2159_v7 = vmax.f32 %v1332_v1, 0.0  ;;  %5117 = vmatmul.mubr.msk.bf16.gmra.mrb[156].mxu0 %vm851_vm3, %v5503_v57  ;;  %v2273_v8 = vmax.f32 %v1788_v4, 0.0  ;;  %5345 = vmatmul.mubr.msk.bf16.gmra.mrb[156].mxu1 %vm851_vm3, %v5504_v60 }
 0x169   :  { %5120 = vmatprep.mubr.msk.bf16.mxu0 %vm5593_vm1, %v5592_v0  ;;  %5348 = vmatprep.mubr.msk.bf16.mxu1 %vm5593_vm1, %v5592_v0 }
 0x16a   :  { %v4233_v9 = vpack.c.bf16 %v2159_v7, %v2158_v6  ;;  %v4518_v10 = vpack.c.bf16 %v2273_v8, %v2272_v3 }
 0x16b   :  { %v1336_v11 = vpop.f32.mrb[52].mxu0  ;;  %v1792_v12 = vpop.f32.mrb[52].mxu1 }
 0x16c   :  { %4741 = vst [vmem:[%s6894_s3 + $0x60] sm:$0xff] %v4233_v9   ;;  %v1337_v13 = vadd.f32 %v5967_v61, %v1336_v11  ;;  %v5014_v14 = vpop.f32.mrb[53].mxu0  ;;  %4798 = vst [vmem:[%s6894_s3 + $0x228] sm:$0xff] %v4518_v10   ;;  %v1793_v16 = vadd.f32 %v5967_v61, %v1792_v12  ;;  %v5242_v17 = vpop.f32.mrb[53].mxu1 }
 0x16d   :  { %v1339_v19 = vpop.f32.mrb[54].mxu0  ;;  %v1795_v20 = vpop.f32.mrb[54].mxu1 }
 0x16e   :  { %v1340_v21 = vadd.f32 %v5967_v61, %v1339_v19  ;;  %v5015_v22 = vpop.f32.mrb[55].mxu0  ;;  %v2274_v23 = vmax.f32 %v1793_v16, 0.0  ;;  %v1796_v24 = vadd.f32 %v5967_v61, %v1795_v20  ;;  %v5243_v25 = vpop.f32.mrb[55].mxu1  ;;  %v2160_v26 = vmax.f32 %v1337_v13, 0.0  ;;  %v5511_v13 = vld [vmem:[%s6891_s0 + $0x158] sm:$0xff]   ;;  %v5512_v16 = vld [vmem:[%s6891_s0 + $0x320] sm:$0xff]  }
 0x170   :  { %v2161_v27 = vmax.f32 %v1340_v21, 0.0  ;;  %5121 = vmatmul.mubr.msk.bf16.gmra.mrb[160].mxu0 %vm851_vm3, %v5505_v15  ;;  %v2275_v28 = vmax.f32 %v1796_v24, 0.0  ;;  %5349 = vmatmul.mubr.msk.bf16.gmra.mrb[160].mxu1 %vm851_vm3, %v5506_v18 }
 0x171   :  { %5124 = vmatprep.mubr.msk.bf16.mxu0 %vm5593_vm1, %v5592_v0  ;;  %5352 = vmatprep.mubr.msk.bf16.mxu1 %vm5593_vm1, %v5592_v0 }
 0x172   :  { %v4238_v29 = vpack.c.bf16 %v2161_v27, %v2160_v26  ;;  %v4523_v30 = vpack.c.bf16 %v2275_v28, %v2274_v23 }
 0x173   :  { %v1344_v31 = vpop.f32.mrb[56].mxu0  ;;  %v1800_v32 = vpop.f32.mrb[56].mxu1 }
 0x174   :  { %4742 = vst [vmem:[%s6894_s3 + $0x68] sm:$0xff] %v4238_v29   ;;  %v1345_v33 = vadd.f32 %v5967_v61, %v1344_v31  ;;  %v5018_v34 = vpop.f32.mrb[57].mxu0  ;;  %4799 = vst [vmem:[%s6894_s3 + $0x230] sm:$0xff] %v4523_v30   ;;  %v1801_v36 = vadd.f32 %v5967_v61, %v1800_v32  ;;  %v5246_v37 = vpop.f32.mrb[57].mxu1 }
 0x175   :  { %v1347_v39 = vpop.f32.mrb[58].mxu0  ;;  %v1803_v40 = vpop.f32.mrb[58].mxu1 }
 0x176   :  { %v1348_v41 = vadd.f32 %v5967_v61, %v1347_v39  ;;  %v5019_v42 = vpop.f32.mrb[59].mxu0  ;;  %v2276_v43 = vmax.f32 %v1801_v36, 0.0  ;;  %v1804_v44 = vadd.f32 %v5967_v61, %v1803_v40  ;;  %v5247_v45 = vpop.f32.mrb[59].mxu1  ;;  %v2162_v46 = vmax.f32 %v1345_v33, 0.0  ;;  %v5513_v33 = vld [vmem:[%s6891_s0 + $0x160] sm:$0xff]   ;;  %v5514_v36 = vld [vmem:[%s6891_s0 + $0x328] sm:$0xff]  }
 0x178   :  { %v2163_v47 = vmax.f32 %v1348_v41, 0.0  ;;  %5125 = vmatmul.mubr.msk.bf16.gmra.mrb[164].mxu0 %vm851_vm3, %v5507_v35  ;;  %v2277_v48 = vmax.f32 %v1804_v44, 0.0  ;;  %5353 = vmatmul.mubr.msk.bf16.gmra.mrb[164].mxu1 %vm851_vm3, %v5508_v38 }
 0x179   :  { %5128 = vmatprep.mubr.msk.bf16.mxu0 %vm5593_vm1, %v5592_v0  ;;  %5356 = vmatprep.mubr.msk.bf16.mxu1 %vm5593_vm1, %v5592_v0 }
 0x17a   :  { %v4243_v49 = vpack.c.bf16 %v2163_v47, %v2162_v46  ;;  %v4528_v50 = vpack.c.bf16 %v2277_v48, %v2276_v43 }
 0x17b   :  { %v1352_v51 = vpop.f32.mrb[60].mxu0  ;;  %v1808_v52 = vpop.f32.mrb[60].mxu1 }
 0x17c   :  { %4743 = vst [vmem:[%s6894_s3 + $0x70] sm:$0xff] %v4243_v49   ;;  %v1353_v53 = vadd.f32 %v5967_v61, %v1352_v51  ;;  %v5022_v54 = vpop.f32.mrb[61].mxu0  ;;  %4800 = vst [vmem:[%s6894_s3 + $0x238] sm:$0xff] %v4528_v50   ;;  %v1809_v56 = vadd.f32 %v5967_v61, %v1808_v52  ;;  %v5250_v57 = vpop.f32.mrb[61].mxu1 }
 0x17d   :  { %v1355_v59 = vpop.f32.mrb[62].mxu0  ;;  %v1811_v60 = vpop.f32.mrb[62].mxu1 }
 0x17e   :  { %v1356_v62 = vadd.f32 %v5967_v61, %v1355_v59  ;;  %v5023_v63 = vpop.f32.mrb[63].mxu0  ;;  %v2278_v1 = vmax.f32 %v1809_v56, 0.0  ;;  %v1812_v2 = vadd.f32 %v5967_v61, %v1811_v60  ;;  %v5251_v3 = vpop.f32.mrb[63].mxu1  ;;  %v2164_v4 = vmax.f32 %v1353_v53, 0.0  ;;  %v5515_v53 = vld [vmem:[%s6891_s0 + $0x168] sm:$0xff]   ;;  %v5516_v56 = vld [vmem:[%s6891_s0 + $0x330] sm:$0xff]  }
 0x180   :  { %v2165_v5 = vmax.f32 %v1356_v62, 0.0  ;;  %5129 = vmatmul.mubr.msk.bf16.gmra.mrb[168].mxu0 %vm851_vm3, %v5509_v55  ;;  %v2279_v6 = vmax.f32 %v1812_v2, 0.0  ;;  %5357 = vmatmul.mubr.msk.bf16.gmra.mrb[168].mxu1 %vm851_vm3, %v5510_v58 }
 0x181   :  { %5132 = vmatprep.mubr.msk.bf16.mxu0 %vm5593_vm1, %v5592_v0  ;;  %5360 = vmatprep.mubr.msk.bf16.mxu1 %vm5593_vm1, %v5592_v0 }
 0x182   :  { %v4248_v7 = vpack.c.bf16 %v2165_v5, %v2164_v4  ;;  %v4533_v8 = vpack.c.bf16 %v2279_v6, %v2278_v1 }
 0x183   :  { %v1360_v9 = vpop.f32.mrb[64].mxu0  ;;  %v1816_v10 = vpop.f32.mrb[64].mxu1 }
 0x184   :  { %4744 = vst [vmem:[%s6894_s3 + $0x78] sm:$0xff] %v4248_v7   ;;  %v1361_v11 = vadd.f32 %v5967_v61, %v1360_v9  ;;  %v5026_v12 = vpop.f32.mrb[65].mxu0  ;;  %4801 = vst [vmem:[%s6894_s3 + $0x240] sm:$0xff] %v4533_v8   ;;  %v1817_v14 = vadd.f32 %v5967_v61, %v1816_v10  ;;  %v5254_v15 = vpop.f32.mrb[65].mxu1 }
 0x185   :  { %v1363_v17 = vpop.f32.mrb[66].mxu0  ;;  %v1819_v18 = vpop.f32.mrb[66].mxu1 }
 0x186   :  { %v1364_v19 = vadd.f32 %v5967_v61, %v1363_v17  ;;  %v5027_v20 = vpop.f32.mrb[67].mxu0  ;;  %v2280_v21 = vmax.f32 %v1817_v14, 0.0  ;;  %v1820_v22 = vadd.f32 %v5967_v61, %v1819_v18  ;;  %v5255_v23 = vpop.f32.mrb[67].mxu1  ;;  %v2166_v24 = vmax.f32 %v1361_v11, 0.0  ;;  %v5517_v11 = vld [vmem:[%s6891_s0 + $0x170] sm:$0xff]   ;;  %v5518_v14 = vld [vmem:[%s6891_s0 + $0x338] sm:$0xff]  }
 0x188   :  { %v2167_v25 = vmax.f32 %v1364_v19, 0.0  ;;  %5133 = vmatmul.mubr.msk.bf16.gmra.mrb[172].mxu0 %vm851_vm3, %v5511_v13  ;;  %v2281_v26 = vmax.f32 %v1820_v22, 0.0  ;;  %5361 = vmatmul.mubr.msk.bf16.gmra.mrb[172].mxu1 %vm851_vm3, %v5512_v16 }
 0x189   :  { %5136 = vmatprep.mubr.msk.bf16.mxu0 %vm5593_vm1, %v5592_v0  ;;  %5364 = vmatprep.mubr.msk.bf16.mxu1 %vm5593_vm1, %v5592_v0 }
 0x18a   :  { %v4253_v27 = vpack.c.bf16 %v2167_v25, %v2166_v24  ;;  %v4538_v28 = vpack.c.bf16 %v2281_v26, %v2280_v21 }
 0x18b   :  { %v1368_v29 = vpop.f32.mrb[68].mxu0  ;;  %v1824_v30 = vpop.f32.mrb[68].mxu1 }
 0x18c   :  { %4745 = vst [vmem:[%s6894_s3 + $0x80] sm:$0xff] %v4253_v27   ;;  %v1369_v31 = vadd.f32 %v5967_v61, %v1368_v29  ;;  %v5030_v32 = vpop.f32.mrb[69].mxu0  ;;  %4802 = vst [vmem:[%s6894_s3 + $0x248] sm:$0xff] %v4538_v28   ;;  %v1825_v34 = vadd.f32 %v5967_v61, %v1824_v30  ;;  %v5258_v35 = vpop.f32.mrb[69].mxu1 }
 0x18d   :  { %v1371_v37 = vpop.f32.mrb[70].mxu0  ;;  %v1827_v38 = vpop.f32.mrb[70].mxu1 }
 0x18e   :  { %v1372_v39 = vadd.f32 %v5967_v61, %v1371_v37  ;;  %v5031_v40 = vpop.f32.mrb[71].mxu0  ;;  %v2282_v41 = vmax.f32 %v1825_v34, 0.0  ;;  %v1828_v42 = vadd.f32 %v5967_v61, %v1827_v38  ;;  %v5259_v43 = vpop.f32.mrb[71].mxu1  ;;  %v2168_v44 = vmax.f32 %v1369_v31, 0.0  ;;  %v5519_v31 = vld [vmem:[%s6891_s0 + $0x178] sm:$0xff]   ;;  %v5520_v34 = vld [vmem:[%s6891_s0 + $0x340] sm:$0xff]  }
 0x190   :  { %v2169_v45 = vmax.f32 %v1372_v39, 0.0  ;;  %5137 = vmatmul.mubr.msk.bf16.gmra.mrb[176].mxu0 %vm851_vm3, %v5513_v33  ;;  %v2283_v46 = vmax.f32 %v1828_v42, 0.0  ;;  %5365 = vmatmul.mubr.msk.bf16.gmra.mrb[176].mxu1 %vm851_vm3, %v5514_v36 }
 0x191   :  { %5140 = vmatprep.mubr.msk.bf16.mxu0 %vm5593_vm1, %v5592_v0  ;;  %5368 = vmatprep.mubr.msk.bf16.mxu1 %vm5593_vm1, %v5592_v0 }
 0x192   :  { %v4258_v47 = vpack.c.bf16 %v2169_v45, %v2168_v44  ;;  %v4543_v48 = vpack.c.bf16 %v2283_v46, %v2282_v41 }
 0x193   :  { %v1376_v49 = vpop.f32.mrb[72].mxu0  ;;  %v1832_v50 = vpop.f32.mrb[72].mxu1 }
 0x194   :  { %4746 = vst [vmem:[%s6894_s3 + $0x88] sm:$0xff] %v4258_v47   ;;  %v1377_v51 = vadd.f32 %v5967_v61, %v1376_v49  ;;  %v5034_v52 = vpop.f32.mrb[73].mxu0  ;;  %4803 = vst [vmem:[%s6894_s3 + $0x250] sm:$0xff] %v4543_v48   ;;  %v1833_v54 = vadd.f32 %v5967_v61, %v1832_v50  ;;  %v5262_v55 = vpop.f32.mrb[73].mxu1 }
 0x195   :  { %v1379_v57 = vpop.f32.mrb[74].mxu0  ;;  %v1835_v58 = vpop.f32.mrb[74].mxu1 }
 0x196   :  { %v1380_v59 = vadd.f32 %v5967_v61, %v1379_v57  ;;  %v5035_v60 = vpop.f32.mrb[75].mxu0  ;;  %v2284_v62 = vmax.f32 %v1833_v54, 0.0  ;;  %v1836_v63 = vadd.f32 %v5967_v61, %v1835_v58  ;;  %v5263_v1 = vpop.f32.mrb[75].mxu1  ;;  %v2170_v2 = vmax.f32 %v1377_v51, 0.0  ;;  %v5521_v51 = vld [vmem:[%s6891_s0 + $0x180] sm:$0xff]   ;;  %v5522_v54 = vld [vmem:[%s6891_s0 + $0x348] sm:$0xff]  }
 0x198   :  { %v2171_v3 = vmax.f32 %v1380_v59, 0.0  ;;  %5141 = vmatmul.mubr.msk.bf16.gmra.mrb[180].mxu0 %vm851_vm3, %v5515_v53  ;;  %v2285_v4 = vmax.f32 %v1836_v63, 0.0  ;;  %5369 = vmatmul.mubr.msk.bf16.gmra.mrb[180].mxu1 %vm851_vm3, %v5516_v56 }
 0x199   :  { %5144 = vmatprep.mubr.msk.bf16.mxu0 %vm5593_vm1, %v5592_v0  ;;  %5372 = vmatprep.mubr.msk.bf16.mxu1 %vm5593_vm1, %v5592_v0 }
 0x19a   :  { %v4263_v5 = vpack.c.bf16 %v2171_v3, %v2170_v2  ;;  %v4548_v6 = vpack.c.bf16 %v2285_v4, %v2284_v62 }
 0x19b   :  { %v1384_v7 = vpop.f32.mrb[76].mxu0  ;;  %v1840_v8 = vpop.f32.mrb[76].mxu1 }
 0x19c   :  { %4747 = vst [vmem:[%s6894_s3 + $0x90] sm:$0xff] %v4263_v5   ;;  %v1385_v9 = vadd.f32 %v5967_v61, %v1384_v7  ;;  %v5038_v10 = vpop.f32.mrb[77].mxu0  ;;  %4804 = vst [vmem:[%s6894_s3 + $0x258] sm:$0xff] %v4548_v6   ;;  %v1841_v12 = vadd.f32 %v5967_v61, %v1840_v8  ;;  %v5266_v13 = vpop.f32.mrb[77].mxu1 }
 0x19d   :  { %v1387_v15 = vpop.f32.mrb[78].mxu0  ;;  %v1843_v16 = vpop.f32.mrb[78].mxu1 }
 0x19e   :  { %v1388_v17 = vadd.f32 %v5967_v61, %v1387_v15  ;;  %v5039_v18 = vpop.f32.mrb[79].mxu0  ;;  %v2286_v19 = vmax.f32 %v1841_v12, 0.0  ;;  %v1844_v20 = vadd.f32 %v5967_v61, %v1843_v16  ;;  %v5267_v21 = vpop.f32.mrb[79].mxu1  ;;  %v2172_v22 = vmax.f32 %v1385_v9, 0.0  ;;  %v6410_v61 = vld [vmem:[#allocation4] ss:$0 sm:$0xff] }
 0x19f   :  { %v5523_v9 = vld [vmem:[%s6891_s0 + $0x188] sm:$0xff]   ;;  %v5524_v12 = vld [vmem:[%s6891_s0 + $0x350] sm:$0xff]  }
 0x1a0   :  { %v2173_v23 = vmax.f32 %v1388_v17, 0.0  ;;  %5145 = vmatmul.mubr.msk.bf16.gmra.mrb[184].mxu0 %vm851_vm3, %v5517_v11  ;;  %v2287_v24 = vmax.f32 %v1844_v20, 0.0  ;;  %5373 = vmatmul.mubr.msk.bf16.gmra.mrb[184].mxu1 %vm851_vm3, %v5518_v14 }
 0x1a1   :  { %5148 = vmatprep.mubr.msk.bf16.mxu0 %vm5593_vm1, %v5592_v0  ;;  %5376 = vmatprep.mubr.msk.bf16.mxu1 %vm5593_vm1, %v5592_v0 }
 0x1a2   :  { %v4268_v25 = vpack.c.bf16 %v2173_v23, %v2172_v22  ;;  %v4553_v26 = vpack.c.bf16 %v2287_v24, %v2286_v19 }
 0x1a3   :  { %v1392_v27 = vpop.f32.mrb[80].mxu0  ;;  %v1848_v28 = vpop.f32.mrb[80].mxu1 }
 0x1a4   :  { %4748 = vst [vmem:[%s6894_s3 + $0x98] sm:$0xff] %v4268_v25   ;;  %v1393_v29 = vadd.f32 %v6410_v61, %v1392_v27  ;;  %v5042_v30 = vpop.f32.mrb[81].mxu0  ;;  %4805 = vst [vmem:[%s6894_s3 + $0x260] sm:$0xff] %v4553_v26   ;;  %v1849_v32 = vadd.f32 %v6410_v61, %v1848_v28  ;;  %v5270_v33 = vpop.f32.mrb[81].mxu1 }
 0x1a5   :  { %v1395_v35 = vpop.f32.mrb[82].mxu0  ;;  %v1851_v36 = vpop.f32.mrb[82].mxu1 }
 0x1a6   :  { %v1396_v37 = vadd.f32 %v6410_v61, %v1395_v35  ;;  %v5043_v38 = vpop.f32.mrb[83].mxu0  ;;  %v2288_v39 = vmax.f32 %v1849_v32, 0.0  ;;  %v1852_v40 = vadd.f32 %v6410_v61, %v1851_v36  ;;  %v5271_v41 = vpop.f32.mrb[83].mxu1  ;;  %v2174_v42 = vmax.f32 %v1393_v29, 0.0  ;;  %v5525_v29 = vld [vmem:[%s6891_s0 + $0x190] sm:$0xff]   ;;  %v5526_v32 = vld [vmem:[%s6891_s0 + $0x358] sm:$0xff]  }
 0x1a8   :  { %v2175_v43 = vmax.f32 %v1396_v37, 0.0  ;;  %5149 = vmatmul.mubr.msk.bf16.gmra.mrb[188].mxu0 %vm851_vm3, %v5519_v31  ;;  %v2289_v44 = vmax.f32 %v1852_v40, 0.0  ;;  %5377 = vmatmul.mubr.msk.bf16.gmra.mrb[188].mxu1 %vm851_vm3, %v5520_v34 }
 0x1a9   :  { %5152 = vmatprep.mubr.msk.bf16.mxu0 %vm5593_vm1, %v5592_v0  ;;  %5380 = vmatprep.mubr.msk.bf16.mxu1 %vm5593_vm1, %v5592_v0 }
 0x1aa   :  { %v4273_v45 = vpack.c.bf16 %v2175_v43, %v2174_v42  ;;  %v4558_v46 = vpack.c.bf16 %v2289_v44, %v2288_v39 }
 0x1ab   :  { %v1400_v47 = vpop.f32.mrb[84].mxu0  ;;  %v1856_v48 = vpop.f32.mrb[84].mxu1 }
 0x1ac   :  { %4749 = vst [vmem:[%s6894_s3 + $0xa0] sm:$0xff] %v4273_v45   ;;  %v1401_v49 = vadd.f32 %v6410_v61, %v1400_v47  ;;  %v5046_v50 = vpop.f32.mrb[85].mxu0  ;;  %4806 = vst [vmem:[%s6894_s3 + $0x268] sm:$0xff] %v4558_v46   ;;  %v1857_v52 = vadd.f32 %v6410_v61, %v1856_v48  ;;  %v5274_v53 = vpop.f32.mrb[85].mxu1 }
 0x1ad   :  { %v1403_v55 = vpop.f32.mrb[86].mxu0  ;;  %v1859_v56 = vpop.f32.mrb[86].mxu1 }
 0x1ae   :  { %v1404_v57 = vadd.f32 %v6410_v61, %v1403_v55  ;;  %v5047_v58 = vpop.f32.mrb[87].mxu0  ;;  %v2290_v59 = vmax.f32 %v1857_v52, 0.0  ;;  %v1860_v60 = vadd.f32 %v6410_v61, %v1859_v56  ;;  %v5275_v62 = vpop.f32.mrb[87].mxu1  ;;  %v2176_v63 = vmax.f32 %v1401_v49, 0.0  ;;  %v5527_v49 = vld [vmem:[%s6891_s0 + $0x198] sm:$0xff]   ;;  %v5528_v52 = vld [vmem:[%s6891_s0 + $0x360] sm:$0xff]  }
 0x1b0   :  { %v2177_v1 = vmax.f32 %v1404_v57, 0.0  ;;  %5153 = vmatmul.mubr.msk.bf16.gmra.mrb[192].mxu0 %vm851_vm3, %v5521_v51  ;;  %v2291_v2 = vmax.f32 %v1860_v60, 0.0  ;;  %5381 = vmatmul.mubr.msk.bf16.gmra.mrb[192].mxu1 %vm851_vm3, %v5522_v54 }
 0x1b1   :  { %5156 = vmatprep.mubr.msk.bf16.mxu0 %vm5593_vm1, %v5592_v0  ;;  %5384 = vmatprep.mubr.msk.bf16.mxu1 %vm5593_vm1, %v5592_v0 }
 0x1b2   :  { %v4278_v3 = vpack.c.bf16 %v2177_v1, %v2176_v63  ;;  %v4563_v4 = vpack.c.bf16 %v2291_v2, %v2290_v59 }
 0x1b3   :  { %v1408_v5 = vpop.f32.mrb[88].mxu0  ;;  %v1864_v6 = vpop.f32.mrb[88].mxu1 }
 0x1b4   :  { %4750 = vst [vmem:[%s6894_s3 + $0xa8] sm:$0xff] %v4278_v3   ;;  %v1409_v7 = vadd.f32 %v6410_v61, %v1408_v5  ;;  %v5050_v8 = vpop.f32.mrb[89].mxu0  ;;  %4807 = vst [vmem:[%s6894_s3 + $0x270] sm:$0xff] %v4563_v4   ;;  %v1865_v10 = vadd.f32 %v6410_v61, %v1864_v6  ;;  %v5278_v11 = vpop.f32.mrb[89].mxu1 }
 0x1b5   :  { %v1411_v13 = vpop.f32.mrb[90].mxu0  ;;  %v1867_v14 = vpop.f32.mrb[90].mxu1 }
 0x1b6   :  { %v1412_v15 = vadd.f32 %v6410_v61, %v1411_v13  ;;  %v5051_v16 = vpop.f32.mrb[91].mxu0  ;;  %v2292_v17 = vmax.f32 %v1865_v10, 0.0  ;;  %v1868_v18 = vadd.f32 %v6410_v61, %v1867_v14  ;;  %v5279_v19 = vpop.f32.mrb[91].mxu1  ;;  %v2178_v20 = vmax.f32 %v1409_v7, 0.0  ;;  %v5529_v7 = vld [vmem:[%s6891_s0 + $0x1a0] sm:$0xff]   ;;  %v5530_v10 = vld [vmem:[%s6891_s0 + $0x368] sm:$0xff]  }
 0x1b8   :  { %v2179_v21 = vmax.f32 %v1412_v15, 0.0  ;;  %5157 = vmatmul.mubr.msk.bf16.gmra.mrb[196].mxu0 %vm851_vm3, %v5523_v9  ;;  %v2293_v22 = vmax.f32 %v1868_v18, 0.0  ;;  %5385 = vmatmul.mubr.msk.bf16.gmra.mrb[196].mxu1 %vm851_vm3, %v5524_v12 }
 0x1b9   :  { %5160 = vmatprep.mubr.msk.bf16.mxu0 %vm5593_vm1, %v5592_v0  ;;  %5388 = vmatprep.mubr.msk.bf16.mxu1 %vm5593_vm1, %v5592_v0 }
 0x1ba   :  { %v4283_v23 = vpack.c.bf16 %v2179_v21, %v2178_v20  ;;  %v4568_v24 = vpack.c.bf16 %v2293_v22, %v2292_v17 }
 0x1bb   :  { %v1416_v25 = vpop.f32.mrb[92].mxu0  ;;  %v1872_v26 = vpop.f32.mrb[92].mxu1 }
 0x1bc   :  { %4751 = vst [vmem:[%s6894_s3 + $0xb0] sm:$0xff] %v4283_v23   ;;  %v1417_v27 = vadd.f32 %v6410_v61, %v1416_v25  ;;  %v5054_v28 = vpop.f32.mrb[93].mxu0  ;;  %4808 = vst [vmem:[%s6894_s3 + $0x278] sm:$0xff] %v4568_v24   ;;  %v1873_v30 = vadd.f32 %v6410_v61, %v1872_v26  ;;  %v5282_v31 = vpop.f32.mrb[93].mxu1 }
 0x1bd   :  { %v1419_v33 = vpop.f32.mrb[94].mxu0  ;;  %v1875_v34 = vpop.f32.mrb[94].mxu1 }
 0x1be   :  { %v1420_v35 = vadd.f32 %v6410_v61, %v1419_v33  ;;  %v5055_v36 = vpop.f32.mrb[95].mxu0  ;;  %v2294_v37 = vmax.f32 %v1873_v30, 0.0  ;;  %v1876_v38 = vadd.f32 %v6410_v61, %v1875_v34  ;;  %v5283_v39 = vpop.f32.mrb[95].mxu1  ;;  %v2180_v40 = vmax.f32 %v1417_v27, 0.0  ;;  %v5531_v27 = vld [vmem:[%s6891_s0 + $0x1a8] sm:$0xff]   ;;  %v5532_v30 = vld [vmem:[%s6891_s0 + $0x370] sm:$0xff]  }
 0x1c0   :  { %v2181_v41 = vmax.f32 %v1420_v35, 0.0  ;;  %5161 = vmatmul.mubr.msk.bf16.gmra.mrb[200].mxu0 %vm851_vm3, %v5525_v29  ;;  %v2295_v42 = vmax.f32 %v1876_v38, 0.0  ;;  %5389 = vmatmul.mubr.msk.bf16.gmra.mrb[200].mxu1 %vm851_vm3, %v5526_v32 }
 0x1c1   :  { %5164 = vmatprep.mubr.msk.bf16.mxu0 %vm5593_vm1, %v5592_v0  ;;  %5392 = vmatprep.mubr.msk.bf16.mxu1 %vm5593_vm1, %v5592_v0 }
 0x1c2   :  { %v4288_v43 = vpack.c.bf16 %v2181_v41, %v2180_v40  ;;  %v4573_v44 = vpack.c.bf16 %v2295_v42, %v2294_v37 }
 0x1c3   :  { %v1424_v45 = vpop.f32.mrb[96].mxu0  ;;  %v1880_v46 = vpop.f32.mrb[96].mxu1 }
 0x1c4   :  { %4752 = vst [vmem:[%s6894_s3 + $0xb8] sm:$0xff] %v4288_v43   ;;  %v1425_v47 = vadd.f32 %v6410_v61, %v1424_v45  ;;  %v5058_v48 = vpop.f32.mrb[97].mxu0  ;;  %4809 = vst [vmem:[%s6894_s3 + $0x280] sm:$0xff] %v4573_v44   ;;  %v1881_v50 = vadd.f32 %v6410_v61, %v1880_v46  ;;  %v5286_v51 = vpop.f32.mrb[97].mxu1 }
 0x1c5   :  { %v1427_v53 = vpop.f32.mrb[98].mxu0  ;;  %v1883_v54 = vpop.f32.mrb[98].mxu1 }
 0x1c6   :  { %v1428_v55 = vadd.f32 %v6410_v61, %v1427_v53  ;;  %v5059_v56 = vpop.f32.mrb[99].mxu0  ;;  %v2296_v57 = vmax.f32 %v1881_v50, 0.0  ;;  %v1884_v58 = vadd.f32 %v6410_v61, %v1883_v54  ;;  %v5287_v59 = vpop.f32.mrb[99].mxu1  ;;  %v2182_v60 = vmax.f32 %v1425_v47, 0.0  ;;  %v5533_v47 = vld [vmem:[%s6891_s0 + $0x1b0] sm:$0xff]   ;;  %v5534_v50 = vld [vmem:[%s6891_s0 + $0x378] sm:$0xff]  }
 0x1c8   :  { %v2183_v62 = vmax.f32 %v1428_v55, 0.0  ;;  %5165 = vmatmul.mubr.msk.bf16.gmra.mrb[204].mxu0 %vm851_vm3, %v5527_v49  ;;  %v2297_v63 = vmax.f32 %v1884_v58, 0.0  ;;  %5393 = vmatmul.mubr.msk.bf16.gmra.mrb[204].mxu1 %vm851_vm3, %v5528_v52 }
 0x1c9   :  { %5168 = vmatprep.mubr.msk.bf16.mxu0 %vm5593_vm1, %v5592_v0  ;;  %5396 = vmatprep.mubr.msk.bf16.mxu1 %vm5593_vm1, %v5592_v0 }
 0x1ca   :  { %v4293_v1 = vpack.c.bf16 %v2183_v62, %v2182_v60  ;;  %v4578_v2 = vpack.c.bf16 %v2297_v63, %v2296_v57 }
 0x1cb   :  { %v1432_v3 = vpop.f32.mrb[100].mxu0  ;;  %v1888_v4 = vpop.f32.mrb[100].mxu1 }
 0x1cc   :  { %4753 = vst [vmem:[%s6894_s3 + $0xc0] sm:$0xff] %v4293_v1   ;;  %v1433_v5 = vadd.f32 %v6410_v61, %v1432_v3  ;;  %v5062_v6 = vpop.f32.mrb[101].mxu0  ;;  %4810 = vst [vmem:[%s6894_s3 + $0x288] sm:$0xff] %v4578_v2   ;;  %v1889_v8 = vadd.f32 %v6410_v61, %v1888_v4  ;;  %v5290_v9 = vpop.f32.mrb[101].mxu1 }
 0x1cd   :  { %v1435_v11 = vpop.f32.mrb[102].mxu0  ;;  %v1891_v12 = vpop.f32.mrb[102].mxu1 }
 0x1ce   :  { %v1436_v13 = vadd.f32 %v6410_v61, %v1435_v11  ;;  %v5063_v14 = vpop.f32.mrb[103].mxu0  ;;  %v2298_v15 = vmax.f32 %v1889_v8, 0.0  ;;  %v1892_v16 = vadd.f32 %v6410_v61, %v1891_v12  ;;  %v5291_v17 = vpop.f32.mrb[103].mxu1  ;;  %v2184_v18 = vmax.f32 %v1433_v5, 0.0  ;;  %v5535_v5 = vld [vmem:[%s6891_s0 + $0x1b8] sm:$0xff]  }
 0x1cf   :  { %v5536_v8 = vld [vmem:[%s6891_s0 + $0x380] ss:$0 sps:$4 sm:$0xff]  }
 0x1d0   :  { %v2185_v19 = vmax.f32 %v1436_v13, 0.0  ;;  %5169 = vmatmul.mubr.msk.bf16.gmra.mrb[208].mxu0 %vm851_vm3, %v5529_v7  ;;  %v2299_v20 = vmax.f32 %v1892_v16, 0.0  ;;  %5397 = vmatmul.mubr.msk.bf16.gmra.mrb[208].mxu1 %vm851_vm3, %v5530_v10 }
 0x1d1   :  { %5172 = vmatprep.mubr.msk.bf16.mxu0 %vm5593_vm1, %v5592_v0  ;;  %5400 = vmatprep.mubr.msk.bf16.mxu1 %vm5593_vm1, %v5592_v0 }
 0x1d2   :  { %v4298_v21 = vpack.c.bf16 %v2185_v19, %v2184_v18  ;;  %v4583_v22 = vpack.c.bf16 %v2299_v20, %v2298_v15 }
 0x1d3   :  { %v1440_v23 = vpop.f32.mrb[104].mxu0  ;;  %v1896_v24 = vpop.f32.mrb[104].mxu1 }
 0x1d4   :  { %4754 = vst [vmem:[%s6894_s3 + $0xc8] sm:$0xff] %v4298_v21   ;;  %v1441_v25 = vadd.f32 %v6410_v61, %v1440_v23  ;;  %v5066_v26 = vpop.f32.mrb[105].mxu0  ;;  %4811 = vst [vmem:[%s6894_s3 + $0x290] sm:$0xff] %v4583_v22   ;;  %v1897_v28 = vadd.f32 %v6410_v61, %v1896_v24  ;;  %v5294_v29 = vpop.f32.mrb[105].mxu1 }
 0x1d5   :  { %v1443_v31 = vpop.f32.mrb[106].mxu0  ;;  %v1899_v32 = vpop.f32.mrb[106].mxu1 }
 0x1d6   :  { %v1444_v33 = vadd.f32 %v6410_v61, %v1443_v31  ;;  %v5067_v34 = vpop.f32.mrb[107].mxu0  ;;  %v2300_v35 = vmax.f32 %v1897_v28, 0.0  ;;  %v1900_v36 = vadd.f32 %v6410_v61, %v1899_v32  ;;  %v5295_v37 = vpop.f32.mrb[107].mxu1  ;;  %v2186_v38 = vmax.f32 %v1441_v25, 0.0  ;;  %v5537_v25 = vld [vmem:[%s6891_s0 + $0x1c0] sm:$0xff]  }
 0x1d8   :  { %v2187_v39 = vmax.f32 %v1444_v33, 0.0  ;;  %5173 = vmatmul.mubr.msk.bf16.gmra.mrb[212].mxu0 %vm851_vm3, %v5531_v27  ;;  %v2301_v40 = vmax.f32 %v1900_v36, 0.0  ;;  %5401 = vmatmul.mubr.msk.bf16.gmra.mrb[212].mxu1 %vm851_vm3, %v5532_v30 }
 0x1d9   :  { %5176 = vmatprep.mubr.msk.bf16.mxu0 %vm5593_vm1, %v5592_v0  ;;  %5404 = vmatprep.mubr.msk.bf16.mxu1 %vm5593_vm1, %v5592_v0 }
 0x1da   :  { %v4303_v41 = vpack.c.bf16 %v2187_v39, %v2186_v38  ;;  %v4588_v42 = vpack.c.bf16 %v2301_v40, %v2300_v35 }
 0x1db   :  { %v1448_v43 = vpop.f32.mrb[108].mxu0  ;;  %v1904_v44 = vpop.f32.mrb[108].mxu1 }
 0x1dc   :  { %4755 = vst [vmem:[%s6894_s3 + $0xd0] sm:$0xff] %v4303_v41   ;;  %v1449_v45 = vadd.f32 %v6410_v61, %v1448_v43  ;;  %v5070_v46 = vpop.f32.mrb[109].mxu0  ;;  %4812 = vst [vmem:[%s6894_s3 + $0x298] sm:$0xff] %v4588_v42   ;;  %v1905_v48 = vadd.f32 %v6410_v61, %v1904_v44  ;;  %v5298_v49 = vpop.f32.mrb[109].mxu1 }
 0x1dd   :  { %v1451_v51 = vpop.f32.mrb[110].mxu0  ;;  %v1907_v52 = vpop.f32.mrb[110].mxu1 }
 0x1de   :  { %v1452_v53 = vadd.f32 %v6410_v61, %v1451_v51  ;;  %v5071_v54 = vpop.f32.mrb[111].mxu0  ;;  %v2302_v55 = vmax.f32 %v1905_v48, 0.0  ;;  %v1908_v56 = vadd.f32 %v6410_v61, %v1907_v52  ;;  %v5299_v57 = vpop.f32.mrb[111].mxu1  ;;  %v2188_v58 = vmax.f32 %v1449_v45, 0.0 }
 0x1e0   :  { %v2189_v59 = vmax.f32 %v1452_v53, 0.0  ;;  %5177 = vmatmul.mubr.msk.bf16.gmra.mrb[216].mxu0 %vm851_vm3, %v5533_v47  ;;  %v2303_v60 = vmax.f32 %v1908_v56, 0.0  ;;  %5405 = vmatmul.mubr.msk.bf16.gmra.mrb[216].mxu1 %vm851_vm3, %v5534_v50 }
 0x1e1   :  { %5180 = vmatprep.mubr.msk.bf16.mxu0 %vm5593_vm1, %v5592_v0  ;;  %5408 = vmatprep.mubr.msk.bf16.mxu1 %vm5593_vm1, %v5592_v0 }
 0x1e2   :  { %v4308_v62 = vpack.c.bf16 %v2189_v59, %v2188_v58  ;;  %v4593_v63 = vpack.c.bf16 %v2303_v60, %v2302_v55 }
 0x1e3   :  { %v1456_v1 = vpop.f32.mrb[112].mxu0  ;;  %v1912_v2 = vpop.f32.mrb[112].mxu1 }
 0x1e4   :  { %4756 = vst [vmem:[%s6894_s3 + $0xd8] sm:$0xff] %v4308_v62   ;;  %v1457_v3 = vadd.f32 %v6410_v61, %v1456_v1  ;;  %v5074_v4 = vpop.f32.mrb[113].mxu0  ;;  %4813 = vst [vmem:[%s6894_s3 + $0x2a0] sm:$0xff] %v4593_v63   ;;  %v1913_v6 = vadd.f32 %v6410_v61, %v1912_v2  ;;  %v5302_v7 = vpop.f32.mrb[113].mxu1 }
 0x1e5   :  { %v1459_v9 = vpop.f32.mrb[114].mxu0  ;;  %v1915_v10 = vpop.f32.mrb[114].mxu1 }
 0x1e6   :  { %v1460_v11 = vadd.f32 %v6410_v61, %v1459_v9  ;;  %v5075_v12 = vpop.f32.mrb[115].mxu0  ;;  %v2304_v13 = vmax.f32 %v1913_v6, 0.0  ;;  %v1916_v14 = vadd.f32 %v6410_v61, %v1915_v10  ;;  %v5303_v15 = vpop.f32.mrb[115].mxu1  ;;  %v2190_v16 = vmax.f32 %v1457_v3, 0.0 }
 0x1e8   :  { %v2191_v17 = vmax.f32 %v1460_v11, 0.0  ;;  %5181 = vmatmul.mubr.msk.bf16.gmra.mrb[220].mxu0 %vm851_vm3, %v5535_v5  ;;  %v2305_v18 = vmax.f32 %v1916_v14, 0.0  ;;  %5409 = vmatmul.mubr.msk.bf16.gmra.mrb[220].mxu1 %vm851_vm3, %v5536_v8 }
 0x1e9   :  { %5184 = vmatprep.mubr.msk.bf16.mxu0 %vm5593_vm1, %v5592_v0 }
 0x1ea   :  { %v4313_v19 = vpack.c.bf16 %v2191_v17, %v2190_v16  ;;  %v4598_v20 = vpack.c.bf16 %v2305_v18, %v2304_v13 }
 0x1eb   :  { %v1464_v21 = vpop.f32.mrb[116].mxu0  ;;  %v1920_v22 = vpop.f32.mrb[116].mxu1 }
 0x1ec   :  { %4757 = vst [vmem:[%s6894_s3 + $0xe0] sm:$0xff] %v4313_v19   ;;  %v1465_v23 = vadd.f32 %v6410_v61, %v1464_v21  ;;  %v5078_v24 = vpop.f32.mrb[117].mxu0  ;;  %4814 = vst [vmem:[%s6894_s3 + $0x2a8] sm:$0xff] %v4598_v20   ;;  %v1921_v0 = vadd.f32 %v6410_v61, %v1920_v22  ;;  %v5306_v26 = vpop.f32.mrb[117].mxu1 }
 0x1ed   :  { %v1467_v27 = vpop.f32.mrb[118].mxu0  ;;  %v1923_v28 = vpop.f32.mrb[118].mxu1 }
 0x1ee   :  { %v1468_v29 = vadd.f32 %v6410_v61, %v1467_v27  ;;  %v5079_v30 = vpop.f32.mrb[119].mxu0  ;;  %v2306_v31 = vmax.f32 %v1921_v0, 0.0  ;;  %v1924_v32 = vadd.f32 %v6410_v61, %v1923_v28  ;;  %v5307_v33 = vpop.f32.mrb[119].mxu1  ;;  %v2192_v34 = vmax.f32 %v1465_v23, 0.0 }
 0x1f0   :  { %v2193_v35 = vmax.f32 %v1468_v29, 0.0  ;;  %5185 = vmatmul.mubr.msk.bf16.gmra.mrb[224].mxu0 %vm851_vm3, %v5537_v25  ;;  %v2307_v36 = vmax.f32 %v1924_v32, 0.0 }
 0x1f2   :  { %v4318_v37 = vpack.c.bf16 %v2193_v35, %v2192_v34  ;;  %v4603_v38 = vpack.c.bf16 %v2307_v36, %v2306_v31 }
 0x1f3   :  { %v1472_v39 = vpop.f32.mrb[120].mxu0  ;;  %v1928_v40 = vpop.f32.mrb[120].mxu1 }
 0x1f4   :  { %4758 = vst [vmem:[%s6894_s3 + $0xe8] sm:$0xff] %v4318_v37   ;;  %v1473_v41 = vadd.f32 %v6410_v61, %v1472_v39  ;;  %v5082_v42 = vpop.f32.mrb[121].mxu0  ;;  %4815 = vst [vmem:[%s6894_s3 + $0x2b0] sm:$0xff] %v4603_v38   ;;  %v1929_v43 = vadd.f32 %v6410_v61, %v1928_v40  ;;  %v5310_v44 = vpop.f32.mrb[121].mxu1 }
 0x1f5   :  { %v1475_v45 = vpop.f32.mrb[122].mxu0  ;;  %v1931_v46 = vpop.f32.mrb[122].mxu1 }
 0x1f6   :  { %v1476_v47 = vadd.f32 %v6410_v61, %v1475_v45  ;;  %v5083_v48 = vpop.f32.mrb[123].mxu0  ;;  %v2308_v49 = vmax.f32 %v1929_v43, 0.0  ;;  %v1932_v50 = vadd.f32 %v6410_v61, %v1931_v46  ;;  %v5311_v51 = vpop.f32.mrb[123].mxu1  ;;  %v2194_v52 = vmax.f32 %v1473_v41, 0.0 }
 0x1f8   :  { %v2195_v53 = vmax.f32 %v1476_v47, 0.0  ;;  %v2309_v54 = vmax.f32 %v1932_v50, 0.0 }
 0x1fa   :  { %v4323_v55 = vpack.c.bf16 %v2195_v53, %v2194_v52  ;;  %v4608_v56 = vpack.c.bf16 %v2309_v54, %v2308_v49 }
 0x1fb   :  { %v1480_v57 = vpop.f32.mrb[124].mxu0  ;;  %v1936_v58 = vpop.f32.mrb[124].mxu1 }
 0x1fc   :  { %4759 = vst [vmem:[%s6894_s3 + $0xf0] sm:$0xff] %v4323_v55   ;;  %v1481_v59 = vadd.f32 %v6410_v61, %v1480_v57  ;;  %v5086_v60 = vpop.f32.mrb[125].mxu0  ;;  %4816 = vst [vmem:[%s6894_s3 + $0x2b8] sm:$0xff] %v4608_v56   ;;  %v1937_v62 = vadd.f32 %v6410_v61, %v1936_v58  ;;  %v5314_v63 = vpop.f32.mrb[125].mxu1 }
 0x1fd   :  { %v1483_v1 = vpop.f32.mrb[126].mxu0  ;;  %v1939_v2 = vpop.f32.mrb[126].mxu1 }
 0x1fe   :  { %v1484_v3 = vadd.f32 %v6410_v61, %v1483_v1  ;;  %v5087_v4 = vpop.f32.mrb[127].mxu0  ;;  %v2310_v5 = vmax.f32 %v1937_v62, 0.0  ;;  %v1940_v6 = vadd.f32 %v6410_v61, %v1939_v2  ;;  %v5315_v7 = vpop.f32.mrb[127].mxu1  ;;  %v2196_v8 = vmax.f32 %v1481_v59, 0.0 }
 0x200   :  { %v2197_v9 = vmax.f32 %v1484_v3, 0.0  ;;  %v2311_v10 = vmax.f32 %v1940_v6, 0.0 }
 0x202   :  { %v4328_v11 = vpack.c.bf16 %v2197_v9, %v2196_v8  ;;  %v4613_v12 = vpack.c.bf16 %v2311_v10, %v2310_v5 }
 0x203   :  { %v1488_v13 = vpop.f32.mrb[128].mxu0  ;;  %v1944_v14 = vpop.f32.mrb[128].mxu1 }
 0x204   :  { %4760 = vst [vmem:[%s6894_s3 + $0xf8] sm:$0xff] %v4328_v11   ;;  %v1489_v15 = vadd.f32 %v6410_v61, %v1488_v13  ;;  %v5090_v16 = vpop.f32.mrb[129].mxu0  ;;  %4817 = vst [vmem:[%s6894_s3 + $0x2c0] sm:$0xff] %v4613_v12   ;;  %v1945_v17 = vadd.f32 %v6410_v61, %v1944_v14  ;;  %v5318_v18 = vpop.f32.mrb[129].mxu1 }
 0x205   :  { %v1491_v19 = vpop.f32.mrb[130].mxu0  ;;  %v1947_v20 = vpop.f32.mrb[130].mxu1 }
 0x206   :  { %v1492_v21 = vadd.f32 %v6410_v61, %v1491_v19  ;;  %v5091_v22 = vpop.f32.mrb[131].mxu0  ;;  %v2312_v23 = vmax.f32 %v1945_v17, 0.0  ;;  %v1948_v24 = vadd.f32 %v6410_v61, %v1947_v20  ;;  %v5319_v25 = vpop.f32.mrb[131].mxu1  ;;  %v2198_v0 = vmax.f32 %v1489_v15, 0.0 }
 0x208   :  { %v2199_v26 = vmax.f32 %v1492_v21, 0.0  ;;  %v2313_v27 = vmax.f32 %v1948_v24, 0.0 }
 0x20a   :  { %v4333_v28 = vpack.c.bf16 %v2199_v26, %v2198_v0  ;;  %v4618_v29 = vpack.c.bf16 %v2313_v27, %v2312_v23 }
 0x20b   :  { %v1496_v30 = vpop.f32.mrb[132].mxu0  ;;  %v1952_v31 = vpop.f32.mrb[132].mxu1 }
 0x20c   :  { %4761 = vst [vmem:[%s6894_s3 + $0x100] sm:$0xff] %v4333_v28   ;;  %v1497_v32 = vadd.f32 %v6410_v61, %v1496_v30  ;;  %v5094_v33 = vpop.f32.mrb[133].mxu0  ;;  %4818 = vst [vmem:[%s6894_s3 + $0x2c8] sm:$0xff] %v4618_v29   ;;  %v1953_v34 = vadd.f32 %v6410_v61, %v1952_v31  ;;  %v5322_v35 = vpop.f32.mrb[133].mxu1 }
 0x20d   :  { %v1499_v36 = vpop.f32.mrb[134].mxu0  ;;  %v1955_v37 = vpop.f32.mrb[134].mxu1 }
 0x20e   :  { %v1500_v38 = vadd.f32 %v6410_v61, %v1499_v36  ;;  %v5095_v39 = vpop.f32.mrb[135].mxu0  ;;  %v2314_v40 = vmax.f32 %v1953_v34, 0.0  ;;  %v1956_v41 = vadd.f32 %v6410_v61, %v1955_v37  ;;  %v5323_v42 = vpop.f32.mrb[135].mxu1  ;;  %v2200_v43 = vmax.f32 %v1497_v32, 0.0 }
 0x210   :  { %v2201_v44 = vmax.f32 %v1500_v38, 0.0  ;;  %v2315_v45 = vmax.f32 %v1956_v41, 0.0 }
 0x212   :  { %v4338_v46 = vpack.c.bf16 %v2201_v44, %v2200_v43  ;;  %v4623_v47 = vpack.c.bf16 %v2315_v45, %v2314_v40 }
 0x213   :  { %v1504_v48 = vpop.f32.mrb[136].mxu0  ;;  %v1960_v49 = vpop.f32.mrb[136].mxu1 }
 0x214   :  { %4762 = vst [vmem:[%s6894_s3 + $0x108] sm:$0xff] %v4338_v46   ;;  %v1505_v50 = vadd.f32 %v6410_v61, %v1504_v48  ;;  %v5098_v51 = vpop.f32.mrb[137].mxu0  ;;  %4819 = vst [vmem:[%s6894_s3 + $0x2d0] sm:$0xff] %v4623_v47   ;;  %v1961_v52 = vadd.f32 %v6410_v61, %v1960_v49  ;;  %v5326_v53 = vpop.f32.mrb[137].mxu1 }
 0x215   :  { %v1507_v54 = vpop.f32.mrb[138].mxu0  ;;  %v1963_v55 = vpop.f32.mrb[138].mxu1 }
 0x216   :  { %v1508_v56 = vadd.f32 %v6410_v61, %v1507_v54  ;;  %v5099_v57 = vpop.f32.mrb[139].mxu0  ;;  %v2316_v58 = vmax.f32 %v1961_v52, 0.0  ;;  %v1964_v59 = vadd.f32 %v6410_v61, %v1963_v55  ;;  %v5327_v60 = vpop.f32.mrb[139].mxu1  ;;  %v2202_v62 = vmax.f32 %v1505_v50, 0.0 }
 0x218   :  { %v2203_v63 = vmax.f32 %v1508_v56, 0.0  ;;  %v2317_v1 = vmax.f32 %v1964_v59, 0.0 }
 0x21a   :  { %v4343_v2 = vpack.c.bf16 %v2203_v63, %v2202_v62  ;;  %v4628_v3 = vpack.c.bf16 %v2317_v1, %v2316_v58 }
 0x21b   :  { %v1512_v4 = vpop.f32.mrb[140].mxu0  ;;  %v1968_v5 = vpop.f32.mrb[140].mxu1 }
 0x21c   :  { %4763 = vst [vmem:[%s6894_s3 + $0x110] sm:$0xff] %v4343_v2   ;;  %v1513_v6 = vadd.f32 %v6410_v61, %v1512_v4  ;;  %v5102_v7 = vpop.f32.mrb[141].mxu0  ;;  %4820 = vst [vmem:[%s6894_s3 + $0x2d8] sm:$0xff] %v4628_v3   ;;  %v1969_v8 = vadd.f32 %v6410_v61, %v1968_v5  ;;  %v5330_v9 = vpop.f32.mrb[141].mxu1 }
 0x21d   :  { %v1515_v10 = vpop.f32.mrb[142].mxu0  ;;  %v1971_v11 = vpop.f32.mrb[142].mxu1 }
 0x21e   :  { %v1516_v12 = vadd.f32 %v6410_v61, %v1515_v10  ;;  %v5103_v13 = vpop.f32.mrb[143].mxu0  ;;  %v2318_v14 = vmax.f32 %v1969_v8, 0.0  ;;  %v1972_v15 = vadd.f32 %v6410_v61, %v1971_v11  ;;  %v5331_v16 = vpop.f32.mrb[143].mxu1  ;;  %v2204_v17 = vmax.f32 %v1513_v6, 0.0 }
 0x220   :  { %v2205_v18 = vmax.f32 %v1516_v12, 0.0  ;;  %v2319_v19 = vmax.f32 %v1972_v15, 0.0 }
 0x222   :  { %v4348_v20 = vpack.c.bf16 %v2205_v18, %v2204_v17  ;;  %v4633_v21 = vpack.c.bf16 %v2319_v19, %v2318_v14 }
 0x223   :  { %v1520_v22 = vpop.f32.mrb[144].mxu0  ;;  %v1976_v23 = vpop.f32.mrb[144].mxu1 }
 0x224   :  { %4764 = vst [vmem:[%s6894_s3 + $0x118] sm:$0xff] %v4348_v20   ;;  %v1521_v24 = vadd.f32 %v6410_v61, %v1520_v22  ;;  %v5106_v25 = vpop.f32.mrb[145].mxu0  ;;  %4821 = vst [vmem:[%s6894_s3 + $0x2e0] sm:$0xff] %v4633_v21   ;;  %v1977_v0 = vadd.f32 %v6410_v61, %v1976_v23  ;;  %v5334_v26 = vpop.f32.mrb[145].mxu1 }
 0x225   :  { %v1523_v27 = vpop.f32.mrb[146].mxu0  ;;  %v1979_v28 = vpop.f32.mrb[146].mxu1 }
 0x226   :  { %v1524_v29 = vadd.f32 %v6410_v61, %v1523_v27  ;;  %v5107_v30 = vpop.f32.mrb[147].mxu0  ;;  %v2320_v31 = vmax.f32 %v1977_v0, 0.0  ;;  %v1980_v32 = vadd.f32 %v6410_v61, %v1979_v28  ;;  %v5335_v33 = vpop.f32.mrb[147].mxu1  ;;  %v2206_v34 = vmax.f32 %v1521_v24, 0.0 }
 0x228   :  { %v2207_v35 = vmax.f32 %v1524_v29, 0.0  ;;  %v2321_v36 = vmax.f32 %v1980_v32, 0.0 }
 0x22a   :  { %v4353_v37 = vpack.c.bf16 %v2207_v35, %v2206_v34  ;;  %v4638_v38 = vpack.c.bf16 %v2321_v36, %v2320_v31 }
 0x22b   :  { %v1528_v39 = vpop.f32.mrb[148].mxu0  ;;  %v1984_v40 = vpop.f32.mrb[148].mxu1 }
 0x22c   :  { %4765 = vst [vmem:[%s6894_s3 + $0x120] sm:$0xff] %v4353_v37   ;;  %v1529_v41 = vadd.f32 %v6410_v61, %v1528_v39  ;;  %v5110_v42 = vpop.f32.mrb[149].mxu0  ;;  %4822 = vst [vmem:[%s6894_s3 + $0x2e8] sm:$0xff] %v4638_v38   ;;  %v1985_v43 = vadd.f32 %v6410_v61, %v1984_v40  ;;  %v5338_v44 = vpop.f32.mrb[149].mxu1 }
 0x22d   :  { %v1531_v45 = vpop.f32.mrb[150].mxu0  ;;  %v1987_v46 = vpop.f32.mrb[150].mxu1 }
 0x22e   :  { %v1532_v47 = vadd.f32 %v6410_v61, %v1531_v45  ;;  %v5111_v48 = vpop.f32.mrb[151].mxu0  ;;  %v2322_v49 = vmax.f32 %v1985_v43, 0.0  ;;  %v1988_v50 = vadd.f32 %v6410_v61, %v1987_v46  ;;  %v5339_v51 = vpop.f32.mrb[151].mxu1  ;;  %v2208_v52 = vmax.f32 %v1529_v41, 0.0 }
 0x230   :  { %v2209_v53 = vmax.f32 %v1532_v47, 0.0  ;;  %v2323_v54 = vmax.f32 %v1988_v50, 0.0 }
 0x232   :  { %v4358_v55 = vpack.c.bf16 %v2209_v53, %v2208_v52  ;;  %v4643_v56 = vpack.c.bf16 %v2323_v54, %v2322_v49 }
 0x233   :  { %v1536_v57 = vpop.f32.mrb[152].mxu0  ;;  %v1992_v58 = vpop.f32.mrb[152].mxu1 }
 0x234   :  { %4766 = vst [vmem:[%s6894_s3 + $0x128] sm:$0xff] %v4358_v55   ;;  %v1537_v59 = vadd.f32 %v6410_v61, %v1536_v57  ;;  %v5114_v60 = vpop.f32.mrb[153].mxu0  ;;  %4823 = vst [vmem:[%s6894_s3 + $0x2f0] sm:$0xff] %v4643_v56   ;;  %v1993_v62 = vadd.f32 %v6410_v61, %v1992_v58  ;;  %v5342_v63 = vpop.f32.mrb[153].mxu1 }
 0x235   :  { %v1539_v1 = vpop.f32.mrb[154].mxu0  ;;  %v1995_v2 = vpop.f32.mrb[154].mxu1 }
 0x236   :  { %v1540_v3 = vadd.f32 %v6410_v61, %v1539_v1  ;;  %v5115_v4 = vpop.f32.mrb[155].mxu0  ;;  %v2324_v5 = vmax.f32 %v1993_v62, 0.0  ;;  %v1996_v6 = vadd.f32 %v6410_v61, %v1995_v2  ;;  %v5343_v7 = vpop.f32.mrb[155].mxu1  ;;  %v2210_v8 = vmax.f32 %v1537_v59, 0.0 }
 0x238   :  { %v2211_v9 = vmax.f32 %v1540_v3, 0.0  ;;  %v2325_v10 = vmax.f32 %v1996_v6, 0.0 }
 0x23a   :  { %v4363_v11 = vpack.c.bf16 %v2211_v9, %v2210_v8  ;;  %v4648_v12 = vpack.c.bf16 %v2325_v10, %v2324_v5 }
 0x23b   :  { %v1544_v13 = vpop.f32.mrb[156].mxu0  ;;  %v2000_v14 = vpop.f32.mrb[156].mxu1 }
 0x23c   :  { %4767 = vst [vmem:[%s6894_s3 + $0x130] sm:$0xff] %v4363_v11   ;;  %v1545_v15 = vadd.f32 %v6410_v61, %v1544_v13  ;;  %v5118_v16 = vpop.f32.mrb[157].mxu0  ;;  %4824 = vst [vmem:[%s6894_s3 + $0x2f8] sm:$0xff] %v4648_v12   ;;  %v2001_v17 = vadd.f32 %v6410_v61, %v2000_v14  ;;  %v5346_v18 = vpop.f32.mrb[157].mxu1 }
 0x23d   :  { %v1547_v19 = vpop.f32.mrb[158].mxu0  ;;  %v2003_v20 = vpop.f32.mrb[158].mxu1 }
 0x23e   :  { %v1548_v21 = vadd.f32 %v6410_v61, %v1547_v19  ;;  %v5119_v22 = vpop.f32.mrb[159].mxu0  ;;  %v2326_v23 = vmax.f32 %v2001_v17, 0.0  ;;  %v2004_v24 = vadd.f32 %v6410_v61, %v2003_v20  ;;  %v5347_v25 = vpop.f32.mrb[159].mxu1  ;;  %v2212_v0 = vmax.f32 %v1545_v15, 0.0 }
 0x240   :  { %v2213_v26 = vmax.f32 %v1548_v21, 0.0  ;;  %v2327_v27 = vmax.f32 %v2004_v24, 0.0  ;;  %v6752_v24 = vld [vmem:[#allocation4] ss:$0 sm:$0xff] }
 0x242   :  { %v4368_v28 = vpack.c.bf16 %v2213_v26, %v2212_v0  ;;  %v4653_v29 = vpack.c.bf16 %v2327_v27, %v2326_v23 }
 0x243   :  { %v1552_v30 = vpop.f32.mrb[160].mxu0  ;;  %v2008_v31 = vpop.f32.mrb[160].mxu1 }
 0x244   :  { %4768 = vst [vmem:[%s6894_s3 + $0x138] sm:$0xff] %v4368_v28   ;;  %v1553_v32 = vadd.f32 %v6410_v61, %v1552_v30  ;;  %v5122_v33 = vpop.f32.mrb[161].mxu0  ;;  %4825 = vst [vmem:[%s6894_s3 + $0x300] sm:$0xff] %v4653_v29   ;;  %v2009_v34 = vadd.f32 %v6410_v61, %v2008_v31  ;;  %v5350_v35 = vpop.f32.mrb[161].mxu1 }
 0x245   :  { %v1555_v36 = vpop.f32.mrb[162].mxu0  ;;  %v2011_v37 = vpop.f32.mrb[162].mxu1 }
 0x246   :  { %v1556_v38 = vadd.f32 %v6410_v61, %v1555_v36  ;;  %v5123_v39 = vpop.f32.mrb[163].mxu0  ;;  %v2328_v40 = vmax.f32 %v2009_v34, 0.0  ;;  %v2012_v41 = vadd.f32 %v6410_v61, %v2011_v37  ;;  %v5351_v42 = vpop.f32.mrb[163].mxu1  ;;  %v2214_v43 = vmax.f32 %v1553_v32, 0.0 }
 0x248   :  { %v2215_v44 = vmax.f32 %v1556_v38, 0.0  ;;  %v2329_v45 = vmax.f32 %v2012_v41, 0.0 }
 0x24a   :  { %v4373_v46 = vpack.c.bf16 %v2215_v44, %v2214_v43  ;;  %v4658_v47 = vpack.c.bf16 %v2329_v45, %v2328_v40 }
 0x24b   :  { %v1560_v48 = vpop.f32.mrb[164].mxu0  ;;  %v2016_v49 = vpop.f32.mrb[164].mxu1 }
 0x24c   :  { %4769 = vst [vmem:[%s6894_s3 + $0x140] sm:$0xff] %v4373_v46   ;;  %v1561_v50 = vadd.f32 %v6410_v61, %v1560_v48  ;;  %v5126_v51 = vpop.f32.mrb[165].mxu0  ;;  %4826 = vst [vmem:[%s6894_s3 + $0x308] sm:$0xff] %v4658_v47   ;;  %v2017_v52 = vadd.f32 %v6410_v61, %v2016_v49  ;;  %v5354_v53 = vpop.f32.mrb[165].mxu1 }
 0x24d   :  { %v1563_v54 = vpop.f32.mrb[166].mxu0  ;;  %v2019_v55 = vpop.f32.mrb[166].mxu1 }
 0x24e   :  { %v1564_v56 = vadd.f32 %v6410_v61, %v1563_v54  ;;  %v5127_v57 = vpop.f32.mrb[167].mxu0  ;;  %v2330_v58 = vmax.f32 %v2017_v52, 0.0  ;;  %v2020_v59 = vadd.f32 %v6410_v61, %v2019_v55  ;;  %v5355_v60 = vpop.f32.mrb[167].mxu1  ;;  %v2216_v62 = vmax.f32 %v1561_v50, 0.0 }
 0x250   :  { %v2217_v63 = vmax.f32 %v1564_v56, 0.0  ;;  %v2331_v1 = vmax.f32 %v2020_v59, 0.0 }
 0x252   :  { %v4378_v2 = vpack.c.bf16 %v2217_v63, %v2216_v62  ;;  %v4663_v3 = vpack.c.bf16 %v2331_v1, %v2330_v58 }
 0x253   :  { %v1568_v4 = vpop.f32.mrb[168].mxu0  ;;  %v2024_v5 = vpop.f32.mrb[168].mxu1 }
 0x254   :  { %4770 = vst [vmem:[%s6894_s3 + $0x148] sm:$0xff] %v4378_v2   ;;  %v1569_v6 = vadd.f32 %v6410_v61, %v1568_v4  ;;  %v5130_v7 = vpop.f32.mrb[169].mxu0  ;;  %4827 = vst [vmem:[%s6894_s3 + $0x310] sm:$0xff] %v4663_v3   ;;  %v2025_v8 = vadd.f32 %v6410_v61, %v2024_v5  ;;  %v5358_v9 = vpop.f32.mrb[169].mxu1 }
 0x255   :  { %v1571_v10 = vpop.f32.mrb[170].mxu0  ;;  %v2027_v11 = vpop.f32.mrb[170].mxu1 }
 0x256   :  { %v1572_v12 = vadd.f32 %v6410_v61, %v1571_v10  ;;  %v5131_v13 = vpop.f32.mrb[171].mxu0  ;;  %v2332_v14 = vmax.f32 %v2025_v8, 0.0  ;;  %v2028_v15 = vadd.f32 %v6410_v61, %v2027_v11  ;;  %v5359_v16 = vpop.f32.mrb[171].mxu1  ;;  %v2218_v17 = vmax.f32 %v1569_v6, 0.0 }
 0x258   :  { %v2219_v18 = vmax.f32 %v1572_v12, 0.0  ;;  %v2333_v19 = vmax.f32 %v2028_v15, 0.0 }
 0x25a   :  { %v4383_v20 = vpack.c.bf16 %v2219_v18, %v2218_v17  ;;  %v4668_v21 = vpack.c.bf16 %v2333_v19, %v2332_v14 }
 0x25b   :  { %v1576_v22 = vpop.f32.mrb[172].mxu0  ;;  %v2032_v23 = vpop.f32.mrb[172].mxu1 }
 0x25c   :  { %4771 = vst [vmem:[%s6894_s3 + $0x150] sm:$0xff] %v4383_v20   ;;  %v1577_v25 = vadd.f32 %v6752_v24, %v1576_v22  ;;  %v5134_v0 = vpop.f32.mrb[173].mxu0  ;;  %4828 = vst [vmem:[%s6894_s3 + $0x318] sm:$0xff] %v4668_v21   ;;  %v2033_v61 = vadd.f32 %v6752_v24, %v2032_v23  ;;  %v5362_v26 = vpop.f32.mrb[173].mxu1 }
 0x25d   :  { %v1579_v27 = vpop.f32.mrb[174].mxu0  ;;  %v2035_v28 = vpop.f32.mrb[174].mxu1 }
 0x25e   :  { %v1580_v29 = vadd.f32 %v6752_v24, %v1579_v27  ;;  %v5135_v30 = vpop.f32.mrb[175].mxu0  ;;  %v2334_v31 = vmax.f32 %v2033_v61, 0.0  ;;  %v2036_v32 = vadd.f32 %v6752_v24, %v2035_v28  ;;  %v5363_v33 = vpop.f32.mrb[175].mxu1  ;;  %v2220_v34 = vmax.f32 %v1577_v25, 0.0 }
 0x260   :  { %v2221_v35 = vmax.f32 %v1580_v29, 0.0  ;;  %v2335_v36 = vmax.f32 %v2036_v32, 0.0 }
 0x262   :  { %v4388_v37 = vpack.c.bf16 %v2221_v35, %v2220_v34  ;;  %v4673_v38 = vpack.c.bf16 %v2335_v36, %v2334_v31 }
 0x263   :  { %v1584_v39 = vpop.f32.mrb[176].mxu0  ;;  %v2040_v40 = vpop.f32.mrb[176].mxu1 }
 0x264   :  { %4772 = vst [vmem:[%s6894_s3 + $0x158] sm:$0xff] %v4388_v37   ;;  %v1585_v41 = vadd.f32 %v6752_v24, %v1584_v39  ;;  %v5138_v42 = vpop.f32.mrb[177].mxu0  ;;  %4829 = vst [vmem:[%s6894_s3 + $0x320] sm:$0xff] %v4673_v38   ;;  %v2041_v43 = vadd.f32 %v6752_v24, %v2040_v40  ;;  %v5366_v44 = vpop.f32.mrb[177].mxu1 }
 0x265   :  { %v1587_v45 = vpop.f32.mrb[178].mxu0  ;;  %v2043_v46 = vpop.f32.mrb[178].mxu1 }
 0x266   :  { %v1588_v47 = vadd.f32 %v6752_v24, %v1587_v45  ;;  %v5139_v48 = vpop.f32.mrb[179].mxu0  ;;  %v2336_v49 = vmax.f32 %v2041_v43, 0.0  ;;  %v2044_v50 = vadd.f32 %v6752_v24, %v2043_v46  ;;  %v5367_v51 = vpop.f32.mrb[179].mxu1  ;;  %v2222_v52 = vmax.f32 %v1585_v41, 0.0 }
 0x268   :  { %v2223_v53 = vmax.f32 %v1588_v47, 0.0  ;;  %v2337_v54 = vmax.f32 %v2044_v50, 0.0 }
 0x26a   :  { %v4393_v55 = vpack.c.bf16 %v2223_v53, %v2222_v52  ;;  %v4678_v56 = vpack.c.bf16 %v2337_v54, %v2336_v49 }
 0x26b   :  { %v1592_v57 = vpop.f32.mrb[180].mxu0  ;;  %v2048_v58 = vpop.f32.mrb[180].mxu1 }
 0x26c   :  { %4773 = vst [vmem:[%s6894_s3 + $0x160] sm:$0xff] %v4393_v55   ;;  %v1593_v59 = vadd.f32 %v6752_v24, %v1592_v57  ;;  %v5142_v60 = vpop.f32.mrb[181].mxu0  ;;  %4830 = vst [vmem:[%s6894_s3 + $0x328] sm:$0xff] %v4678_v56   ;;  %v2049_v62 = vadd.f32 %v6752_v24, %v2048_v58  ;;  %v5370_v63 = vpop.f32.mrb[181].mxu1 }
 0x26d   :  { %v1595_v1 = vpop.f32.mrb[182].mxu0  ;;  %v2051_v2 = vpop.f32.mrb[182].mxu1 }
 0x26e   :  { %v1596_v3 = vadd.f32 %v6752_v24, %v1595_v1  ;;  %v5143_v4 = vpop.f32.mrb[183].mxu0  ;;  %v2338_v5 = vmax.f32 %v2049_v62, 0.0  ;;  %v2052_v6 = vadd.f32 %v6752_v24, %v2051_v2  ;;  %v5371_v7 = vpop.f32.mrb[183].mxu1  ;;  %v2224_v8 = vmax.f32 %v1593_v59, 0.0 }
 0x270   :  { %v2225_v9 = vmax.f32 %v1596_v3, 0.0  ;;  %v2339_v10 = vmax.f32 %v2052_v6, 0.0 }
 0x272   :  { %v4398_v11 = vpack.c.bf16 %v2225_v9, %v2224_v8  ;;  %v4683_v12 = vpack.c.bf16 %v2339_v10, %v2338_v5 }
 0x273   :  { %v1600_v13 = vpop.f32.mrb[184].mxu0  ;;  %v2056_v14 = vpop.f32.mrb[184].mxu1 }
 0x274   :  { %4774 = vst [vmem:[%s6894_s3 + $0x168] sm:$0xff] %v4398_v11   ;;  %v1601_v15 = vadd.f32 %v6752_v24, %v1600_v13  ;;  %v5146_v16 = vpop.f32.mrb[185].mxu0  ;;  %4831 = vst [vmem:[%s6894_s3 + $0x330] sm:$0xff] %v4683_v12   ;;  %v2057_v17 = vadd.f32 %v6752_v24, %v2056_v14  ;;  %v5374_v18 = vpop.f32.mrb[185].mxu1 }
 0x275   :  { %v1603_v19 = vpop.f32.mrb[186].mxu0  ;;  %v2059_v20 = vpop.f32.mrb[186].mxu1 }
 0x276   :  { %v1604_v21 = vadd.f32 %v6752_v24, %v1603_v19  ;;  %v5147_v22 = vpop.f32.mrb[187].mxu0  ;;  %v2340_v23 = vmax.f32 %v2057_v17, 0.0  ;;  %v2060_v25 = vadd.f32 %v6752_v24, %v2059_v20  ;;  %v5375_v0 = vpop.f32.mrb[187].mxu1  ;;  %v2226_v61 = vmax.f32 %v1601_v15, 0.0 }
 0x278   :  { %v2227_v26 = vmax.f32 %v1604_v21, 0.0  ;;  %v2341_v27 = vmax.f32 %v2060_v25, 0.0 }
 0x27a   :  { %v4403_v28 = vpack.c.bf16 %v2227_v26, %v2226_v61  ;;  %v4688_v29 = vpack.c.bf16 %v2341_v27, %v2340_v23 }
 0x27b   :  { %v1608_v30 = vpop.f32.mrb[188].mxu0  ;;  %v2064_v31 = vpop.f32.mrb[188].mxu1 }
 0x27c   :  { %4775 = vst [vmem:[%s6894_s3 + $0x170] sm:$0xff] %v4403_v28   ;;  %v1609_v32 = vadd.f32 %v6752_v24, %v1608_v30  ;;  %v5150_v33 = vpop.f32.mrb[189].mxu0  ;;  %4832 = vst [vmem:[%s6894_s3 + $0x338] sm:$0xff] %v4688_v29   ;;  %v2065_v34 = vadd.f32 %v6752_v24, %v2064_v31  ;;  %v5378_v35 = vpop.f32.mrb[189].mxu1 }
 0x27d   :  { %v1611_v36 = vpop.f32.mrb[190].mxu0  ;;  %v2067_v37 = vpop.f32.mrb[190].mxu1 }
 0x27e   :  { %v1612_v38 = vadd.f32 %v6752_v24, %v1611_v36  ;;  %v5151_v39 = vpop.f32.mrb[191].mxu0  ;;  %v2342_v40 = vmax.f32 %v2065_v34, 0.0  ;;  %v2068_v41 = vadd.f32 %v6752_v24, %v2067_v37  ;;  %v5379_v42 = vpop.f32.mrb[191].mxu1  ;;  %v2228_v43 = vmax.f32 %v1609_v32, 0.0 }
 0x280   :  { %v2229_v44 = vmax.f32 %v1612_v38, 0.0  ;;  %v2343_v45 = vmax.f32 %v2068_v41, 0.0 }
 0x282   :  { %v4408_v46 = vpack.c.bf16 %v2229_v44, %v2228_v43  ;;  %v4693_v47 = vpack.c.bf16 %v2343_v45, %v2342_v40 }
 0x283   :  { %v1616_v48 = vpop.f32.mrb[192].mxu0  ;;  %v2072_v49 = vpop.f32.mrb[192].mxu1 }
 0x284   :  { %4776 = vst [vmem:[%s6894_s3 + $0x178] sm:$0xff] %v4408_v46   ;;  %v1617_v50 = vadd.f32 %v6752_v24, %v1616_v48  ;;  %v5154_v51 = vpop.f32.mrb[193].mxu0  ;;  %4833 = vst [vmem:[%s6894_s3 + $0x340] sm:$0xff] %v4693_v47   ;;  %v2073_v52 = vadd.f32 %v6752_v24, %v2072_v49  ;;  %v5382_v53 = vpop.f32.mrb[193].mxu1 }
 0x285   :  { %v1619_v54 = vpop.f32.mrb[194].mxu0  ;;  %v2075_v55 = vpop.f32.mrb[194].mxu1 }
 0x286   :  { %v1620_v56 = vadd.f32 %v6752_v24, %v1619_v54  ;;  %v5155_v57 = vpop.f32.mrb[195].mxu0  ;;  %v2344_v58 = vmax.f32 %v2073_v52, 0.0  ;;  %v2076_v59 = vadd.f32 %v6752_v24, %v2075_v55  ;;  %v5383_v60 = vpop.f32.mrb[195].mxu1  ;;  %v2230_v62 = vmax.f32 %v1617_v50, 0.0 }
 0x288   :  { %v2231_v63 = vmax.f32 %v1620_v56, 0.0  ;;  %v2345_v1 = vmax.f32 %v2076_v59, 0.0 }
 0x28a   :  { %v4413_v2 = vpack.c.bf16 %v2231_v63, %v2230_v62  ;;  %v4698_v3 = vpack.c.bf16 %v2345_v1, %v2344_v58 }
 0x28b   :  { %v1624_v4 = vpop.f32.mrb[196].mxu0  ;;  %v2080_v5 = vpop.f32.mrb[196].mxu1 }
 0x28c   :  { %4777 = vst [vmem:[%s6894_s3 + $0x180] sm:$0xff] %v4413_v2   ;;  %v1625_v6 = vadd.f32 %v6752_v24, %v1624_v4  ;;  %v5158_v7 = vpop.f32.mrb[197].mxu0  ;;  %4834 = vst [vmem:[%s6894_s3 + $0x348] sm:$0xff] %v4698_v3   ;;  %v2081_v8 = vadd.f32 %v6752_v24, %v2080_v5  ;;  %v5386_v9 = vpop.f32.mrb[197].mxu1 }
 0x28d   :  { %v1627_v10 = vpop.f32.mrb[198].mxu0  ;;  %v2083_v11 = vpop.f32.mrb[198].mxu1 }
 0x28e   :  { %v1628_v12 = vadd.f32 %v6752_v24, %v1627_v10  ;;  %v5159_v13 = vpop.f32.mrb[199].mxu0  ;;  %v2346_v14 = vmax.f32 %v2081_v8, 0.0  ;;  %v2084_v15 = vadd.f32 %v6752_v24, %v2083_v11  ;;  %v5387_v16 = vpop.f32.mrb[199].mxu1  ;;  %v2232_v17 = vmax.f32 %v1625_v6, 0.0 }
 0x290   :  { %v2233_v18 = vmax.f32 %v1628_v12, 0.0  ;;  %v2347_v19 = vmax.f32 %v2084_v15, 0.0 }
 0x292   :  { %v4418_v20 = vpack.c.bf16 %v2233_v18, %v2232_v17  ;;  %v4703_v21 = vpack.c.bf16 %v2347_v19, %v2346_v14 }
 0x293   :  { %v1632_v22 = vpop.f32.mrb[200].mxu0  ;;  %v2088_v23 = vpop.f32.mrb[200].mxu1 }
 0x294   :  { %4778 = vst [vmem:[%s6894_s3 + $0x188] sm:$0xff] %v4418_v20   ;;  %v1633_v25 = vadd.f32 %v6752_v24, %v1632_v22  ;;  %v5162_v0 = vpop.f32.mrb[201].mxu0  ;;  %4835 = vst [vmem:[%s6894_s3 + $0x350] sm:$0xff] %v4703_v21   ;;  %v2089_v61 = vadd.f32 %v6752_v24, %v2088_v23  ;;  %v5390_v26 = vpop.f32.mrb[201].mxu1 }
 0x295   :  { %v1635_v27 = vpop.f32.mrb[202].mxu0  ;;  %v2091_v28 = vpop.f32.mrb[202].mxu1 }
 0x296   :  { %v1636_v29 = vadd.f32 %v6752_v24, %v1635_v27  ;;  %v5163_v30 = vpop.f32.mrb[203].mxu0  ;;  %v2348_v31 = vmax.f32 %v2089_v61, 0.0  ;;  %v2092_v32 = vadd.f32 %v6752_v24, %v2091_v28  ;;  %v5391_v33 = vpop.f32.mrb[203].mxu1  ;;  %v2234_v34 = vmax.f32 %v1633_v25, 0.0 }
 0x298   :  { %v2235_v35 = vmax.f32 %v1636_v29, 0.0  ;;  %v2349_v36 = vmax.f32 %v2092_v32, 0.0 }
 0x29a   :  { %v4423_v37 = vpack.c.bf16 %v2235_v35, %v2234_v34  ;;  %v4708_v38 = vpack.c.bf16 %v2349_v36, %v2348_v31 }
 0x29b   :  { %v1640_v39 = vpop.f32.mrb[204].mxu0  ;;  %v2096_v40 = vpop.f32.mrb[204].mxu1 }
 0x29c   :  { %4779 = vst [vmem:[%s6894_s3 + $0x190] sm:$0xff] %v4423_v37   ;;  %v1641_v41 = vadd.f32 %v6752_v24, %v1640_v39  ;;  %v5166_v42 = vpop.f32.mrb[205].mxu0  ;;  %4836 = vst [vmem:[%s6894_s3 + $0x358] sm:$0xff] %v4708_v38   ;;  %v2097_v43 = vadd.f32 %v6752_v24, %v2096_v40  ;;  %v5394_v44 = vpop.f32.mrb[205].mxu1 }
 0x29d   :  { %v1643_v45 = vpop.f32.mrb[206].mxu0  ;;  %v2099_v46 = vpop.f32.mrb[206].mxu1 }
 0x29e   :  { %v1644_v47 = vadd.f32 %v6752_v24, %v1643_v45  ;;  %v5167_v48 = vpop.f32.mrb[207].mxu0  ;;  %v2350_v49 = vmax.f32 %v2097_v43, 0.0  ;;  %v2100_v50 = vadd.f32 %v6752_v24, %v2099_v46  ;;  %v5395_v51 = vpop.f32.mrb[207].mxu1  ;;  %v2236_v52 = vmax.f32 %v1641_v41, 0.0 }
 0x2a0   :  { %v2237_v53 = vmax.f32 %v1644_v47, 0.0  ;;  %v2351_v54 = vmax.f32 %v2100_v50, 0.0 }
 0x2a2   :  { %v4428_v55 = vpack.c.bf16 %v2237_v53, %v2236_v52  ;;  %v4713_v56 = vpack.c.bf16 %v2351_v54, %v2350_v49 }
 0x2a3   :  { %v1648_v57 = vpop.f32.mrb[208].mxu0  ;;  %v2104_v58 = vpop.f32.mrb[208].mxu1 }
 0x2a4   :  { %4780 = vst [vmem:[%s6894_s3 + $0x198] sm:$0xff] %v4428_v55   ;;  %v1649_v59 = vadd.f32 %v6752_v24, %v1648_v57  ;;  %v5170_v60 = vpop.f32.mrb[209].mxu0  ;;  %4837 = vst [vmem:[%s6894_s3 + $0x360] sm:$0xff] %v4713_v56   ;;  %v2105_v62 = vadd.f32 %v6752_v24, %v2104_v58  ;;  %v5398_v63 = vpop.f32.mrb[209].mxu1 }
 0x2a5   :  { %v1651_v1 = vpop.f32.mrb[210].mxu0  ;;  %v2107_v2 = vpop.f32.mrb[210].mxu1 }
 0x2a6   :  { %v1652_v3 = vadd.f32 %v6752_v24, %v1651_v1  ;;  %v5171_v4 = vpop.f32.mrb[211].mxu0  ;;  %v2352_v5 = vmax.f32 %v2105_v62, 0.0  ;;  %v2108_v6 = vadd.f32 %v6752_v24, %v2107_v2  ;;  %v5399_v7 = vpop.f32.mrb[211].mxu1  ;;  %v2238_v8 = vmax.f32 %v1649_v59, 0.0 }
 0x2a8   :  { %v2239_v9 = vmax.f32 %v1652_v3, 0.0  ;;  %v2353_v10 = vmax.f32 %v2108_v6, 0.0 }
 0x2aa   :  { %v4433_v11 = vpack.c.bf16 %v2239_v9, %v2238_v8  ;;  %v4718_v12 = vpack.c.bf16 %v2353_v10, %v2352_v5 }
 0x2ab   :  { %v1656_v13 = vpop.f32.mrb[212].mxu0  ;;  %v2112_v14 = vpop.f32.mrb[212].mxu1 }
 0x2ac   :  { %4781 = vst [vmem:[%s6894_s3 + $0x1a0] sm:$0xff] %v4433_v11   ;;  %v1657_v15 = vadd.f32 %v6752_v24, %v1656_v13  ;;  %v5174_v16 = vpop.f32.mrb[213].mxu0  ;;  %4838 = vst [vmem:[%s6894_s3 + $0x368] sm:$0xff] %v4718_v12   ;;  %v2113_v17 = vadd.f32 %v6752_v24, %v2112_v14  ;;  %v5402_v18 = vpop.f32.mrb[213].mxu1 }
 0x2ad   :  { %v1659_v19 = vpop.f32.mrb[214].mxu0  ;;  %v2115_v20 = vpop.f32.mrb[214].mxu1 }
 0x2ae   :  { %v1660_v21 = vadd.f32 %v6752_v24, %v1659_v19  ;;  %v5175_v22 = vpop.f32.mrb[215].mxu0  ;;  %v2354_v23 = vmax.f32 %v2113_v17, 0.0  ;;  %v2116_v25 = vadd.f32 %v6752_v24, %v2115_v20  ;;  %v5403_v0 = vpop.f32.mrb[215].mxu1  ;;  %v2240_v61 = vmax.f32 %v1657_v15, 0.0 }
 0x2b0   :  { %v2241_v26 = vmax.f32 %v1660_v21, 0.0  ;;  %v2355_v27 = vmax.f32 %v2116_v25, 0.0 }
 0x2b2   :  { %v4438_v28 = vpack.c.bf16 %v2241_v26, %v2240_v61  ;;  %v4723_v29 = vpack.c.bf16 %v2355_v27, %v2354_v23 }
 0x2b3   :  { %v1664_v30 = vpop.f32.mrb[216].mxu0  ;;  %v2120_v31 = vpop.f32.mrb[216].mxu1 }
 0x2b4   :  { %4782 = vst [vmem:[%s6894_s3 + $0x1a8] sm:$0xff] %v4438_v28   ;;  %v1665_v32 = vadd.f32 %v6752_v24, %v1664_v30  ;;  %v5178_v33 = vpop.f32.mrb[217].mxu0  ;;  %4839 = vst [vmem:[%s6894_s3 + $0x370] sm:$0xff] %v4723_v29   ;;  %v2121_v34 = vadd.f32 %v6752_v24, %v2120_v31  ;;  %v5406_v35 = vpop.f32.mrb[217].mxu1 }
 0x2b5   :  { %v1667_v36 = vpop.f32.mrb[218].mxu0  ;;  %v2123_v37 = vpop.f32.mrb[218].mxu1 }
 0x2b6   :  { %v1668_v38 = vadd.f32 %v6752_v24, %v1667_v36  ;;  %v5179_v39 = vpop.f32.mrb[219].mxu0  ;;  %v2356_v40 = vmax.f32 %v2121_v34, 0.0  ;;  %v2124_v41 = vadd.f32 %v6752_v24, %v2123_v37  ;;  %v5407_v42 = vpop.f32.mrb[219].mxu1  ;;  %v2242_v43 = vmax.f32 %v1665_v32, 0.0 }
 0x2b8   :  { %v2243_v44 = vmax.f32 %v1668_v38, 0.0  ;;  %v2357_v45 = vmax.f32 %v2124_v41, 0.0 }
 0x2ba   :  { %v4443_v46 = vpack.c.bf16 %v2243_v44, %v2242_v43  ;;  %v4728_v47 = vpack.c.bf16 %v2357_v45, %v2356_v40 }
 0x2bb   :  { %v1672_v48 = vpop.f32.mrb[220].mxu0  ;;  %v2128_v49 = vpop.f32.mrb[220].mxu1 }
 0x2bc   :  { %4783 = vst [vmem:[%s6894_s3 + $0x1b0] sm:$0xff] %v4443_v46   ;;  %v1673_v50 = vadd.f32 %v6752_v24, %v1672_v48  ;;  %v5182_v51 = vpop.f32.mrb[221].mxu0  ;;  %4840 = vst [vmem:[%s6894_s3 + $0x378] sm:$0xff] %v4728_v47   ;;  %v2129_v52 = vadd.f32 %v6752_v24, %v2128_v49  ;;  %v5410_v53 = vpop.f32.mrb[221].mxu1 }
 0x2bd   :  { %v1675_v54 = vpop.f32.mrb[222].mxu0  ;;  %v2131_v55 = vpop.f32.mrb[222].mxu1 }
 0x2be   :  { %v1676_v56 = vadd.f32 %v6752_v24, %v1675_v54  ;;  %v5183_v57 = vpop.f32.mrb[223].mxu0  ;;  %v2358_v58 = vmax.f32 %v2129_v52, 0.0  ;;  %v5411_v59 = vpop.f32.mrb[223].mxu1  ;;  %v2244_v60 = vmax.f32 %v1673_v50, 0.0 }
 0x2c0   :  { %v2245_v62 = vmax.f32 %v1676_v56, 0.0  ;;  %v4169_v63 = vpack.c.bf16 %v2358_v58, %v2358_v58 }
 0x2c2   :  { %v4448_v1 = vpack.c.bf16 %v2245_v62, %v2244_v60  ;;  %3484 = vst [vmem:[%s6894_s3 + $0x380] sm:$0xf] %v4169_v63 }
 0x2c3   :  { %v1680_v2 = vpop.f32.mrb[224].mxu0 }
 0x2c4   :  { %4784 = vst [vmem:[%s6894_s3 + $0x1b8] sm:$0xff] %v4448_v1   ;;  %v1681_v3 = vadd.f32 %v6752_v24, %v1680_v2  ;;  %v5186_v4 = vpop.f32.mrb[225].mxu0 }
 0x2c5   :  { %v1683_v5 = vpop.f32.mrb[226].mxu0 }
 0x2c6   :  { %v1684_v6 = vadd.f32 %v6752_v24, %v1683_v5  ;;  %v5187_v7 = vpop.f32.mrb[227].mxu0  ;;  %v2246_v8 = vmax.f32 %v1681_v3, 0.0 }
 0x2c8   :  { %v2247_v9 = vmax.f32 %v1684_v6, 0.0 }
 0x2ca   :  { %v4453_v10 = vpack.c.bf16 %v2247_v9, %v2246_v8 }
 0x2cc   :  { %4785 = vst [vmem:[%s6894_s3 + $0x1c0] sm:$0xff] %v4453_v10  }
 0x2cd   :  { %3489 = vsyncpa [#allocation3], 1 }
 0x2ce   :  { %3490 = vsyncpa [#allocation5], 1 }

// kernel: net_forward.5
= control target key start
LH: loop header
LB: loop body
LE: loop exit
PB: predicated region body
PF: predicated region fallthrough
CT: control target
= control target key end

     0   :  { %s2882_s12 = smov 0   ;;  %s3233_s0 = inlined_call_operand.vmem [shape: bf16[1568,144], index: 0, kind: input, shape index: {}]   ;;  %s3234_s1 = inlined_call_operand.vmem [shape: bf16[144,128], index: 1, kind: input, shape index: {}]   ;;  %s3235_s2 = inlined_call_operand.vmem [shape: f32[1,128], index: 2, kind: input, shape index: {}]   ;;  %s3236_s3 = inlined_call_operand.vmem [shape: bf16[1568,128], index: 3, kind: output, shape index: {}]  }
   0x1 LB: > { %s2013_s13 = sadd.s32 4294967295, %s2859_s12   ;;  %p2017_p0 = scmp.ge.s32.totalorder %s2859_s12, 1  ;;  %s2859_s12 = sphi %s2882_s12, %s13_s12  }
   0x2   : > { %p139_p1 = scmp.lt.s32.totalorder %s2859_s12, 3 }
   0x4   : > { %p140_p2 = pnand %p2017_p0, %p139_p1 }
   0x5   : > { %v2697_v0 = vld [vmem:[%s3234_s1] sm:$0xff] (!%p140_p2)   ;;  %v2861_v1 = vmov (!%p140_p2), 0   ;;  %s164_s16 = smul.u32 (!%p140_p2), 98, %s2013_s13  ;;  %v2698_v2 = vld [vmem:[%s3234_s1 + $0x8] sm:$0xff] (!%p140_p2)   ;;  %v2699_v3 = vld [vmem:[%s3234_s1 + $0x10] sm:$0xff] (!%p140_p2)   ;;  %vm796_vm0 = vcmask (!%p140_p2), 130048  }
   0x6   : > { %143 = sbr.rel (%p140_p2) target bundleno = 455 (0x1c7), region = 32  ;;  %944 = vmatprep.subr.bf16.mxu0 (!%p140_p2), %v2861_v1  ;;  %2670 = vmatprep.subr.bf16.mxu1 (!%p140_p2), %v2861_v1  ;;  %v2700_v4 = vld [vmem:[%s3234_s1 + $0x18] sm:$0xff] (!%p140_p2)   ;;  %v2701_v7 = vld [vmem:[%s3234_s1 + $0x20] sm:$0xff] (!%p140_p2)   ;;  %v2702_v8 = vld [vmem:[%s3234_s1 + $0x28] sm:$0xff] (!%p140_p2)  }
   0x7   : > { %945 = vmatpush1.bf16.msra.mxu0 (!%p140_p2), %v2697_v0  ;;  %2679 = vmatpush1.bf16.msra.mxu1 (!%p140_p2), %v2697_v0  ;;  %p165_p3 = scmp.lt.s32.totalorder (!%p140_p2), %s164_s16, 195  ;;  %v2703_v9 = vld [vmem:[%s3234_s1 + $0x30] sm:$0xff] (!%p140_p2)   ;;  %v2704_v10 = vld [vmem:[%s3234_s1 + $0x38] sm:$0xff] (!%p140_p2)   ;;  %v2705_v11 = vld [vmem:[%s3234_s1 + $0x40] sm:$0xff] (!%p140_p2)  }
   0x8   : > { %946 = vmatprep.subr.bf16.mxu0 (!%p140_p2), %v2861_v1  ;;  %2671 = vmatprep.subr.bf16.mxu1 (!%p140_p2), %v2861_v1 }
   0xb   : > { %947 = vmatpush1.bf16.msra.mxu0 (!%p140_p2), %v2698_v2  ;;  %2680 = vmatpush1.bf16.msra.mxu1 (!%p140_p2), %v2698_v2 }
   0xc   : > { %948 = vmatprep.subr.bf16.mxu0 (!%p140_p2), %v2861_v1  ;;  %2672 = vmatprep.subr.bf16.mxu1 (!%p140_p2), %v2861_v1 }
   0xd   : > { %s3238_s16 = smov (!%p165_p3, %s164_s16), 195 }
   0xe   : > { %s2278_s21 = sshll.u32 %s3238_s16, 3  ;;  %s2020_s13 = sshll.u32 %s3238_s16, 2 }
   0xf   : > { %s2905_s24 = scalar_lea.vmem %s3233_s0, %s2278_s21  ;;  %949 = vmatpush1.bf16.msra.mxu0 %v2699_v3  ;;  %2681 = vmatpush1.bf16.msra.mxu1 %v2699_v3  ;;  %s3085_s17 = scalar_lea.vmem %s3236_s3, %s2020_s13 }
  0x10   : > { %v2708_v5 = vld [vmem:[%s2905_s24 + $0x4] ss:$8 sps:$4 sm:$0xff]   ;;  %950 = vmatprep.subr.bf16.mxu0 %v2861_v1  ;;  %2673 = vmatprep.subr.bf16.mxu1 %v2861_v1  ;;  %v2711_v6 = vld [vmem:[%s2905_s24 + $0x194] ss:$8 sps:$4 sm:$0xff]   ;;  %v2706_v12 = vld [vmem:[%s2905_s24] ss:$8 sps:$4 sm:$0xff]  }
  0x11   : > { %2129 = vmatprep.mubr.msk.bf16.mxu0 %vm796_vm0, %v2708_v5  ;;  %2154 = vmatprep.mubr.msk.bf16.mxu1 %vm796_vm0, %v2711_v6  ;;  %v2709_v13 = vld [vmem:[%s2905_s24 + $0x190] ss:$8 sps:$4 sm:$0xff]   ;;  %v2712_v14 = vld [vmem:[%s2905_s24 + $0x14] ss:$8 sps:$4 sm:$0xff]   ;;  %v2715_v15 = vld [vmem:[%s2905_s24 + $0x1a4] ss:$8 sps:$4 sm:$0xff]  }
  0x12   : > { %v2714_v16 = vld [vmem:[%s2905_s24 + $0x10] ss:$8 sps:$4 sm:$0xff]   ;;  %v2717_v17 = vld [vmem:[%s2905_s24 + $0x1a0] ss:$8 sps:$4 sm:$0xff]   ;;  %v2718_v18 = vld [vmem:[%s2905_s24 + $0x24] ss:$8 sps:$4 sm:$0xff]  }
  0x13   : > { %951 = vmatpush1.bf16.msra.mxu0 %v2700_v4  ;;  %2682 = vmatpush1.bf16.msra.mxu1 %v2700_v4  ;;  %v2721_v19 = vld [vmem:[%s2905_s24 + $0x1b4] ss:$8 sps:$4 sm:$0xff]   ;;  %v2720_v20 = vld [vmem:[%s2905_s24 + $0x20] ss:$8 sps:$4 sm:$0xff]   ;;  %v2723_v21 = vld [vmem:[%s2905_s24 + $0x1b0] ss:$8 sps:$4 sm:$0xff]  }
  0x14   : > { %952 = vmatprep.subr.bf16.mxu0 %v2861_v1  ;;  %2674 = vmatprep.subr.bf16.mxu1 %v2861_v1  ;;  %v2724_v22 = vld [vmem:[%s2905_s24 + $0x34] ss:$8 sps:$4 sm:$0xff]   ;;  %v2727_v23 = vld [vmem:[%s2905_s24 + $0x1c4] ss:$8 sps:$4 sm:$0xff]   ;;  %v2726_v24 = vld [vmem:[%s2905_s24 + $0x30] ss:$8 sps:$4 sm:$0xff]  }
  0x15   : > { %v2729_v25 = vld [vmem:[%s2905_s24 + $0x1c0] ss:$8 sps:$4 sm:$0xff]   ;;  %v2730_v26 = vld [vmem:[%s2905_s24 + $0x44] ss:$8 sps:$4 sm:$0xff]   ;;  %v2733_v27 = vld [vmem:[%s2905_s24 + $0x1d4] ss:$8 sps:$4 sm:$0xff]  }
  0x16   : > { %v2732_v28 = vld [vmem:[%s2905_s24 + $0x40] ss:$8 sps:$4 sm:$0xff]   ;;  %v2735_v29 = vld [vmem:[%s2905_s24 + $0x1d0] ss:$8 sps:$4 sm:$0xff]   ;;  %v2736_v30 = vld [vmem:[%s2905_s24 + $0x54] ss:$8 sps:$4 sm:$0xff]  }
  0x17   : > { %953 = vmatpush1.bf16.msra.mxu0 %v2701_v7  ;;  %2683 = vmatpush1.bf16.msra.mxu1 %v2701_v7  ;;  %v2739_v31 = vld [vmem:[%s2905_s24 + $0x1e4] ss:$8 sps:$4 sm:$0xff]   ;;  %v2738_v32 = vld [vmem:[%s2905_s24 + $0x50] ss:$8 sps:$4 sm:$0xff]   ;;  %v2741_v33 = vld [vmem:[%s2905_s24 + $0x1e0] ss:$8 sps:$4 sm:$0xff]  }
  0x18   : > { %954 = vmatprep.subr.bf16.mxu0 %v2861_v1  ;;  %2675 = vmatprep.subr.bf16.mxu1 %v2861_v1  ;;  %v2742_v34 = vld [vmem:[%s2905_s24 + $0x64] ss:$8 sps:$4 sm:$0xff]   ;;  %v2745_v35 = vld [vmem:[%s2905_s24 + $0x1f4] ss:$8 sps:$4 sm:$0xff]   ;;  %v2744_v36 = vld [vmem:[%s2905_s24 + $0x60] ss:$8 sps:$4 sm:$0xff]  }
  0x19   : > { %v2747_v37 = vld [vmem:[%s2905_s24 + $0x1f0] ss:$8 sps:$4 sm:$0xff]   ;;  %v2748_v38 = vld [vmem:[%s2905_s24 + $0x74] ss:$8 sps:$4 sm:$0xff]   ;;  %v2751_v39 = vld [vmem:[%s2905_s24 + $0x204] ss:$8 sps:$4 sm:$0xff]  }
  0x1a   : > { %v2750_v40 = vld [vmem:[%s2905_s24 + $0x70] ss:$8 sps:$4 sm:$0xff]   ;;  %v2753_v41 = vld [vmem:[%s2905_s24 + $0x200] ss:$8 sps:$4 sm:$0xff]   ;;  %v2754_v42 = vld [vmem:[%s2905_s24 + $0x84] ss:$8 sps:$4 sm:$0xff]  }
  0x1b   : > { %955 = vmatpush1.bf16.msra.mxu0 %v2702_v8  ;;  %2684 = vmatpush1.bf16.msra.mxu1 %v2702_v8  ;;  %v2757_v43 = vld [vmem:[%s2905_s24 + $0x214] ss:$8 sps:$4 sm:$0xff]   ;;  %v2756_v44 = vld [vmem:[%s2905_s24 + $0x80] ss:$8 sps:$4 sm:$0xff]   ;;  %v2759_v45 = vld [vmem:[%s2905_s24 + $0x210] ss:$8 sps:$4 sm:$0xff]  }
  0x1c   : > { %956 = vmatprep.subr.bf16.mxu0 %v2861_v1  ;;  %2676 = vmatprep.subr.bf16.mxu1 %v2861_v1  ;;  %v2760_v46 = vld [vmem:[%s2905_s24 + $0x94] ss:$8 sps:$4 sm:$0xff]   ;;  %v2763_v47 = vld [vmem:[%s2905_s24 + $0x224] ss:$8 sps:$4 sm:$0xff]   ;;  %v2762_v48 = vld [vmem:[%s2905_s24 + $0x90] ss:$8 sps:$4 sm:$0xff]  }
  0x1d   : > { %v2765_v49 = vld [vmem:[%s2905_s24 + $0x220] ss:$8 sps:$4 sm:$0xff]   ;;  %v2766_v50 = vld [vmem:[%s2905_s24 + $0xa4] ss:$8 sps:$4 sm:$0xff]   ;;  %v2769_v51 = vld [vmem:[%s2905_s24 + $0x234] ss:$8 sps:$4 sm:$0xff]  }
  0x1e   : > { %v2768_v52 = vld [vmem:[%s2905_s24 + $0xa0] ss:$8 sps:$4 sm:$0xff]   ;;  %v2771_v53 = vld [vmem:[%s2905_s24 + $0x230] ss:$8 sps:$4 sm:$0xff]   ;;  %v2772_v54 = vld [vmem:[%s2905_s24 + $0xb4] ss:$8 sps:$4 sm:$0xff]  }
  0x1f   : > { %957 = vmatpush1.bf16.msra.mxu0 %v2703_v9  ;;  %2685 = vmatpush1.bf16.msra.mxu1 %v2703_v9  ;;  %v2775_v55 = vld [vmem:[%s2905_s24 + $0x244] ss:$8 sps:$4 sm:$0xff]   ;;  %v2774_v56 = vld [vmem:[%s2905_s24 + $0xb0] ss:$8 sps:$4 sm:$0xff]   ;;  %v2777_v57 = vld [vmem:[%s2905_s24 + $0x240] ss:$8 sps:$4 sm:$0xff]  }
  0x20   : > { %958 = vmatprep.subr.bf16.mxu0 %v2861_v1  ;;  %2677 = vmatprep.subr.bf16.mxu1 %v2861_v1  ;;  %v2778_v58 = vld [vmem:[%s2905_s24 + $0xc4] ss:$8 sps:$4 sm:$0xff]   ;;  %v2781_v59 = vld [vmem:[%s2905_s24 + $0x254] ss:$8 sps:$4 sm:$0xff]   ;;  %v2780_v60 = vld [vmem:[%s2905_s24 + $0xc0] ss:$8 sps:$4 sm:$0xff]  }
  0x21   : > { %v2783_v61 = vld [vmem:[%s2905_s24 + $0x250] ss:$8 sps:$4 sm:$0xff]   ;;  %v2784_v62 = vld [vmem:[%s2905_s24 + $0xd4] ss:$8 sps:$4 sm:$0xff]   ;;  %v2787_v63 = vld [vmem:[%s2905_s24 + $0x264] ss:$8 sps:$4 sm:$0xff]  }
  0x22   : > { %v2786_v0 = vld [vmem:[%s2905_s24 + $0xd0] ss:$8 sps:$4 sm:$0xff]   ;;  %v2790_v2 = vld [vmem:[%s2905_s24 + $0xe4] ss:$8 sps:$4 sm:$0xff]   ;;  %v2793_v3 = vld [vmem:[%s2905_s24 + $0x274] ss:$8 sps:$4 sm:$0xff]  }
  0x23   : > { %959 = vmatpush1.bf16.msra.mxu0 %v2704_v10  ;;  %2686 = vmatpush1.bf16.msra.mxu1 %v2704_v10  ;;  %v2792_v4 = vld [vmem:[%s2905_s24 + $0xe0] ss:$8 sps:$4 sm:$0xff]   ;;  %v2795_v5 = vld [vmem:[%s2905_s24 + $0x270] ss:$8 sps:$4 sm:$0xff]   ;;  %v2796_v6 = vld [vmem:[%s2905_s24 + $0xf4] ss:$8 sps:$4 sm:$0xff]  }
  0x24   : > { %960 = vmatprep.subr.bf16.mxu0 %v2861_v1  ;;  %2678 = vmatprep.subr.bf16.mxu1 %v2861_v1  ;;  %v2789_v1 = vld [vmem:[%s2905_s24 + $0x260] ss:$8 sps:$4 sm:$0xff]   ;;  %v2799_v7 = vld [vmem:[%s2905_s24 + $0x284] ss:$8 sps:$4 sm:$0xff]   ;;  %v2798_v8 = vld [vmem:[%s2905_s24 + $0xf0] ss:$8 sps:$4 sm:$0xff]  }
  0x25   : > { %v2801_v9 = vld [vmem:[%s2905_s24 + $0x280] ss:$8 sps:$4 sm:$0xff]   ;;  %v2802_v10 = vld [vmem:[%s2905_s24 + $0x104] ss:$8 sps:$4 sm:$0xff]  }
  0x27   : > { %961 = vmatpush1.bf16.msra.mxu0 %v2705_v11  ;;  %2687 = vmatpush1.bf16.msra.mxu1 %v2705_v11  ;;  %v2805_v11 = vld [vmem:[%s2905_s24 + $0x294] ss:$8 sps:$4 sm:$0xff]  }
  0x2a   : > { %977 = vmatmul.mubr.bf16.vlgmr.msra.gmra.mrb[0].mxu0 %v2706_v12  ;;  %1177 = vmatmul.mubr.bf16.vlgmr.msra.gmra.mrb[0].mxu1 %v2709_v13  ;;  %v2804_v12 = vld [vmem:[%s2905_s24 + $0x100] ss:$8 sps:$4 sm:$0xff]   ;;  %v2807_v13 = vld [vmem:[%s2905_s24 + $0x290] ss:$8 sps:$4 sm:$0xff]  }
  0x2b   : > { %2130 = vmatprep.mubr.msk.bf16.mxu0 %vm796_vm0, %v2712_v14  ;;  %2155 = vmatprep.mubr.msk.bf16.mxu1 %vm796_vm0, %v2715_v15  ;;  %v2808_v14 = vld [vmem:[%s2905_s24 + $0x114] ss:$8 sps:$4 sm:$0xff]   ;;  %v2811_v15 = vld [vmem:[%s2905_s24 + $0x2a4] ss:$8 sps:$4 sm:$0xff]  }
  0x32   : > { %985 = vmatmul.mubr.bf16.gmra.mrb[4].mxu0 %v2714_v16  ;;  %1185 = vmatmul.mubr.bf16.gmra.mrb[4].mxu1 %v2717_v17  ;;  %v2810_v16 = vld [vmem:[%s2905_s24 + $0x110] ss:$8 sps:$4 sm:$0xff]   ;;  %v2813_v17 = vld [vmem:[%s2905_s24 + $0x2a0] ss:$8 sps:$4 sm:$0xff]  }
  0x33   : > { %2131 = vmatprep.mubr.msk.bf16.mxu0 %vm796_vm0, %v2718_v18  ;;  %2156 = vmatprep.mubr.msk.bf16.mxu1 %vm796_vm0, %v2721_v19  ;;  %v2814_v18 = vld [vmem:[%s2905_s24 + $0x124] ss:$8 sps:$4 sm:$0xff]   ;;  %v2817_v19 = vld [vmem:[%s2905_s24 + $0x2b4] ss:$8 sps:$4 sm:$0xff]  }
  0x3a   : > { %993 = vmatmul.mubr.bf16.gmra.mrb[8].mxu0 %v2720_v20  ;;  %1193 = vmatmul.mubr.bf16.gmra.mrb[8].mxu1 %v2723_v21  ;;  %v2816_v20 = vld [vmem:[%s2905_s24 + $0x120] ss:$8 sps:$4 sm:$0xff]   ;;  %v2819_v21 = vld [vmem:[%s2905_s24 + $0x2b0] ss:$8 sps:$4 sm:$0xff]  }
  0x3b   : > { %2132 = vmatprep.mubr.msk.bf16.mxu0 %vm796_vm0, %v2724_v22  ;;  %2157 = vmatprep.mubr.msk.bf16.mxu1 %vm796_vm0, %v2727_v23  ;;  %v2820_v22 = vld [vmem:[%s2905_s24 + $0x134] ss:$8 sps:$4 sm:$0xff]   ;;  %v2823_v23 = vld [vmem:[%s2905_s24 + $0x2c4] ss:$8 sps:$4 sm:$0xff]  }
  0x42   : > { %1001 = vmatmul.mubr.bf16.gmra.mrb[12].mxu0 %v2726_v24  ;;  %1201 = vmatmul.mubr.bf16.gmra.mrb[12].mxu1 %v2729_v25  ;;  %v2822_v24 = vld [vmem:[%s2905_s24 + $0x130] ss:$8 sps:$4 sm:$0xff]   ;;  %v2825_v25 = vld [vmem:[%s2905_s24 + $0x2c0] ss:$8 sps:$4 sm:$0xff]  }
  0x43   : > { %2133 = vmatprep.mubr.msk.bf16.mxu0 %vm796_vm0, %v2730_v26  ;;  %2158 = vmatprep.mubr.msk.bf16.mxu1 %vm796_vm0, %v2733_v27  ;;  %v2826_v26 = vld [vmem:[%s2905_s24 + $0x144] ss:$8 sps:$4 sm:$0xff]   ;;  %v2829_v27 = vld [vmem:[%s2905_s24 + $0x2d4] ss:$8 sps:$4 sm:$0xff]  }
  0x4a   : > { %1009 = vmatmul.mubr.bf16.gmra.mrb[16].mxu0 %v2732_v28  ;;  %1209 = vmatmul.mubr.bf16.gmra.mrb[16].mxu1 %v2735_v29  ;;  %v2828_v28 = vld [vmem:[%s2905_s24 + $0x140] ss:$8 sps:$4 sm:$0xff]   ;;  %v2831_v29 = vld [vmem:[%s2905_s24 + $0x2d0] ss:$8 sps:$4 sm:$0xff]  }
  0x4b   : > { %2134 = vmatprep.mubr.msk.bf16.mxu0 %vm796_vm0, %v2736_v30  ;;  %2159 = vmatprep.mubr.msk.bf16.mxu1 %vm796_vm0, %v2739_v31  ;;  %v2832_v30 = vld [vmem:[%s2905_s24 + $0x154] ss:$8 sps:$4 sm:$0xff]   ;;  %v2835_v31 = vld [vmem:[%s2905_s24 + $0x2e4] ss:$8 sps:$4 sm:$0xff]  }
  0x52   : > { %1017 = vmatmul.mubr.bf16.gmra.mrb[20].mxu0 %v2738_v32  ;;  %1217 = vmatmul.mubr.bf16.gmra.mrb[20].mxu1 %v2741_v33  ;;  %v2834_v32 = vld [vmem:[%s2905_s24 + $0x150] ss:$8 sps:$4 sm:$0xff]   ;;  %v2837_v33 = vld [vmem:[%s2905_s24 + $0x2e0] ss:$8 sps:$4 sm:$0xff]  }
  0x53   : > { %2135 = vmatprep.mubr.msk.bf16.mxu0 %vm796_vm0, %v2742_v34  ;;  %2160 = vmatprep.mubr.msk.bf16.mxu1 %vm796_vm0, %v2745_v35  ;;  %v2838_v34 = vld [vmem:[%s2905_s24 + $0x164] ss:$8 sps:$4 sm:$0xff]   ;;  %v2841_v35 = vld [vmem:[%s2905_s24 + $0x2f4] ss:$8 sps:$4 sm:$0xff]  }
  0x5a   : > { %1025 = vmatmul.mubr.bf16.gmra.mrb[24].mxu0 %v2744_v36  ;;  %1225 = vmatmul.mubr.bf16.gmra.mrb[24].mxu1 %v2747_v37  ;;  %v2840_v36 = vld [vmem:[%s2905_s24 + $0x160] ss:$8 sps:$4 sm:$0xff]   ;;  %v2843_v37 = vld [vmem:[%s2905_s24 + $0x2f0] ss:$8 sps:$4 sm:$0xff]  }
  0x5b   : > { %2136 = vmatprep.mubr.msk.bf16.mxu0 %vm796_vm0, %v2748_v38  ;;  %2161 = vmatprep.mubr.msk.bf16.mxu1 %vm796_vm0, %v2751_v39  ;;  %v2844_v38 = vld [vmem:[%s2905_s24 + $0x174] ss:$8 sps:$4 sm:$0xff]   ;;  %v2847_v39 = vld [vmem:[%s2905_s24 + $0x304] ss:$8 sps:$4 sm:$0xff]  }
  0x62   : > { %1033 = vmatmul.mubr.bf16.gmra.mrb[28].mxu0 %v2750_v40  ;;  %1233 = vmatmul.mubr.bf16.gmra.mrb[28].mxu1 %v2753_v41  ;;  %v2846_v40 = vld [vmem:[%s2905_s24 + $0x170] ss:$8 sps:$4 sm:$0xff]   ;;  %v2849_v41 = vld [vmem:[%s2905_s24 + $0x300] ss:$8 sps:$4 sm:$0xff]  }
  0x63   : > { %2137 = vmatprep.mubr.msk.bf16.mxu0 %vm796_vm0, %v2754_v42  ;;  %2162 = vmatprep.mubr.msk.bf16.mxu1 %vm796_vm0, %v2757_v43  ;;  %v2850_v42 = vld [vmem:[%s2905_s24 + $0x184] ss:$8 sps:$4 sm:$0xff]   ;;  %v2852_v43 = vld [vmem:[%s2905_s24 + $0x180] ss:$8 sps:$4 sm:$0xff]  }
  0x6a   : > { %1041 = vmatmul.mubr.bf16.gmra.mrb[32].mxu0 %v2756_v44  ;;  %1241 = vmatmul.mubr.bf16.gmra.mrb[32].mxu1 %v2759_v45  ;;  %v3075_v44 = vld [vmem:[%s3235_s2] ss:$0 sm:$0xff] }
  0x6b   : > { %2138 = vmatprep.mubr.msk.bf16.mxu0 %vm796_vm0, %v2760_v46  ;;  %2163 = vmatprep.mubr.msk.bf16.mxu1 %vm796_vm0, %v2763_v47 }
  0x72   : > { %1049 = vmatmul.mubr.bf16.gmra.mrb[36].mxu0 %v2762_v48  ;;  %1249 = vmatmul.mubr.bf16.gmra.mrb[36].mxu1 %v2765_v49 }
  0x73   : > { %2139 = vmatprep.mubr.msk.bf16.mxu0 %vm796_vm0, %v2766_v50  ;;  %2164 = vmatprep.mubr.msk.bf16.mxu1 %vm796_vm0, %v2769_v51 }
  0x7a   : > { %1057 = vmatmul.mubr.bf16.gmra.mrb[40].mxu0 %v2768_v52  ;;  %1257 = vmatmul.mubr.bf16.gmra.mrb[40].mxu1 %v2771_v53 }
  0x7b   : > { %2140 = vmatprep.mubr.msk.bf16.mxu0 %vm796_vm0, %v2772_v54  ;;  %2165 = vmatprep.mubr.msk.bf16.mxu1 %vm796_vm0, %v2775_v55 }
  0x82   : > { %1065 = vmatmul.mubr.bf16.gmra.mrb[44].mxu0 %v2774_v56  ;;  %1265 = vmatmul.mubr.bf16.gmra.mrb[44].mxu1 %v2777_v57 }
  0x83   : > { %2141 = vmatprep.mubr.msk.bf16.mxu0 %vm796_vm0, %v2778_v58  ;;  %2166 = vmatprep.mubr.msk.bf16.mxu1 %vm796_vm0, %v2781_v59 }
  0x8a   : > { %1073 = vmatmul.mubr.bf16.gmra.mrb[48].mxu0 %v2780_v60  ;;  %1273 = vmatmul.mubr.bf16.gmra.mrb[48].mxu1 %v2783_v61 }
  0x8b   : > { %2142 = vmatprep.mubr.msk.bf16.mxu0 %vm796_vm0, %v2784_v62  ;;  %2167 = vmatprep.mubr.msk.bf16.mxu1 %vm796_vm0, %v2787_v63 }
  0x92   : > { %1081 = vmatmul.mubr.bf16.gmra.mrb[52].mxu0 %v2786_v0  ;;  %1281 = vmatmul.mubr.bf16.gmra.mrb[52].mxu1 %v2789_v1 }
  0x93   : > { %2143 = vmatprep.mubr.msk.bf16.mxu0 %vm796_vm0, %v2790_v2  ;;  %2168 = vmatprep.mubr.msk.bf16.mxu1 %vm796_vm0, %v2793_v3 }
  0x9a   : > { %1089 = vmatmul.mubr.bf16.gmra.mrb[56].mxu0 %v2792_v4  ;;  %1289 = vmatmul.mubr.bf16.gmra.mrb[56].mxu1 %v2795_v5 }
  0x9b   : > { %2144 = vmatprep.mubr.msk.bf16.mxu0 %vm796_vm0, %v2796_v6  ;;  %2169 = vmatprep.mubr.msk.bf16.mxu1 %vm796_vm0, %v2799_v7 }
  0xa2   : > { %1097 = vmatmul.mubr.bf16.gmra.mrb[60].mxu0 %v2798_v8  ;;  %1297 = vmatmul.mubr.bf16.gmra.mrb[60].mxu1 %v2801_v9 }
  0xa3   : > { %2145 = vmatprep.mubr.msk.bf16.mxu0 %vm796_vm0, %v2802_v10  ;;  %2170 = vmatprep.mubr.msk.bf16.mxu1 %vm796_vm0, %v2805_v11 }
  0xaa   : > { %1105 = vmatmul.mubr.bf16.gmra.mrb[64].mxu0 %v2804_v12  ;;  %1305 = vmatmul.mubr.bf16.gmra.mrb[64].mxu1 %v2807_v13 }
  0xab   : > { %2146 = vmatprep.mubr.msk.bf16.mxu0 %vm796_vm0, %v2808_v14  ;;  %2171 = vmatprep.mubr.msk.bf16.mxu1 %vm796_vm0, %v2811_v15 }
  0xb2   : > { %1113 = vmatmul.mubr.bf16.gmra.mrb[68].mxu0 %v2810_v16  ;;  %1313 = vmatmul.mubr.bf16.gmra.mrb[68].mxu1 %v2813_v17 }
  0xb3   : > { %2147 = vmatprep.mubr.msk.bf16.mxu0 %vm796_vm0, %v2814_v18  ;;  %2172 = vmatprep.mubr.msk.bf16.mxu1 %vm796_vm0, %v2817_v19 }
  0xba   : > { %1121 = vmatmul.mubr.bf16.gmra.mrb[72].mxu0 %v2816_v20  ;;  %1321 = vmatmul.mubr.bf16.gmra.mrb[72].mxu1 %v2819_v21 }
  0xbb   : > { %2148 = vmatprep.mubr.msk.bf16.mxu0 %vm796_vm0, %v2820_v22  ;;  %2173 = vmatprep.mubr.msk.bf16.mxu1 %vm796_vm0, %v2823_v23 }
  0xc2   : > { %1129 = vmatmul.mubr.bf16.gmra.mrb[76].mxu0 %v2822_v24  ;;  %1329 = vmatmul.mubr.bf16.gmra.mrb[76].mxu1 %v2825_v25 }
  0xc3   : > { %2149 = vmatprep.mubr.msk.bf16.mxu0 %vm796_vm0, %v2826_v26  ;;  %2174 = vmatprep.mubr.msk.bf16.mxu1 %vm796_vm0, %v2829_v27 }
  0xca   : > { %1137 = vmatmul.mubr.bf16.gmra.mrb[80].mxu0 %v2828_v28  ;;  %1337 = vmatmul.mubr.bf16.gmra.mrb[80].mxu1 %v2831_v29 }
  0xcb   : > { %2150 = vmatprep.mubr.msk.bf16.mxu0 %vm796_vm0, %v2832_v30  ;;  %2175 = vmatprep.mubr.msk.bf16.mxu1 %vm796_vm0, %v2835_v31 }
  0xd2   : > { %1145 = vmatmul.mubr.bf16.gmra.mrb[84].mxu0 %v2834_v32  ;;  %1345 = vmatmul.mubr.bf16.gmra.mrb[84].mxu1 %v2837_v33 }
  0xd3   : > { %2151 = vmatprep.mubr.msk.bf16.mxu0 %vm796_vm0, %v2838_v34  ;;  %2176 = vmatprep.mubr.msk.bf16.mxu1 %vm796_vm0, %v2841_v35 }
  0xda   : > { %1153 = vmatmul.mubr.bf16.gmra.mrb[88].mxu0 %v2840_v36  ;;  %1353 = vmatmul.mubr.bf16.gmra.mrb[88].mxu1 %v2843_v37 }
  0xdb   : > { %2152 = vmatprep.mubr.msk.bf16.mxu0 %vm796_vm0, %v2844_v38  ;;  %2177 = vmatprep.mubr.msk.bf16.mxu1 %vm796_vm0, %v2847_v39 }
  0xe2   : > { %1161 = vmatmul.mubr.bf16.gmra.mrb[92].mxu0 %v2846_v40  ;;  %1361 = vmatmul.mubr.bf16.gmra.mrb[92].mxu1 %v2849_v41 }
  0xe3   : > { %2153 = vmatprep.mubr.msk.bf16.mxu0 %vm796_vm0, %v2850_v42 }
  0xea   : > { %1169 = vmatmul.mubr.bf16.gmra.mrb[96].mxu0 %v2852_v43 }
  0xfd   : > { %v978_v45 = vpop.f32.mrb[0].mxu0  ;;  %v1178_v46 = vpop.f32.mrb[0].mxu1 }
  0xfe   : > { %v979_v47 = vadd.f32 %v3075_v44, %v978_v45  ;;  %v980_v48 = vpop.f32.mrb[1].mxu0  ;;  %v1179_v49 = vadd.f32 %v3075_v44, %v1178_v46  ;;  %v1180_v50 = vpop.f32.mrb[1].mxu1 }
  0xff   : > { %v981_v51 = vpop.f32.mrb[2].mxu0  ;;  %v1181_v52 = vpop.f32.mrb[2].mxu1 }
 0x100   : > { %v982_v53 = vadd.f32 %v3075_v44, %v981_v51  ;;  %v983_v54 = vpop.f32.mrb[3].mxu0  ;;  %v1419_v55 = vmax.f32 %v1179_v49, 0.0  ;;  %v1182_v56 = vadd.f32 %v3075_v44, %v1181_v52  ;;  %v1183_v57 = vpop.f32.mrb[3].mxu1  ;;  %v1369_v58 = vmax.f32 %v979_v47, 0.0 }
 0x102   : > { %v1370_v59 = vmax.f32 %v982_v53, 0.0  ;;  %v1420_v60 = vmax.f32 %v1182_v56, 0.0 }
 0x104   : > { %v2380_v61 = vpack.c.bf16 %v1370_v59, %v1369_v58  ;;  %v2505_v62 = vpack.c.bf16 %v1420_v60, %v1419_v55 }
 0x105   : > { %v986_v63 = vpop.f32.mrb[4].mxu0  ;;  %v1186_v0 = vpop.f32.mrb[4].mxu1 }
 0x106   : > { %2381 = vst [vmem:[%s3085_s17] sm:$0xff] %v2380_v61   ;;  %2646 = vst [vmem:[%s3085_s17 + $0xc8] sm:$0xff] %v2505_v62   ;;  %v987_v1 = vadd.f32 %v3075_v44, %v986_v63  ;;  %v988_v2 = vpop.f32.mrb[5].mxu0  ;;  %v1187_v3 = vadd.f32 %v3075_v44, %v1186_v0  ;;  %v1188_v4 = vpop.f32.mrb[5].mxu1 }
 0x107   : > { %v989_v5 = vpop.f32.mrb[6].mxu0  ;;  %v1189_v6 = vpop.f32.mrb[6].mxu1 }
 0x108   : > { %v990_v7 = vadd.f32 %v3075_v44, %v989_v5  ;;  %v991_v8 = vpop.f32.mrb[7].mxu0  ;;  %v1421_v9 = vmax.f32 %v1187_v3, 0.0  ;;  %v1190_v10 = vadd.f32 %v3075_v44, %v1189_v6  ;;  %v1191_v11 = vpop.f32.mrb[7].mxu1  ;;  %v1371_v12 = vmax.f32 %v987_v1, 0.0 }
 0x10a   : > { %v1372_v13 = vmax.f32 %v990_v7, 0.0  ;;  %v1422_v14 = vmax.f32 %v1190_v10, 0.0 }
 0x10c   : > { %v2385_v15 = vpack.c.bf16 %v1372_v13, %v1371_v12  ;;  %v2510_v16 = vpack.c.bf16 %v1422_v14, %v1421_v9 }
 0x10d   : > { %v994_v17 = vpop.f32.mrb[8].mxu0  ;;  %v1194_v18 = vpop.f32.mrb[8].mxu1 }
 0x10e   : > { %2622 = vst [vmem:[%s3085_s17 + $0x8] sm:$0xff] %v2385_v15   ;;  %2647 = vst [vmem:[%s3085_s17 + $0xd0] sm:$0xff] %v2510_v16   ;;  %v995_v19 = vadd.f32 %v3075_v44, %v994_v17  ;;  %v996_v20 = vpop.f32.mrb[9].mxu0  ;;  %v1195_v21 = vadd.f32 %v3075_v44, %v1194_v18  ;;  %v1196_v22 = vpop.f32.mrb[9].mxu1 }
 0x10f   : > { %v997_v23 = vpop.f32.mrb[10].mxu0  ;;  %v1197_v24 = vpop.f32.mrb[10].mxu1 }
 0x110   : > { %v998_v25 = vadd.f32 %v3075_v44, %v997_v23  ;;  %v999_v26 = vpop.f32.mrb[11].mxu0  ;;  %v1423_v27 = vmax.f32 %v1195_v21, 0.0  ;;  %v1198_v28 = vadd.f32 %v3075_v44, %v1197_v24  ;;  %v1199_v29 = vpop.f32.mrb[11].mxu1  ;;  %v1373_v30 = vmax.f32 %v995_v19, 0.0 }
 0x112   : > { %v1374_v31 = vmax.f32 %v998_v25, 0.0  ;;  %v1424_v32 = vmax.f32 %v1198_v28, 0.0 }
 0x114   : > { %v2390_v33 = vpack.c.bf16 %v1374_v31, %v1373_v30  ;;  %v2515_v34 = vpack.c.bf16 %v1424_v32, %v1423_v27 }
 0x115   : > { %v1002_v35 = vpop.f32.mrb[12].mxu0  ;;  %v1202_v36 = vpop.f32.mrb[12].mxu1 }
 0x116   : > { %2623 = vst [vmem:[%s3085_s17 + $0x10] sm:$0xff] %v2390_v33   ;;  %2648 = vst [vmem:[%s3085_s17 + $0xd8] sm:$0xff] %v2515_v34   ;;  %v1003_v37 = vadd.f32 %v3075_v44, %v1002_v35  ;;  %v1004_v38 = vpop.f32.mrb[13].mxu0  ;;  %v1203_v39 = vadd.f32 %v3075_v44, %v1202_v36  ;;  %v1204_v40 = vpop.f32.mrb[13].mxu1 }
 0x117   : > { %v1005_v41 = vpop.f32.mrb[14].mxu0  ;;  %v1205_v42 = vpop.f32.mrb[14].mxu1 }
 0x118   : > { %v1006_v43 = vadd.f32 %v3075_v44, %v1005_v41  ;;  %v1007_v45 = vpop.f32.mrb[15].mxu0  ;;  %v1425_v46 = vmax.f32 %v1203_v39, 0.0  ;;  %v1206_v47 = vadd.f32 %v3075_v44, %v1205_v42  ;;  %v1207_v48 = vpop.f32.mrb[15].mxu1  ;;  %v1375_v49 = vmax.f32 %v1003_v37, 0.0 }
 0x11a   : > { %v1376_v50 = vmax.f32 %v1006_v43, 0.0  ;;  %v1426_v51 = vmax.f32 %v1206_v47, 0.0 }
 0x11c   : > { %v2395_v52 = vpack.c.bf16 %v1376_v50, %v1375_v49  ;;  %v2520_v53 = vpack.c.bf16 %v1426_v51, %v1425_v46 }
 0x11d   : > { %v1010_v54 = vpop.f32.mrb[16].mxu0  ;;  %v1210_v55 = vpop.f32.mrb[16].mxu1 }
 0x11e   : > { %2624 = vst [vmem:[%s3085_s17 + $0x18] sm:$0xff] %v2395_v52   ;;  %2649 = vst [vmem:[%s3085_s17 + $0xe0] sm:$0xff] %v2520_v53   ;;  %v1011_v56 = vadd.f32 %v3075_v44, %v1010_v54  ;;  %v1012_v57 = vpop.f32.mrb[17].mxu0  ;;  %v1211_v58 = vadd.f32 %v3075_v44, %v1210_v55  ;;  %v1212_v59 = vpop.f32.mrb[17].mxu1 }
 0x11f   : > { %v1013_v60 = vpop.f32.mrb[18].mxu0  ;;  %v1213_v61 = vpop.f32.mrb[18].mxu1 }
 0x120   : > { %v1014_v62 = vadd.f32 %v3075_v44, %v1013_v60  ;;  %v1015_v63 = vpop.f32.mrb[19].mxu0  ;;  %v1427_v0 = vmax.f32 %v1211_v58, 0.0  ;;  %v1214_v1 = vadd.f32 %v3075_v44, %v1213_v61  ;;  %v1215_v2 = vpop.f32.mrb[19].mxu1  ;;  %v1377_v3 = vmax.f32 %v1011_v56, 0.0 }
 0x122   : > { %v1378_v4 = vmax.f32 %v1014_v62, 0.0  ;;  %v1428_v5 = vmax.f32 %v1214_v1, 0.0 }
 0x124   : > { %v2400_v6 = vpack.c.bf16 %v1378_v4, %v1377_v3  ;;  %v2525_v7 = vpack.c.bf16 %v1428_v5, %v1427_v0 }
 0x125   : > { %v1018_v8 = vpop.f32.mrb[20].mxu0  ;;  %v1218_v9 = vpop.f32.mrb[20].mxu1 }
 0x126   : > { %2625 = vst [vmem:[%s3085_s17 + $0x20] sm:$0xff] %v2400_v6   ;;  %2650 = vst [vmem:[%s3085_s17 + $0xe8] sm:$0xff] %v2525_v7   ;;  %v1019_v10 = vadd.f32 %v3075_v44, %v1018_v8  ;;  %v1020_v11 = vpop.f32.mrb[21].mxu0  ;;  %v1219_v12 = vadd.f32 %v3075_v44, %v1218_v9  ;;  %v1220_v13 = vpop.f32.mrb[21].mxu1 }
 0x127   : > { %v1021_v14 = vpop.f32.mrb[22].mxu0  ;;  %v1221_v15 = vpop.f32.mrb[22].mxu1 }
 0x128   : > { %v1022_v16 = vadd.f32 %v3075_v44, %v1021_v14  ;;  %v1023_v17 = vpop.f32.mrb[23].mxu0  ;;  %v1429_v18 = vmax.f32 %v1219_v12, 0.0  ;;  %v1222_v19 = vadd.f32 %v3075_v44, %v1221_v15  ;;  %v1223_v20 = vpop.f32.mrb[23].mxu1  ;;  %v1379_v21 = vmax.f32 %v1019_v10, 0.0 }
 0x12a   : > { %v1380_v22 = vmax.f32 %v1022_v16, 0.0  ;;  %v1430_v23 = vmax.f32 %v1222_v19, 0.0 }
 0x12c   : > { %v2405_v24 = vpack.c.bf16 %v1380_v22, %v1379_v21  ;;  %v2530_v25 = vpack.c.bf16 %v1430_v23, %v1429_v18 }
 0x12d   : > { %v1026_v26 = vpop.f32.mrb[24].mxu0  ;;  %v1226_v27 = vpop.f32.mrb[24].mxu1 }
 0x12e   : > { %2626 = vst [vmem:[%s3085_s17 + $0x28] sm:$0xff] %v2405_v24   ;;  %2651 = vst [vmem:[%s3085_s17 + $0xf0] sm:$0xff] %v2530_v25   ;;  %v1027_v28 = vadd.f32 %v3075_v44, %v1026_v26  ;;  %v1028_v29 = vpop.f32.mrb[25].mxu0  ;;  %v1227_v30 = vadd.f32 %v3075_v44, %v1226_v27  ;;  %v1228_v31 = vpop.f32.mrb[25].mxu1 }
 0x12f   : > { %v1029_v32 = vpop.f32.mrb[26].mxu0  ;;  %v1229_v33 = vpop.f32.mrb[26].mxu1 }
 0x130   : > { %v1030_v34 = vadd.f32 %v3075_v44, %v1029_v32  ;;  %v1031_v35 = vpop.f32.mrb[27].mxu0  ;;  %v1431_v36 = vmax.f32 %v1227_v30, 0.0  ;;  %v1230_v37 = vadd.f32 %v3075_v44, %v1229_v33  ;;  %v1231_v38 = vpop.f32.mrb[27].mxu1  ;;  %v1381_v39 = vmax.f32 %v1027_v28, 0.0 }
 0x132   : > { %v1382_v40 = vmax.f32 %v1030_v34, 0.0  ;;  %v1432_v41 = vmax.f32 %v1230_v37, 0.0 }
 0x134   : > { %v2410_v42 = vpack.c.bf16 %v1382_v40, %v1381_v39  ;;  %v2535_v43 = vpack.c.bf16 %v1432_v41, %v1431_v36 }
 0x135   : > { %v1034_v45 = vpop.f32.mrb[28].mxu0  ;;  %v1234_v46 = vpop.f32.mrb[28].mxu1 }
 0x136   : > { %2627 = vst [vmem:[%s3085_s17 + $0x30] sm:$0xff] %v2410_v42   ;;  %2652 = vst [vmem:[%s3085_s17 + $0xf8] sm:$0xff] %v2535_v43   ;;  %v1035_v47 = vadd.f32 %v3075_v44, %v1034_v45  ;;  %v1036_v48 = vpop.f32.mrb[29].mxu0  ;;  %v1235_v49 = vadd.f32 %v3075_v44, %v1234_v46  ;;  %v1236_v50 = vpop.f32.mrb[29].mxu1 }
 0x137   : > { %v1037_v51 = vpop.f32.mrb[30].mxu0  ;;  %v1237_v52 = vpop.f32.mrb[30].mxu1 }
 0x138   : > { %v1038_v53 = vadd.f32 %v3075_v44, %v1037_v51  ;;  %v1039_v54 = vpop.f32.mrb[31].mxu0  ;;  %v1433_v55 = vmax.f32 %v1235_v49, 0.0  ;;  %v1238_v56 = vadd.f32 %v3075_v44, %v1237_v52  ;;  %v1239_v57 = vpop.f32.mrb[31].mxu1  ;;  %v1383_v58 = vmax.f32 %v1035_v47, 0.0 }
 0x13a   : > { %v1384_v59 = vmax.f32 %v1038_v53, 0.0  ;;  %v1434_v60 = vmax.f32 %v1238_v56, 0.0 }
 0x13c   : > { %v2415_v61 = vpack.c.bf16 %v1384_v59, %v1383_v58  ;;  %v2540_v62 = vpack.c.bf16 %v1434_v60, %v1433_v55 }
 0x13d   : > { %v1042_v63 = vpop.f32.mrb[32].mxu0  ;;  %v1242_v0 = vpop.f32.mrb[32].mxu1 }
 0x13e   : > { %2628 = vst [vmem:[%s3085_s17 + $0x38] sm:$0xff] %v2415_v61   ;;  %2653 = vst [vmem:[%s3085_s17 + $0x100] sm:$0xff] %v2540_v62   ;;  %v1043_v1 = vadd.f32 %v3075_v44, %v1042_v63  ;;  %v1044_v2 = vpop.f32.mrb[33].mxu0  ;;  %v1243_v3 = vadd.f32 %v3075_v44, %v1242_v0  ;;  %v1244_v4 = vpop.f32.mrb[33].mxu1 }
 0x13f   : > { %v1045_v5 = vpop.f32.mrb[34].mxu0  ;;  %v1245_v6 = vpop.f32.mrb[34].mxu1 }
 0x140   : > { %v1046_v7 = vadd.f32 %v3075_v44, %v1045_v5  ;;  %v1047_v8 = vpop.f32.mrb[35].mxu0  ;;  %v1435_v9 = vmax.f32 %v1243_v3, 0.0  ;;  %v1246_v10 = vadd.f32 %v3075_v44, %v1245_v6  ;;  %v1247_v11 = vpop.f32.mrb[35].mxu1  ;;  %v1385_v12 = vmax.f32 %v1043_v1, 0.0 }
 0x142   : > { %v1386_v13 = vmax.f32 %v1046_v7, 0.0  ;;  %v1436_v14 = vmax.f32 %v1246_v10, 0.0 }
 0x144   : > { %v2420_v15 = vpack.c.bf16 %v1386_v13, %v1385_v12  ;;  %v2545_v16 = vpack.c.bf16 %v1436_v14, %v1435_v9 }
 0x145   : > { %v1050_v17 = vpop.f32.mrb[36].mxu0  ;;  %v1250_v18 = vpop.f32.mrb[36].mxu1 }
 0x146   : > { %2629 = vst [vmem:[%s3085_s17 + $0x40] sm:$0xff] %v2420_v15   ;;  %2654 = vst [vmem:[%s3085_s17 + $0x108] sm:$0xff] %v2545_v16   ;;  %v1051_v19 = vadd.f32 %v3075_v44, %v1050_v17  ;;  %v1052_v20 = vpop.f32.mrb[37].mxu0  ;;  %v1251_v21 = vadd.f32 %v3075_v44, %v1250_v18  ;;  %v1252_v22 = vpop.f32.mrb[37].mxu1 }
 0x147   : > { %v1053_v23 = vpop.f32.mrb[38].mxu0  ;;  %v1253_v24 = vpop.f32.mrb[38].mxu1 }
 0x148   : > { %v1054_v25 = vadd.f32 %v3075_v44, %v1053_v23  ;;  %v1055_v26 = vpop.f32.mrb[39].mxu0  ;;  %v1437_v27 = vmax.f32 %v1251_v21, 0.0  ;;  %v1254_v28 = vadd.f32 %v3075_v44, %v1253_v24  ;;  %v1255_v29 = vpop.f32.mrb[39].mxu1  ;;  %v1387_v30 = vmax.f32 %v1051_v19, 0.0 }
 0x14a   : > { %v1388_v31 = vmax.f32 %v1054_v25, 0.0  ;;  %v1438_v32 = vmax.f32 %v1254_v28, 0.0 }
 0x14c   : > { %v2425_v33 = vpack.c.bf16 %v1388_v31, %v1387_v30  ;;  %v2550_v34 = vpack.c.bf16 %v1438_v32, %v1437_v27 }
 0x14d   : > { %v1058_v35 = vpop.f32.mrb[40].mxu0  ;;  %v1258_v36 = vpop.f32.mrb[40].mxu1 }
 0x14e   : > { %2630 = vst [vmem:[%s3085_s17 + $0x48] sm:$0xff] %v2425_v33   ;;  %2655 = vst [vmem:[%s3085_s17 + $0x110] sm:$0xff] %v2550_v34   ;;  %v1059_v37 = vadd.f32 %v3075_v44, %v1058_v35  ;;  %v1060_v38 = vpop.f32.mrb[41].mxu0  ;;  %v1259_v39 = vadd.f32 %v3075_v44, %v1258_v36  ;;  %v1260_v40 = vpop.f32.mrb[41].mxu1 }
 0x14f   : > { %v1061_v41 = vpop.f32.mrb[42].mxu0  ;;  %v1261_v42 = vpop.f32.mrb[42].mxu1 }
 0x150   : > { %v1062_v43 = vadd.f32 %v3075_v44, %v1061_v41  ;;  %v1063_v45 = vpop.f32.mrb[43].mxu0  ;;  %v1439_v46 = vmax.f32 %v1259_v39, 0.0  ;;  %v1262_v47 = vadd.f32 %v3075_v44, %v1261_v42  ;;  %v1263_v48 = vpop.f32.mrb[43].mxu1  ;;  %v1389_v49 = vmax.f32 %v1059_v37, 0.0 }
 0x152   : > { %v1390_v50 = vmax.f32 %v1062_v43, 0.0  ;;  %v1440_v51 = vmax.f32 %v1262_v47, 0.0 }
 0x154   : > { %v2430_v52 = vpack.c.bf16 %v1390_v50, %v1389_v49  ;;  %v2555_v53 = vpack.c.bf16 %v1440_v51, %v1439_v46 }
 0x155   : > { %v1066_v54 = vpop.f32.mrb[44].mxu0  ;;  %v1266_v55 = vpop.f32.mrb[44].mxu1 }
 0x156   : > { %2631 = vst [vmem:[%s3085_s17 + $0x50] sm:$0xff] %v2430_v52   ;;  %2656 = vst [vmem:[%s3085_s17 + $0x118] sm:$0xff] %v2555_v53   ;;  %v1067_v56 = vadd.f32 %v3075_v44, %v1066_v54  ;;  %v1068_v57 = vpop.f32.mrb[45].mxu0  ;;  %v1267_v58 = vadd.f32 %v3075_v44, %v1266_v55  ;;  %v1268_v59 = vpop.f32.mrb[45].mxu1 }
 0x157   : > { %v1069_v60 = vpop.f32.mrb[46].mxu0  ;;  %v1269_v61 = vpop.f32.mrb[46].mxu1 }
 0x158   : > { %v1070_v62 = vadd.f32 %v3075_v44, %v1069_v60  ;;  %v1071_v63 = vpop.f32.mrb[47].mxu0  ;;  %v1441_v0 = vmax.f32 %v1267_v58, 0.0  ;;  %v1270_v1 = vadd.f32 %v3075_v44, %v1269_v61  ;;  %v1271_v2 = vpop.f32.mrb[47].mxu1  ;;  %v1391_v3 = vmax.f32 %v1067_v56, 0.0 }
 0x15a   : > { %v1392_v4 = vmax.f32 %v1070_v62, 0.0  ;;  %v1442_v5 = vmax.f32 %v1270_v1, 0.0 }
 0x15c   : > { %v2435_v6 = vpack.c.bf16 %v1392_v4, %v1391_v3  ;;  %v2560_v7 = vpack.c.bf16 %v1442_v5, %v1441_v0 }
 0x15d   : > { %v1074_v8 = vpop.f32.mrb[48].mxu0  ;;  %v1274_v9 = vpop.f32.mrb[48].mxu1 }
 0x15e   : > { %2632 = vst [vmem:[%s3085_s17 + $0x58] sm:$0xff] %v2435_v6   ;;  %2657 = vst [vmem:[%s3085_s17 + $0x120] sm:$0xff] %v2560_v7   ;;  %v1075_v10 = vadd.f32 %v3075_v44, %v1074_v8  ;;  %v1076_v11 = vpop.f32.mrb[49].mxu0  ;;  %v1275_v12 = vadd.f32 %v3075_v44, %v1274_v9  ;;  %v1276_v13 = vpop.f32.mrb[49].mxu1 }
 0x15f   : > { %v1077_v14 = vpop.f32.mrb[50].mxu0  ;;  %v1277_v15 = vpop.f32.mrb[50].mxu1 }
 0x160   : > { %v1078_v16 = vadd.f32 %v3075_v44, %v1077_v14  ;;  %v1079_v17 = vpop.f32.mrb[51].mxu0  ;;  %v1443_v18 = vmax.f32 %v1275_v12, 0.0  ;;  %v1278_v19 = vadd.f32 %v3075_v44, %v1277_v15  ;;  %v1279_v20 = vpop.f32.mrb[51].mxu1  ;;  %v1393_v21 = vmax.f32 %v1075_v10, 0.0 }
 0x162   : > { %v1394_v22 = vmax.f32 %v1078_v16, 0.0  ;;  %v1444_v23 = vmax.f32 %v1278_v19, 0.0 }
 0x164   : > { %v2440_v24 = vpack.c.bf16 %v1394_v22, %v1393_v21  ;;  %v2565_v25 = vpack.c.bf16 %v1444_v23, %v1443_v18 }
 0x165   : > { %v1082_v26 = vpop.f32.mrb[52].mxu0  ;;  %v1282_v27 = vpop.f32.mrb[52].mxu1 }
 0x166   : > { %2633 = vst [vmem:[%s3085_s17 + $0x60] sm:$0xff] %v2440_v24   ;;  %2658 = vst [vmem:[%s3085_s17 + $0x128] sm:$0xff] %v2565_v25   ;;  %v1083_v28 = vadd.f32 %v3075_v44, %v1082_v26  ;;  %v1084_v29 = vpop.f32.mrb[53].mxu0  ;;  %v1283_v30 = vadd.f32 %v3075_v44, %v1282_v27  ;;  %v1284_v31 = vpop.f32.mrb[53].mxu1 }
 0x167   : > { %v1085_v32 = vpop.f32.mrb[54].mxu0  ;;  %v1285_v33 = vpop.f32.mrb[54].mxu1 }
 0x168   : > { %v1086_v34 = vadd.f32 %v3075_v44, %v1085_v32  ;;  %v1087_v35 = vpop.f32.mrb[55].mxu0  ;;  %v1445_v36 = vmax.f32 %v1283_v30, 0.0  ;;  %v1286_v37 = vadd.f32 %v3075_v44, %v1285_v33  ;;  %v1287_v38 = vpop.f32.mrb[55].mxu1  ;;  %v1395_v39 = vmax.f32 %v1083_v28, 0.0 }
 0x16a   : > { %v1396_v40 = vmax.f32 %v1086_v34, 0.0  ;;  %v1446_v41 = vmax.f32 %v1286_v37, 0.0 }
 0x16c   : > { %v2445_v42 = vpack.c.bf16 %v1396_v40, %v1395_v39  ;;  %v2570_v43 = vpack.c.bf16 %v1446_v41, %v1445_v36 }
 0x16d   : > { %v1090_v45 = vpop.f32.mrb[56].mxu0  ;;  %v1290_v46 = vpop.f32.mrb[56].mxu1 }
 0x16e   : > { %2634 = vst [vmem:[%s3085_s17 + $0x68] sm:$0xff] %v2445_v42   ;;  %2659 = vst [vmem:[%s3085_s17 + $0x130] sm:$0xff] %v2570_v43   ;;  %v1091_v47 = vadd.f32 %v3075_v44, %v1090_v45  ;;  %v1092_v48 = vpop.f32.mrb[57].mxu0  ;;  %v1291_v49 = vadd.f32 %v3075_v44, %v1290_v46  ;;  %v1292_v50 = vpop.f32.mrb[57].mxu1 }
 0x16f   : > { %v1093_v51 = vpop.f32.mrb[58].mxu0  ;;  %v1293_v52 = vpop.f32.mrb[58].mxu1 }
 0x170   : > { %v1094_v53 = vadd.f32 %v3075_v44, %v1093_v51  ;;  %v1095_v54 = vpop.f32.mrb[59].mxu0  ;;  %v1447_v55 = vmax.f32 %v1291_v49, 0.0  ;;  %v1294_v56 = vadd.f32 %v3075_v44, %v1293_v52  ;;  %v1295_v57 = vpop.f32.mrb[59].mxu1  ;;  %v1397_v58 = vmax.f32 %v1091_v47, 0.0 }
 0x172   : > { %v1398_v59 = vmax.f32 %v1094_v53, 0.0  ;;  %v1448_v60 = vmax.f32 %v1294_v56, 0.0 }
 0x174   : > { %v2450_v61 = vpack.c.bf16 %v1398_v59, %v1397_v58  ;;  %v2575_v62 = vpack.c.bf16 %v1448_v60, %v1447_v55 }
 0x175   : > { %v1098_v63 = vpop.f32.mrb[60].mxu0  ;;  %v1298_v0 = vpop.f32.mrb[60].mxu1 }
 0x176   : > { %2635 = vst [vmem:[%s3085_s17 + $0x70] sm:$0xff] %v2450_v61   ;;  %2660 = vst [vmem:[%s3085_s17 + $0x138] sm:$0xff] %v2575_v62   ;;  %v1099_v1 = vadd.f32 %v3075_v44, %v1098_v63  ;;  %v1100_v2 = vpop.f32.mrb[61].mxu0  ;;  %v1299_v3 = vadd.f32 %v3075_v44, %v1298_v0  ;;  %v1300_v4 = vpop.f32.mrb[61].mxu1 }
 0x177   : > { %v1101_v5 = vpop.f32.mrb[62].mxu0  ;;  %v1301_v6 = vpop.f32.mrb[62].mxu1 }
 0x178   : > { %v1102_v7 = vadd.f32 %v3075_v44, %v1101_v5  ;;  %v1103_v8 = vpop.f32.mrb[63].mxu0  ;;  %v1449_v9 = vmax.f32 %v1299_v3, 0.0  ;;  %v1302_v10 = vadd.f32 %v3075_v44, %v1301_v6  ;;  %v1303_v11 = vpop.f32.mrb[63].mxu1  ;;  %v1399_v12 = vmax.f32 %v1099_v1, 0.0 }
 0x17a   : > { %v1400_v13 = vmax.f32 %v1102_v7, 0.0  ;;  %v1450_v14 = vmax.f32 %v1302_v10, 0.0 }
 0x17c   : > { %v2455_v15 = vpack.c.bf16 %v1400_v13, %v1399_v12  ;;  %v2580_v16 = vpack.c.bf16 %v1450_v14, %v1449_v9 }
 0x17d   : > { %v1106_v17 = vpop.f32.mrb[64].mxu0  ;;  %v1306_v18 = vpop.f32.mrb[64].mxu1 }
 0x17e   : > { %2636 = vst [vmem:[%s3085_s17 + $0x78] sm:$0xff] %v2455_v15   ;;  %2661 = vst [vmem:[%s3085_s17 + $0x140] sm:$0xff] %v2580_v16   ;;  %v1107_v19 = vadd.f32 %v3075_v44, %v1106_v17  ;;  %v1108_v20 = vpop.f32.mrb[65].mxu0  ;;  %v1307_v21 = vadd.f32 %v3075_v44, %v1306_v18  ;;  %v1308_v22 = vpop.f32.mrb[65].mxu1 }
 0x17f   : > { %v1109_v23 = vpop.f32.mrb[66].mxu0  ;;  %v1309_v24 = vpop.f32.mrb[66].mxu1 }
 0x180   : > { %v1110_v25 = vadd.f32 %v3075_v44, %v1109_v23  ;;  %v1111_v26 = vpop.f32.mrb[67].mxu0  ;;  %v1451_v27 = vmax.f32 %v1307_v21, 0.0  ;;  %v1310_v28 = vadd.f32 %v3075_v44, %v1309_v24  ;;  %v1311_v29 = vpop.f32.mrb[67].mxu1  ;;  %v1401_v30 = vmax.f32 %v1107_v19, 0.0 }
 0x182   : > { %v1402_v31 = vmax.f32 %v1110_v25, 0.0  ;;  %v1452_v32 = vmax.f32 %v1310_v28, 0.0 }
 0x184   : > { %v2460_v33 = vpack.c.bf16 %v1402_v31, %v1401_v30  ;;  %v2585_v34 = vpack.c.bf16 %v1452_v32, %v1451_v27 }
 0x185   : > { %v1114_v35 = vpop.f32.mrb[68].mxu0  ;;  %v1314_v36 = vpop.f32.mrb[68].mxu1 }
 0x186   : > { %2637 = vst [vmem:[%s3085_s17 + $0x80] sm:$0xff] %v2460_v33   ;;  %2662 = vst [vmem:[%s3085_s17 + $0x148] sm:$0xff] %v2585_v34   ;;  %v1115_v37 = vadd.f32 %v3075_v44, %v1114_v35  ;;  %v1116_v38 = vpop.f32.mrb[69].mxu0  ;;  %v1315_v39 = vadd.f32 %v3075_v44, %v1314_v36  ;;  %v1316_v40 = vpop.f32.mrb[69].mxu1 }
 0x187   : > { %v1117_v41 = vpop.f32.mrb[70].mxu0  ;;  %v1317_v42 = vpop.f32.mrb[70].mxu1 }
 0x188   : > { %v1118_v43 = vadd.f32 %v3075_v44, %v1117_v41  ;;  %v1119_v45 = vpop.f32.mrb[71].mxu0  ;;  %v1453_v46 = vmax.f32 %v1315_v39, 0.0  ;;  %v1318_v47 = vadd.f32 %v3075_v44, %v1317_v42  ;;  %v1319_v48 = vpop.f32.mrb[71].mxu1  ;;  %v1403_v49 = vmax.f32 %v1115_v37, 0.0 }
 0x18a   : > { %v1404_v50 = vmax.f32 %v1118_v43, 0.0  ;;  %v1454_v51 = vmax.f32 %v1318_v47, 0.0 }
 0x18c   : > { %v2465_v52 = vpack.c.bf16 %v1404_v50, %v1403_v49  ;;  %v2590_v53 = vpack.c.bf16 %v1454_v51, %v1453_v46 }
 0x18d   : > { %v1122_v54 = vpop.f32.mrb[72].mxu0  ;;  %v1322_v55 = vpop.f32.mrb[72].mxu1 }
 0x18e   : > { %2638 = vst [vmem:[%s3085_s17 + $0x88] sm:$0xff] %v2465_v52   ;;  %2663 = vst [vmem:[%s3085_s17 + $0x150] sm:$0xff] %v2590_v53   ;;  %v1123_v56 = vadd.f32 %v3075_v44, %v1122_v54  ;;  %v1124_v57 = vpop.f32.mrb[73].mxu0  ;;  %v1323_v58 = vadd.f32 %v3075_v44, %v1322_v55  ;;  %v1324_v59 = vpop.f32.mrb[73].mxu1 }
 0x18f   : > { %v1125_v60 = vpop.f32.mrb[74].mxu0  ;;  %v1325_v61 = vpop.f32.mrb[74].mxu1 }
 0x190   : > { %v1126_v62 = vadd.f32 %v3075_v44, %v1125_v60  ;;  %v1127_v63 = vpop.f32.mrb[75].mxu0  ;;  %v1455_v0 = vmax.f32 %v1323_v58, 0.0  ;;  %v1326_v1 = vadd.f32 %v3075_v44, %v1325_v61  ;;  %v1327_v2 = vpop.f32.mrb[75].mxu1  ;;  %v1405_v3 = vmax.f32 %v1123_v56, 0.0 }
 0x192   : > { %v1406_v4 = vmax.f32 %v1126_v62, 0.0  ;;  %v1456_v5 = vmax.f32 %v1326_v1, 0.0 }
 0x194   : > { %v2470_v6 = vpack.c.bf16 %v1406_v4, %v1405_v3  ;;  %v2595_v7 = vpack.c.bf16 %v1456_v5, %v1455_v0 }
 0x195   : > { %v1130_v8 = vpop.f32.mrb[76].mxu0  ;;  %v1330_v9 = vpop.f32.mrb[76].mxu1 }
 0x196   : > { %2639 = vst [vmem:[%s3085_s17 + $0x90] sm:$0xff] %v2470_v6   ;;  %2664 = vst [vmem:[%s3085_s17 + $0x158] sm:$0xff] %v2595_v7   ;;  %v1131_v10 = vadd.f32 %v3075_v44, %v1130_v8  ;;  %v1132_v11 = vpop.f32.mrb[77].mxu0  ;;  %v1331_v12 = vadd.f32 %v3075_v44, %v1330_v9  ;;  %v1332_v13 = vpop.f32.mrb[77].mxu1 }
 0x197   : > { %v1133_v14 = vpop.f32.mrb[78].mxu0  ;;  %v1333_v15 = vpop.f32.mrb[78].mxu1 }
 0x198   : > { %v1134_v16 = vadd.f32 %v3075_v44, %v1133_v14  ;;  %v1135_v17 = vpop.f32.mrb[79].mxu0  ;;  %v1457_v18 = vmax.f32 %v1331_v12, 0.0  ;;  %v1334_v19 = vadd.f32 %v3075_v44, %v1333_v15  ;;  %v1335_v20 = vpop.f32.mrb[79].mxu1  ;;  %v1407_v21 = vmax.f32 %v1131_v10, 0.0 }
 0x19a   : > { %v1408_v22 = vmax.f32 %v1134_v16, 0.0  ;;  %v1458_v23 = vmax.f32 %v1334_v19, 0.0 }
 0x19c   : > { %v2475_v24 = vpack.c.bf16 %v1408_v22, %v1407_v21  ;;  %v2600_v25 = vpack.c.bf16 %v1458_v23, %v1457_v18 }
 0x19d   : > { %v1138_v26 = vpop.f32.mrb[80].mxu0  ;;  %v1338_v27 = vpop.f32.mrb[80].mxu1 }
 0x19e   : > { %2640 = vst [vmem:[%s3085_s17 + $0x98] sm:$0xff] %v2475_v24   ;;  %2665 = vst [vmem:[%s3085_s17 + $0x160] sm:$0xff] %v2600_v25   ;;  %v1139_v28 = vadd.f32 %v3075_v44, %v1138_v26  ;;  %v1140_v29 = vpop.f32.mrb[81].mxu0  ;;  %v1339_v30 = vadd.f32 %v3075_v44, %v1338_v27  ;;  %v1340_v31 = vpop.f32.mrb[81].mxu1 }
 0x19f   : > { %v1141_v32 = vpop.f32.mrb[82].mxu0  ;;  %v1341_v33 = vpop.f32.mrb[82].mxu1 }
 0x1a0   : > { %v1142_v34 = vadd.f32 %v3075_v44, %v1141_v32  ;;  %v1143_v35 = vpop.f32.mrb[83].mxu0  ;;  %v1459_v36 = vmax.f32 %v1339_v30, 0.0  ;;  %v1342_v37 = vadd.f32 %v3075_v44, %v1341_v33  ;;  %v1343_v38 = vpop.f32.mrb[83].mxu1  ;;  %v1409_v39 = vmax.f32 %v1139_v28, 0.0 }
 0x1a2   : > { %v1410_v40 = vmax.f32 %v1142_v34, 0.0  ;;  %v1460_v41 = vmax.f32 %v1342_v37, 0.0 }
 0x1a4   : > { %v2480_v42 = vpack.c.bf16 %v1410_v40, %v1409_v39  ;;  %v2605_v43 = vpack.c.bf16 %v1460_v41, %v1459_v36 }
 0x1a5   : > { %v1146_v45 = vpop.f32.mrb[84].mxu0  ;;  %v1346_v46 = vpop.f32.mrb[84].mxu1 }
 0x1a6   : > { %2641 = vst [vmem:[%s3085_s17 + $0xa0] sm:$0xff] %v2480_v42   ;;  %2666 = vst [vmem:[%s3085_s17 + $0x168] sm:$0xff] %v2605_v43   ;;  %v1147_v47 = vadd.f32 %v3075_v44, %v1146_v45  ;;  %v1148_v48 = vpop.f32.mrb[85].mxu0  ;;  %v1347_v49 = vadd.f32 %v3075_v44, %v1346_v46  ;;  %v1348_v50 = vpop.f32.mrb[85].mxu1 }
 0x1a7   : > { %v1149_v51 = vpop.f32.mrb[86].mxu0  ;;  %v1349_v52 = vpop.f32.mrb[86].mxu1 }
 0x1a8   : > { %v1150_v53 = vadd.f32 %v3075_v44, %v1149_v51  ;;  %v1151_v54 = vpop.f32.mrb[87].mxu0  ;;  %v1461_v55 = vmax.f32 %v1347_v49, 0.0  ;;  %v1350_v56 = vadd.f32 %v3075_v44, %v1349_v52  ;;  %v1351_v57 = vpop.f32.mrb[87].mxu1  ;;  %v1411_v58 = vmax.f32 %v1147_v47, 0.0 }
 0x1aa   : > { %v1412_v59 = vmax.f32 %v1150_v53, 0.0  ;;  %v1462_v60 = vmax.f32 %v1350_v56, 0.0 }
 0x1ac   : > { %v2485_v61 = vpack.c.bf16 %v1412_v59, %v1411_v58  ;;  %v2610_v62 = vpack.c.bf16 %v1462_v60, %v1461_v55 }
 0x1ad   : > { %v1154_v63 = vpop.f32.mrb[88].mxu0  ;;  %v1354_v0 = vpop.f32.mrb[88].mxu1 }
 0x1ae   : > { %2642 = vst [vmem:[%s3085_s17 + $0xa8] sm:$0xff] %v2485_v61   ;;  %2667 = vst [vmem:[%s3085_s17 + $0x170] sm:$0xff] %v2610_v62   ;;  %v1155_v1 = vadd.f32 %v3075_v44, %v1154_v63  ;;  %v1156_v2 = vpop.f32.mrb[89].mxu0  ;;  %v1355_v3 = vadd.f32 %v3075_v44, %v1354_v0  ;;  %v1356_v4 = vpop.f32.mrb[89].mxu1 }
 0x1af   : > { %v1157_v5 = vpop.f32.mrb[90].mxu0  ;;  %v1357_v6 = vpop.f32.mrb[90].mxu1 }
 0x1b0   : > { %v1158_v7 = vadd.f32 %v3075_v44, %v1157_v5  ;;  %v1159_v8 = vpop.f32.mrb[91].mxu0  ;;  %v1463_v9 = vmax.f32 %v1355_v3, 0.0  ;;  %v1358_v10 = vadd.f32 %v3075_v44, %v1357_v6  ;;  %v1359_v11 = vpop.f32.mrb[91].mxu1  ;;  %v1413_v12 = vmax.f32 %v1155_v1, 0.0 }
 0x1b2   : > { %v1414_v13 = vmax.f32 %v1158_v7, 0.0  ;;  %v1464_v14 = vmax.f32 %v1358_v10, 0.0 }
 0x1b4   : > { %v2490_v15 = vpack.c.bf16 %v1414_v13, %v1413_v12  ;;  %v2615_v16 = vpack.c.bf16 %v1464_v14, %v1463_v9 }
 0x1b5   : > { %v1162_v17 = vpop.f32.mrb[92].mxu0  ;;  %v1362_v18 = vpop.f32.mrb[92].mxu1 }
 0x1b6   : > { %2643 = vst [vmem:[%s3085_s17 + $0xb0] sm:$0xff] %v2490_v15   ;;  %2668 = vst [vmem:[%s3085_s17 + $0x178] sm:$0xff] %v2615_v16   ;;  %v1163_v19 = vadd.f32 %v3075_v44, %v1162_v17  ;;  %v1164_v20 = vpop.f32.mrb[93].mxu0  ;;  %v1363_v21 = vadd.f32 %v3075_v44, %v1362_v18  ;;  %v1364_v22 = vpop.f32.mrb[93].mxu1 }
 0x1b7   : > { %v1165_v23 = vpop.f32.mrb[94].mxu0  ;;  %v1365_v24 = vpop.f32.mrb[94].mxu1 }
 0x1b8   : > { %v1166_v25 = vadd.f32 %v3075_v44, %v1165_v23  ;;  %v1167_v26 = vpop.f32.mrb[95].mxu0  ;;  %v1465_v27 = vmax.f32 %v1363_v21, 0.0  ;;  %v1366_v28 = vadd.f32 %v3075_v44, %v1365_v24  ;;  %v1367_v29 = vpop.f32.mrb[95].mxu1  ;;  %v1415_v30 = vmax.f32 %v1163_v19, 0.0 }
 0x1ba   : > { %v1416_v31 = vmax.f32 %v1166_v25, 0.0  ;;  %v1466_v32 = vmax.f32 %v1366_v28, 0.0 }
 0x1bc   : > { %v2495_v33 = vpack.c.bf16 %v1416_v31, %v1415_v30  ;;  %v2620_v34 = vpack.c.bf16 %v1466_v32, %v1465_v27 }
 0x1bd   : > { %v1170_v35 = vpop.f32.mrb[96].mxu0 }
 0x1be   : > { %2644 = vst [vmem:[%s3085_s17 + $0xb8] sm:$0xff] %v2495_v33   ;;  %2669 = vst [vmem:[%s3085_s17 + $0x180] sm:$0xff] %v2620_v34   ;;  %v1171_v36 = vadd.f32 %v3075_v44, %v1170_v35  ;;  %v1172_v37 = vpop.f32.mrb[97].mxu0 }
 0x1bf   : > { %v1173_v38 = vpop.f32.mrb[98].mxu0 }
 0x1c0   : > { %v1174_v39 = vadd.f32 %v3075_v44, %v1173_v38  ;;  %v1175_v40 = vpop.f32.mrb[99].mxu0  ;;  %v1417_v41 = vmax.f32 %v1171_v36, 0.0 }
 0x1c2   : > { %v1418_v42 = vmax.f32 %v1174_v39, 0.0 }
 0x1c4   : > { %v2500_v43 = vpack.c.bf16 %v1418_v42, %v1417_v41 }
 0x1c6   : > { %2645 = vst [vmem:[%s3085_s17 + $0xc0] sm:$0xff] %v2500_v43  }
 0x1c7 PF: > { %s13_s12 = sadd.s32 1, %s2859_s12  }
 0x1c8   : > { %p10_p4 = scmp.ge.s32.totalorder %s13_s12, 4  }
 0x1ca   :  { %12 = sbr.rel (!%p10_p4) target bundleno = 1 (0x1), region = 62 }

// kernel: net_forward.6
= control target key start
LH: loop header
LB: loop body
LE: loop exit
PB: predicated region body
PF: predicated region fallthrough
CT: control target
= control target key end

     0   :  { %s435_s6 = smov 0   ;;  %s568_s0 = inlined_call_operand.vmem [shape: bf16[2,14,2,14,256], index: 0, kind: input, shape index: {}]   ;;  %s569_s1 = inlined_call_operand.vmem [shape: bf16[2,14,14,32], index: 1, kind: output, shape index: {}]  }
   0x1 LB: > { %s398_s7 = sadd.s32 4294967295, %s423_s6   ;;  %p402_p0 = scmp.ge.s32.totalorder %s423_s6, 1  ;;  %s423_s6 = sphi %s435_s6, %s11_s6  }
   0x2   : > { %p87_p1 = scmp.lt.s32.totalorder %s423_s6, 3 }
   0x4   : > { %p88_p2 = pnand %p402_p0, %p87_p1 }
   0x5   : > { %p107_p3 = scmp.lt.s32.totalorder (!%p88_p2), %s398_s7, 1  ;;  %vm313_vm0 = vcmask (!%p88_p2), 257024   ;;  %vm315_vm1 = vcmask (!%p88_p2), 256000  }
   0x6   : > { %91 = sbr.rel (%p88_p2) target bundleno = 49 (0x31), region = 24 }
   0xd   : > { %s571_s7 = smov (!%p107_p3, %s398_s7), 1 }
   0xe   : > { %s407_s8 = smul.u32 448, %s571_s7 }
   0xf   : > { %s408_s12 = smul.u32 112, %s571_s7 }
  0x10   : > { %s446_s11 = scalar_lea.vmem %s568_s0, %s407_s8 }
  0x11   : > { %v117_v0 = vld [vmem:[%s446_s11] sm:$0xff]  ;;  %v119_v1 = vld [vmem:[%s446_s11 + $0x10] sm:$0xff]  ;;  %v118_v2 = vld [vmem:[%s446_s11 + $0x8] sm:$0x77]  ;;  %s463_s15 = scalar_lea.vmem %s569_s1, %s408_s12 }
  0x12   : > { %v173_v3 = vmax.bf16 %v119_v1, %v117_v0  ;;  %v120_v4 = vld [vmem:[%s446_s11 + $0x18] sm:$0x77]  ;;  %v121_v5 = vld [vmem:[%s446_s11 + $0x20] sm:$0xff]  ;;  %v123_v6 = vld [vmem:[%s446_s11 + $0x30] sm:$0xff] }
  0x13   : > { %v174_v7 = vmax.bf16 %v120_v4, %v118_v2  ;;  %v175_v8 = vmax.bf16 %v123_v6, %v121_v5  ;;  %v122_v9 = vld [vmem:[%s446_s11 + $0x28] sm:$0x77]  ;;  %v124_v10 = vld [vmem:[%s446_s11 + $0x38] sm:$0x77]  ;;  %v125_v11 = vld [vmem:[%s446_s11 + $0x40] sm:$0xff] }
  0x14   : > { %v229_v12 = vrot.slane %v173_v3, 4  ;;  %v176_v13 = vmax.bf16 %v124_v10, %v122_v9  ;;  %v127_v14 = vld [vmem:[%s446_s11 + $0x50] sm:$0xff]  ;;  %v126_v15 = vld [vmem:[%s446_s11 + $0x48] sm:$0x77]  ;;  %v128_v16 = vld [vmem:[%s446_s11 + $0x58] sm:$0x77] }
  0x15   : > { %v230_v17 = vrot.slane %v174_v7, 4  ;;  %v231_v18 = vrot.slane %v175_v8, 4  ;;  %v177_v19 = vmax.bf16 %v127_v14, %v125_v11  ;;  %v178_v20 = vmax.bf16 %v128_v16, %v126_v15  ;;  %v129_v21 = vld [vmem:[%s446_s11 + $0x60] sm:$0xff]  ;;  %v131_v22 = vld [vmem:[%s446_s11 + $0x70] sm:$0xff]  ;;  %v130_v23 = vld [vmem:[%s446_s11 + $0x68] sm:$0x77] }
  0x16   : > { %v285_v24 = vmax.bf16 %v229_v12, %v173_v3  ;;  %v232_v25 = vrot.slane %v176_v13, 4  ;;  %v179_v26 = vmax.bf16 %v131_v22, %v129_v21  ;;  %v132_v27 = vld [vmem:[%s446_s11 + $0x78] sm:$0x77]  ;;  %v133_v28 = vld [vmem:[%s446_s11 + $0x80] sm:$0xff]  ;;  %v135_v29 = vld [vmem:[%s446_s11 + $0x90] sm:$0xff] }
  0x17   : > { %v286_v30 = vmax.bf16 %v230_v17, %v174_v7  ;;  %v287_v31 = vmax.bf16 %v231_v18, %v175_v8  ;;  %v233_v32 = vrot.slane %v177_v19, 4  ;;  %v234_v33 = vrot.slane %v178_v20, 4  ;;  %v134_v34 = vld [vmem:[%s446_s11 + $0x88] sm:$0x77]  ;;  %v136_v35 = vld [vmem:[%s446_s11 + $0x98] sm:$0x77] }
  0x18   : > { %314 = vst.msk [vmem:[%s463_s15] sm:$0xf] %vm313_vm0, %v285_v24  ;;  %v288_v36 = vmax.bf16 %v232_v25, %v176_v13  ;;  %v235_v37 = vrot.slane %v179_v26, 4  ;;  %v180_v38 = vmax.bf16 %v132_v27, %v130_v23  ;;  %v181_v39 = vmax.bf16 %v135_v29, %v133_v28  ;;  %v137_v40 = vld [vmem:[%s446_s11 + $0xa0] sm:$0xff]  ;;  %v139_v41 = vld [vmem:[%s446_s11 + $0xb0] sm:$0xff] }
  0x19   : > { %v138_v42 = vld [vmem:[%s446_s11 + $0xa8] sm:$0x77]  ;;  %316 = vst.msk [vmem:[%s463_s15 + $0x4] sm:$0x7] %vm315_vm1, %v286_v30  ;;  %v289_v43 = vmax.bf16 %v233_v32, %v177_v19  ;;  %v290_v44 = vmax.bf16 %v234_v33, %v178_v20  ;;  %v182_v45 = vmax.bf16 %v136_v35, %v134_v34  ;;  %v183_v46 = vmax.bf16 %v139_v41, %v137_v40  ;;  %v140_v47 = vld [vmem:[%s446_s11 + $0xb8] sm:$0x77] }
  0x1a   : > { %317 = vst.msk [vmem:[%s463_s15 + $0x8] sm:$0xf] %vm313_vm0, %v287_v31  ;;  %v141_v48 = vld [vmem:[%s446_s11 + $0xc0] sm:$0xff]  ;;  %v143_v49 = vld [vmem:[%s446_s11 + $0xd0] sm:$0xff]  ;;  %v291_v50 = vmax.bf16 %v235_v37, %v179_v26  ;;  %v236_v51 = vrot.slane %v180_v38, 4  ;;  %v237_v52 = vrot.slane %v181_v39, 4  ;;  %v184_v53 = vmax.bf16 %v140_v47, %v138_v42 }
  0x1b   : > { %318 = vst.msk [vmem:[%s463_s15 + $0xc] sm:$0x7] %vm315_vm1, %v288_v36  ;;  %v142_v54 = vld [vmem:[%s446_s11 + $0xc8] sm:$0x77]  ;;  %v144_v55 = vld [vmem:[%s446_s11 + $0xd8] sm:$0x77]  ;;  %v185_v58 = vmax.bf16 %v143_v49, %v141_v48 }
  0x1c   : > { %319 = vst.msk [vmem:[%s463_s15 + $0x10] sm:$0xf] %vm313_vm0, %v289_v43  ;;  %v238_v56 = vrot.slane %v182_v45, 4  ;;  %v239_v57 = vrot.slane %v183_v46, 4  ;;  %v186_v59 = vmax.bf16 %v144_v55, %v142_v54  ;;  %v145_v60 = vld [vmem:[%s446_s11 + $0xe0] sm:$0xff]  ;;  %v147_v61 = vld [vmem:[%s446_s11 + $0xf0] sm:$0xff]  ;;  %v292_v63 = vmax.bf16 %v236_v51, %v180_v38 }
  0x1d   : > { %320 = vst.msk [vmem:[%s463_s15 + $0x14] sm:$0x7] %vm315_vm1, %v290_v44  ;;  %v146_v62 = vld [vmem:[%s446_s11 + $0xe8] sm:$0x77]  ;;  %v293_v0 = vmax.bf16 %v237_v52, %v181_v39  ;;  %v240_v1 = vrot.slane %v184_v53, 4  ;;  %v187_v2 = vmax.bf16 %v147_v61, %v145_v60  ;;  %v149_v4 = vld [vmem:[%s446_s11 + $0x100] sm:$0xff] }
  0x1e   : > { %321 = vst.msk [vmem:[%s463_s15 + $0x18] sm:$0xf] %vm313_vm0, %v291_v50  ;;  %v148_v3 = vld [vmem:[%s446_s11 + $0xf8] sm:$0x77]  ;;  %v151_v5 = vld [vmem:[%s446_s11 + $0x110] sm:$0xff]  ;;  %v294_v6 = vmax.bf16 %v238_v56, %v182_v45  ;;  %v295_v7 = vmax.bf16 %v239_v57, %v183_v46  ;;  %v241_v8 = vrot.slane %v185_v58, 4 }
  0x1f   : > { %v242_v9 = vrot.slane %v186_v59, 4  ;;  %v150_v10 = vld [vmem:[%s446_s11 + $0x108] sm:$0x77]  ;;  %v152_v11 = vld [vmem:[%s446_s11 + $0x118] sm:$0x77]  ;;  %v296_v12 = vmax.bf16 %v240_v1, %v184_v53  ;;  %v243_v13 = vrot.slane %v187_v2, 4  ;;  %v188_v14 = vmax.bf16 %v148_v3, %v146_v62 }
  0x20   : > { %322 = vst.msk [vmem:[%s463_s15 + $0x1c] sm:$0x7] %vm315_vm1, %v292_v63  ;;  %v189_v15 = vmax.bf16 %v151_v5, %v149_v4  ;;  %v153_v16 = vld [vmem:[%s446_s11 + $0x120] sm:$0xff]  ;;  %v155_v17 = vld [vmem:[%s446_s11 + $0x130] sm:$0xff]  ;;  %v154_v18 = vld [vmem:[%s446_s11 + $0x128] sm:$0x77]  ;;  %v297_v19 = vmax.bf16 %v241_v8, %v185_v58  ;;  %v190_v21 = vmax.bf16 %v152_v11, %v150_v10 }
  0x21   : > { %323 = vst.msk [vmem:[%s463_s15 + $0x20] sm:$0xf] %vm313_vm0, %v293_v0  ;;  %325 = vst.msk [vmem:[%s463_s15 + $0x28] sm:$0xf] %vm313_vm0, %v295_v7  ;;  %v298_v20 = vmax.bf16 %v242_v9, %v186_v59  ;;  %v191_v22 = vmax.bf16 %v155_v17, %v153_v16  ;;  %v156_v23 = vld [vmem:[%s446_s11 + $0x138] sm:$0x77]  ;;  %v299_v26 = vmax.bf16 %v243_v13, %v187_v2 }
  0x22   : > { %324 = vst.msk [vmem:[%s463_s15 + $0x24] sm:$0x7] %vm315_vm1, %v294_v6  ;;  %v157_v24 = vld [vmem:[%s446_s11 + $0x140] sm:$0xff]  ;;  %v159_v25 = vld [vmem:[%s446_s11 + $0x150] sm:$0xff]  ;;  %326 = vst.msk [vmem:[%s463_s15 + $0x2c] sm:$0x7] %vm315_vm1, %v296_v12  ;;  %v192_v29 = vmax.bf16 %v156_v23, %v154_v18 }
  0x23   : > { %v244_v27 = vrot.slane %v188_v14, 4  ;;  %v245_v28 = vrot.slane %v189_v15, 4  ;;  %v158_v30 = vld [vmem:[%s446_s11 + $0x148] sm:$0x77]  ;;  %v160_v31 = vld [vmem:[%s446_s11 + $0x158] sm:$0x77]  ;;  %v193_v34 = vmax.bf16 %v159_v25, %v157_v24 }
  0x24   : > { %327 = vst.msk [vmem:[%s463_s15 + $0x30] sm:$0xf] %vm313_vm0, %v297_v19  ;;  %v246_v32 = vrot.slane %v190_v21, 4  ;;  %v247_v33 = vrot.slane %v191_v22, 4  ;;  %v194_v35 = vmax.bf16 %v160_v31, %v158_v30  ;;  %v161_v36 = vld [vmem:[%s446_s11 + $0x160] sm:$0xff]  ;;  %v163_v37 = vld [vmem:[%s446_s11 + $0x170] sm:$0xff] }
  0x25   : > { %328 = vst.msk [vmem:[%s463_s15 + $0x34] sm:$0x7] %vm315_vm1, %v298_v20  ;;  %v162_v38 = vld [vmem:[%s446_s11 + $0x168] sm:$0x77]  ;;  %v300_v39 = vmax.bf16 %v244_v27, %v188_v14  ;;  %v301_v40 = vmax.bf16 %v245_v28, %v189_v15  ;;  %v248_v41 = vrot.slane %v192_v29, 4  ;;  %v195_v42 = vmax.bf16 %v163_v37, %v161_v36  ;;  %v165_v44 = vld [vmem:[%s446_s11 + $0x180] sm:$0xff] }
  0x26   : > { %329 = vst.msk [vmem:[%s463_s15 + $0x38] sm:$0xf] %vm313_vm0, %v299_v26  ;;  %v164_v43 = vld [vmem:[%s446_s11 + $0x178] sm:$0x77]  ;;  %v167_v45 = vld [vmem:[%s446_s11 + $0x190] sm:$0xff]  ;;  %v302_v46 = vmax.bf16 %v246_v32, %v190_v21  ;;  %v303_v47 = vmax.bf16 %v247_v33, %v191_v22  ;;  %v249_v48 = vrot.slane %v193_v34, 4 }
  0x27   : > { %v250_v49 = vrot.slane %v194_v35, 4  ;;  %v166_v50 = vld [vmem:[%s446_s11 + $0x188] sm:$0x77]  ;;  %v168_v51 = vld [vmem:[%s446_s11 + $0x198] sm:$0x77]  ;;  %v304_v52 = vmax.bf16 %v248_v41, %v192_v29  ;;  %v251_v53 = vrot.slane %v195_v42, 4  ;;  %v196_v54 = vmax.bf16 %v164_v43, %v162_v38 }
  0x28   : > { %330 = vst.msk [vmem:[%s463_s15 + $0x3c] sm:$0x7] %vm315_vm1, %v300_v39  ;;  %v197_v55 = vmax.bf16 %v167_v45, %v165_v44  ;;  %v169_v56 = vld [vmem:[%s446_s11 + $0x1a0] sm:$0xff]  ;;  %v171_v57 = vld [vmem:[%s446_s11 + $0x1b0] sm:$0xff]  ;;  %v170_v58 = vld [vmem:[%s446_s11 + $0x1a8] sm:$0x77]  ;;  %v305_v59 = vmax.bf16 %v249_v48, %v193_v34  ;;  %v198_v61 = vmax.bf16 %v168_v51, %v166_v50 }
  0x29   : > { %331 = vst.msk [vmem:[%s463_s15 + $0x40] sm:$0xf] %vm313_vm0, %v301_v40  ;;  %333 = vst.msk [vmem:[%s463_s15 + $0x48] sm:$0xf] %vm313_vm0, %v303_v47  ;;  %v306_v60 = vmax.bf16 %v250_v49, %v194_v35  ;;  %v199_v62 = vmax.bf16 %v171_v57, %v169_v56  ;;  %v172_v63 = vld [vmem:[%s446_s11 + $0x1b8] sm:$0x77]  ;;  %v307_v0 = vmax.bf16 %v251_v53, %v195_v42 }
  0x2a   : > { %332 = vst.msk [vmem:[%s463_s15 + $0x44] sm:$0x7] %vm315_vm1, %v302_v46  ;;  %334 = vst.msk [vmem:[%s463_s15 + $0x4c] sm:$0x7] %vm315_vm1, %v304_v52  ;;  %v252_v1 = vrot.slane %v196_v54, 4  ;;  %v253_v2 = vrot.slane %v197_v55, 4  ;;  %v200_v3 = vmax.bf16 %v172_v63, %v170_v58 }
  0x2b   : > { %335 = vst.msk [vmem:[%s463_s15 + $0x50] sm:$0xf] %vm313_vm0, %v305_v59  ;;  %v254_v4 = vrot.slane %v198_v61, 4  ;;  %v255_v5 = vrot.slane %v199_v62, 4  ;;  %337 = vst.msk [vmem:[%s463_s15 + $0x58] sm:$0xf] %vm313_vm0, %v307_v0 }
  0x2c   : > { %336 = vst.msk [vmem:[%s463_s15 + $0x54] sm:$0x7] %vm315_vm1, %v306_v60  ;;  %v308_v6 = vmax.bf16 %v252_v1, %v196_v54  ;;  %v309_v7 = vmax.bf16 %v253_v2, %v197_v55  ;;  %v256_v8 = vrot.slane %v200_v3, 4 }
  0x2d   : > { %v310_v9 = vmax.bf16 %v254_v4, %v198_v61  ;;  %v311_v10 = vmax.bf16 %v255_v5, %v199_v62 }
  0x2e   : > { %338 = vst.msk [vmem:[%s463_s15 + $0x5c] sm:$0x7] %vm315_vm1, %v308_v6  ;;  %v312_v11 = vmax.bf16 %v256_v8, %v200_v3 }
  0x2f   : > { %339 = vst.msk [vmem:[%s463_s15 + $0x60] sm:$0xf] %vm313_vm0, %v309_v7  ;;  %341 = vst.msk [vmem:[%s463_s15 + $0x68] sm:$0xf] %vm313_vm0, %v311_v10 }
  0x30   : > { %340 = vst.msk [vmem:[%s463_s15 + $0x64] sm:$0x7] %vm315_vm1, %v310_v9  ;;  %342 = vst.msk [vmem:[%s463_s15 + $0x6c] sm:$0x7] %vm315_vm1, %v312_v11 }
  0x31 PF: > { %s11_s6 = sadd.s32 1, %s423_s6  }
  0x32   : > { %p8_p4 = scmp.ge.s32.totalorder %s11_s6, 4  }
  0x34   :  { %10 = sbr.rel (!%p8_p4) target bundleno = 1 (0x1), region = 54 }

// kernel: net_forward.7
= control target key start
LH: loop header
LB: loop body
LE: loop exit
PB: predicated region body
PF: predicated region fallthrough
CT: control target
= control target key end

     0   :  { %v1599_v36 = vlaneseq  ;;  %v16521_v37 = vmov 1966171168   ;;  %s21656_s0 = inlined_call_operand.vmem [shape: bf16[2,6272], index: 0, kind: input, shape index: {}]   ;;  %s21657_s1 = inlined_call_operand.vmem [shape: bf16[6272,512], index: 1, kind: input, shape index: {}]   ;;  %s21658_s2 = inlined_call_operand.vmem [shape: f32[1,512], index: 2, kind: input, shape index: {}]   ;;  %s21659_s3 = inlined_call_operand.vmem [shape: bf16[512,10], index: 3, kind: input, shape index: {}]   ;;  %s21660_s4 = inlined_call_operand.vmem [shape: f32[1,10], index: 4, kind: input, shape index: {}]   ;;  %s21661_s5 = inlined_call_operand.hbm [shape: f32[2,10], index: 5, kind: output, shape index: {}]  }
   0x1   :  { %v14097_v0 = vld [vmem:[%s21657_s1 + $0x4] ss:$16 sps:$4 sm:$0xff]   ;;  %v14099_v1 = vld [vmem:[%s21657_s1 + $0xc] ss:$16 sps:$4 sm:$0xff]   ;;  %v14101_v2 = vld [vmem:[%s21657_s1] ss:$16 sps:$4 sm:$0xff]   ;;  %v1628_v38 = vunpack.c.l.s4 %v16521_v37 }
   0x2   :  { %9823 = vmatprep.subr.bf16.mxu0 %v14097_v0  ;;  %v14102_v3 = vld [vmem:[%s21657_s1 + $0x8] ss:$16 sps:$4 sm:$0xff]   ;;  %10848 = vmatprep.subr.bf16.mxu1 %v14099_v1  ;;  %v14103_v4 = vld [vmem:[%s21657_s1 + $0x24] ss:$16 sps:$4 sm:$0xff]   ;;  %v14105_v5 = vld [vmem:[%s21657_s1 + $0x2c] ss:$16 sps:$4 sm:$0xff]  }
   0x3   :  { %9824 = vmatpush1.bf16.msra.mxu0 %v14101_v2  ;;  %10849 = vmatpush1.bf16.msra.mxu1 %v14102_v3  ;;  %v14107_v6 = vld [vmem:[%s21657_s1 + $0x20] ss:$16 sps:$4 sm:$0xff]   ;;  %v14108_v7 = vld [vmem:[%s21657_s1 + $0x28] ss:$16 sps:$4 sm:$0xff]   ;;  %v14109_v8 = vld [vmem:[%s21657_s1 + $0x44] ss:$16 sps:$4 sm:$0xff]   ;;  %v1629_v43 = vunpack.c.0.s8 %v1628_v38 }
   0x4   :  { %9825 = vmatprep.subr.bf16.mxu0 %v14103_v4  ;;  %10850 = vmatprep.subr.bf16.mxu1 %v14105_v5  ;;  %v14111_v9 = vld [vmem:[%s21657_s1 + $0x4c] ss:$16 sps:$4 sm:$0xff]   ;;  %v14113_v10 = vld [vmem:[%s21657_s1 + $0x40] ss:$16 sps:$4 sm:$0xff]   ;;  %v14114_v11 = vld [vmem:[%s21657_s1 + $0x48] ss:$16 sps:$4 sm:$0xff]  }
   0x5   :  { %v14115_v12 = vld [vmem:[%s21657_s1 + $0x64] ss:$16 sps:$4 sm:$0xff]   ;;  %v14117_v13 = vld [vmem:[%s21657_s1 + $0x6c] ss:$16 sps:$4 sm:$0xff]   ;;  %v14119_v14 = vld [vmem:[%s21657_s1 + $0x60] ss:$16 sps:$4 sm:$0xff]  }
   0x6   :  { %v14120_v15 = vld [vmem:[%s21657_s1 + $0x68] ss:$16 sps:$4 sm:$0xff]   ;;  %v14121_v16 = vld [vmem:[%s21657_s1 + $0x84] ss:$16 sps:$4 sm:$0xff]   ;;  %v14123_v17 = vld [vmem:[%s21657_s1 + $0x8c] ss:$16 sps:$4 sm:$0xff]  }
   0x7   :  { %9826 = vmatpush1.bf16.msra.mxu0 %v14107_v6  ;;  %10851 = vmatpush1.bf16.msra.mxu1 %v14108_v7  ;;  %v14125_v18 = vld [vmem:[%s21657_s1 + $0x80] ss:$16 sps:$4 sm:$0xff]   ;;  %v14126_v19 = vld [vmem:[%s21657_s1 + $0x88] ss:$16 sps:$4 sm:$0xff]   ;;  %v14127_v20 = vld [vmem:[%s21657_s1 + $0xa4] ss:$16 sps:$4 sm:$0xff]  }
   0x8   :  { %9827 = vmatprep.subr.bf16.mxu0 %v14109_v8  ;;  %10852 = vmatprep.subr.bf16.mxu1 %v14111_v9  ;;  %v14129_v21 = vld [vmem:[%s21657_s1 + $0xac] ss:$16 sps:$4 sm:$0xff]   ;;  %v14131_v22 = vld [vmem:[%s21657_s1 + $0xa0] ss:$16 sps:$4 sm:$0xff]   ;;  %v14132_v23 = vld [vmem:[%s21657_s1 + $0xa8] ss:$16 sps:$4 sm:$0xff]  }
   0x9   :  { %v14133_v24 = vld [vmem:[%s21657_s1 + $0xc4] ss:$16 sps:$4 sm:$0xff]   ;;  %v14135_v25 = vld [vmem:[%s21657_s1 + $0xcc] ss:$16 sps:$4 sm:$0xff]   ;;  %v14137_v26 = vld [vmem:[%s21657_s1 + $0xc0] ss:$16 sps:$4 sm:$0xff]  }
   0xa   :  { %v14138_v27 = vld [vmem:[%s21657_s1 + $0xc8] ss:$16 sps:$4 sm:$0xff]   ;;  %v14139_v28 = vld [vmem:[%s21657_s1 + $0xe4] ss:$16 sps:$4 sm:$0xff]   ;;  %v14141_v29 = vld [vmem:[%s21657_s1 + $0xec] ss:$16 sps:$4 sm:$0xff]  }
   0xb   :  { %9828 = vmatpush1.bf16.msra.mxu0 %v14113_v10  ;;  %10853 = vmatpush1.bf16.msra.mxu1 %v14114_v11  ;;  %v14143_v30 = vld [vmem:[%s21657_s1 + $0xe0] ss:$16 sps:$4 sm:$0xff]   ;;  %v14144_v31 = vld [vmem:[%s21657_s1 + $0xe8] ss:$16 sps:$4 sm:$0xff]   ;;  %v14145_v32 = vld [vmem:[%s21657_s1 + $0x104] ss:$16 sps:$4 sm:$0xff]  }
   0xc   :  { %9829 = vmatprep.subr.bf16.mxu0 %v14115_v12  ;;  %10854 = vmatprep.subr.bf16.mxu1 %v14117_v13  ;;  %v14147_v33 = vld [vmem:[%s21657_s1 + $0x10c] ss:$16 sps:$4 sm:$0xff]   ;;  %v14149_v34 = vld [vmem:[%s21657_s1 + $0x100] ss:$16 sps:$4 sm:$0xff]   ;;  %v14150_v35 = vld [vmem:[%s21657_s1 + $0x108] ss:$16 sps:$4 sm:$0xff]  }
   0xd   :  { %v14151_v39 = vld [vmem:[%s21657_s1 + $0x124] ss:$16 sps:$4 sm:$0xff]   ;;  %v14153_v40 = vld [vmem:[%s21657_s1 + $0x12c] ss:$16 sps:$4 sm:$0xff]   ;;  %v14155_v41 = vld [vmem:[%s21657_s1 + $0x120] ss:$16 sps:$4 sm:$0xff]  }
   0xe   :  { %v16671_v42 = vshrl.u32 %v1599_v36, 7  ;;  %v14156_v44 = vld [vmem:[%s21657_s1 + $0x128] ss:$16 sps:$4 sm:$0xff]   ;;  %v14157_v45 = vld [vmem:[%s21657_s1 + $0x144] ss:$16 sps:$4 sm:$0xff]  }
   0xf   :  { %9830 = vmatpush1.bf16.msra.mxu0 %v14119_v14  ;;  %10855 = vmatpush1.bf16.msra.mxu1 %v14120_v15  ;;  %v14159_v46 = vld [vmem:[%s21657_s1 + $0x14c] ss:$16 sps:$4 sm:$0xff]   ;;  %v14161_v47 = vld [vmem:[%s21657_s1 + $0x140] ss:$16 sps:$4 sm:$0xff]   ;;  %v14162_v48 = vld [vmem:[%s21657_s1 + $0x148] ss:$16 sps:$4 sm:$0xff]  }
  0x10   :  { %9831 = vmatprep.subr.bf16.mxu0 %v14121_v16  ;;  %10856 = vmatprep.subr.bf16.mxu1 %v14123_v17  ;;  %v16689_v49 = vsub.s32 %v1629_v43, %v16671_v42  ;;  %v14163_v50 = vld [vmem:[%s21657_s1 + $0x164] ss:$16 sps:$4 sm:$0xff]   ;;  %v14165_v51 = vld [vmem:[%s21657_s1 + $0x16c] ss:$16 sps:$4 sm:$0xff]   ;;  %v14167_v53 = vld [vmem:[%s21657_s1 + $0x160] ss:$16 sps:$4 sm:$0xff]  }
  0x11   :  { %v16700_v52 = vld [vmem:[%s21656_s0] sm:$0xff]  ;;  %v14168_v55 = vld [vmem:[%s21657_s1 + $0x168] ss:$16 sps:$4 sm:$0xff]   ;;  %v14171_v57 = vld [vmem:[%s21657_s1 + $0x18c] ss:$16 sps:$4 sm:$0xff]  }
  0x12   :  { %v1633_v54 = vrot.slane %v16700_v52, %v16689_v49  ;;  %v14169_v56 = vld [vmem:[%s21657_s1 + $0x184] ss:$16 sps:$4 sm:$0xff]   ;;  %v14173_v59 = vld [vmem:[%s21657_s1 + $0x180] ss:$16 sps:$4 sm:$0xff]   ;;  %v14174_v61 = vld [vmem:[%s21657_s1 + $0x188] ss:$16 sps:$4 sm:$0xff]  }
  0x13   :  { %9832 = vmatpush1.bf16.msra.mxu0 %v14125_v18  ;;  %10857 = vmatpush1.bf16.msra.mxu1 %v14126_v19  ;;  %v14175_v62 = vld [vmem:[%s21657_s1 + $0x1a4] ss:$16 sps:$4 sm:$0xff]   ;;  %v14177_v63 = vld [vmem:[%s21657_s1 + $0x1ac] ss:$16 sps:$4 sm:$0xff]   ;;  %v14179_v0 = vld [vmem:[%s21657_s1 + $0x1a0] ss:$16 sps:$4 sm:$0xff]  }
  0x14   :  { %9833 = vmatprep.subr.bf16.mxu0 %v14127_v20  ;;  %10858 = vmatprep.subr.bf16.mxu1 %v14129_v21  ;;  %v1641_v58 = vcombine.high %v1633_v54, %v1633_v54  ;;  %v14180_v1 = vld [vmem:[%s21657_s1 + $0x1a8] ss:$16 sps:$4 sm:$0xff]   ;;  %v14181_v2 = vld [vmem:[%s21657_s1 + $0x1c4] ss:$16 sps:$4 sm:$0xff]   ;;  %v14183_v3 = vld [vmem:[%s21657_s1 + $0x1cc] ss:$16 sps:$4 sm:$0xff]   ;;  %v16769_v13 = vrot.slane %v1633_v54, %v16689_v49 }
  0x15   :  { %v14185_v4 = vld [vmem:[%s21657_s1 + $0x1c0] ss:$16 sps:$4 sm:$0xff]   ;;  %v14186_v5 = vld [vmem:[%s21657_s1 + $0x1c8] ss:$16 sps:$4 sm:$0xff]   ;;  %v14187_v6 = vld [vmem:[%s21657_s1 + $0x1e4] ss:$16 sps:$4 sm:$0xff]  }
  0x16   :  { %v1663_v60 = vrot.slane %v1641_v58, %v16689_v49  ;;  %v14189_v7 = vld [vmem:[%s21657_s1 + $0x1ec] ss:$16 sps:$4 sm:$0xff]   ;;  %v14191_v8 = vld [vmem:[%s21657_s1 + $0x1e0] ss:$16 sps:$4 sm:$0xff]   ;;  %v14192_v9 = vld [vmem:[%s21657_s1 + $0x1e8] ss:$16 sps:$4 sm:$0xff]  }
  0x17   :  { %9834 = vmatpush1.bf16.msra.mxu0 %v14131_v22  ;;  %10859 = vmatpush1.bf16.msra.mxu1 %v14132_v23  ;;  %v14195_v10 = vld [vmem:[%s21657_s1 + $0x204] ss:$16 sps:$4 sm:$0xff]   ;;  %v14198_v11 = vld [vmem:[%s21657_s1 + $0x20c] ss:$16 sps:$4 sm:$0xff]   ;;  %v14193_v12 = vld [vmem:[%s21657_s1 + $0x200] ss:$16 sps:$4 sm:$0xff]  }
  0x18   :  { %9835 = vmatprep.subr.bf16.mxu0 %v14133_v24  ;;  %10860 = vmatprep.subr.bf16.mxu1 %v14135_v25  ;;  %v14196_v14 = vld [vmem:[%s21657_s1 + $0x208] ss:$16 sps:$4 sm:$0xff]   ;;  %v14201_v15 = vld [vmem:[%s21657_s1 + $0x224] ss:$16 sps:$4 sm:$0xff]   ;;  %v14204_v16 = vld [vmem:[%s21657_s1 + $0x22c] ss:$16 sps:$4 sm:$0xff]   ;;  %v1673_v17 = vcombine.high %v1663_v60, %v1663_v60 }
  0x19   :  { %9855 = vmatprep.mubr.bf16.mxu0 %v1663_v60  ;;  %10880 = vmatprep.mubr.bf16.mxu1 %v1663_v60  ;;  %v14199_v18 = vld [vmem:[%s21657_s1 + $0x220] ss:$16 sps:$4 sm:$0xff]   ;;  %v14202_v19 = vld [vmem:[%s21657_s1 + $0x228] ss:$16 sps:$4 sm:$0xff]   ;;  %v14207_v20 = vld [vmem:[%s21657_s1 + $0x244] ss:$16 sps:$4 sm:$0xff]  }
  0x1a   :  { %v14210_v21 = vld [vmem:[%s21657_s1 + $0x24c] ss:$16 sps:$4 sm:$0xff]   ;;  %v14205_v22 = vld [vmem:[%s21657_s1 + $0x240] ss:$16 sps:$4 sm:$0xff]   ;;  %v14208_v23 = vld [vmem:[%s21657_s1 + $0x248] ss:$16 sps:$4 sm:$0xff]  }
  0x1b   :  { %9836 = vmatpush1.bf16.msra.mxu0 %v14137_v26  ;;  %10861 = vmatpush1.bf16.msra.mxu1 %v14138_v27  ;;  %v14213_v24 = vld [vmem:[%s21657_s1 + $0x264] ss:$16 sps:$4 sm:$0xff]   ;;  %v14216_v25 = vld [vmem:[%s21657_s1 + $0x26c] ss:$16 sps:$4 sm:$0xff]   ;;  %v14211_v26 = vld [vmem:[%s21657_s1 + $0x260] ss:$16 sps:$4 sm:$0xff]  }
  0x1c   :  { %9837 = vmatprep.subr.bf16.mxu0 %v14139_v28  ;;  %10862 = vmatprep.subr.bf16.mxu1 %v14141_v29  ;;  %v14214_v27 = vld [vmem:[%s21657_s1 + $0x268] ss:$16 sps:$4 sm:$0xff]   ;;  %v14219_v28 = vld [vmem:[%s21657_s1 + $0x284] ss:$16 sps:$4 sm:$0xff]   ;;  %v14222_v29 = vld [vmem:[%s21657_s1 + $0x28c] ss:$16 sps:$4 sm:$0xff]  }
  0x1d   :  { %v14231_v36 = vld [vmem:[%s21657_s1 + $0x2c4] ss:$16 sps:$4 sm:$0xff]   ;;  %v14234_v37 = vld [vmem:[%s21657_s1 + $0x2cc] ss:$16 sps:$4 sm:$0xff]   ;;  %v14229_v38 = vld [vmem:[%s21657_s1 + $0x2c0] ss:$16 sps:$4 sm:$0xff]  }
  0x1e   :  { %v14235_v43 = vld [vmem:[%s21657_s1 + $0x2e0] ss:$16 sps:$4 sm:$0xff]   ;;  %v14250_v54 = vld [vmem:[%s21657_s1 + $0x328] ss:$16 sps:$4 sm:$0xff]   ;;  %v14264_v60 = vld [vmem:[%s21657_s1 + $0x36c] ss:$16 sps:$4 sm:$0xff]  }
  0x1f   :  { %9838 = vmatpush1.bf16.msra.mxu0 %v14143_v30  ;;  %10863 = vmatpush1.bf16.msra.mxu1 %v14144_v31  ;;  %v14217_v30 = vld [vmem:[%s21657_s1 + $0x280] ss:$16 sps:$4 sm:$0xff]   ;;  %v14220_v31 = vld [vmem:[%s21657_s1 + $0x288] ss:$16 sps:$4 sm:$0xff]  }
  0x20   :  { %9839 = vmatprep.subr.bf16.mxu0 %v14145_v32  ;;  %10864 = vmatprep.subr.bf16.mxu1 %v14147_v33  ;;  %v14225_v32 = vld [vmem:[%s21657_s1 + $0x2a4] ss:$16 sps:$4 sm:$0xff]   ;;  %v14228_v33 = vld [vmem:[%s21657_s1 + $0x2ac] ss:$16 sps:$4 sm:$0xff]   ;;  %v14256_v58 = vld [vmem:[%s21657_s1 + $0x348] ss:$16 sps:$4 sm:$0xff]  }
  0x23   :  { %9840 = vmatpush1.bf16.msra.mxu0 %v14149_v34  ;;  %10865 = vmatpush1.bf16.msra.mxu1 %v14150_v35  ;;  %v14223_v34 = vld [vmem:[%s21657_s1 + $0x2a0] ss:$16 sps:$4 sm:$0xff]   ;;  %v14226_v35 = vld [vmem:[%s21657_s1 + $0x2a8] ss:$16 sps:$4 sm:$0xff]  }
  0x24   :  { %9841 = vmatprep.subr.bf16.mxu0 %v14151_v39  ;;  %10866 = vmatprep.subr.bf16.mxu1 %v14153_v40  ;;  %v14232_v39 = vld [vmem:[%s21657_s1 + $0x2c8] ss:$16 sps:$4 sm:$0xff]   ;;  %v14237_v40 = vld [vmem:[%s21657_s1 + $0x2e4] ss:$16 sps:$4 sm:$0xff]  }
  0x27   :  { %9842 = vmatpush1.bf16.msra.mxu0 %v14155_v41  ;;  %10867 = vmatpush1.bf16.msra.mxu1 %v14156_v44  ;;  %v14240_v41 = vld [vmem:[%s21657_s1 + $0x2ec] ss:$16 sps:$4 sm:$0xff]   ;;  %v14238_v44 = vld [vmem:[%s21657_s1 + $0x2e8] ss:$16 sps:$4 sm:$0xff]  }
  0x28   :  { %9843 = vmatprep.subr.bf16.mxu0 %v14157_v45  ;;  %10868 = vmatprep.subr.bf16.mxu1 %v14159_v46  ;;  %v14243_v45 = vld [vmem:[%s21657_s1 + $0x304] ss:$16 sps:$4 sm:$0xff]   ;;  %v14246_v46 = vld [vmem:[%s21657_s1 + $0x30c] ss:$16 sps:$4 sm:$0xff]  }
  0x2b   :  { %9844 = vmatpush1.bf16.msra.mxu0 %v14161_v47  ;;  %10869 = vmatpush1.bf16.msra.mxu1 %v14162_v48  ;;  %v14241_v47 = vld [vmem:[%s21657_s1 + $0x300] ss:$16 sps:$4 sm:$0xff]   ;;  %v14244_v48 = vld [vmem:[%s21657_s1 + $0x308] ss:$16 sps:$4 sm:$0xff]  }
  0x2c   :  { %9845 = vmatprep.subr.bf16.mxu0 %v14163_v50  ;;  %10870 = vmatprep.subr.bf16.mxu1 %v14165_v51  ;;  %v14249_v50 = vld [vmem:[%s21657_s1 + $0x324] ss:$16 sps:$4 sm:$0xff]   ;;  %v14252_v51 = vld [vmem:[%s21657_s1 + $0x32c] ss:$16 sps:$4 sm:$0xff]  }
  0x2f   :  { %9846 = vmatpush1.bf16.msra.mxu0 %v14167_v53  ;;  %10871 = vmatpush1.bf16.msra.mxu1 %v14168_v55  ;;  %v14247_v53 = vld [vmem:[%s21657_s1 + $0x320] ss:$16 sps:$4 sm:$0xff]   ;;  %v14255_v55 = vld [vmem:[%s21657_s1 + $0x344] ss:$16 sps:$4 sm:$0xff]  }
  0x30   :  { %9847 = vmatprep.subr.bf16.mxu0 %v14169_v56  ;;  %10872 = vmatprep.subr.bf16.mxu1 %v14171_v57  ;;  %v14258_v56 = vld [vmem:[%s21657_s1 + $0x34c] ss:$16 sps:$4 sm:$0xff]   ;;  %v14253_v57 = vld [vmem:[%s21657_s1 + $0x340] ss:$16 sps:$4 sm:$0xff]  }
  0x33   :  { %9848 = vmatpush1.bf16.msra.mxu0 %v14173_v59  ;;  %10873 = vmatpush1.bf16.msra.mxu1 %v14174_v61  ;;  %v14261_v59 = vld [vmem:[%s21657_s1 + $0x364] ss:$16 sps:$4 sm:$0xff]   ;;  %v14259_v61 = vld [vmem:[%s21657_s1 + $0x360] ss:$16 sps:$4 sm:$0xff]  }
  0x34   :  { %9849 = vmatprep.subr.bf16.mxu0 %v14175_v62  ;;  %10874 = vmatprep.subr.bf16.mxu1 %v14177_v63  ;;  %v14262_v62 = vld [vmem:[%s21657_s1 + $0x368] ss:$16 sps:$4 sm:$0xff]   ;;  %v14267_v63 = vld [vmem:[%s21657_s1 + $0x384] ss:$16 sps:$4 sm:$0xff]  }
  0x37   :  { %9850 = vmatpush1.bf16.msra.mxu0 %v14179_v0  ;;  %10875 = vmatpush1.bf16.msra.mxu1 %v14180_v1  ;;  %v14270_v0 = vld [vmem:[%s21657_s1 + $0x38c] ss:$16 sps:$4 sm:$0xff]   ;;  %v14265_v1 = vld [vmem:[%s21657_s1 + $0x380] ss:$16 sps:$4 sm:$0xff]  }
  0x38   :  { %9851 = vmatprep.subr.bf16.mxu0 %v14181_v2  ;;  %10876 = vmatprep.subr.bf16.mxu1 %v14183_v3  ;;  %v14268_v2 = vld [vmem:[%s21657_s1 + $0x388] ss:$16 sps:$4 sm:$0xff]   ;;  %v14273_v3 = vld [vmem:[%s21657_s1 + $0x3a4] ss:$16 sps:$4 sm:$0xff]  }
  0x3b   :  { %9852 = vmatpush1.bf16.msra.mxu0 %v14185_v4  ;;  %10877 = vmatpush1.bf16.msra.mxu1 %v14186_v5  ;;  %v14276_v4 = vld [vmem:[%s21657_s1 + $0x3ac] ss:$16 sps:$4 sm:$0xff]   ;;  %v14271_v5 = vld [vmem:[%s21657_s1 + $0x3a0] ss:$16 sps:$4 sm:$0xff]  }
  0x3c   :  { %9853 = vmatprep.subr.bf16.mxu0 %v14187_v6  ;;  %10878 = vmatprep.subr.bf16.mxu1 %v14189_v7  ;;  %v14274_v6 = vld [vmem:[%s21657_s1 + $0x3a8] ss:$16 sps:$4 sm:$0xff]   ;;  %v14279_v7 = vld [vmem:[%s21657_s1 + $0x3c4] ss:$16 sps:$4 sm:$0xff]  }
  0x3f   :  { %9854 = vmatpush1.bf16.msra.mxu0 %v14191_v8  ;;  %10879 = vmatpush1.bf16.msra.mxu1 %v14192_v9  ;;  %v14282_v8 = vld [vmem:[%s21657_s1 + $0x3cc] ss:$16 sps:$4 sm:$0xff]   ;;  %v1626_v9 = vcombine.high %v16700_v52, %v16700_v52 }
  0x40   :  { %9864 = vmatprep.subr.bf16.mxu0 %v14195_v10  ;;  %10889 = vmatprep.subr.bf16.mxu1 %v14198_v11  ;;  %v14277_v10 = vld [vmem:[%s21657_s1 + $0x3c0] ss:$16 sps:$4 sm:$0xff]   ;;  %v14280_v11 = vld [vmem:[%s21657_s1 + $0x3c8] ss:$16 sps:$4 sm:$0xff]   ;;  %v14288_v52 = vld [vmem:[%s21657_s1 + $0x3ec] ss:$16 sps:$4 sm:$0xff]  }
  0x42   :  { %9856 = vmatmul.mubr.bf16.vlgmr.msra.gmra.mrb[0].mxu0 %v16769_v13  ;;  %10881 = vmatmul.mubr.bf16.vlgmr.msra.gmra.mrb[0].mxu1 %v16769_v13 }
  0x43   :  { %9865 = vmatpush1.bf16.msra.mxu0 %v14193_v12  ;;  %10890 = vmatpush1.bf16.msra.mxu1 %v14196_v14  ;;  %v14285_v12 = vld [vmem:[%s21657_s1 + $0x3e4] ss:$16 sps:$4 sm:$0xff]   ;;  %v16953_v14 = vrot.slane %v1626_v9, %v16689_v49  ;;  %v14364_v9 = vld [vmem:[%s21657_s1 + $0x588] ss:$16 sps:$4 sm:$0xff]  }
  0x44   :  { %9866 = vmatprep.subr.bf16.mxu0 %v14201_v15  ;;  %10891 = vmatprep.subr.bf16.mxu1 %v14204_v16  ;;  %v14283_v15 = vld [vmem:[%s21657_s1 + $0x3e0] ss:$16 sps:$4 sm:$0xff]   ;;  %v14286_v16 = vld [vmem:[%s21657_s1 + $0x3e8] ss:$16 sps:$4 sm:$0xff]  }
  0x45   :  { %9896 = vmatprep.mubr.bf16.mxu0 %v1673_v17  ;;  %10921 = vmatprep.mubr.bf16.mxu1 %v1673_v17  ;;  %v14291_v17 = vld [vmem:[%s21657_s1 + $0x404] ss:$16 sps:$4 sm:$0xff]  }
  0x47   :  { %9867 = vmatpush1.bf16.msra.mxu0 %v14199_v18  ;;  %10892 = vmatpush1.bf16.msra.mxu1 %v14202_v19  ;;  %v14294_v18 = vld [vmem:[%s21657_s1 + $0x40c] ss:$16 sps:$4 sm:$0xff]   ;;  %v1642_v19 = vcombine.high %v16953_v14, %v16953_v14 }
  0x48   :  { %9868 = vmatprep.subr.bf16.mxu0 %v14207_v20  ;;  %10893 = vmatprep.subr.bf16.mxu1 %v14210_v21  ;;  %v14289_v20 = vld [vmem:[%s21657_s1 + $0x400] ss:$16 sps:$4 sm:$0xff]   ;;  %v1671_v21 = vcombine.high %v16769_v13, %v16769_v13 }
  0x49   :  { %v14295_v13 = vld [vmem:[%s21657_s1 + $0x420] ss:$16 sps:$4 sm:$0xff]  }
  0x4b   :  { %9869 = vmatpush1.bf16.msra.mxu0 %v14205_v22  ;;  %10894 = vmatpush1.bf16.msra.mxu1 %v14208_v23  ;;  %v14292_v22 = vld [vmem:[%s21657_s1 + $0x408] ss:$16 sps:$4 sm:$0xff]   ;;  %v14297_v23 = vld [vmem:[%s21657_s1 + $0x424] ss:$16 sps:$4 sm:$0xff]  }
  0x4c   :  { %9870 = vmatprep.subr.bf16.mxu0 %v14213_v24  ;;  %10895 = vmatprep.subr.bf16.mxu1 %v14216_v25  ;;  %v14300_v24 = vld [vmem:[%s21657_s1 + $0x42c] ss:$16 sps:$4 sm:$0xff]   ;;  %v16984_v25 = vrot.slane %v1642_v19, %v16689_v49  ;;  %v14381_v19 = vld [vmem:[%s21657_s1 + $0x5e4] ss:$16 sps:$4 sm:$0xff]  }
  0x4f   :  { %9871 = vmatpush1.bf16.msra.mxu0 %v14211_v26  ;;  %10896 = vmatpush1.bf16.msra.mxu1 %v14214_v27  ;;  %v14298_v26 = vld [vmem:[%s21657_s1 + $0x428] ss:$16 sps:$4 sm:$0xff]   ;;  %v14303_v27 = vld [vmem:[%s21657_s1 + $0x444] ss:$16 sps:$4 sm:$0xff]  }
  0x50   :  { %9872 = vmatprep.subr.bf16.mxu0 %v14219_v28  ;;  %10897 = vmatprep.subr.bf16.mxu1 %v14222_v29  ;;  %v14306_v28 = vld [vmem:[%s21657_s1 + $0x44c] ss:$16 sps:$4 sm:$0xff]   ;;  %v14301_v29 = vld [vmem:[%s21657_s1 + $0x440] ss:$16 sps:$4 sm:$0xff]  }
  0x53   :  { %9873 = vmatpush1.bf16.msra.mxu0 %v14217_v30  ;;  %10898 = vmatpush1.bf16.msra.mxu1 %v14220_v31  ;;  %v14304_v30 = vld [vmem:[%s21657_s1 + $0x448] ss:$16 sps:$4 sm:$0xff]   ;;  %v14309_v31 = vld [vmem:[%s21657_s1 + $0x464] ss:$16 sps:$4 sm:$0xff]  }
  0x54   :  { %9874 = vmatprep.subr.bf16.mxu0 %v14225_v32  ;;  %10899 = vmatprep.subr.bf16.mxu1 %v14228_v33  ;;  %v14312_v32 = vld [vmem:[%s21657_s1 + $0x46c] ss:$16 sps:$4 sm:$0xff]   ;;  %v14307_v33 = vld [vmem:[%s21657_s1 + $0x460] ss:$16 sps:$4 sm:$0xff]  }
  0x57   :  { %9875 = vmatpush1.bf16.msra.mxu0 %v14223_v34  ;;  %10900 = vmatpush1.bf16.msra.mxu1 %v14226_v35  ;;  %v14310_v34 = vld [vmem:[%s21657_s1 + $0x468] ss:$16 sps:$4 sm:$0xff]   ;;  %v14315_v35 = vld [vmem:[%s21657_s1 + $0x484] ss:$16 sps:$4 sm:$0xff]  }
  0x58   :  { %9876 = vmatprep.subr.bf16.mxu0 %v14231_v36  ;;  %10901 = vmatprep.subr.bf16.mxu1 %v14234_v37  ;;  %v14318_v36 = vld [vmem:[%s21657_s1 + $0x48c] ss:$16 sps:$4 sm:$0xff]   ;;  %v14313_v37 = vld [vmem:[%s21657_s1 + $0x480] ss:$16 sps:$4 sm:$0xff]  }
  0x5b   :  { %9877 = vmatpush1.bf16.msra.mxu0 %v14229_v38  ;;  %10902 = vmatpush1.bf16.msra.mxu1 %v14232_v39  ;;  %v14316_v38 = vld [vmem:[%s21657_s1 + $0x488] ss:$16 sps:$4 sm:$0xff]   ;;  %v14321_v39 = vld [vmem:[%s21657_s1 + $0x4a4] ss:$16 sps:$4 sm:$0xff]  }
  0x5c   :  { %9878 = vmatprep.subr.bf16.mxu0 %v14237_v40  ;;  %10903 = vmatprep.subr.bf16.mxu1 %v14240_v41  ;;  %v14324_v40 = vld [vmem:[%s21657_s1 + $0x4ac] ss:$16 sps:$4 sm:$0xff]   ;;  %v14319_v41 = vld [vmem:[%s21657_s1 + $0x4a0] ss:$16 sps:$4 sm:$0xff]  }
  0x5f   :  { %9879 = vmatpush1.bf16.msra.mxu0 %v14235_v43  ;;  %10904 = vmatpush1.bf16.msra.mxu1 %v14238_v44  ;;  %v14322_v43 = vld [vmem:[%s21657_s1 + $0x4a8] ss:$16 sps:$4 sm:$0xff]   ;;  %v14327_v44 = vld [vmem:[%s21657_s1 + $0x4c4] ss:$16 sps:$4 sm:$0xff]  }
  0x60   :  { %9880 = vmatprep.subr.bf16.mxu0 %v14243_v45  ;;  %10905 = vmatprep.subr.bf16.mxu1 %v14246_v46  ;;  %v14330_v45 = vld [vmem:[%s21657_s1 + $0x4cc] ss:$16 sps:$4 sm:$0xff]   ;;  %v14325_v46 = vld [vmem:[%s21657_s1 + $0x4c0] ss:$16 sps:$4 sm:$0xff]  }
  0x63   :  { %9881 = vmatpush1.bf16.msra.mxu0 %v14241_v47  ;;  %10906 = vmatpush1.bf16.msra.mxu1 %v14244_v48  ;;  %v14328_v47 = vld [vmem:[%s21657_s1 + $0x4c8] ss:$16 sps:$4 sm:$0xff]   ;;  %v14333_v48 = vld [vmem:[%s21657_s1 + $0x4e4] ss:$16 sps:$4 sm:$0xff]  }
  0x64   :  { %9882 = vmatprep.subr.bf16.mxu0 %v14249_v50  ;;  %10907 = vmatprep.subr.bf16.mxu1 %v14252_v51  ;;  %v14336_v50 = vld [vmem:[%s21657_s1 + $0x4ec] ss:$16 sps:$4 sm:$0xff]   ;;  %v14331_v51 = vld [vmem:[%s21657_s1 + $0x4e0] ss:$16 sps:$4 sm:$0xff]  }
  0x67   :  { %9883 = vmatpush1.bf16.msra.mxu0 %v14247_v53  ;;  %10908 = vmatpush1.bf16.msra.mxu1 %v14250_v54  ;;  %v14334_v53 = vld [vmem:[%s21657_s1 + $0x4e8] ss:$16 sps:$4 sm:$0xff]   ;;  %v14339_v54 = vld [vmem:[%s21657_s1 + $0x504] ss:$16 sps:$4 sm:$0xff]  }
  0x68   :  { %9884 = vmatprep.subr.bf16.mxu0 %v14255_v55  ;;  %10909 = vmatprep.subr.bf16.mxu1 %v14258_v56  ;;  %v14342_v55 = vld [vmem:[%s21657_s1 + $0x50c] ss:$16 sps:$4 sm:$0xff]   ;;  %v14337_v56 = vld [vmem:[%s21657_s1 + $0x500] ss:$16 sps:$4 sm:$0xff]  }
  0x6b   :  { %9885 = vmatpush1.bf16.msra.mxu0 %v14253_v57  ;;  %10910 = vmatpush1.bf16.msra.mxu1 %v14256_v58  ;;  %v14340_v57 = vld [vmem:[%s21657_s1 + $0x508] ss:$16 sps:$4 sm:$0xff]   ;;  %v14345_v58 = vld [vmem:[%s21657_s1 + $0x524] ss:$16 sps:$4 sm:$0xff]  }
  0x6c   :  { %9886 = vmatprep.subr.bf16.mxu0 %v14261_v59  ;;  %10911 = vmatprep.subr.bf16.mxu1 %v14264_v60  ;;  %v14348_v59 = vld [vmem:[%s21657_s1 + $0x52c] ss:$16 sps:$4 sm:$0xff]   ;;  %v14343_v60 = vld [vmem:[%s21657_s1 + $0x520] ss:$16 sps:$4 sm:$0xff]  }
  0x6f   :  { %9887 = vmatpush1.bf16.msra.mxu0 %v14259_v61  ;;  %10912 = vmatpush1.bf16.msra.mxu1 %v14262_v62  ;;  %v14346_v61 = vld [vmem:[%s21657_s1 + $0x528] ss:$16 sps:$4 sm:$0xff]   ;;  %v14351_v62 = vld [vmem:[%s21657_s1 + $0x544] ss:$16 sps:$4 sm:$0xff]  }
  0x70   :  { %9888 = vmatprep.subr.bf16.mxu0 %v14267_v63  ;;  %10913 = vmatprep.subr.bf16.mxu1 %v14270_v0  ;;  %v14354_v63 = vld [vmem:[%s21657_s1 + $0x54c] ss:$16 sps:$4 sm:$0xff]   ;;  %v14349_v0 = vld [vmem:[%s21657_s1 + $0x540] ss:$16 sps:$4 sm:$0xff]  }
  0x73   :  { %9889 = vmatpush1.bf16.msra.mxu0 %v14265_v1  ;;  %10914 = vmatpush1.bf16.msra.mxu1 %v14268_v2  ;;  %v14352_v1 = vld [vmem:[%s21657_s1 + $0x548] ss:$16 sps:$4 sm:$0xff]   ;;  %v14357_v2 = vld [vmem:[%s21657_s1 + $0x564] ss:$16 sps:$4 sm:$0xff]  }
  0x74   :  { %9890 = vmatprep.subr.bf16.mxu0 %v14273_v3  ;;  %10915 = vmatprep.subr.bf16.mxu1 %v14276_v4  ;;  %v14360_v3 = vld [vmem:[%s21657_s1 + $0x56c] ss:$16 sps:$4 sm:$0xff]   ;;  %v14355_v4 = vld [vmem:[%s21657_s1 + $0x560] ss:$16 sps:$4 sm:$0xff]  }
  0x77   :  { %9891 = vmatpush1.bf16.msra.mxu0 %v14271_v5  ;;  %10916 = vmatpush1.bf16.msra.mxu1 %v14274_v6  ;;  %v14358_v5 = vld [vmem:[%s21657_s1 + $0x568] ss:$16 sps:$4 sm:$0xff]   ;;  %v14363_v6 = vld [vmem:[%s21657_s1 + $0x584] ss:$16 sps:$4 sm:$0xff]  }
  0x78   :  { %9892 = vmatprep.subr.bf16.mxu0 %v14279_v7  ;;  %10917 = vmatprep.subr.bf16.mxu1 %v14282_v8  ;;  %v14366_v7 = vld [vmem:[%s21657_s1 + $0x58c] ss:$16 sps:$4 sm:$0xff]   ;;  %v14361_v8 = vld [vmem:[%s21657_s1 + $0x580] ss:$16 sps:$4 sm:$0xff]  }
  0x7b   :  { %9893 = vmatpush1.bf16.msra.mxu0 %v14277_v10  ;;  %10918 = vmatpush1.bf16.msra.mxu1 %v14280_v11  ;;  %v14369_v10 = vld [vmem:[%s21657_s1 + $0x5a4] ss:$16 sps:$4 sm:$0xff]   ;;  %v14372_v11 = vld [vmem:[%s21657_s1 + $0x5ac] ss:$16 sps:$4 sm:$0xff]  }
  0x7c   :  { %9894 = vmatprep.subr.bf16.mxu0 %v14285_v12  ;;  %10919 = vmatprep.subr.bf16.mxu1 %v14288_v52  ;;  %v14367_v12 = vld [vmem:[%s21657_s1 + $0x5a0] ss:$16 sps:$4 sm:$0xff]   ;;  %v14370_v52 = vld [vmem:[%s21657_s1 + $0x5a8] ss:$16 sps:$4 sm:$0xff]  }
  0x7f   :  { %9895 = vmatpush1.bf16.msra.mxu0 %v14283_v15  ;;  %10920 = vmatpush1.bf16.msra.mxu1 %v14286_v16  ;;  %v14375_v15 = vld [vmem:[%s21657_s1 + $0x5c4] ss:$16 sps:$4 sm:$0xff]   ;;  %v14378_v16 = vld [vmem:[%s21657_s1 + $0x5cc] ss:$16 sps:$4 sm:$0xff]  }
  0x80   :  { %9905 = vmatprep.subr.bf16.mxu0 %v14291_v17  ;;  %10930 = vmatprep.subr.bf16.mxu1 %v14294_v18  ;;  %v14373_v17 = vld [vmem:[%s21657_s1 + $0x5c0] ss:$16 sps:$4 sm:$0xff]   ;;  %v14376_v18 = vld [vmem:[%s21657_s1 + $0x5c8] ss:$16 sps:$4 sm:$0xff]  }
  0x82   :  { %9897 = vmatmul.mubr.bf16.vlgmr.msra.gmra.mrb[0].mxu0 %v1671_v21  ;;  %10922 = vmatmul.mubr.bf16.vlgmr.msra.gmra.mrb[0].mxu1 %v1671_v21  ;;  %v14379_v21 = vld [vmem:[%s21657_s1 + $0x5e0] ss:$16 sps:$4 sm:$0xff]  }
  0x83   :  { %9906 = vmatpush1.bf16.msra.mxu0 %v14289_v20  ;;  %10931 = vmatpush1.bf16.msra.mxu1 %v14292_v22  ;;  %v14384_v20 = vld [vmem:[%s21657_s1 + $0x5ec] ss:$16 sps:$4 sm:$0xff]   ;;  %v14382_v22 = vld [vmem:[%s21657_s1 + $0x5e8] ss:$16 sps:$4 sm:$0xff]  }
  0x84   :  { %9907 = vmatprep.subr.bf16.mxu0 %v14297_v23  ;;  %10932 = vmatprep.subr.bf16.mxu1 %v14300_v24  ;;  %v14388_v23 = vld [vmem:[%s21657_s1 + $0x604] ss:$16 sps:$4 sm:$0xff]   ;;  %v14391_v24 = vld [vmem:[%s21657_s1 + $0x60c] ss:$16 sps:$4 sm:$0xff]  }
  0x85   :  { %9937 = vmatprep.mubr.bf16.mxu0 %v16984_v25  ;;  %10962 = vmatprep.mubr.bf16.mxu1 %v16984_v25 }
  0x87   :  { %9908 = vmatpush1.bf16.msra.mxu0 %v14295_v13  ;;  %10933 = vmatpush1.bf16.msra.mxu1 %v14298_v26  ;;  %v14386_v13 = vld [vmem:[%s21657_s1 + $0x600] ss:$16 sps:$4 sm:$0xff]   ;;  %v17173_v26 = vrot.slane %v16953_v14, %v16689_v49  ;;  %v1674_v14 = vcombine.high %v16984_v25, %v16984_v25  ;;  %v14400_v25 = vld [vmem:[%s21657_s1 + $0x644] ss:$16 sps:$4 sm:$0xff]  }
  0x88   :  { %9909 = vmatprep.subr.bf16.mxu0 %v14303_v27  ;;  %10934 = vmatprep.subr.bf16.mxu1 %v14306_v28  ;;  %v14389_v27 = vld [vmem:[%s21657_s1 + $0x608] ss:$16 sps:$4 sm:$0xff]   ;;  %v14394_v28 = vld [vmem:[%s21657_s1 + $0x624] ss:$16 sps:$4 sm:$0xff]  }
  0x8b   :  { %9910 = vmatpush1.bf16.msra.mxu0 %v14301_v29  ;;  %10935 = vmatpush1.bf16.msra.mxu1 %v14304_v30  ;;  %v14397_v29 = vld [vmem:[%s21657_s1 + $0x62c] ss:$16 sps:$4 sm:$0xff]   ;;  %v14392_v30 = vld [vmem:[%s21657_s1 + $0x620] ss:$16 sps:$4 sm:$0xff]  }
  0x8c   :  { %9911 = vmatprep.subr.bf16.mxu0 %v14309_v31  ;;  %10936 = vmatprep.subr.bf16.mxu1 %v14312_v32  ;;  %v14395_v31 = vld [vmem:[%s21657_s1 + $0x628] ss:$16 sps:$4 sm:$0xff]   ;;  %v14403_v32 = vld [vmem:[%s21657_s1 + $0x64c] ss:$16 sps:$4 sm:$0xff]  }
  0x8f   :  { %9912 = vmatpush1.bf16.msra.mxu0 %v14307_v33  ;;  %10937 = vmatpush1.bf16.msra.mxu1 %v14310_v34  ;;  %v14398_v33 = vld [vmem:[%s21657_s1 + $0x640] ss:$16 sps:$4 sm:$0xff]   ;;  %v14401_v34 = vld [vmem:[%s21657_s1 + $0x648] ss:$16 sps:$4 sm:$0xff]  }
  0x90   :  { %9913 = vmatprep.subr.bf16.mxu0 %v14315_v35  ;;  %10938 = vmatprep.subr.bf16.mxu1 %v14318_v36  ;;  %v14406_v35 = vld [vmem:[%s21657_s1 + $0x664] ss:$16 sps:$4 sm:$0xff]   ;;  %v14409_v36 = vld [vmem:[%s21657_s1 + $0x66c] ss:$16 sps:$4 sm:$0xff]  }
  0x93   :  { %9914 = vmatpush1.bf16.msra.mxu0 %v14313_v37  ;;  %10939 = vmatpush1.bf16.msra.mxu1 %v14316_v38  ;;  %v14404_v37 = vld [vmem:[%s21657_s1 + $0x660] ss:$16 sps:$4 sm:$0xff]   ;;  %v14407_v38 = vld [vmem:[%s21657_s1 + $0x668] ss:$16 sps:$4 sm:$0xff]  }
  0x94   :  { %9915 = vmatprep.subr.bf16.mxu0 %v14321_v39  ;;  %10940 = vmatprep.subr.bf16.mxu1 %v14324_v40  ;;  %v14412_v39 = vld [vmem:[%s21657_s1 + $0x684] ss:$16 sps:$4 sm:$0xff]   ;;  %v14415_v40 = vld [vmem:[%s21657_s1 + $0x68c] ss:$16 sps:$4 sm:$0xff]  }
  0x97   :  { %9916 = vmatpush1.bf16.msra.mxu0 %v14319_v41  ;;  %10941 = vmatpush1.bf16.msra.mxu1 %v14322_v43  ;;  %v14410_v41 = vld [vmem:[%s21657_s1 + $0x680] ss:$16 sps:$4 sm:$0xff]   ;;  %v14413_v43 = vld [vmem:[%s21657_s1 + $0x688] ss:$16 sps:$4 sm:$0xff]  }
  0x98   :  { %9917 = vmatprep.subr.bf16.mxu0 %v14327_v44  ;;  %10942 = vmatprep.subr.bf16.mxu1 %v14330_v45  ;;  %v14418_v44 = vld [vmem:[%s21657_s1 + $0x6a4] ss:$16 sps:$4 sm:$0xff]   ;;  %v14421_v45 = vld [vmem:[%s21657_s1 + $0x6ac] ss:$16 sps:$4 sm:$0xff]  }
  0x9b   :  { %9918 = vmatpush1.bf16.msra.mxu0 %v14325_v46  ;;  %10943 = vmatpush1.bf16.msra.mxu1 %v14328_v47  ;;  %v14416_v46 = vld [vmem:[%s21657_s1 + $0x6a0] ss:$16 sps:$4 sm:$0xff]   ;;  %v14419_v47 = vld [vmem:[%s21657_s1 + $0x6a8] ss:$16 sps:$4 sm:$0xff]  }
  0x9c   :  { %9919 = vmatprep.subr.bf16.mxu0 %v14333_v48  ;;  %10944 = vmatprep.subr.bf16.mxu1 %v14336_v50  ;;  %v14424_v48 = vld [vmem:[%s21657_s1 + $0x6c4] ss:$16 sps:$4 sm:$0xff]   ;;  %v14427_v50 = vld [vmem:[%s21657_s1 + $0x6cc] ss:$16 sps:$4 sm:$0xff]  }
  0x9f   :  { %9920 = vmatpush1.bf16.msra.mxu0 %v14331_v51  ;;  %10945 = vmatpush1.bf16.msra.mxu1 %v14334_v53  ;;  %v14422_v51 = vld [vmem:[%s21657_s1 + $0x6c0] ss:$16 sps:$4 sm:$0xff]   ;;  %v14425_v53 = vld [vmem:[%s21657_s1 + $0x6c8] ss:$16 sps:$4 sm:$0xff]  }
  0xa0   :  { %9921 = vmatprep.subr.bf16.mxu0 %v14339_v54  ;;  %10946 = vmatprep.subr.bf16.mxu1 %v14342_v55  ;;  %v14430_v54 = vld [vmem:[%s21657_s1 + $0x6e4] ss:$16 sps:$4 sm:$0xff]   ;;  %v14433_v55 = vld [vmem:[%s21657_s1 + $0x6ec] ss:$16 sps:$4 sm:$0xff]  }
  0xa3   :  { %9922 = vmatpush1.bf16.msra.mxu0 %v14337_v56  ;;  %10947 = vmatpush1.bf16.msra.mxu1 %v14340_v57  ;;  %v14428_v56 = vld [vmem:[%s21657_s1 + $0x6e0] ss:$16 sps:$4 sm:$0xff]   ;;  %v14431_v57 = vld [vmem:[%s21657_s1 + $0x6e8] ss:$16 sps:$4 sm:$0xff]  }
  0xa4   :  { %9923 = vmatprep.subr.bf16.mxu0 %v14345_v58  ;;  %10948 = vmatprep.subr.bf16.mxu1 %v14348_v59  ;;  %v14436_v58 = vld [vmem:[%s21657_s1 + $0x704] ss:$16 sps:$4 sm:$0xff]   ;;  %v14439_v59 = vld [vmem:[%s21657_s1 + $0x70c] ss:$16 sps:$4 sm:$0xff]  }
  0xa7   :  { %9924 = vmatpush1.bf16.msra.mxu0 %v14343_v60  ;;  %10949 = vmatpush1.bf16.msra.mxu1 %v14346_v61  ;;  %v14434_v60 = vld [vmem:[%s21657_s1 + $0x700] ss:$16 sps:$4 sm:$0xff]   ;;  %v14437_v61 = vld [vmem:[%s21657_s1 + $0x708] ss:$16 sps:$4 sm:$0xff]  }
  0xa8   :  { %9925 = vmatprep.subr.bf16.mxu0 %v14351_v62  ;;  %10950 = vmatprep.subr.bf16.mxu1 %v14354_v63  ;;  %v14442_v62 = vld [vmem:[%s21657_s1 + $0x724] ss:$16 sps:$4 sm:$0xff]   ;;  %v14445_v63 = vld [vmem:[%s21657_s1 + $0x72c] ss:$16 sps:$4 sm:$0xff]  }
  0xab   :  { %9926 = vmatpush1.bf16.msra.mxu0 %v14349_v0  ;;  %10951 = vmatpush1.bf16.msra.mxu1 %v14352_v1  ;;  %v14440_v0 = vld [vmem:[%s21657_s1 + $0x720] ss:$16 sps:$4 sm:$0xff]   ;;  %v14443_v1 = vld [vmem:[%s21657_s1 + $0x728] ss:$16 sps:$4 sm:$0xff]  }
  0xac   :  { %9927 = vmatprep.subr.bf16.mxu0 %v14357_v2  ;;  %10952 = vmatprep.subr.bf16.mxu1 %v14360_v3  ;;  %v14448_v2 = vld [vmem:[%s21657_s1 + $0x744] ss:$16 sps:$4 sm:$0xff]   ;;  %v14451_v3 = vld [vmem:[%s21657_s1 + $0x74c] ss:$16 sps:$4 sm:$0xff]  }
  0xaf   :  { %9928 = vmatpush1.bf16.msra.mxu0 %v14355_v4  ;;  %10953 = vmatpush1.bf16.msra.mxu1 %v14358_v5  ;;  %v14446_v4 = vld [vmem:[%s21657_s1 + $0x740] ss:$16 sps:$4 sm:$0xff]   ;;  %v14449_v5 = vld [vmem:[%s21657_s1 + $0x748] ss:$16 sps:$4 sm:$0xff]  }
  0xb0   :  { %9929 = vmatprep.subr.bf16.mxu0 %v14363_v6  ;;  %10954 = vmatprep.subr.bf16.mxu1 %v14366_v7  ;;  %v14454_v6 = vld [vmem:[%s21657_s1 + $0x764] ss:$16 sps:$4 sm:$0xff]   ;;  %v14457_v7 = vld [vmem:[%s21657_s1 + $0x76c] ss:$16 sps:$4 sm:$0xff]  }
  0xb3   :  { %9930 = vmatpush1.bf16.msra.mxu0 %v14361_v8  ;;  %10955 = vmatpush1.bf16.msra.mxu1 %v14364_v9  ;;  %v14452_v8 = vld [vmem:[%s21657_s1 + $0x760] ss:$16 sps:$4 sm:$0xff]   ;;  %v14455_v9 = vld [vmem:[%s21657_s1 + $0x768] ss:$16 sps:$4 sm:$0xff]  }
  0xb4   :  { %9931 = vmatprep.subr.bf16.mxu0 %v14369_v10  ;;  %10956 = vmatprep.subr.bf16.mxu1 %v14372_v11  ;;  %v14460_v10 = vld [vmem:[%s21657_s1 + $0x784] ss:$16 sps:$4 sm:$0xff]   ;;  %v14463_v11 = vld [vmem:[%s21657_s1 + $0x78c] ss:$16 sps:$4 sm:$0xff]  }
  0xb7   :  { %9932 = vmatpush1.bf16.msra.mxu0 %v14367_v12  ;;  %10957 = vmatpush1.bf16.msra.mxu1 %v14370_v52  ;;  %v14458_v12 = vld [vmem:[%s21657_s1 + $0x780] ss:$16 sps:$4 sm:$0xff]   ;;  %v14461_v52 = vld [vmem:[%s21657_s1 + $0x788] ss:$16 sps:$4 sm:$0xff]  }
  0xb8   :  { %9933 = vmatprep.subr.bf16.mxu0 %v14375_v15  ;;  %10958 = vmatprep.subr.bf16.mxu1 %v14378_v16  ;;  %v14466_v15 = vld [vmem:[%s21657_s1 + $0x7a4] ss:$16 sps:$4 sm:$0xff]   ;;  %v14469_v16 = vld [vmem:[%s21657_s1 + $0x7ac] ss:$16 sps:$4 sm:$0xff]  }
  0xbb   :  { %9934 = vmatpush1.bf16.msra.mxu0 %v14373_v17  ;;  %10959 = vmatpush1.bf16.msra.mxu1 %v14376_v18  ;;  %v14464_v17 = vld [vmem:[%s21657_s1 + $0x7a0] ss:$16 sps:$4 sm:$0xff]   ;;  %v14467_v18 = vld [vmem:[%s21657_s1 + $0x7a8] ss:$16 sps:$4 sm:$0xff]  }
  0xbc   :  { %9935 = vmatprep.subr.bf16.mxu0 %v14381_v19  ;;  %10960 = vmatprep.subr.bf16.mxu1 %v14384_v20  ;;  %v14472_v19 = vld [vmem:[%s21657_s1 + $0x7c4] ss:$16 sps:$4 sm:$0xff]   ;;  %v14475_v20 = vld [vmem:[%s21657_s1 + $0x7cc] ss:$16 sps:$4 sm:$0xff]  }
  0xbf   :  { %9936 = vmatpush1.bf16.msra.mxu0 %v14379_v21  ;;  %10961 = vmatpush1.bf16.msra.mxu1 %v14382_v22  ;;  %v17347_v21 = vld.sshfl [vmem:[%s21656_s0 + $0x8] sm:$0xff pattern:$0x75316420]  ;;  %v14470_v22 = vld [vmem:[%s21657_s1 + $0x7c0] ss:$16 sps:$4 sm:$0xff]  }
  0xc0   :  { %9946 = vmatprep.subr.bf16.mxu0 %v14388_v23  ;;  %10971 = vmatprep.subr.bf16.mxu1 %v14391_v24  ;;  %v14473_v23 = vld [vmem:[%s21657_s1 + $0x7c8] ss:$16 sps:$4 sm:$0xff]   ;;  %v14478_v24 = vld [vmem:[%s21657_s1 + $0x7e4] ss:$16 sps:$4 sm:$0xff]  }
  0xc2   :  { %9938 = vmatmul.mubr.bf16.vlgmr.msra.gmra.mrb[0].mxu0 %v17173_v26  ;;  %10963 = vmatmul.mubr.bf16.vlgmr.msra.gmra.mrb[0].mxu1 %v17173_v26 }
  0xc3   :  { %9947 = vmatpush1.bf16.msra.mxu0 %v14386_v13  ;;  %10972 = vmatpush1.bf16.msra.mxu1 %v14389_v27  ;;  %v14481_v13 = vld [vmem:[%s21657_s1 + $0x7ec] ss:$16 sps:$4 sm:$0xff]   ;;  %v14476_v27 = vld [vmem:[%s21657_s1 + $0x7e0] ss:$16 sps:$4 sm:$0xff]  }
  0xc4   :  { %9948 = vmatprep.subr.bf16.mxu0 %v14394_v28  ;;  %10973 = vmatprep.subr.bf16.mxu1 %v14397_v29  ;;  %v14479_v28 = vld [vmem:[%s21657_s1 + $0x7e8] ss:$16 sps:$4 sm:$0xff]   ;;  %v14484_v29 = vld [vmem:[%s21657_s1 + $0x804] ss:$16 sps:$4 sm:$0xff]  }
  0xc5   :  { %9978 = vmatprep.mubr.bf16.mxu0 %v1674_v14  ;;  %11003 = vmatprep.mubr.bf16.mxu1 %v1674_v14  ;;  %v14487_v14 = vld [vmem:[%s21657_s1 + $0x80c] ss:$16 sps:$4 sm:$0xff]  }
  0xc7   :  { %9949 = vmatpush1.bf16.msra.mxu0 %v14392_v30  ;;  %10974 = vmatpush1.bf16.msra.mxu1 %v14395_v31  ;;  %v1690_v30 = vcombine.high %v17347_v21, %v17347_v21  ;;  %v1672_v31 = vcombine.high %v17173_v26, %v17173_v26  ;;  %v14493_v26 = vld [vmem:[%s21657_s1 + $0x82c] ss:$16 sps:$4 sm:$0xff]  }
  0xc8   :  { %9950 = vmatprep.subr.bf16.mxu0 %v14400_v25  ;;  %10975 = vmatprep.subr.bf16.mxu1 %v14403_v32  ;;  %v14482_v25 = vld [vmem:[%s21657_s1 + $0x800] ss:$16 sps:$4 sm:$0xff]   ;;  %v14485_v32 = vld [vmem:[%s21657_s1 + $0x808] ss:$16 sps:$4 sm:$0xff]  }
  0xcb   :  { %9951 = vmatpush1.bf16.msra.mxu0 %v14398_v33  ;;  %10976 = vmatpush1.bf16.msra.mxu1 %v14401_v34  ;;  %v14490_v33 = vld [vmem:[%s21657_s1 + $0x824] ss:$16 sps:$4 sm:$0xff]   ;;  %v17390_v34 = vrot.slane %v1690_v30, %v16689_v49 }
  0xcc   :  { %9952 = vmatprep.subr.bf16.mxu0 %v14406_v35  ;;  %10977 = vmatprep.subr.bf16.mxu1 %v14409_v36  ;;  %v14488_v35 = vld [vmem:[%s21657_s1 + $0x820] ss:$16 sps:$4 sm:$0xff]   ;;  %v14491_v36 = vld [vmem:[%s21657_s1 + $0x828] ss:$16 sps:$4 sm:$0xff]   ;;  %v14574_v30 = vld [vmem:[%s21657_s1 + $0x9e4] ss:$16 sps:$4 sm:$0xff]  }
  0xcf   :  { %9953 = vmatpush1.bf16.msra.mxu0 %v14404_v37  ;;  %10978 = vmatpush1.bf16.msra.mxu1 %v14407_v38  ;;  %v14496_v37 = vld [vmem:[%s21657_s1 + $0x844] ss:$16 sps:$4 sm:$0xff]   ;;  %v14499_v38 = vld [vmem:[%s21657_s1 + $0x84c] ss:$16 sps:$4 sm:$0xff]  }
  0xd0   :  { %9954 = vmatprep.subr.bf16.mxu0 %v14412_v39  ;;  %10979 = vmatprep.subr.bf16.mxu1 %v14415_v40  ;;  %v14494_v39 = vld [vmem:[%s21657_s1 + $0x840] ss:$16 sps:$4 sm:$0xff]   ;;  %v14497_v40 = vld [vmem:[%s21657_s1 + $0x848] ss:$16 sps:$4 sm:$0xff]  }
  0xd3   :  { %9955 = vmatpush1.bf16.msra.mxu0 %v14410_v41  ;;  %10980 = vmatpush1.bf16.msra.mxu1 %v14413_v43  ;;  %v14502_v41 = vld [vmem:[%s21657_s1 + $0x864] ss:$16 sps:$4 sm:$0xff]   ;;  %v14505_v43 = vld [vmem:[%s21657_s1 + $0x86c] ss:$16 sps:$4 sm:$0xff]  }
  0xd4   :  { %9956 = vmatprep.subr.bf16.mxu0 %v14418_v44  ;;  %10981 = vmatprep.subr.bf16.mxu1 %v14421_v45  ;;  %v14500_v44 = vld [vmem:[%s21657_s1 + $0x860] ss:$16 sps:$4 sm:$0xff]   ;;  %v14503_v45 = vld [vmem:[%s21657_s1 + $0x868] ss:$16 sps:$4 sm:$0xff]  }
  0xd7   :  { %9957 = vmatpush1.bf16.msra.mxu0 %v14416_v46  ;;  %10982 = vmatpush1.bf16.msra.mxu1 %v14419_v47  ;;  %v14508_v46 = vld [vmem:[%s21657_s1 + $0x884] ss:$16 sps:$4 sm:$0xff]   ;;  %v14511_v47 = vld [vmem:[%s21657_s1 + $0x88c] ss:$16 sps:$4 sm:$0xff]  }
  0xd8   :  { %9958 = vmatprep.subr.bf16.mxu0 %v14424_v48  ;;  %10983 = vmatprep.subr.bf16.mxu1 %v14427_v50  ;;  %v14506_v48 = vld [vmem:[%s21657_s1 + $0x880] ss:$16 sps:$4 sm:$0xff]   ;;  %v14509_v50 = vld [vmem:[%s21657_s1 + $0x888] ss:$16 sps:$4 sm:$0xff]  }
  0xdb   :  { %9959 = vmatpush1.bf16.msra.mxu0 %v14422_v51  ;;  %10984 = vmatpush1.bf16.msra.mxu1 %v14425_v53  ;;  %v14514_v51 = vld [vmem:[%s21657_s1 + $0x8a4] ss:$16 sps:$4 sm:$0xff]   ;;  %v14517_v53 = vld [vmem:[%s21657_s1 + $0x8ac] ss:$16 sps:$4 sm:$0xff]  }
  0xdc   :  { %9960 = vmatprep.subr.bf16.mxu0 %v14430_v54  ;;  %10985 = vmatprep.subr.bf16.mxu1 %v14433_v55  ;;  %v14512_v54 = vld [vmem:[%s21657_s1 + $0x8a0] ss:$16 sps:$4 sm:$0xff]   ;;  %v14515_v55 = vld [vmem:[%s21657_s1 + $0x8a8] ss:$16 sps:$4 sm:$0xff]  }
  0xdf   :  { %9961 = vmatpush1.bf16.msra.mxu0 %v14428_v56  ;;  %10986 = vmatpush1.bf16.msra.mxu1 %v14431_v57  ;;  %v14520_v56 = vld [vmem:[%s21657_s1 + $0x8c4] ss:$16 sps:$4 sm:$0xff]   ;;  %v14523_v57 = vld [vmem:[%s21657_s1 + $0x8cc] ss:$16 sps:$4 sm:$0xff]  }
  0xe0   :  { %9962 = vmatprep.subr.bf16.mxu0 %v14436_v58  ;;  %10987 = vmatprep.subr.bf16.mxu1 %v14439_v59  ;;  %v14518_v58 = vld [vmem:[%s21657_s1 + $0x8c0] ss:$16 sps:$4 sm:$0xff]   ;;  %v14521_v59 = vld [vmem:[%s21657_s1 + $0x8c8] ss:$16 sps:$4 sm:$0xff]  }
  0xe3   :  { %9963 = vmatpush1.bf16.msra.mxu0 %v14434_v60  ;;  %10988 = vmatpush1.bf16.msra.mxu1 %v14437_v61  ;;  %v14526_v60 = vld [vmem:[%s21657_s1 + $0x8e4] ss:$16 sps:$4 sm:$0xff]   ;;  %v14529_v61 = vld [vmem:[%s21657_s1 + $0x8ec] ss:$16 sps:$4 sm:$0xff]  }
  0xe4   :  { %9964 = vmatprep.subr.bf16.mxu0 %v14442_v62  ;;  %10989 = vmatprep.subr.bf16.mxu1 %v14445_v63  ;;  %v14524_v62 = vld [vmem:[%s21657_s1 + $0x8e0] ss:$16 sps:$4 sm:$0xff]   ;;  %v14527_v63 = vld [vmem:[%s21657_s1 + $0x8e8] ss:$16 sps:$4 sm:$0xff]  }
  0xe7   :  { %9965 = vmatpush1.bf16.msra.mxu0 %v14440_v0  ;;  %10990 = vmatpush1.bf16.msra.mxu1 %v14443_v1  ;;  %v14532_v0 = vld [vmem:[%s21657_s1 + $0x904] ss:$16 sps:$4 sm:$0xff]   ;;  %v14535_v1 = vld [vmem:[%s21657_s1 + $0x90c] ss:$16 sps:$4 sm:$0xff]  }
  0xe8   :  { %9966 = vmatprep.subr.bf16.mxu0 %v14448_v2  ;;  %10991 = vmatprep.subr.bf16.mxu1 %v14451_v3  ;;  %v14530_v2 = vld [vmem:[%s21657_s1 + $0x900] ss:$16 sps:$4 sm:$0xff]   ;;  %v14533_v3 = vld [vmem:[%s21657_s1 + $0x908] ss:$16 sps:$4 sm:$0xff]  }
  0xeb   :  { %9967 = vmatpush1.bf16.msra.mxu0 %v14446_v4  ;;  %10992 = vmatpush1.bf16.msra.mxu1 %v14449_v5  ;;  %v14538_v4 = vld [vmem:[%s21657_s1 + $0x924] ss:$16 sps:$4 sm:$0xff]   ;;  %v14541_v5 = vld [vmem:[%s21657_s1 + $0x92c] ss:$16 sps:$4 sm:$0xff]  }
  0xec   :  { %9968 = vmatprep.subr.bf16.mxu0 %v14454_v6  ;;  %10993 = vmatprep.subr.bf16.mxu1 %v14457_v7  ;;  %v14536_v6 = vld [vmem:[%s21657_s1 + $0x920] ss:$16 sps:$4 sm:$0xff]   ;;  %v14539_v7 = vld [vmem:[%s21657_s1 + $0x928] ss:$16 sps:$4 sm:$0xff]  }
  0xef   :  { %9969 = vmatpush1.bf16.msra.mxu0 %v14452_v8  ;;  %10994 = vmatpush1.bf16.msra.mxu1 %v14455_v9  ;;  %v14544_v8 = vld [vmem:[%s21657_s1 + $0x944] ss:$16 sps:$4 sm:$0xff]   ;;  %v14547_v9 = vld [vmem:[%s21657_s1 + $0x94c] ss:$16 sps:$4 sm:$0xff]  }
  0xf0   :  { %9970 = vmatprep.subr.bf16.mxu0 %v14460_v10  ;;  %10995 = vmatprep.subr.bf16.mxu1 %v14463_v11  ;;  %v14542_v10 = vld [vmem:[%s21657_s1 + $0x940] ss:$16 sps:$4 sm:$0xff]   ;;  %v14545_v11 = vld [vmem:[%s21657_s1 + $0x948] ss:$16 sps:$4 sm:$0xff]  }
  0xf3   :  { %9971 = vmatpush1.bf16.msra.mxu0 %v14458_v12  ;;  %10996 = vmatpush1.bf16.msra.mxu1 %v14461_v52  ;;  %v14550_v12 = vld [vmem:[%s21657_s1 + $0x964] ss:$16 sps:$4 sm:$0xff]   ;;  %v14553_v52 = vld [vmem:[%s21657_s1 + $0x96c] ss:$16 sps:$4 sm:$0xff]  }
  0xf4   :  { %9972 = vmatprep.subr.bf16.mxu0 %v14466_v15  ;;  %10997 = vmatprep.subr.bf16.mxu1 %v14469_v16  ;;  %v14548_v15 = vld [vmem:[%s21657_s1 + $0x960] ss:$16 sps:$4 sm:$0xff]   ;;  %v14551_v16 = vld [vmem:[%s21657_s1 + $0x968] ss:$16 sps:$4 sm:$0xff]  }
  0xf7   :  { %9973 = vmatpush1.bf16.msra.mxu0 %v14464_v17  ;;  %10998 = vmatpush1.bf16.msra.mxu1 %v14467_v18  ;;  %v14556_v17 = vld [vmem:[%s21657_s1 + $0x984] ss:$16 sps:$4 sm:$0xff]   ;;  %v14559_v18 = vld [vmem:[%s21657_s1 + $0x98c] ss:$16 sps:$4 sm:$0xff]  }
  0xf8   :  { %9974 = vmatprep.subr.bf16.mxu0 %v14472_v19  ;;  %10999 = vmatprep.subr.bf16.mxu1 %v14475_v20  ;;  %v14554_v19 = vld [vmem:[%s21657_s1 + $0x980] ss:$16 sps:$4 sm:$0xff]   ;;  %v14557_v20 = vld [vmem:[%s21657_s1 + $0x988] ss:$16 sps:$4 sm:$0xff]  }
  0xfb   :  { %9975 = vmatpush1.bf16.msra.mxu0 %v14470_v22  ;;  %11000 = vmatpush1.bf16.msra.mxu1 %v14473_v23  ;;  %v14562_v22 = vld [vmem:[%s21657_s1 + $0x9a4] ss:$16 sps:$4 sm:$0xff]   ;;  %v14565_v23 = vld [vmem:[%s21657_s1 + $0x9ac] ss:$16 sps:$4 sm:$0xff]  }
  0xfc   :  { %9976 = vmatprep.subr.bf16.mxu0 %v14478_v24  ;;  %11001 = vmatprep.subr.bf16.mxu1 %v14481_v13  ;;  %v14560_v24 = vld [vmem:[%s21657_s1 + $0x9a0] ss:$16 sps:$4 sm:$0xff]   ;;  %v14563_v13 = vld [vmem:[%s21657_s1 + $0x9a8] ss:$16 sps:$4 sm:$0xff]  }
  0xff   :  { %9977 = vmatpush1.bf16.msra.mxu0 %v14476_v27  ;;  %11002 = vmatpush1.bf16.msra.mxu1 %v14479_v28  ;;  %v14568_v27 = vld [vmem:[%s21657_s1 + $0x9c4] ss:$16 sps:$4 sm:$0xff]   ;;  %v14571_v28 = vld [vmem:[%s21657_s1 + $0x9cc] ss:$16 sps:$4 sm:$0xff]  }
 0x100   :  { %9987 = vmatprep.subr.bf16.mxu0 %v14484_v29  ;;  %11012 = vmatprep.subr.bf16.mxu1 %v14487_v14  ;;  %v14566_v29 = vld [vmem:[%s21657_s1 + $0x9c0] ss:$16 sps:$4 sm:$0xff]   ;;  %v14569_v14 = vld [vmem:[%s21657_s1 + $0x9c8] ss:$16 sps:$4 sm:$0xff]  }
 0x102   :  { %9979 = vmatmul.mubr.bf16.vlgmr.msra.gmra.mrb[0].mxu0 %v1672_v31  ;;  %11004 = vmatmul.mubr.bf16.vlgmr.msra.gmra.mrb[0].mxu1 %v1672_v31  ;;  %v14577_v31 = vld [vmem:[%s21657_s1 + $0x9ec] ss:$16 sps:$4 sm:$0xff]  }
 0x103   :  { %9988 = vmatpush1.bf16.msra.mxu0 %v14482_v25  ;;  %11013 = vmatpush1.bf16.msra.mxu1 %v14485_v32  ;;  %v14572_v25 = vld [vmem:[%s21657_s1 + $0x9e0] ss:$16 sps:$4 sm:$0xff]   ;;  %v14575_v32 = vld [vmem:[%s21657_s1 + $0x9e8] ss:$16 sps:$4 sm:$0xff]  }
 0x104   :  { %9989 = vmatprep.subr.bf16.mxu0 %v14490_v33  ;;  %11014 = vmatprep.subr.bf16.mxu1 %v14493_v26  ;;  %v14580_v33 = vld [vmem:[%s21657_s1 + $0xa04] ss:$16 sps:$4 sm:$0xff]   ;;  %v14583_v26 = vld [vmem:[%s21657_s1 + $0xa0c] ss:$16 sps:$4 sm:$0xff]  }
 0x105   :  { %10019 = vmatprep.mubr.bf16.mxu0 %v17390_v34  ;;  %11044 = vmatprep.mubr.bf16.mxu1 %v17390_v34 }
 0x107   :  { %9990 = vmatpush1.bf16.msra.mxu0 %v14488_v35  ;;  %11015 = vmatpush1.bf16.msra.mxu1 %v14491_v36  ;;  %v17576_v35 = vrot.slane %v17347_v21, %v16689_v49  ;;  %v14578_v36 = vld [vmem:[%s21657_s1 + $0xa00] ss:$16 sps:$4 sm:$0xff]   ;;  %v14589_v21 = vld [vmem:[%s21657_s1 + $0xa2c] ss:$16 sps:$4 sm:$0xff]  }
 0x108   :  { %9991 = vmatprep.subr.bf16.mxu0 %v14496_v37  ;;  %11016 = vmatprep.subr.bf16.mxu1 %v14499_v38  ;;  %v14581_v37 = vld [vmem:[%s21657_s1 + $0xa08] ss:$16 sps:$4 sm:$0xff]   ;;  %v14586_v38 = vld [vmem:[%s21657_s1 + $0xa24] ss:$16 sps:$4 sm:$0xff]  }
 0x10b   :  { %9992 = vmatpush1.bf16.msra.mxu0 %v14494_v39  ;;  %11017 = vmatpush1.bf16.msra.mxu1 %v14497_v40  ;;  %v1722_v39 = vcombine.high %v17390_v34, %v17390_v34  ;;  %v14584_v40 = vld [vmem:[%s21657_s1 + $0xa20] ss:$16 sps:$4 sm:$0xff]   ;;  %v14592_v34 = vld [vmem:[%s21657_s1 + $0xa44] ss:$16 sps:$4 sm:$0xff]  }
 0x10c   :  { %9993 = vmatprep.subr.bf16.mxu0 %v14502_v41  ;;  %11018 = vmatprep.subr.bf16.mxu1 %v14505_v43  ;;  %v14587_v41 = vld [vmem:[%s21657_s1 + $0xa28] ss:$16 sps:$4 sm:$0xff]   ;;  %v14595_v43 = vld [vmem:[%s21657_s1 + $0xa4c] ss:$16 sps:$4 sm:$0xff]  }
 0x10f   :  { %9994 = vmatpush1.bf16.msra.mxu0 %v14500_v44  ;;  %11019 = vmatpush1.bf16.msra.mxu1 %v14503_v45  ;;  %v14590_v44 = vld [vmem:[%s21657_s1 + $0xa40] ss:$16 sps:$4 sm:$0xff]   ;;  %v14593_v45 = vld [vmem:[%s21657_s1 + $0xa48] ss:$16 sps:$4 sm:$0xff]  }
 0x110   :  { %9995 = vmatprep.subr.bf16.mxu0 %v14508_v46  ;;  %11020 = vmatprep.subr.bf16.mxu1 %v14511_v47  ;;  %v14598_v46 = vld [vmem:[%s21657_s1 + $0xa64] ss:$16 sps:$4 sm:$0xff]   ;;  %v14601_v47 = vld [vmem:[%s21657_s1 + $0xa6c] ss:$16 sps:$4 sm:$0xff]  }
 0x113   :  { %9996 = vmatpush1.bf16.msra.mxu0 %v14506_v48  ;;  %11021 = vmatpush1.bf16.msra.mxu1 %v14509_v50  ;;  %v14596_v48 = vld [vmem:[%s21657_s1 + $0xa60] ss:$16 sps:$4 sm:$0xff]   ;;  %v14599_v50 = vld [vmem:[%s21657_s1 + $0xa68] ss:$16 sps:$4 sm:$0xff]  }
 0x114   :  { %9997 = vmatprep.subr.bf16.mxu0 %v14514_v51  ;;  %11022 = vmatprep.subr.bf16.mxu1 %v14517_v53  ;;  %v14604_v51 = vld [vmem:[%s21657_s1 + $0xa84] ss:$16 sps:$4 sm:$0xff]   ;;  %v14607_v53 = vld [vmem:[%s21657_s1 + $0xa8c] ss:$16 sps:$4 sm:$0xff]  }
 0x117   :  { %9998 = vmatpush1.bf16.msra.mxu0 %v14512_v54  ;;  %11023 = vmatpush1.bf16.msra.mxu1 %v14515_v55  ;;  %v14602_v54 = vld [vmem:[%s21657_s1 + $0xa80] ss:$16 sps:$4 sm:$0xff]   ;;  %v14605_v55 = vld [vmem:[%s21657_s1 + $0xa88] ss:$16 sps:$4 sm:$0xff]  }
 0x118   :  { %9999 = vmatprep.subr.bf16.mxu0 %v14520_v56  ;;  %11024 = vmatprep.subr.bf16.mxu1 %v14523_v57  ;;  %v14610_v56 = vld [vmem:[%s21657_s1 + $0xaa4] ss:$16 sps:$4 sm:$0xff]   ;;  %v14613_v57 = vld [vmem:[%s21657_s1 + $0xaac] ss:$16 sps:$4 sm:$0xff]  }
 0x11b   :  { %10000 = vmatpush1.bf16.msra.mxu0 %v14518_v58  ;;  %11025 = vmatpush1.bf16.msra.mxu1 %v14521_v59  ;;  %v14608_v58 = vld [vmem:[%s21657_s1 + $0xaa0] ss:$16 sps:$4 sm:$0xff]   ;;  %v14611_v59 = vld [vmem:[%s21657_s1 + $0xaa8] ss:$16 sps:$4 sm:$0xff]  }
 0x11c   :  { %10001 = vmatprep.subr.bf16.mxu0 %v14526_v60  ;;  %11026 = vmatprep.subr.bf16.mxu1 %v14529_v61  ;;  %v14616_v60 = vld [vmem:[%s21657_s1 + $0xac4] ss:$16 sps:$4 sm:$0xff]   ;;  %v14619_v61 = vld [vmem:[%s21657_s1 + $0xacc] ss:$16 sps:$4 sm:$0xff]  }
 0x11f   :  { %10002 = vmatpush1.bf16.msra.mxu0 %v14524_v62  ;;  %11027 = vmatpush1.bf16.msra.mxu1 %v14527_v63  ;;  %v14614_v62 = vld [vmem:[%s21657_s1 + $0xac0] ss:$16 sps:$4 sm:$0xff]   ;;  %v14617_v63 = vld [vmem:[%s21657_s1 + $0xac8] ss:$16 sps:$4 sm:$0xff]  }
 0x120   :  { %10003 = vmatprep.subr.bf16.mxu0 %v14532_v0  ;;  %11028 = vmatprep.subr.bf16.mxu1 %v14535_v1  ;;  %v14622_v0 = vld [vmem:[%s21657_s1 + $0xae4] ss:$16 sps:$4 sm:$0xff]   ;;  %v14625_v1 = vld [vmem:[%s21657_s1 + $0xaec] ss:$16 sps:$4 sm:$0xff]  }
 0x123   :  { %10004 = vmatpush1.bf16.msra.mxu0 %v14530_v2  ;;  %11029 = vmatpush1.bf16.msra.mxu1 %v14533_v3  ;;  %v14620_v2 = vld [vmem:[%s21657_s1 + $0xae0] ss:$16 sps:$4 sm:$0xff]   ;;  %v14623_v3 = vld [vmem:[%s21657_s1 + $0xae8] ss:$16 sps:$4 sm:$0xff]  }
 0x124   :  { %10005 = vmatprep.subr.bf16.mxu0 %v14538_v4  ;;  %11030 = vmatprep.subr.bf16.mxu1 %v14541_v5  ;;  %v14628_v4 = vld [vmem:[%s21657_s1 + $0xb04] ss:$16 sps:$4 sm:$0xff]   ;;  %v14631_v5 = vld [vmem:[%s21657_s1 + $0xb0c] ss:$16 sps:$4 sm:$0xff]  }
 0x127   :  { %10006 = vmatpush1.bf16.msra.mxu0 %v14536_v6  ;;  %11031 = vmatpush1.bf16.msra.mxu1 %v14539_v7  ;;  %v14626_v6 = vld [vmem:[%s21657_s1 + $0xb00] ss:$16 sps:$4 sm:$0xff]   ;;  %v14629_v7 = vld [vmem:[%s21657_s1 + $0xb08] ss:$16 sps:$4 sm:$0xff]  }
 0x128   :  { %10007 = vmatprep.subr.bf16.mxu0 %v14544_v8  ;;  %11032 = vmatprep.subr.bf16.mxu1 %v14547_v9  ;;  %v14634_v8 = vld [vmem:[%s21657_s1 + $0xb24] ss:$16 sps:$4 sm:$0xff]   ;;  %v14637_v9 = vld [vmem:[%s21657_s1 + $0xb2c] ss:$16 sps:$4 sm:$0xff]  }
 0x12b   :  { %10008 = vmatpush1.bf16.msra.mxu0 %v14542_v10  ;;  %11033 = vmatpush1.bf16.msra.mxu1 %v14545_v11  ;;  %v14632_v10 = vld [vmem:[%s21657_s1 + $0xb20] ss:$16 sps:$4 sm:$0xff]   ;;  %v14635_v11 = vld [vmem:[%s21657_s1 + $0xb28] ss:$16 sps:$4 sm:$0xff]  }
 0x12c   :  { %10009 = vmatprep.subr.bf16.mxu0 %v14550_v12  ;;  %11034 = vmatprep.subr.bf16.mxu1 %v14553_v52  ;;  %v14640_v12 = vld [vmem:[%s21657_s1 + $0xb44] ss:$16 sps:$4 sm:$0xff]   ;;  %v14643_v52 = vld [vmem:[%s21657_s1 + $0xb4c] ss:$16 sps:$4 sm:$0xff]  }
 0x12f   :  { %10010 = vmatpush1.bf16.msra.mxu0 %v14548_v15  ;;  %11035 = vmatpush1.bf16.msra.mxu1 %v14551_v16  ;;  %v14638_v15 = vld [vmem:[%s21657_s1 + $0xb40] ss:$16 sps:$4 sm:$0xff]   ;;  %v14641_v16 = vld [vmem:[%s21657_s1 + $0xb48] ss:$16 sps:$4 sm:$0xff]  }
 0x130   :  { %10011 = vmatprep.subr.bf16.mxu0 %v14556_v17  ;;  %11036 = vmatprep.subr.bf16.mxu1 %v14559_v18  ;;  %v14646_v17 = vld [vmem:[%s21657_s1 + $0xb64] ss:$16 sps:$4 sm:$0xff]   ;;  %v14649_v18 = vld [vmem:[%s21657_s1 + $0xb6c] ss:$16 sps:$4 sm:$0xff]  }
 0x133   :  { %10012 = vmatpush1.bf16.msra.mxu0 %v14554_v19  ;;  %11037 = vmatpush1.bf16.msra.mxu1 %v14557_v20  ;;  %v14644_v19 = vld [vmem:[%s21657_s1 + $0xb60] ss:$16 sps:$4 sm:$0xff]   ;;  %v14647_v20 = vld [vmem:[%s21657_s1 + $0xb68] ss:$16 sps:$4 sm:$0xff]  }
 0x134   :  { %10013 = vmatprep.subr.bf16.mxu0 %v14562_v22  ;;  %11038 = vmatprep.subr.bf16.mxu1 %v14565_v23  ;;  %v14652_v22 = vld [vmem:[%s21657_s1 + $0xb84] ss:$16 sps:$4 sm:$0xff]   ;;  %v14655_v23 = vld [vmem:[%s21657_s1 + $0xb8c] ss:$16 sps:$4 sm:$0xff]  }
 0x137   :  { %10014 = vmatpush1.bf16.msra.mxu0 %v14560_v24  ;;  %11039 = vmatpush1.bf16.msra.mxu1 %v14563_v13  ;;  %v14650_v24 = vld [vmem:[%s21657_s1 + $0xb80] ss:$16 sps:$4 sm:$0xff]   ;;  %v14653_v13 = vld [vmem:[%s21657_s1 + $0xb88] ss:$16 sps:$4 sm:$0xff]  }
 0x138   :  { %10015 = vmatprep.subr.bf16.mxu0 %v14568_v27  ;;  %11040 = vmatprep.subr.bf16.mxu1 %v14571_v28  ;;  %v14658_v27 = vld [vmem:[%s21657_s1 + $0xba4] ss:$16 sps:$4 sm:$0xff]   ;;  %v14661_v28 = vld [vmem:[%s21657_s1 + $0xbac] ss:$16 sps:$4 sm:$0xff]  }
 0x13b   :  { %10016 = vmatpush1.bf16.msra.mxu0 %v14566_v29  ;;  %11041 = vmatpush1.bf16.msra.mxu1 %v14569_v14  ;;  %v14656_v29 = vld [vmem:[%s21657_s1 + $0xba0] ss:$16 sps:$4 sm:$0xff]   ;;  %v14659_v14 = vld [vmem:[%s21657_s1 + $0xba8] ss:$16 sps:$4 sm:$0xff]  }
 0x13c   :  { %10017 = vmatprep.subr.bf16.mxu0 %v14574_v30  ;;  %11042 = vmatprep.subr.bf16.mxu1 %v14577_v31  ;;  %v14664_v30 = vld [vmem:[%s21657_s1 + $0xbc4] ss:$16 sps:$4 sm:$0xff]   ;;  %v14667_v31 = vld [vmem:[%s21657_s1 + $0xbcc] ss:$16 sps:$4 sm:$0xff]  }
 0x13f   :  { %10018 = vmatpush1.bf16.msra.mxu0 %v14572_v25  ;;  %11043 = vmatpush1.bf16.msra.mxu1 %v14575_v32  ;;  %v16491_v25 = vld [vmem:[%s21656_s0 + $0x8] sm:$0xff] }
 0x140   :  { %10028 = vmatprep.subr.bf16.mxu0 %v14580_v33  ;;  %11053 = vmatprep.subr.bf16.mxu1 %v14583_v26  ;;  %v1675_v32 = vcombine.high %v16491_v25, %v16491_v25  ;;  %v14662_v33 = vld [vmem:[%s21657_s1 + $0xbc0] ss:$16 sps:$4 sm:$0xff]   ;;  %v14665_v26 = vld [vmem:[%s21657_s1 + $0xbc8] ss:$16 sps:$4 sm:$0xff]  }
 0x141   :  { %v14746_v25 = vld [vmem:[%s21657_s1 + $0xd80] ss:$16 sps:$4 sm:$0xff]  }
 0x142   :  { %10020 = vmatmul.mubr.bf16.vlgmr.msra.gmra.mrb[0].mxu0 %v17576_v35  ;;  %11045 = vmatmul.mubr.bf16.vlgmr.msra.gmra.mrb[0].mxu1 %v17576_v35 }
 0x143   :  { %10029 = vmatpush1.bf16.msra.mxu0 %v14578_v36  ;;  %11054 = vmatpush1.bf16.msra.mxu1 %v14581_v37  ;;  %v14670_v36 = vld [vmem:[%s21657_s1 + $0xbe4] ss:$16 sps:$4 sm:$0xff]   ;;  %v14673_v37 = vld [vmem:[%s21657_s1 + $0xbec] ss:$16 sps:$4 sm:$0xff]  }
 0x144   :  { %10030 = vmatprep.subr.bf16.mxu0 %v14586_v38  ;;  %11055 = vmatprep.subr.bf16.mxu1 %v14589_v21  ;;  %v17766_v38 = vrot.slane %v1675_v32, %v16689_v49  ;;  %v14668_v21 = vld [vmem:[%s21657_s1 + $0xbe0] ss:$16 sps:$4 sm:$0xff]   ;;  %v14749_v32 = vld [vmem:[%s21657_s1 + $0xd88] ss:$16 sps:$4 sm:$0xff]  }
 0x145   :  { %10060 = vmatprep.mubr.bf16.mxu0 %v1722_v39  ;;  %11085 = vmatprep.mubr.bf16.mxu1 %v1722_v39  ;;  %v14671_v39 = vld [vmem:[%s21657_s1 + $0xbe8] ss:$16 sps:$4 sm:$0xff]  }
 0x147   :  { %10031 = vmatpush1.bf16.msra.mxu0 %v14584_v40  ;;  %11056 = vmatpush1.bf16.msra.mxu1 %v14587_v41  ;;  %v14676_v40 = vld [vmem:[%s21657_s1 + $0xc04] ss:$16 sps:$4 sm:$0xff]   ;;  %v14679_v41 = vld [vmem:[%s21657_s1 + $0xc0c] ss:$16 sps:$4 sm:$0xff]  }
 0x148   :  { %10032 = vmatprep.subr.bf16.mxu0 %v14592_v34  ;;  %11057 = vmatprep.subr.bf16.mxu1 %v14595_v43  ;;  %v1691_v34 = vcombine.high %v17766_v38, %v17766_v38  ;;  %v1720_v43 = vcombine.high %v17576_v35, %v17576_v35  ;;  %v14685_v35 = vld [vmem:[%s21657_s1 + $0xc2c] ss:$16 sps:$4 sm:$0xff]  }
 0x14b   :  { %10033 = vmatpush1.bf16.msra.mxu0 %v14590_v44  ;;  %11058 = vmatpush1.bf16.msra.mxu1 %v14593_v45  ;;  %v14674_v44 = vld [vmem:[%s21657_s1 + $0xc00] ss:$16 sps:$4 sm:$0xff]   ;;  %v14677_v45 = vld [vmem:[%s21657_s1 + $0xc08] ss:$16 sps:$4 sm:$0xff]  }
 0x14c   :  { %10034 = vmatprep.subr.bf16.mxu0 %v14598_v46  ;;  %11059 = vmatprep.subr.bf16.mxu1 %v14601_v47  ;;  %v14682_v46 = vld [vmem:[%s21657_s1 + $0xc24] ss:$16 sps:$4 sm:$0xff]   ;;  %v17797_v47 = vrot.slane %v1691_v34, %v16689_v49 }
 0x14d   :  { %v14766_v34 = vld [vmem:[%s21657_s1 + $0xde4] ss:$16 sps:$4 sm:$0xff]  }
 0x14f   :  { %10035 = vmatpush1.bf16.msra.mxu0 %v14596_v48  ;;  %11060 = vmatpush1.bf16.msra.mxu1 %v14599_v50  ;;  %v14680_v48 = vld [vmem:[%s21657_s1 + $0xc20] ss:$16 sps:$4 sm:$0xff]   ;;  %v14683_v50 = vld [vmem:[%s21657_s1 + $0xc28] ss:$16 sps:$4 sm:$0xff]  }
 0x150   :  { %10036 = vmatprep.subr.bf16.mxu0 %v14604_v51  ;;  %11061 = vmatprep.subr.bf16.mxu1 %v14607_v53  ;;  %v14688_v51 = vld [vmem:[%s21657_s1 + $0xc44] ss:$16 sps:$4 sm:$0xff]   ;;  %v14691_v53 = vld [vmem:[%s21657_s1 + $0xc4c] ss:$16 sps:$4 sm:$0xff]  }
 0x153   :  { %10037 = vmatpush1.bf16.msra.mxu0 %v14602_v54  ;;  %11062 = vmatpush1.bf16.msra.mxu1 %v14605_v55  ;;  %v14686_v54 = vld [vmem:[%s21657_s1 + $0xc40] ss:$16 sps:$4 sm:$0xff]   ;;  %v14689_v55 = vld [vmem:[%s21657_s1 + $0xc48] ss:$16 sps:$4 sm:$0xff]  }
 0x154   :  { %10038 = vmatprep.subr.bf16.mxu0 %v14610_v56  ;;  %11063 = vmatprep.subr.bf16.mxu1 %v14613_v57  ;;  %v14694_v56 = vld [vmem:[%s21657_s1 + $0xc64] ss:$16 sps:$4 sm:$0xff]   ;;  %v14697_v57 = vld [vmem:[%s21657_s1 + $0xc6c] ss:$16 sps:$4 sm:$0xff]  }
 0x157   :  { %10039 = vmatpush1.bf16.msra.mxu0 %v14608_v58  ;;  %11064 = vmatpush1.bf16.msra.mxu1 %v14611_v59  ;;  %v14692_v58 = vld [vmem:[%s21657_s1 + $0xc60] ss:$16 sps:$4 sm:$0xff]   ;;  %v14695_v59 = vld [vmem:[%s21657_s1 + $0xc68] ss:$16 sps:$4 sm:$0xff]  }
 0x158   :  { %10040 = vmatprep.subr.bf16.mxu0 %v14616_v60  ;;  %11065 = vmatprep.subr.bf16.mxu1 %v14619_v61  ;;  %v14700_v60 = vld [vmem:[%s21657_s1 + $0xc84] ss:$16 sps:$4 sm:$0xff]   ;;  %v14703_v61 = vld [vmem:[%s21657_s1 + $0xc8c] ss:$16 sps:$4 sm:$0xff]  }
 0x15b   :  { %10041 = vmatpush1.bf16.msra.mxu0 %v14614_v62  ;;  %11066 = vmatpush1.bf16.msra.mxu1 %v14617_v63  ;;  %v14698_v62 = vld [vmem:[%s21657_s1 + $0xc80] ss:$16 sps:$4 sm:$0xff]   ;;  %v14701_v63 = vld [vmem:[%s21657_s1 + $0xc88] ss:$16 sps:$4 sm:$0xff]  }
 0x15c   :  { %10042 = vmatprep.subr.bf16.mxu0 %v14622_v0  ;;  %11067 = vmatprep.subr.bf16.mxu1 %v14625_v1  ;;  %v14706_v0 = vld [vmem:[%s21657_s1 + $0xca4] ss:$16 sps:$4 sm:$0xff]   ;;  %v14709_v1 = vld [vmem:[%s21657_s1 + $0xcac] ss:$16 sps:$4 sm:$0xff]  }
 0x15f   :  { %10043 = vmatpush1.bf16.msra.mxu0 %v14620_v2  ;;  %11068 = vmatpush1.bf16.msra.mxu1 %v14623_v3  ;;  %v14704_v2 = vld [vmem:[%s21657_s1 + $0xca0] ss:$16 sps:$4 sm:$0xff]   ;;  %v14707_v3 = vld [vmem:[%s21657_s1 + $0xca8] ss:$16 sps:$4 sm:$0xff]  }
 0x160   :  { %10044 = vmatprep.subr.bf16.mxu0 %v14628_v4  ;;  %11069 = vmatprep.subr.bf16.mxu1 %v14631_v5  ;;  %v14712_v4 = vld [vmem:[%s21657_s1 + $0xcc4] ss:$16 sps:$4 sm:$0xff]   ;;  %v14715_v5 = vld [vmem:[%s21657_s1 + $0xccc] ss:$16 sps:$4 sm:$0xff]  }
 0x163   :  { %10045 = vmatpush1.bf16.msra.mxu0 %v14626_v6  ;;  %11070 = vmatpush1.bf16.msra.mxu1 %v14629_v7  ;;  %v14710_v6 = vld [vmem:[%s21657_s1 + $0xcc0] ss:$16 sps:$4 sm:$0xff]   ;;  %v14713_v7 = vld [vmem:[%s21657_s1 + $0xcc8] ss:$16 sps:$4 sm:$0xff]  }
 0x164   :  { %10046 = vmatprep.subr.bf16.mxu0 %v14634_v8  ;;  %11071 = vmatprep.subr.bf16.mxu1 %v14637_v9  ;;  %v14718_v8 = vld [vmem:[%s21657_s1 + $0xce4] ss:$16 sps:$4 sm:$0xff]   ;;  %v14721_v9 = vld [vmem:[%s21657_s1 + $0xcec] ss:$16 sps:$4 sm:$0xff]  }
 0x167   :  { %10047 = vmatpush1.bf16.msra.mxu0 %v14632_v10  ;;  %11072 = vmatpush1.bf16.msra.mxu1 %v14635_v11  ;;  %v14716_v10 = vld [vmem:[%s21657_s1 + $0xce0] ss:$16 sps:$4 sm:$0xff]   ;;  %v14719_v11 = vld [vmem:[%s21657_s1 + $0xce8] ss:$16 sps:$4 sm:$0xff]  }
 0x168   :  { %10048 = vmatprep.subr.bf16.mxu0 %v14640_v12  ;;  %11073 = vmatprep.subr.bf16.mxu1 %v14643_v52  ;;  %v14724_v12 = vld [vmem:[%s21657_s1 + $0xd04] ss:$16 sps:$4 sm:$0xff]   ;;  %v14727_v52 = vld [vmem:[%s21657_s1 + $0xd0c] ss:$16 sps:$4 sm:$0xff]  }
 0x16b   :  { %10049 = vmatpush1.bf16.msra.mxu0 %v14638_v15  ;;  %11074 = vmatpush1.bf16.msra.mxu1 %v14641_v16  ;;  %v14722_v15 = vld [vmem:[%s21657_s1 + $0xd00] ss:$16 sps:$4 sm:$0xff]   ;;  %v14725_v16 = vld [vmem:[%s21657_s1 + $0xd08] ss:$16 sps:$4 sm:$0xff]  }
 0x16c   :  { %10050 = vmatprep.subr.bf16.mxu0 %v14646_v17  ;;  %11075 = vmatprep.subr.bf16.mxu1 %v14649_v18  ;;  %v14730_v17 = vld [vmem:[%s21657_s1 + $0xd24] ss:$16 sps:$4 sm:$0xff]   ;;  %v14733_v18 = vld [vmem:[%s21657_s1 + $0xd2c] ss:$16 sps:$4 sm:$0xff]  }
 0x16f   :  { %10051 = vmatpush1.bf16.msra.mxu0 %v14644_v19  ;;  %11076 = vmatpush1.bf16.msra.mxu1 %v14647_v20  ;;  %v14728_v19 = vld [vmem:[%s21657_s1 + $0xd20] ss:$16 sps:$4 sm:$0xff]   ;;  %v14731_v20 = vld [vmem:[%s21657_s1 + $0xd28] ss:$16 sps:$4 sm:$0xff]  }
 0x170   :  { %10052 = vmatprep.subr.bf16.mxu0 %v14652_v22  ;;  %11077 = vmatprep.subr.bf16.mxu1 %v14655_v23  ;;  %v14736_v22 = vld [vmem:[%s21657_s1 + $0xd44] ss:$16 sps:$4 sm:$0xff]   ;;  %v14739_v23 = vld [vmem:[%s21657_s1 + $0xd4c] ss:$16 sps:$4 sm:$0xff]  }
 0x173   :  { %10053 = vmatpush1.bf16.msra.mxu0 %v14650_v24  ;;  %11078 = vmatpush1.bf16.msra.mxu1 %v14653_v13  ;;  %v14734_v24 = vld [vmem:[%s21657_s1 + $0xd40] ss:$16 sps:$4 sm:$0xff]   ;;  %v14737_v13 = vld [vmem:[%s21657_s1 + $0xd48] ss:$16 sps:$4 sm:$0xff]  }
 0x174   :  { %10054 = vmatprep.subr.bf16.mxu0 %v14658_v27  ;;  %11079 = vmatprep.subr.bf16.mxu1 %v14661_v28  ;;  %v14742_v27 = vld [vmem:[%s21657_s1 + $0xd64] ss:$16 sps:$4 sm:$0xff]   ;;  %v14745_v28 = vld [vmem:[%s21657_s1 + $0xd6c] ss:$16 sps:$4 sm:$0xff]  }
 0x177   :  { %10055 = vmatpush1.bf16.msra.mxu0 %v14656_v29  ;;  %11080 = vmatpush1.bf16.msra.mxu1 %v14659_v14  ;;  %v14740_v29 = vld [vmem:[%s21657_s1 + $0xd60] ss:$16 sps:$4 sm:$0xff]   ;;  %v14743_v14 = vld [vmem:[%s21657_s1 + $0xd68] ss:$16 sps:$4 sm:$0xff]  }
 0x178   :  { %10056 = vmatprep.subr.bf16.mxu0 %v14664_v30  ;;  %11081 = vmatprep.subr.bf16.mxu1 %v14667_v31  ;;  %v14748_v30 = vld [vmem:[%s21657_s1 + $0xd84] ss:$16 sps:$4 sm:$0xff]   ;;  %v14751_v31 = vld [vmem:[%s21657_s1 + $0xd8c] ss:$16 sps:$4 sm:$0xff]  }
 0x17b   :  { %10057 = vmatpush1.bf16.msra.mxu0 %v14662_v33  ;;  %11082 = vmatpush1.bf16.msra.mxu1 %v14665_v26  ;;  %v14754_v33 = vld [vmem:[%s21657_s1 + $0xda4] ss:$16 sps:$4 sm:$0xff]   ;;  %v14757_v26 = vld [vmem:[%s21657_s1 + $0xdac] ss:$16 sps:$4 sm:$0xff]  }
 0x17c   :  { %10058 = vmatprep.subr.bf16.mxu0 %v14670_v36  ;;  %11083 = vmatprep.subr.bf16.mxu1 %v14673_v37  ;;  %v14752_v36 = vld [vmem:[%s21657_s1 + $0xda0] ss:$16 sps:$4 sm:$0xff]   ;;  %v14755_v37 = vld [vmem:[%s21657_s1 + $0xda8] ss:$16 sps:$4 sm:$0xff]  }
 0x17f   :  { %10059 = vmatpush1.bf16.msra.mxu0 %v14668_v21  ;;  %11084 = vmatpush1.bf16.msra.mxu1 %v14671_v39  ;;  %v14760_v21 = vld [vmem:[%s21657_s1 + $0xdc4] ss:$16 sps:$4 sm:$0xff]   ;;  %v14763_v39 = vld [vmem:[%s21657_s1 + $0xdcc] ss:$16 sps:$4 sm:$0xff]  }
 0x180   :  { %10069 = vmatprep.subr.bf16.mxu0 %v14676_v40  ;;  %11094 = vmatprep.subr.bf16.mxu1 %v14679_v41  ;;  %v14758_v40 = vld [vmem:[%s21657_s1 + $0xdc0] ss:$16 sps:$4 sm:$0xff]   ;;  %v14761_v41 = vld [vmem:[%s21657_s1 + $0xdc8] ss:$16 sps:$4 sm:$0xff]  }
 0x182   :  { %10061 = vmatmul.mubr.bf16.vlgmr.msra.gmra.mrb[0].mxu0 %v1720_v43  ;;  %11086 = vmatmul.mubr.bf16.vlgmr.msra.gmra.mrb[0].mxu1 %v1720_v43  ;;  %v14769_v43 = vld [vmem:[%s21657_s1 + $0xdec] ss:$16 sps:$4 sm:$0xff]  }
 0x183   :  { %10070 = vmatpush1.bf16.msra.mxu0 %v14674_v44  ;;  %11095 = vmatpush1.bf16.msra.mxu1 %v14677_v45  ;;  %v14764_v44 = vld [vmem:[%s21657_s1 + $0xde0] ss:$16 sps:$4 sm:$0xff]   ;;  %v14767_v45 = vld [vmem:[%s21657_s1 + $0xde8] ss:$16 sps:$4 sm:$0xff]  }
 0x184   :  { %10071 = vmatprep.subr.bf16.mxu0 %v14682_v46  ;;  %11096 = vmatprep.subr.bf16.mxu1 %v14685_v35  ;;  %v14773_v46 = vld [vmem:[%s21657_s1 + $0xe04] ss:$16 sps:$4 sm:$0xff]   ;;  %v14776_v35 = vld [vmem:[%s21657_s1 + $0xe0c] ss:$16 sps:$4 sm:$0xff]  }
 0x185   :  { %10101 = vmatprep.mubr.bf16.mxu0 %v17797_v47  ;;  %11126 = vmatprep.mubr.bf16.mxu1 %v17797_v47 }
 0x187   :  { %10072 = vmatpush1.bf16.msra.mxu0 %v14680_v48  ;;  %11097 = vmatpush1.bf16.msra.mxu1 %v14683_v50  ;;  %v17983_v48 = vrot.slane %v17766_v38, %v16689_v49  ;;  %v14771_v50 = vld [vmem:[%s21657_s1 + $0xe00] ss:$16 sps:$4 sm:$0xff]   ;;  %v14782_v38 = vld [vmem:[%s21657_s1 + $0xe2c] ss:$16 sps:$4 sm:$0xff]  }
 0x188   :  { %10073 = vmatprep.subr.bf16.mxu0 %v14688_v51  ;;  %11098 = vmatprep.subr.bf16.mxu1 %v14691_v53  ;;  %v14774_v51 = vld [vmem:[%s21657_s1 + $0xe08] ss:$16 sps:$4 sm:$0xff]   ;;  %v14779_v53 = vld [vmem:[%s21657_s1 + $0xe24] ss:$16 sps:$4 sm:$0xff]  }
 0x18b   :  { %10074 = vmatpush1.bf16.msra.mxu0 %v14686_v54  ;;  %11099 = vmatpush1.bf16.msra.mxu1 %v14689_v55  ;;  %v1723_v54 = vcombine.high %v17797_v47, %v17797_v47  ;;  %v14777_v55 = vld [vmem:[%s21657_s1 + $0xe20] ss:$16 sps:$4 sm:$0xff]   ;;  %v14785_v47 = vld [vmem:[%s21657_s1 + $0xe44] ss:$16 sps:$4 sm:$0xff]  }
 0x18c   :  { %10075 = vmatprep.subr.bf16.mxu0 %v14694_v56  ;;  %11100 = vmatprep.subr.bf16.mxu1 %v14697_v57  ;;  %v14780_v56 = vld [vmem:[%s21657_s1 + $0xe28] ss:$16 sps:$4 sm:$0xff]   ;;  %v14788_v57 = vld [vmem:[%s21657_s1 + $0xe4c] ss:$16 sps:$4 sm:$0xff]  }
 0x18f   :  { %10076 = vmatpush1.bf16.msra.mxu0 %v14692_v58  ;;  %11101 = vmatpush1.bf16.msra.mxu1 %v14695_v59  ;;  %v14783_v58 = vld [vmem:[%s21657_s1 + $0xe40] ss:$16 sps:$4 sm:$0xff]   ;;  %v14786_v59 = vld [vmem:[%s21657_s1 + $0xe48] ss:$16 sps:$4 sm:$0xff]  }
 0x190   :  { %10077 = vmatprep.subr.bf16.mxu0 %v14700_v60  ;;  %11102 = vmatprep.subr.bf16.mxu1 %v14703_v61  ;;  %v14791_v60 = vld [vmem:[%s21657_s1 + $0xe64] ss:$16 sps:$4 sm:$0xff]   ;;  %v14794_v61 = vld [vmem:[%s21657_s1 + $0xe6c] ss:$16 sps:$4 sm:$0xff]  }
 0x193   :  { %10078 = vmatpush1.bf16.msra.mxu0 %v14698_v62  ;;  %11103 = vmatpush1.bf16.msra.mxu1 %v14701_v63  ;;  %v14789_v62 = vld [vmem:[%s21657_s1 + $0xe60] ss:$16 sps:$4 sm:$0xff]   ;;  %v14792_v63 = vld [vmem:[%s21657_s1 + $0xe68] ss:$16 sps:$4 sm:$0xff]  }
 0x194   :  { %10079 = vmatprep.subr.bf16.mxu0 %v14706_v0  ;;  %11104 = vmatprep.subr.bf16.mxu1 %v14709_v1  ;;  %v14797_v0 = vld [vmem:[%s21657_s1 + $0xe84] ss:$16 sps:$4 sm:$0xff]   ;;  %v14800_v1 = vld [vmem:[%s21657_s1 + $0xe8c] ss:$16 sps:$4 sm:$0xff]  }
 0x197   :  { %10080 = vmatpush1.bf16.msra.mxu0 %v14704_v2  ;;  %11105 = vmatpush1.bf16.msra.mxu1 %v14707_v3  ;;  %v14795_v2 = vld [vmem:[%s21657_s1 + $0xe80] ss:$16 sps:$4 sm:$0xff]   ;;  %v14798_v3 = vld [vmem:[%s21657_s1 + $0xe88] ss:$16 sps:$4 sm:$0xff]  }
 0x198   :  { %10081 = vmatprep.subr.bf16.mxu0 %v14712_v4  ;;  %11106 = vmatprep.subr.bf16.mxu1 %v14715_v5  ;;  %v14803_v4 = vld [vmem:[%s21657_s1 + $0xea4] ss:$16 sps:$4 sm:$0xff]   ;;  %v14806_v5 = vld [vmem:[%s21657_s1 + $0xeac] ss:$16 sps:$4 sm:$0xff]  }
 0x19b   :  { %10082 = vmatpush1.bf16.msra.mxu0 %v14710_v6  ;;  %11107 = vmatpush1.bf16.msra.mxu1 %v14713_v7  ;;  %v14801_v6 = vld [vmem:[%s21657_s1 + $0xea0] ss:$16 sps:$4 sm:$0xff]   ;;  %v14804_v7 = vld [vmem:[%s21657_s1 + $0xea8] ss:$16 sps:$4 sm:$0xff]  }
 0x19c   :  { %10083 = vmatprep.subr.bf16.mxu0 %v14718_v8  ;;  %11108 = vmatprep.subr.bf16.mxu1 %v14721_v9  ;;  %v14809_v8 = vld [vmem:[%s21657_s1 + $0xec4] ss:$16 sps:$4 sm:$0xff]   ;;  %v14812_v9 = vld [vmem:[%s21657_s1 + $0xecc] ss:$16 sps:$4 sm:$0xff]  }
 0x19f   :  { %10084 = vmatpush1.bf16.msra.mxu0 %v14716_v10  ;;  %11109 = vmatpush1.bf16.msra.mxu1 %v14719_v11  ;;  %v14807_v10 = vld [vmem:[%s21657_s1 + $0xec0] ss:$16 sps:$4 sm:$0xff]   ;;  %v14810_v11 = vld [vmem:[%s21657_s1 + $0xec8] ss:$16 sps:$4 sm:$0xff]  }
 0x1a0   :  { %10085 = vmatprep.subr.bf16.mxu0 %v14724_v12  ;;  %11110 = vmatprep.subr.bf16.mxu1 %v14727_v52  ;;  %v14815_v12 = vld [vmem:[%s21657_s1 + $0xee4] ss:$16 sps:$4 sm:$0xff]   ;;  %v14818_v52 = vld [vmem:[%s21657_s1 + $0xeec] ss:$16 sps:$4 sm:$0xff]  }
 0x1a3   :  { %10086 = vmatpush1.bf16.msra.mxu0 %v14722_v15  ;;  %11111 = vmatpush1.bf16.msra.mxu1 %v14725_v16  ;;  %v14813_v15 = vld [vmem:[%s21657_s1 + $0xee0] ss:$16 sps:$4 sm:$0xff]   ;;  %v14816_v16 = vld [vmem:[%s21657_s1 + $0xee8] ss:$16 sps:$4 sm:$0xff]  }
 0x1a4   :  { %10087 = vmatprep.subr.bf16.mxu0 %v14730_v17  ;;  %11112 = vmatprep.subr.bf16.mxu1 %v14733_v18  ;;  %v14821_v17 = vld [vmem:[%s21657_s1 + $0xf04] ss:$16 sps:$4 sm:$0xff]   ;;  %v14824_v18 = vld [vmem:[%s21657_s1 + $0xf0c] ss:$16 sps:$4 sm:$0xff]  }
 0x1a7   :  { %10088 = vmatpush1.bf16.msra.mxu0 %v14728_v19  ;;  %11113 = vmatpush1.bf16.msra.mxu1 %v14731_v20  ;;  %v14819_v19 = vld [vmem:[%s21657_s1 + $0xf00] ss:$16 sps:$4 sm:$0xff]   ;;  %v14822_v20 = vld [vmem:[%s21657_s1 + $0xf08] ss:$16 sps:$4 sm:$0xff]  }
 0x1a8   :  { %10089 = vmatprep.subr.bf16.mxu0 %v14736_v22  ;;  %11114 = vmatprep.subr.bf16.mxu1 %v14739_v23  ;;  %v14827_v22 = vld [vmem:[%s21657_s1 + $0xf24] ss:$16 sps:$4 sm:$0xff]   ;;  %v14830_v23 = vld [vmem:[%s21657_s1 + $0xf2c] ss:$16 sps:$4 sm:$0xff]  }
 0x1ab   :  { %10090 = vmatpush1.bf16.msra.mxu0 %v14734_v24  ;;  %11115 = vmatpush1.bf16.msra.mxu1 %v14737_v13  ;;  %v14825_v24 = vld [vmem:[%s21657_s1 + $0xf20] ss:$16 sps:$4 sm:$0xff]   ;;  %v14828_v13 = vld [vmem:[%s21657_s1 + $0xf28] ss:$16 sps:$4 sm:$0xff]  }
 0x1ac   :  { %10091 = vmatprep.subr.bf16.mxu0 %v14742_v27  ;;  %11116 = vmatprep.subr.bf16.mxu1 %v14745_v28  ;;  %v14833_v27 = vld [vmem:[%s21657_s1 + $0xf44] ss:$16 sps:$4 sm:$0xff]   ;;  %v14836_v28 = vld [vmem:[%s21657_s1 + $0xf4c] ss:$16 sps:$4 sm:$0xff]  }
 0x1af   :  { %10092 = vmatpush1.bf16.msra.mxu0 %v14740_v29  ;;  %11117 = vmatpush1.bf16.msra.mxu1 %v14743_v14  ;;  %v14831_v29 = vld [vmem:[%s21657_s1 + $0xf40] ss:$16 sps:$4 sm:$0xff]   ;;  %v14834_v14 = vld [vmem:[%s21657_s1 + $0xf48] ss:$16 sps:$4 sm:$0xff]  }
 0x1b0   :  { %10093 = vmatprep.subr.bf16.mxu0 %v14748_v30  ;;  %11118 = vmatprep.subr.bf16.mxu1 %v14751_v31  ;;  %v14839_v30 = vld [vmem:[%s21657_s1 + $0xf64] ss:$16 sps:$4 sm:$0xff]   ;;  %v14842_v31 = vld [vmem:[%s21657_s1 + $0xf6c] ss:$16 sps:$4 sm:$0xff]  }
 0x1b3   :  { %10094 = vmatpush1.bf16.msra.mxu0 %v14746_v25  ;;  %11119 = vmatpush1.bf16.msra.mxu1 %v14749_v32  ;;  %v14837_v25 = vld [vmem:[%s21657_s1 + $0xf60] ss:$16 sps:$4 sm:$0xff]   ;;  %v14840_v32 = vld [vmem:[%s21657_s1 + $0xf68] ss:$16 sps:$4 sm:$0xff]  }
 0x1b4   :  { %10095 = vmatprep.subr.bf16.mxu0 %v14754_v33  ;;  %11120 = vmatprep.subr.bf16.mxu1 %v14757_v26  ;;  %v14845_v33 = vld [vmem:[%s21657_s1 + $0xf84] ss:$16 sps:$4 sm:$0xff]   ;;  %v14848_v26 = vld [vmem:[%s21657_s1 + $0xf8c] ss:$16 sps:$4 sm:$0xff]  }
 0x1b7   :  { %10096 = vmatpush1.bf16.msra.mxu0 %v14752_v36  ;;  %11121 = vmatpush1.bf16.msra.mxu1 %v14755_v37  ;;  %v14843_v36 = vld [vmem:[%s21657_s1 + $0xf80] ss:$16 sps:$4 sm:$0xff]   ;;  %v14846_v37 = vld [vmem:[%s21657_s1 + $0xf88] ss:$16 sps:$4 sm:$0xff]  }
 0x1b8   :  { %10097 = vmatprep.subr.bf16.mxu0 %v14760_v21  ;;  %11122 = vmatprep.subr.bf16.mxu1 %v14763_v39  ;;  %v14851_v21 = vld [vmem:[%s21657_s1 + $0xfa4] ss:$16 sps:$4 sm:$0xff]   ;;  %v14854_v39 = vld [vmem:[%s21657_s1 + $0xfac] ss:$16 sps:$4 sm:$0xff]  }
 0x1bb   :  { %10098 = vmatpush1.bf16.msra.mxu0 %v14758_v40  ;;  %11123 = vmatpush1.bf16.msra.mxu1 %v14761_v41  ;;  %v14849_v40 = vld [vmem:[%s21657_s1 + $0xfa0] ss:$16 sps:$4 sm:$0xff]   ;;  %v14852_v41 = vld [vmem:[%s21657_s1 + $0xfa8] ss:$16 sps:$4 sm:$0xff]  }
 0x1bc   :  { %10099 = vmatprep.subr.bf16.mxu0 %v14766_v34  ;;  %11124 = vmatprep.subr.bf16.mxu1 %v14769_v43  ;;  %v14857_v34 = vld [vmem:[%s21657_s1 + $0xfc4] ss:$16 sps:$4 sm:$0xff]   ;;  %v14860_v43 = vld [vmem:[%s21657_s1 + $0xfcc] ss:$16 sps:$4 sm:$0xff]  }
 0x1bf   :  { %10100 = vmatpush1.bf16.msra.mxu0 %v14764_v44  ;;  %11125 = vmatpush1.bf16.msra.mxu1 %v14767_v45  ;;  %v18160_v44 = vld.sshfl [vmem:[%s21656_s0 + $0x10] sm:$0xff pattern:$0x75316420] }
 0x1c0   :  { %10110 = vmatprep.subr.bf16.mxu0 %v14773_v46  ;;  %11135 = vmatprep.subr.bf16.mxu1 %v14776_v35  ;;  %v14855_v45 = vld [vmem:[%s21657_s1 + $0xfc0] ss:$16 sps:$4 sm:$0xff]   ;;  %v14858_v46 = vld [vmem:[%s21657_s1 + $0xfc8] ss:$16 sps:$4 sm:$0xff]   ;;  %v14863_v35 = vld [vmem:[%s21657_s1 + $0xfe4] ss:$16 sps:$4 sm:$0xff]  }
 0x1c2   :  { %10102 = vmatmul.mubr.bf16.vlgmr.msra.gmra.mrb[0].mxu0 %v17983_v48  ;;  %11127 = vmatmul.mubr.bf16.vlgmr.msra.gmra.mrb[0].mxu1 %v17983_v48 }
 0x1c3   :  { %10111 = vmatpush1.bf16.msra.mxu0 %v14771_v50  ;;  %11136 = vmatpush1.bf16.msra.mxu1 %v14774_v51  ;;  %v14866_v50 = vld [vmem:[%s21657_s1 + $0xfec] ss:$16 sps:$4 sm:$0xff]   ;;  %v14861_v51 = vld [vmem:[%s21657_s1 + $0xfe0] ss:$16 sps:$4 sm:$0xff]  }
 0x1c4   :  { %10112 = vmatprep.subr.bf16.mxu0 %v14779_v53  ;;  %11137 = vmatprep.subr.bf16.mxu1 %v14782_v38  ;;  %v14864_v53 = vld [vmem:[%s21657_s1 + $0xfe8] ss:$16 sps:$4 sm:$0xff]   ;;  %v14869_v38 = vld [vmem:[%s21657_s1 + $0x1004] ss:$16 sps:$4 sm:$0xff]  }
 0x1c5   :  { %10142 = vmatprep.mubr.bf16.mxu0 %v1723_v54  ;;  %11167 = vmatprep.mubr.bf16.mxu1 %v1723_v54  ;;  %v14872_v54 = vld [vmem:[%s21657_s1 + $0x100c] ss:$16 sps:$4 sm:$0xff]  }
 0x1c7   :  { %10113 = vmatpush1.bf16.msra.mxu0 %v14777_v55  ;;  %11138 = vmatpush1.bf16.msra.mxu1 %v14780_v56  ;;  %v1739_v55 = vcombine.high %v18160_v44, %v18160_v44  ;;  %v1721_v56 = vcombine.high %v17983_v48, %v17983_v48  ;;  %v14878_v48 = vld [vmem:[%s21657_s1 + $0x102c] ss:$16 sps:$4 sm:$0xff]  }
 0x1c8   :  { %10114 = vmatprep.subr.bf16.mxu0 %v14785_v47  ;;  %11139 = vmatprep.subr.bf16.mxu1 %v14788_v57  ;;  %v14867_v47 = vld [vmem:[%s21657_s1 + $0x1000] ss:$16 sps:$4 sm:$0xff]   ;;  %v14870_v57 = vld [vmem:[%s21657_s1 + $0x1008] ss:$16 sps:$4 sm:$0xff]  }
 0x1cb   :  { %10115 = vmatpush1.bf16.msra.mxu0 %v14783_v58  ;;  %11140 = vmatpush1.bf16.msra.mxu1 %v14786_v59  ;;  %v14875_v58 = vld [vmem:[%s21657_s1 + $0x1024] ss:$16 sps:$4 sm:$0xff]   ;;  %v18203_v59 = vrot.slane %v1739_v55, %v16689_v49 }
 0x1cc   :  { %10116 = vmatprep.subr.bf16.mxu0 %v14791_v60  ;;  %11141 = vmatprep.subr.bf16.mxu1 %v14794_v61  ;;  %v14873_v60 = vld [vmem:[%s21657_s1 + $0x1020] ss:$16 sps:$4 sm:$0xff]   ;;  %v14876_v61 = vld [vmem:[%s21657_s1 + $0x1028] ss:$16 sps:$4 sm:$0xff]   ;;  %v14959_v55 = vld [vmem:[%s21657_s1 + $0x11e4] ss:$16 sps:$4 sm:$0xff]  }
 0x1cf   :  { %10117 = vmatpush1.bf16.msra.mxu0 %v14789_v62  ;;  %11142 = vmatpush1.bf16.msra.mxu1 %v14792_v63  ;;  %v14881_v62 = vld [vmem:[%s21657_s1 + $0x1044] ss:$16 sps:$4 sm:$0xff]   ;;  %v14884_v63 = vld [vmem:[%s21657_s1 + $0x104c] ss:$16 sps:$4 sm:$0xff]  }
 0x1d0   :  { %10118 = vmatprep.subr.bf16.mxu0 %v14797_v0  ;;  %11143 = vmatprep.subr.bf16.mxu1 %v14800_v1  ;;  %v14879_v0 = vld [vmem:[%s21657_s1 + $0x1040] ss:$16 sps:$4 sm:$0xff]   ;;  %v14882_v1 = vld [vmem:[%s21657_s1 + $0x1048] ss:$16 sps:$4 sm:$0xff]  }
 0x1d3   :  { %10119 = vmatpush1.bf16.msra.mxu0 %v14795_v2  ;;  %11144 = vmatpush1.bf16.msra.mxu1 %v14798_v3  ;;  %v14887_v2 = vld [vmem:[%s21657_s1 + $0x1064] ss:$16 sps:$4 sm:$0xff]   ;;  %v14890_v3 = vld [vmem:[%s21657_s1 + $0x106c] ss:$16 sps:$4 sm:$0xff]  }
 0x1d4   :  { %10120 = vmatprep.subr.bf16.mxu0 %v14803_v4  ;;  %11145 = vmatprep.subr.bf16.mxu1 %v14806_v5  ;;  %v14885_v4 = vld [vmem:[%s21657_s1 + $0x1060] ss:$16 sps:$4 sm:$0xff]   ;;  %v14888_v5 = vld [vmem:[%s21657_s1 + $0x1068] ss:$16 sps:$4 sm:$0xff]  }
 0x1d7   :  { %10121 = vmatpush1.bf16.msra.mxu0 %v14801_v6  ;;  %11146 = vmatpush1.bf16.msra.mxu1 %v14804_v7  ;;  %v14893_v6 = vld [vmem:[%s21657_s1 + $0x1084] ss:$16 sps:$4 sm:$0xff]   ;;  %v14896_v7 = vld [vmem:[%s21657_s1 + $0x108c] ss:$16 sps:$4 sm:$0xff]  }
 0x1d8   :  { %10122 = vmatprep.subr.bf16.mxu0 %v14809_v8  ;;  %11147 = vmatprep.subr.bf16.mxu1 %v14812_v9  ;;  %v14891_v8 = vld [vmem:[%s21657_s1 + $0x1080] ss:$16 sps:$4 sm:$0xff]   ;;  %v14894_v9 = vld [vmem:[%s21657_s1 + $0x1088] ss:$16 sps:$4 sm:$0xff]  }
 0x1db   :  { %10123 = vmatpush1.bf16.msra.mxu0 %v14807_v10  ;;  %11148 = vmatpush1.bf16.msra.mxu1 %v14810_v11  ;;  %v14899_v10 = vld [vmem:[%s21657_s1 + $0x10a4] ss:$16 sps:$4 sm:$0xff]   ;;  %v14902_v11 = vld [vmem:[%s21657_s1 + $0x10ac] ss:$16 sps:$4 sm:$0xff]  }
 0x1dc   :  { %10124 = vmatprep.subr.bf16.mxu0 %v14815_v12  ;;  %11149 = vmatprep.subr.bf16.mxu1 %v14818_v52  ;;  %v14897_v12 = vld [vmem:[%s21657_s1 + $0x10a0] ss:$16 sps:$4 sm:$0xff]   ;;  %v14900_v52 = vld [vmem:[%s21657_s1 + $0x10a8] ss:$16 sps:$4 sm:$0xff]  }
 0x1df   :  { %10125 = vmatpush1.bf16.msra.mxu0 %v14813_v15  ;;  %11150 = vmatpush1.bf16.msra.mxu1 %v14816_v16  ;;  %v14905_v15 = vld [vmem:[%s21657_s1 + $0x10c4] ss:$16 sps:$4 sm:$0xff]   ;;  %v14908_v16 = vld [vmem:[%s21657_s1 + $0x10cc] ss:$16 sps:$4 sm:$0xff]  }
 0x1e0   :  { %10126 = vmatprep.subr.bf16.mxu0 %v14821_v17  ;;  %11151 = vmatprep.subr.bf16.mxu1 %v14824_v18  ;;  %v14903_v17 = vld [vmem:[%s21657_s1 + $0x10c0] ss:$16 sps:$4 sm:$0xff]   ;;  %v14906_v18 = vld [vmem:[%s21657_s1 + $0x10c8] ss:$16 sps:$4 sm:$0xff]  }
 0x1e3   :  { %10127 = vmatpush1.bf16.msra.mxu0 %v14819_v19  ;;  %11152 = vmatpush1.bf16.msra.mxu1 %v14822_v20  ;;  %v14911_v19 = vld [vmem:[%s21657_s1 + $0x10e4] ss:$16 sps:$4 sm:$0xff]   ;;  %v14914_v20 = vld [vmem:[%s21657_s1 + $0x10ec] ss:$16 sps:$4 sm:$0xff]  }
 0x1e4   :  { %10128 = vmatprep.subr.bf16.mxu0 %v14827_v22  ;;  %11153 = vmatprep.subr.bf16.mxu1 %v14830_v23  ;;  %v14909_v22 = vld [vmem:[%s21657_s1 + $0x10e0] ss:$16 sps:$4 sm:$0xff]   ;;  %v14912_v23 = vld [vmem:[%s21657_s1 + $0x10e8] ss:$16 sps:$4 sm:$0xff]  }
 0x1e7   :  { %10129 = vmatpush1.bf16.msra.mxu0 %v14825_v24  ;;  %11154 = vmatpush1.bf16.msra.mxu1 %v14828_v13  ;;  %v14917_v24 = vld [vmem:[%s21657_s1 + $0x1104] ss:$16 sps:$4 sm:$0xff]   ;;  %v14920_v13 = vld [vmem:[%s21657_s1 + $0x110c] ss:$16 sps:$4 sm:$0xff]  }
 0x1e8   :  { %10130 = vmatprep.subr.bf16.mxu0 %v14833_v27  ;;  %11155 = vmatprep.subr.bf16.mxu1 %v14836_v28  ;;  %v14915_v27 = vld [vmem:[%s21657_s1 + $0x1100] ss:$16 sps:$4 sm:$0xff]   ;;  %v14918_v28 = vld [vmem:[%s21657_s1 + $0x1108] ss:$16 sps:$4 sm:$0xff]  }
 0x1eb   :  { %10131 = vmatpush1.bf16.msra.mxu0 %v14831_v29  ;;  %11156 = vmatpush1.bf16.msra.mxu1 %v14834_v14  ;;  %v14923_v29 = vld [vmem:[%s21657_s1 + $0x1124] ss:$16 sps:$4 sm:$0xff]   ;;  %v14926_v14 = vld [vmem:[%s21657_s1 + $0x112c] ss:$16 sps:$4 sm:$0xff]  }
 0x1ec   :  { %10132 = vmatprep.subr.bf16.mxu0 %v14839_v30  ;;  %11157 = vmatprep.subr.bf16.mxu1 %v14842_v31  ;;  %v14921_v30 = vld [vmem:[%s21657_s1 + $0x1120] ss:$16 sps:$4 sm:$0xff]   ;;  %v14924_v31 = vld [vmem:[%s21657_s1 + $0x1128] ss:$16 sps:$4 sm:$0xff]  }
 0x1ef   :  { %10133 = vmatpush1.bf16.msra.mxu0 %v14837_v25  ;;  %11158 = vmatpush1.bf16.msra.mxu1 %v14840_v32  ;;  %v14929_v25 = vld [vmem:[%s21657_s1 + $0x1144] ss:$16 sps:$4 sm:$0xff]   ;;  %v14932_v32 = vld [vmem:[%s21657_s1 + $0x114c] ss:$16 sps:$4 sm:$0xff]  }
 0x1f0   :  { %10134 = vmatprep.subr.bf16.mxu0 %v14845_v33  ;;  %11159 = vmatprep.subr.bf16.mxu1 %v14848_v26  ;;  %v14927_v33 = vld [vmem:[%s21657_s1 + $0x1140] ss:$16 sps:$4 sm:$0xff]   ;;  %v14930_v26 = vld [vmem:[%s21657_s1 + $0x1148] ss:$16 sps:$4 sm:$0xff]  }
 0x1f3   :  { %10135 = vmatpush1.bf16.msra.mxu0 %v14843_v36  ;;  %11160 = vmatpush1.bf16.msra.mxu1 %v14846_v37  ;;  %v14935_v36 = vld [vmem:[%s21657_s1 + $0x1164] ss:$16 sps:$4 sm:$0xff]   ;;  %v14938_v37 = vld [vmem:[%s21657_s1 + $0x116c] ss:$16 sps:$4 sm:$0xff]  }
 0x1f4   :  { %10136 = vmatprep.subr.bf16.mxu0 %v14851_v21  ;;  %11161 = vmatprep.subr.bf16.mxu1 %v14854_v39  ;;  %v14933_v21 = vld [vmem:[%s21657_s1 + $0x1160] ss:$16 sps:$4 sm:$0xff]   ;;  %v14936_v39 = vld [vmem:[%s21657_s1 + $0x1168] ss:$16 sps:$4 sm:$0xff]  }
 0x1f7   :  { %10137 = vmatpush1.bf16.msra.mxu0 %v14849_v40  ;;  %11162 = vmatpush1.bf16.msra.mxu1 %v14852_v41  ;;  %v14941_v40 = vld [vmem:[%s21657_s1 + $0x1184] ss:$16 sps:$4 sm:$0xff]   ;;  %v14944_v41 = vld [vmem:[%s21657_s1 + $0x118c] ss:$16 sps:$4 sm:$0xff]  }
 0x1f8   :  { %10138 = vmatprep.subr.bf16.mxu0 %v14857_v34  ;;  %11163 = vmatprep.subr.bf16.mxu1 %v14860_v43  ;;  %v14939_v34 = vld [vmem:[%s21657_s1 + $0x1180] ss:$16 sps:$4 sm:$0xff]   ;;  %v14942_v43 = vld [vmem:[%s21657_s1 + $0x1188] ss:$16 sps:$4 sm:$0xff]  }
 0x1fb   :  { %10139 = vmatpush1.bf16.msra.mxu0 %v14855_v45  ;;  %11164 = vmatpush1.bf16.msra.mxu1 %v14858_v46  ;;  %v14947_v45 = vld [vmem:[%s21657_s1 + $0x11a4] ss:$16 sps:$4 sm:$0xff]   ;;  %v14950_v46 = vld [vmem:[%s21657_s1 + $0x11ac] ss:$16 sps:$4 sm:$0xff]  }
 0x1fc   :  { %10140 = vmatprep.subr.bf16.mxu0 %v14863_v35  ;;  %11165 = vmatprep.subr.bf16.mxu1 %v14866_v50  ;;  %v14945_v35 = vld [vmem:[%s21657_s1 + $0x11a0] ss:$16 sps:$4 sm:$0xff]   ;;  %v14948_v50 = vld [vmem:[%s21657_s1 + $0x11a8] ss:$16 sps:$4 sm:$0xff]  }
 0x1ff   :  { %10141 = vmatpush1.bf16.msra.mxu0 %v14861_v51  ;;  %11166 = vmatpush1.bf16.msra.mxu1 %v14864_v53  ;;  %v14953_v51 = vld [vmem:[%s21657_s1 + $0x11c4] ss:$16 sps:$4 sm:$0xff]   ;;  %v14956_v53 = vld [vmem:[%s21657_s1 + $0x11cc] ss:$16 sps:$4 sm:$0xff]  }
 0x200   :  { %10151 = vmatprep.subr.bf16.mxu0 %v14869_v38  ;;  %11176 = vmatprep.subr.bf16.mxu1 %v14872_v54  ;;  %v14951_v38 = vld [vmem:[%s21657_s1 + $0x11c0] ss:$16 sps:$4 sm:$0xff]   ;;  %v14954_v54 = vld [vmem:[%s21657_s1 + $0x11c8] ss:$16 sps:$4 sm:$0xff]  }
 0x202   :  { %10143 = vmatmul.mubr.bf16.vlgmr.msra.gmra.mrb[0].mxu0 %v1721_v56  ;;  %11168 = vmatmul.mubr.bf16.vlgmr.msra.gmra.mrb[0].mxu1 %v1721_v56  ;;  %v14962_v56 = vld [vmem:[%s21657_s1 + $0x11ec] ss:$16 sps:$4 sm:$0xff]  }
 0x203   :  { %10152 = vmatpush1.bf16.msra.mxu0 %v14867_v47  ;;  %11177 = vmatpush1.bf16.msra.mxu1 %v14870_v57  ;;  %v14957_v47 = vld [vmem:[%s21657_s1 + $0x11e0] ss:$16 sps:$4 sm:$0xff]   ;;  %v14960_v57 = vld [vmem:[%s21657_s1 + $0x11e8] ss:$16 sps:$4 sm:$0xff]  }
 0x204   :  { %10153 = vmatprep.subr.bf16.mxu0 %v14875_v58  ;;  %11178 = vmatprep.subr.bf16.mxu1 %v14878_v48  ;;  %v14965_v58 = vld [vmem:[%s21657_s1 + $0x1204] ss:$16 sps:$4 sm:$0xff]   ;;  %v14968_v48 = vld [vmem:[%s21657_s1 + $0x120c] ss:$16 sps:$4 sm:$0xff]  }
 0x205   :  { %10183 = vmatprep.mubr.bf16.mxu0 %v18203_v59  ;;  %11208 = vmatprep.mubr.bf16.mxu1 %v18203_v59 }
 0x207   :  { %10154 = vmatpush1.bf16.msra.mxu0 %v14873_v60  ;;  %11179 = vmatpush1.bf16.msra.mxu1 %v14876_v61  ;;  %v18389_v60 = vrot.slane %v18160_v44, %v16689_v49  ;;  %v14963_v61 = vld [vmem:[%s21657_s1 + $0x1200] ss:$16 sps:$4 sm:$0xff]   ;;  %v14974_v44 = vld [vmem:[%s21657_s1 + $0x122c] ss:$16 sps:$4 sm:$0xff]  }
 0x208   :  { %10155 = vmatprep.subr.bf16.mxu0 %v14881_v62  ;;  %11180 = vmatprep.subr.bf16.mxu1 %v14884_v63  ;;  %v14966_v62 = vld [vmem:[%s21657_s1 + $0x1208] ss:$16 sps:$4 sm:$0xff]   ;;  %v14971_v63 = vld [vmem:[%s21657_s1 + $0x1224] ss:$16 sps:$4 sm:$0xff]  }
 0x20b   :  { %10156 = vmatpush1.bf16.msra.mxu0 %v14879_v0  ;;  %11181 = vmatpush1.bf16.msra.mxu1 %v14882_v1  ;;  %v1771_v0 = vcombine.high %v18203_v59, %v18203_v59  ;;  %v14969_v1 = vld [vmem:[%s21657_s1 + $0x1220] ss:$16 sps:$4 sm:$0xff]   ;;  %v14977_v59 = vld [vmem:[%s21657_s1 + $0x1244] ss:$16 sps:$4 sm:$0xff]  }
 0x20c   :  { %10157 = vmatprep.subr.bf16.mxu0 %v14887_v2  ;;  %11182 = vmatprep.subr.bf16.mxu1 %v14890_v3  ;;  %v14972_v2 = vld [vmem:[%s21657_s1 + $0x1228] ss:$16 sps:$4 sm:$0xff]   ;;  %v14980_v3 = vld [vmem:[%s21657_s1 + $0x124c] ss:$16 sps:$4 sm:$0xff]  }
 0x20f   :  { %10158 = vmatpush1.bf16.msra.mxu0 %v14885_v4  ;;  %11183 = vmatpush1.bf16.msra.mxu1 %v14888_v5  ;;  %v14975_v4 = vld [vmem:[%s21657_s1 + $0x1240] ss:$16 sps:$4 sm:$0xff]   ;;  %v14978_v5 = vld [vmem:[%s21657_s1 + $0x1248] ss:$16 sps:$4 sm:$0xff]  }
 0x210   :  { %10159 = vmatprep.subr.bf16.mxu0 %v14893_v6  ;;  %11184 = vmatprep.subr.bf16.mxu1 %v14896_v7  ;;  %v14983_v6 = vld [vmem:[%s21657_s1 + $0x1264] ss:$16 sps:$4 sm:$0xff]   ;;  %v14986_v7 = vld [vmem:[%s21657_s1 + $0x126c] ss:$16 sps:$4 sm:$0xff]  }
 0x213   :  { %10160 = vmatpush1.bf16.msra.mxu0 %v14891_v8  ;;  %11185 = vmatpush1.bf16.msra.mxu1 %v14894_v9  ;;  %v14981_v8 = vld [vmem:[%s21657_s1 + $0x1260] ss:$16 sps:$4 sm:$0xff]   ;;  %v14984_v9 = vld [vmem:[%s21657_s1 + $0x1268] ss:$16 sps:$4 sm:$0xff]  }
 0x214   :  { %10161 = vmatprep.subr.bf16.mxu0 %v14899_v10  ;;  %11186 = vmatprep.subr.bf16.mxu1 %v14902_v11  ;;  %v14989_v10 = vld [vmem:[%s21657_s1 + $0x1284] ss:$16 sps:$4 sm:$0xff]   ;;  %v14992_v11 = vld [vmem:[%s21657_s1 + $0x128c] ss:$16 sps:$4 sm:$0xff]  }
 0x217   :  { %10162 = vmatpush1.bf16.msra.mxu0 %v14897_v12  ;;  %11187 = vmatpush1.bf16.msra.mxu1 %v14900_v52  ;;  %v14987_v12 = vld [vmem:[%s21657_s1 + $0x1280] ss:$16 sps:$4 sm:$0xff]   ;;  %v14990_v52 = vld [vmem:[%s21657_s1 + $0x1288] ss:$16 sps:$4 sm:$0xff]  }
 0x218   :  { %10163 = vmatprep.subr.bf16.mxu0 %v14905_v15  ;;  %11188 = vmatprep.subr.bf16.mxu1 %v14908_v16  ;;  %v14995_v15 = vld [vmem:[%s21657_s1 + $0x12a4] ss:$16 sps:$4 sm:$0xff]   ;;  %v14998_v16 = vld [vmem:[%s21657_s1 + $0x12ac] ss:$16 sps:$4 sm:$0xff]  }
 0x21b   :  { %10164 = vmatpush1.bf16.msra.mxu0 %v14903_v17  ;;  %11189 = vmatpush1.bf16.msra.mxu1 %v14906_v18  ;;  %v14993_v17 = vld [vmem:[%s21657_s1 + $0x12a0] ss:$16 sps:$4 sm:$0xff]   ;;  %v14996_v18 = vld [vmem:[%s21657_s1 + $0x12a8] ss:$16 sps:$4 sm:$0xff]  }
 0x21c   :  { %10165 = vmatprep.subr.bf16.mxu0 %v14911_v19  ;;  %11190 = vmatprep.subr.bf16.mxu1 %v14914_v20  ;;  %v15001_v19 = vld [vmem:[%s21657_s1 + $0x12c4] ss:$16 sps:$4 sm:$0xff]   ;;  %v15004_v20 = vld [vmem:[%s21657_s1 + $0x12cc] ss:$16 sps:$4 sm:$0xff]  }
 0x21f   :  { %10166 = vmatpush1.bf16.msra.mxu0 %v14909_v22  ;;  %11191 = vmatpush1.bf16.msra.mxu1 %v14912_v23  ;;  %v14999_v22 = vld [vmem:[%s21657_s1 + $0x12c0] ss:$16 sps:$4 sm:$0xff]   ;;  %v15002_v23 = vld [vmem:[%s21657_s1 + $0x12c8] ss:$16 sps:$4 sm:$0xff]  }
 0x220   :  { %10167 = vmatprep.subr.bf16.mxu0 %v14917_v24  ;;  %11192 = vmatprep.subr.bf16.mxu1 %v14920_v13  ;;  %v15007_v24 = vld [vmem:[%s21657_s1 + $0x12e4] ss:$16 sps:$4 sm:$0xff]   ;;  %v15010_v13 = vld [vmem:[%s21657_s1 + $0x12ec] ss:$16 sps:$4 sm:$0xff]  }
 0x223   :  { %10168 = vmatpush1.bf16.msra.mxu0 %v14915_v27  ;;  %11193 = vmatpush1.bf16.msra.mxu1 %v14918_v28  ;;  %v15005_v27 = vld [vmem:[%s21657_s1 + $0x12e0] ss:$16 sps:$4 sm:$0xff]   ;;  %v15008_v28 = vld [vmem:[%s21657_s1 + $0x12e8] ss:$16 sps:$4 sm:$0xff]  }
 0x224   :  { %10169 = vmatprep.subr.bf16.mxu0 %v14923_v29  ;;  %11194 = vmatprep.subr.bf16.mxu1 %v14926_v14  ;;  %v15013_v29 = vld [vmem:[%s21657_s1 + $0x1304] ss:$16 sps:$4 sm:$0xff]   ;;  %v15016_v14 = vld [vmem:[%s21657_s1 + $0x130c] ss:$16 sps:$4 sm:$0xff]  }
 0x227   :  { %10170 = vmatpush1.bf16.msra.mxu0 %v14921_v30  ;;  %11195 = vmatpush1.bf16.msra.mxu1 %v14924_v31  ;;  %v15011_v30 = vld [vmem:[%s21657_s1 + $0x1300] ss:$16 sps:$4 sm:$0xff]   ;;  %v15014_v31 = vld [vmem:[%s21657_s1 + $0x1308] ss:$16 sps:$4 sm:$0xff]  }
 0x228   :  { %10171 = vmatprep.subr.bf16.mxu0 %v14929_v25  ;;  %11196 = vmatprep.subr.bf16.mxu1 %v14932_v32  ;;  %v15019_v25 = vld [vmem:[%s21657_s1 + $0x1324] ss:$16 sps:$4 sm:$0xff]   ;;  %v15022_v32 = vld [vmem:[%s21657_s1 + $0x132c] ss:$16 sps:$4 sm:$0xff]  }
 0x22b   :  { %10172 = vmatpush1.bf16.msra.mxu0 %v14927_v33  ;;  %11197 = vmatpush1.bf16.msra.mxu1 %v14930_v26  ;;  %v15017_v33 = vld [vmem:[%s21657_s1 + $0x1320] ss:$16 sps:$4 sm:$0xff]   ;;  %v15020_v26 = vld [vmem:[%s21657_s1 + $0x1328] ss:$16 sps:$4 sm:$0xff]  }
 0x22c   :  { %10173 = vmatprep.subr.bf16.mxu0 %v14935_v36  ;;  %11198 = vmatprep.subr.bf16.mxu1 %v14938_v37  ;;  %v15025_v36 = vld [vmem:[%s21657_s1 + $0x1344] ss:$16 sps:$4 sm:$0xff]   ;;  %v15028_v37 = vld [vmem:[%s21657_s1 + $0x134c] ss:$16 sps:$4 sm:$0xff]  }
 0x22f   :  { %10174 = vmatpush1.bf16.msra.mxu0 %v14933_v21  ;;  %11199 = vmatpush1.bf16.msra.mxu1 %v14936_v39  ;;  %v15023_v21 = vld [vmem:[%s21657_s1 + $0x1340] ss:$16 sps:$4 sm:$0xff]   ;;  %v15026_v39 = vld [vmem:[%s21657_s1 + $0x1348] ss:$16 sps:$4 sm:$0xff]  }
 0x230   :  { %10175 = vmatprep.subr.bf16.mxu0 %v14941_v40  ;;  %11200 = vmatprep.subr.bf16.mxu1 %v14944_v41  ;;  %v15031_v40 = vld [vmem:[%s21657_s1 + $0x1364] ss:$16 sps:$4 sm:$0xff]   ;;  %v15034_v41 = vld [vmem:[%s21657_s1 + $0x136c] ss:$16 sps:$4 sm:$0xff]  }
 0x233   :  { %10176 = vmatpush1.bf16.msra.mxu0 %v14939_v34  ;;  %11201 = vmatpush1.bf16.msra.mxu1 %v14942_v43  ;;  %v15029_v34 = vld [vmem:[%s21657_s1 + $0x1360] ss:$16 sps:$4 sm:$0xff]   ;;  %v15032_v43 = vld [vmem:[%s21657_s1 + $0x1368] ss:$16 sps:$4 sm:$0xff]  }
 0x234   :  { %10177 = vmatprep.subr.bf16.mxu0 %v14947_v45  ;;  %11202 = vmatprep.subr.bf16.mxu1 %v14950_v46  ;;  %v15037_v45 = vld [vmem:[%s21657_s1 + $0x1384] ss:$16 sps:$4 sm:$0xff]   ;;  %v15040_v46 = vld [vmem:[%s21657_s1 + $0x138c] ss:$16 sps:$4 sm:$0xff]  }
 0x237   :  { %10178 = vmatpush1.bf16.msra.mxu0 %v14945_v35  ;;  %11203 = vmatpush1.bf16.msra.mxu1 %v14948_v50  ;;  %v15035_v35 = vld [vmem:[%s21657_s1 + $0x1380] ss:$16 sps:$4 sm:$0xff]   ;;  %v15038_v50 = vld [vmem:[%s21657_s1 + $0x1388] ss:$16 sps:$4 sm:$0xff]  }
 0x238   :  { %10179 = vmatprep.subr.bf16.mxu0 %v14953_v51  ;;  %11204 = vmatprep.subr.bf16.mxu1 %v14956_v53  ;;  %v15043_v51 = vld [vmem:[%s21657_s1 + $0x13a4] ss:$16 sps:$4 sm:$0xff]   ;;  %v15046_v53 = vld [vmem:[%s21657_s1 + $0x13ac] ss:$16 sps:$4 sm:$0xff]  }
 0x23b   :  { %10180 = vmatpush1.bf16.msra.mxu0 %v14951_v38  ;;  %11205 = vmatpush1.bf16.msra.mxu1 %v14954_v54  ;;  %v15041_v38 = vld [vmem:[%s21657_s1 + $0x13a0] ss:$16 sps:$4 sm:$0xff]   ;;  %v15044_v54 = vld [vmem:[%s21657_s1 + $0x13a8] ss:$16 sps:$4 sm:$0xff]  }
 0x23c   :  { %10181 = vmatprep.subr.bf16.mxu0 %v14959_v55  ;;  %11206 = vmatprep.subr.bf16.mxu1 %v14962_v56  ;;  %v15049_v55 = vld [vmem:[%s21657_s1 + $0x13c4] ss:$16 sps:$4 sm:$0xff]   ;;  %v15052_v56 = vld [vmem:[%s21657_s1 + $0x13cc] ss:$16 sps:$4 sm:$0xff]  }
 0x23f   :  { %10182 = vmatpush1.bf16.msra.mxu0 %v14957_v47  ;;  %11207 = vmatpush1.bf16.msra.mxu1 %v14960_v57  ;;  %v16492_v47 = vld [vmem:[%s21656_s0 + $0x10] sm:$0xff] }
 0x240   :  { %10192 = vmatprep.subr.bf16.mxu0 %v14965_v58  ;;  %11217 = vmatprep.subr.bf16.mxu1 %v14968_v48  ;;  %v1724_v57 = vcombine.high %v16492_v47, %v16492_v47  ;;  %v15047_v58 = vld [vmem:[%s21657_s1 + $0x13c0] ss:$16 sps:$4 sm:$0xff]   ;;  %v15050_v48 = vld [vmem:[%s21657_s1 + $0x13c8] ss:$16 sps:$4 sm:$0xff]  }
 0x241   :  { %v15131_v47 = vld [vmem:[%s21657_s1 + $0x1580] ss:$16 sps:$4 sm:$0xff]  }
 0x242   :  { %10184 = vmatmul.mubr.bf16.vlgmr.msra.gmra.mrb[0].mxu0 %v18389_v60  ;;  %11209 = vmatmul.mubr.bf16.vlgmr.msra.gmra.mrb[0].mxu1 %v18389_v60 }
 0x243   :  { %10193 = vmatpush1.bf16.msra.mxu0 %v14963_v61  ;;  %11218 = vmatpush1.bf16.msra.mxu1 %v14966_v62  ;;  %v15055_v61 = vld [vmem:[%s21657_s1 + $0x13e4] ss:$16 sps:$4 sm:$0xff]   ;;  %v15058_v62 = vld [vmem:[%s21657_s1 + $0x13ec] ss:$16 sps:$4 sm:$0xff]  }
 0x244   :  { %10194 = vmatprep.subr.bf16.mxu0 %v14971_v63  ;;  %11219 = vmatprep.subr.bf16.mxu1 %v14974_v44  ;;  %v18579_v63 = vrot.slane %v1724_v57, %v16689_v49  ;;  %v15053_v44 = vld [vmem:[%s21657_s1 + $0x13e0] ss:$16 sps:$4 sm:$0xff]   ;;  %v15134_v57 = vld [vmem:[%s21657_s1 + $0x1588] ss:$16 sps:$4 sm:$0xff]  }
 0x245   :  { %10224 = vmatprep.mubr.bf16.mxu0 %v1771_v0  ;;  %11249 = vmatprep.mubr.bf16.mxu1 %v1771_v0  ;;  %v15056_v0 = vld [vmem:[%s21657_s1 + $0x13e8] ss:$16 sps:$4 sm:$0xff]  }
 0x247   :  { %10195 = vmatpush1.bf16.msra.mxu0 %v14969_v1  ;;  %11220 = vmatpush1.bf16.msra.mxu1 %v14972_v2  ;;  %v15061_v1 = vld [vmem:[%s21657_s1 + $0x1404] ss:$16 sps:$4 sm:$0xff]   ;;  %v15064_v2 = vld [vmem:[%s21657_s1 + $0x140c] ss:$16 sps:$4 sm:$0xff]  }
 0x248   :  { %10196 = vmatprep.subr.bf16.mxu0 %v14977_v59  ;;  %11221 = vmatprep.subr.bf16.mxu1 %v14980_v3  ;;  %v1740_v59 = vcombine.high %v18579_v63, %v18579_v63  ;;  %v1769_v3 = vcombine.high %v18389_v60, %v18389_v60  ;;  %v15070_v60 = vld [vmem:[%s21657_s1 + $0x142c] ss:$16 sps:$4 sm:$0xff]  }
 0x24b   :  { %10197 = vmatpush1.bf16.msra.mxu0 %v14975_v4  ;;  %11222 = vmatpush1.bf16.msra.mxu1 %v14978_v5  ;;  %v15059_v4 = vld [vmem:[%s21657_s1 + $0x1400] ss:$16 sps:$4 sm:$0xff]   ;;  %v15062_v5 = vld [vmem:[%s21657_s1 + $0x1408] ss:$16 sps:$4 sm:$0xff]  }
 0x24c   :  { %10198 = vmatprep.subr.bf16.mxu0 %v14983_v6  ;;  %11223 = vmatprep.subr.bf16.mxu1 %v14986_v7  ;;  %v15067_v6 = vld [vmem:[%s21657_s1 + $0x1424] ss:$16 sps:$4 sm:$0xff]   ;;  %v18610_v7 = vrot.slane %v1740_v59, %v16689_v49 }
 0x24d   :  { %v15151_v59 = vld [vmem:[%s21657_s1 + $0x15e4] ss:$16 sps:$4 sm:$0xff]  }
 0x24f   :  { %10199 = vmatpush1.bf16.msra.mxu0 %v14981_v8  ;;  %11224 = vmatpush1.bf16.msra.mxu1 %v14984_v9  ;;  %v15065_v8 = vld [vmem:[%s21657_s1 + $0x1420] ss:$16 sps:$4 sm:$0xff]   ;;  %v15068_v9 = vld [vmem:[%s21657_s1 + $0x1428] ss:$16 sps:$4 sm:$0xff]  }
 0x250   :  { %10200 = vmatprep.subr.bf16.mxu0 %v14989_v10  ;;  %11225 = vmatprep.subr.bf16.mxu1 %v14992_v11  ;;  %v15073_v10 = vld [vmem:[%s21657_s1 + $0x1444] ss:$16 sps:$4 sm:$0xff]   ;;  %v15076_v11 = vld [vmem:[%s21657_s1 + $0x144c] ss:$16 sps:$4 sm:$0xff]  }
 0x253   :  { %10201 = vmatpush1.bf16.msra.mxu0 %v14987_v12  ;;  %11226 = vmatpush1.bf16.msra.mxu1 %v14990_v52  ;;  %v15071_v12 = vld [vmem:[%s21657_s1 + $0x1440] ss:$16 sps:$4 sm:$0xff]   ;;  %v15074_v52 = vld [vmem:[%s21657_s1 + $0x1448] ss:$16 sps:$4 sm:$0xff]  }
 0x254   :  { %10202 = vmatprep.subr.bf16.mxu0 %v14995_v15  ;;  %11227 = vmatprep.subr.bf16.mxu1 %v14998_v16  ;;  %v15079_v15 = vld [vmem:[%s21657_s1 + $0x1464] ss:$16 sps:$4 sm:$0xff]   ;;  %v15082_v16 = vld [vmem:[%s21657_s1 + $0x146c] ss:$16 sps:$4 sm:$0xff]  }
 0x257   :  { %10203 = vmatpush1.bf16.msra.mxu0 %v14993_v17  ;;  %11228 = vmatpush1.bf16.msra.mxu1 %v14996_v18  ;;  %v15077_v17 = vld [vmem:[%s21657_s1 + $0x1460] ss:$16 sps:$4 sm:$0xff]   ;;  %v15080_v18 = vld [vmem:[%s21657_s1 + $0x1468] ss:$16 sps:$4 sm:$0xff]  }
 0x258   :  { %10204 = vmatprep.subr.bf16.mxu0 %v15001_v19  ;;  %11229 = vmatprep.subr.bf16.mxu1 %v15004_v20  ;;  %v15085_v19 = vld [vmem:[%s21657_s1 + $0x1484] ss:$16 sps:$4 sm:$0xff]   ;;  %v15088_v20 = vld [vmem:[%s21657_s1 + $0x148c] ss:$16 sps:$4 sm:$0xff]  }
 0x25b   :  { %10205 = vmatpush1.bf16.msra.mxu0 %v14999_v22  ;;  %11230 = vmatpush1.bf16.msra.mxu1 %v15002_v23  ;;  %v15083_v22 = vld [vmem:[%s21657_s1 + $0x1480] ss:$16 sps:$4 sm:$0xff]   ;;  %v15086_v23 = vld [vmem:[%s21657_s1 + $0x1488] ss:$16 sps:$4 sm:$0xff]  }
 0x25c   :  { %10206 = vmatprep.subr.bf16.mxu0 %v15007_v24  ;;  %11231 = vmatprep.subr.bf16.mxu1 %v15010_v13  ;;  %v15091_v24 = vld [vmem:[%s21657_s1 + $0x14a4] ss:$16 sps:$4 sm:$0xff]   ;;  %v15094_v13 = vld [vmem:[%s21657_s1 + $0x14ac] ss:$16 sps:$4 sm:$0xff]  }
 0x25f   :  { %10207 = vmatpush1.bf16.msra.mxu0 %v15005_v27  ;;  %11232 = vmatpush1.bf16.msra.mxu1 %v15008_v28  ;;  %v15089_v27 = vld [vmem:[%s21657_s1 + $0x14a0] ss:$16 sps:$4 sm:$0xff]   ;;  %v15092_v28 = vld [vmem:[%s21657_s1 + $0x14a8] ss:$16 sps:$4 sm:$0xff]  }
 0x260   :  { %10208 = vmatprep.subr.bf16.mxu0 %v15013_v29  ;;  %11233 = vmatprep.subr.bf16.mxu1 %v15016_v14  ;;  %v15097_v29 = vld [vmem:[%s21657_s1 + $0x14c4] ss:$16 sps:$4 sm:$0xff]   ;;  %v15100_v14 = vld [vmem:[%s21657_s1 + $0x14cc] ss:$16 sps:$4 sm:$0xff]  }
 0x263   :  { %10209 = vmatpush1.bf16.msra.mxu0 %v15011_v30  ;;  %11234 = vmatpush1.bf16.msra.mxu1 %v15014_v31  ;;  %v15095_v30 = vld [vmem:[%s21657_s1 + $0x14c0] ss:$16 sps:$4 sm:$0xff]   ;;  %v15098_v31 = vld [vmem:[%s21657_s1 + $0x14c8] ss:$16 sps:$4 sm:$0xff]  }
 0x264   :  { %10210 = vmatprep.subr.bf16.mxu0 %v15019_v25  ;;  %11235 = vmatprep.subr.bf16.mxu1 %v15022_v32  ;;  %v15103_v25 = vld [vmem:[%s21657_s1 + $0x14e4] ss:$16 sps:$4 sm:$0xff]   ;;  %v15106_v32 = vld [vmem:[%s21657_s1 + $0x14ec] ss:$16 sps:$4 sm:$0xff]  }
 0x267   :  { %10211 = vmatpush1.bf16.msra.mxu0 %v15017_v33  ;;  %11236 = vmatpush1.bf16.msra.mxu1 %v15020_v26  ;;  %v15101_v33 = vld [vmem:[%s21657_s1 + $0x14e0] ss:$16 sps:$4 sm:$0xff]   ;;  %v15104_v26 = vld [vmem:[%s21657_s1 + $0x14e8] ss:$16 sps:$4 sm:$0xff]  }
 0x268   :  { %10212 = vmatprep.subr.bf16.mxu0 %v15025_v36  ;;  %11237 = vmatprep.subr.bf16.mxu1 %v15028_v37  ;;  %v15109_v36 = vld [vmem:[%s21657_s1 + $0x1504] ss:$16 sps:$4 sm:$0xff]   ;;  %v15112_v37 = vld [vmem:[%s21657_s1 + $0x150c] ss:$16 sps:$4 sm:$0xff]  }
 0x26b   :  { %10213 = vmatpush1.bf16.msra.mxu0 %v15023_v21  ;;  %11238 = vmatpush1.bf16.msra.mxu1 %v15026_v39  ;;  %v15107_v21 = vld [vmem:[%s21657_s1 + $0x1500] ss:$16 sps:$4 sm:$0xff]   ;;  %v15110_v39 = vld [vmem:[%s21657_s1 + $0x1508] ss:$16 sps:$4 sm:$0xff]  }
 0x26c   :  { %10214 = vmatprep.subr.bf16.mxu0 %v15031_v40  ;;  %11239 = vmatprep.subr.bf16.mxu1 %v15034_v41  ;;  %v15115_v40 = vld [vmem:[%s21657_s1 + $0x1524] ss:$16 sps:$4 sm:$0xff]   ;;  %v15118_v41 = vld [vmem:[%s21657_s1 + $0x152c] ss:$16 sps:$4 sm:$0xff]  }
 0x26f   :  { %10215 = vmatpush1.bf16.msra.mxu0 %v15029_v34  ;;  %11240 = vmatpush1.bf16.msra.mxu1 %v15032_v43  ;;  %v15113_v34 = vld [vmem:[%s21657_s1 + $0x1520] ss:$16 sps:$4 sm:$0xff]   ;;  %v15116_v43 = vld [vmem:[%s21657_s1 + $0x1528] ss:$16 sps:$4 sm:$0xff]  }
 0x270   :  { %10216 = vmatprep.subr.bf16.mxu0 %v15037_v45  ;;  %11241 = vmatprep.subr.bf16.mxu1 %v15040_v46  ;;  %v15121_v45 = vld [vmem:[%s21657_s1 + $0x1544] ss:$16 sps:$4 sm:$0xff]   ;;  %v15124_v46 = vld [vmem:[%s21657_s1 + $0x154c] ss:$16 sps:$4 sm:$0xff]  }
 0x273   :  { %10217 = vmatpush1.bf16.msra.mxu0 %v15035_v35  ;;  %11242 = vmatpush1.bf16.msra.mxu1 %v15038_v50  ;;  %v15119_v35 = vld [vmem:[%s21657_s1 + $0x1540] ss:$16 sps:$4 sm:$0xff]   ;;  %v15122_v50 = vld [vmem:[%s21657_s1 + $0x1548] ss:$16 sps:$4 sm:$0xff]  }
 0x274   :  { %10218 = vmatprep.subr.bf16.mxu0 %v15043_v51  ;;  %11243 = vmatprep.subr.bf16.mxu1 %v15046_v53  ;;  %v15127_v51 = vld [vmem:[%s21657_s1 + $0x1564] ss:$16 sps:$4 sm:$0xff]   ;;  %v15130_v53 = vld [vmem:[%s21657_s1 + $0x156c] ss:$16 sps:$4 sm:$0xff]  }
 0x277   :  { %10219 = vmatpush1.bf16.msra.mxu0 %v15041_v38  ;;  %11244 = vmatpush1.bf16.msra.mxu1 %v15044_v54  ;;  %v15125_v38 = vld [vmem:[%s21657_s1 + $0x1560] ss:$16 sps:$4 sm:$0xff]   ;;  %v15128_v54 = vld [vmem:[%s21657_s1 + $0x1568] ss:$16 sps:$4 sm:$0xff]  }
 0x278   :  { %10220 = vmatprep.subr.bf16.mxu0 %v15049_v55  ;;  %11245 = vmatprep.subr.bf16.mxu1 %v15052_v56  ;;  %v15133_v55 = vld [vmem:[%s21657_s1 + $0x1584] ss:$16 sps:$4 sm:$0xff]   ;;  %v15136_v56 = vld [vmem:[%s21657_s1 + $0x158c] ss:$16 sps:$4 sm:$0xff]  }
 0x27b   :  { %10221 = vmatpush1.bf16.msra.mxu0 %v15047_v58  ;;  %11246 = vmatpush1.bf16.msra.mxu1 %v15050_v48  ;;  %v15139_v58 = vld [vmem:[%s21657_s1 + $0x15a4] ss:$16 sps:$4 sm:$0xff]   ;;  %v15142_v48 = vld [vmem:[%s21657_s1 + $0x15ac] ss:$16 sps:$4 sm:$0xff]  }
 0x27c   :  { %10222 = vmatprep.subr.bf16.mxu0 %v15055_v61  ;;  %11247 = vmatprep.subr.bf16.mxu1 %v15058_v62  ;;  %v15137_v61 = vld [vmem:[%s21657_s1 + $0x15a0] ss:$16 sps:$4 sm:$0xff]   ;;  %v15140_v62 = vld [vmem:[%s21657_s1 + $0x15a8] ss:$16 sps:$4 sm:$0xff]  }
 0x27f   :  { %10223 = vmatpush1.bf16.msra.mxu0 %v15053_v44  ;;  %11248 = vmatpush1.bf16.msra.mxu1 %v15056_v0  ;;  %v15145_v44 = vld [vmem:[%s21657_s1 + $0x15c4] ss:$16 sps:$4 sm:$0xff]   ;;  %v15148_v0 = vld [vmem:[%s21657_s1 + $0x15cc] ss:$16 sps:$4 sm:$0xff]  }
 0x280   :  { %10233 = vmatprep.subr.bf16.mxu0 %v15061_v1  ;;  %11258 = vmatprep.subr.bf16.mxu1 %v15064_v2  ;;  %v15143_v1 = vld [vmem:[%s21657_s1 + $0x15c0] ss:$16 sps:$4 sm:$0xff]   ;;  %v15146_v2 = vld [vmem:[%s21657_s1 + $0x15c8] ss:$16 sps:$4 sm:$0xff]  }
 0x282   :  { %10225 = vmatmul.mubr.bf16.vlgmr.msra.gmra.mrb[0].mxu0 %v1769_v3  ;;  %11250 = vmatmul.mubr.bf16.vlgmr.msra.gmra.mrb[0].mxu1 %v1769_v3  ;;  %v15154_v3 = vld [vmem:[%s21657_s1 + $0x15ec] ss:$16 sps:$4 sm:$0xff]  }
 0x283   :  { %10234 = vmatpush1.bf16.msra.mxu0 %v15059_v4  ;;  %11259 = vmatpush1.bf16.msra.mxu1 %v15062_v5  ;;  %v15149_v4 = vld [vmem:[%s21657_s1 + $0x15e0] ss:$16 sps:$4 sm:$0xff]   ;;  %v15152_v5 = vld [vmem:[%s21657_s1 + $0x15e8] ss:$16 sps:$4 sm:$0xff]  }
 0x284   :  { %10235 = vmatprep.subr.bf16.mxu0 %v15067_v6  ;;  %11260 = vmatprep.subr.bf16.mxu1 %v15070_v60  ;;  %v15158_v6 = vld [vmem:[%s21657_s1 + $0x1604] ss:$16 sps:$4 sm:$0xff]   ;;  %v15161_v60 = vld [vmem:[%s21657_s1 + $0x160c] ss:$16 sps:$4 sm:$0xff]  }
 0x285   :  { %10265 = vmatprep.mubr.bf16.mxu0 %v18610_v7  ;;  %11290 = vmatprep.mubr.bf16.mxu1 %v18610_v7 }
 0x287   :  { %10236 = vmatpush1.bf16.msra.mxu0 %v15065_v8  ;;  %11261 = vmatpush1.bf16.msra.mxu1 %v15068_v9  ;;  %v18796_v8 = vrot.slane %v18579_v63, %v16689_v49  ;;  %v15156_v9 = vld [vmem:[%s21657_s1 + $0x1600] ss:$16 sps:$4 sm:$0xff]   ;;  %v15167_v63 = vld [vmem:[%s21657_s1 + $0x162c] ss:$16 sps:$4 sm:$0xff]  }
 0x288   :  { %10237 = vmatprep.subr.bf16.mxu0 %v15073_v10  ;;  %11262 = vmatprep.subr.bf16.mxu1 %v15076_v11  ;;  %v15159_v10 = vld [vmem:[%s21657_s1 + $0x1608] ss:$16 sps:$4 sm:$0xff]   ;;  %v15164_v11 = vld [vmem:[%s21657_s1 + $0x1624] ss:$16 sps:$4 sm:$0xff]  }
 0x28b   :  { %10238 = vmatpush1.bf16.msra.mxu0 %v15071_v12  ;;  %11263 = vmatpush1.bf16.msra.mxu1 %v15074_v52  ;;  %v1772_v12 = vcombine.high %v18610_v7, %v18610_v7  ;;  %v15162_v52 = vld [vmem:[%s21657_s1 + $0x1620] ss:$16 sps:$4 sm:$0xff]   ;;  %v15170_v7 = vld [vmem:[%s21657_s1 + $0x1644] ss:$16 sps:$4 sm:$0xff]  }
 0x28c   :  { %10239 = vmatprep.subr.bf16.mxu0 %v15079_v15  ;;  %11264 = vmatprep.subr.bf16.mxu1 %v15082_v16  ;;  %v15165_v15 = vld [vmem:[%s21657_s1 + $0x1628] ss:$16 sps:$4 sm:$0xff]   ;;  %v15173_v16 = vld [vmem:[%s21657_s1 + $0x164c] ss:$16 sps:$4 sm:$0xff]  }
 0x28f   :  { %10240 = vmatpush1.bf16.msra.mxu0 %v15077_v17  ;;  %11265 = vmatpush1.bf16.msra.mxu1 %v15080_v18  ;;  %v15168_v17 = vld [vmem:[%s21657_s1 + $0x1640] ss:$16 sps:$4 sm:$0xff]   ;;  %v15171_v18 = vld [vmem:[%s21657_s1 + $0x1648] ss:$16 sps:$4 sm:$0xff]  }
 0x290   :  { %10241 = vmatprep.subr.bf16.mxu0 %v15085_v19  ;;  %11266 = vmatprep.subr.bf16.mxu1 %v15088_v20  ;;  %v15176_v19 = vld [vmem:[%s21657_s1 + $0x1664] ss:$16 sps:$4 sm:$0xff]   ;;  %v15179_v20 = vld [vmem:[%s21657_s1 + $0x166c] ss:$16 sps:$4 sm:$0xff]  }
 0x293   :  { %10242 = vmatpush1.bf16.msra.mxu0 %v15083_v22  ;;  %11267 = vmatpush1.bf16.msra.mxu1 %v15086_v23  ;;  %v15174_v22 = vld [vmem:[%s21657_s1 + $0x1660] ss:$16 sps:$4 sm:$0xff]   ;;  %v15177_v23 = vld [vmem:[%s21657_s1 + $0x1668] ss:$16 sps:$4 sm:$0xff]  }
 0x294   :  { %10243 = vmatprep.subr.bf16.mxu0 %v15091_v24  ;;  %11268 = vmatprep.subr.bf16.mxu1 %v15094_v13  ;;  %v15182_v24 = vld [vmem:[%s21657_s1 + $0x1684] ss:$16 sps:$4 sm:$0xff]   ;;  %v15185_v13 = vld [vmem:[%s21657_s1 + $0x168c] ss:$16 sps:$4 sm:$0xff]  }
 0x297   :  { %10244 = vmatpush1.bf16.msra.mxu0 %v15089_v27  ;;  %11269 = vmatpush1.bf16.msra.mxu1 %v15092_v28  ;;  %v15180_v27 = vld [vmem:[%s21657_s1 + $0x1680] ss:$16 sps:$4 sm:$0xff]   ;;  %v15183_v28 = vld [vmem:[%s21657_s1 + $0x1688] ss:$16 sps:$4 sm:$0xff]  }
 0x298   :  { %10245 = vmatprep.subr.bf16.mxu0 %v15097_v29  ;;  %11270 = vmatprep.subr.bf16.mxu1 %v15100_v14  ;;  %v15188_v29 = vld [vmem:[%s21657_s1 + $0x16a4] ss:$16 sps:$4 sm:$0xff]   ;;  %v15191_v14 = vld [vmem:[%s21657_s1 + $0x16ac] ss:$16 sps:$4 sm:$0xff]  }
 0x29b   :  { %10246 = vmatpush1.bf16.msra.mxu0 %v15095_v30  ;;  %11271 = vmatpush1.bf16.msra.mxu1 %v15098_v31  ;;  %v15186_v30 = vld [vmem:[%s21657_s1 + $0x16a0] ss:$16 sps:$4 sm:$0xff]   ;;  %v15189_v31 = vld [vmem:[%s21657_s1 + $0x16a8] ss:$16 sps:$4 sm:$0xff]  }
 0x29c   :  { %10247 = vmatprep.subr.bf16.mxu0 %v15103_v25  ;;  %11272 = vmatprep.subr.bf16.mxu1 %v15106_v32  ;;  %v15194_v25 = vld [vmem:[%s21657_s1 + $0x16c4] ss:$16 sps:$4 sm:$0xff]   ;;  %v15197_v32 = vld [vmem:[%s21657_s1 + $0x16cc] ss:$16 sps:$4 sm:$0xff]  }
 0x29f   :  { %10248 = vmatpush1.bf16.msra.mxu0 %v15101_v33  ;;  %11273 = vmatpush1.bf16.msra.mxu1 %v15104_v26  ;;  %v15192_v33 = vld [vmem:[%s21657_s1 + $0x16c0] ss:$16 sps:$4 sm:$0xff]   ;;  %v15195_v26 = vld [vmem:[%s21657_s1 + $0x16c8] ss:$16 sps:$4 sm:$0xff]  }
 0x2a0   :  { %10249 = vmatprep.subr.bf16.mxu0 %v15109_v36  ;;  %11274 = vmatprep.subr.bf16.mxu1 %v15112_v37  ;;  %v15200_v36 = vld [vmem:[%s21657_s1 + $0x16e4] ss:$16 sps:$4 sm:$0xff]   ;;  %v15203_v37 = vld [vmem:[%s21657_s1 + $0x16ec] ss:$16 sps:$4 sm:$0xff]  }
 0x2a3   :  { %10250 = vmatpush1.bf16.msra.mxu0 %v15107_v21  ;;  %11275 = vmatpush1.bf16.msra.mxu1 %v15110_v39  ;;  %v15198_v21 = vld [vmem:[%s21657_s1 + $0x16e0] ss:$16 sps:$4 sm:$0xff]   ;;  %v15201_v39 = vld [vmem:[%s21657_s1 + $0x16e8] ss:$16 sps:$4 sm:$0xff]  }
 0x2a4   :  { %10251 = vmatprep.subr.bf16.mxu0 %v15115_v40  ;;  %11276 = vmatprep.subr.bf16.mxu1 %v15118_v41  ;;  %v15206_v40 = vld [vmem:[%s21657_s1 + $0x1704] ss:$16 sps:$4 sm:$0xff]   ;;  %v15209_v41 = vld [vmem:[%s21657_s1 + $0x170c] ss:$16 sps:$4 sm:$0xff]  }
 0x2a7   :  { %10252 = vmatpush1.bf16.msra.mxu0 %v15113_v34  ;;  %11277 = vmatpush1.bf16.msra.mxu1 %v15116_v43  ;;  %v15204_v34 = vld [vmem:[%s21657_s1 + $0x1700] ss:$16 sps:$4 sm:$0xff]   ;;  %v15207_v43 = vld [vmem:[%s21657_s1 + $0x1708] ss:$16 sps:$4 sm:$0xff]  }
 0x2a8   :  { %10253 = vmatprep.subr.bf16.mxu0 %v15121_v45  ;;  %11278 = vmatprep.subr.bf16.mxu1 %v15124_v46  ;;  %v15212_v45 = vld [vmem:[%s21657_s1 + $0x1724] ss:$16 sps:$4 sm:$0xff]   ;;  %v15215_v46 = vld [vmem:[%s21657_s1 + $0x172c] ss:$16 sps:$4 sm:$0xff]  }
 0x2ab   :  { %10254 = vmatpush1.bf16.msra.mxu0 %v15119_v35  ;;  %11279 = vmatpush1.bf16.msra.mxu1 %v15122_v50  ;;  %v15210_v35 = vld [vmem:[%s21657_s1 + $0x1720] ss:$16 sps:$4 sm:$0xff]   ;;  %v15213_v50 = vld [vmem:[%s21657_s1 + $0x1728] ss:$16 sps:$4 sm:$0xff]  }
 0x2ac   :  { %10255 = vmatprep.subr.bf16.mxu0 %v15127_v51  ;;  %11280 = vmatprep.subr.bf16.mxu1 %v15130_v53  ;;  %v15218_v51 = vld [vmem:[%s21657_s1 + $0x1744] ss:$16 sps:$4 sm:$0xff]   ;;  %v15221_v53 = vld [vmem:[%s21657_s1 + $0x174c] ss:$16 sps:$4 sm:$0xff]  }
 0x2af   :  { %10256 = vmatpush1.bf16.msra.mxu0 %v15125_v38  ;;  %11281 = vmatpush1.bf16.msra.mxu1 %v15128_v54  ;;  %v15216_v38 = vld [vmem:[%s21657_s1 + $0x1740] ss:$16 sps:$4 sm:$0xff]   ;;  %v15219_v54 = vld [vmem:[%s21657_s1 + $0x1748] ss:$16 sps:$4 sm:$0xff]  }
 0x2b0   :  { %10257 = vmatprep.subr.bf16.mxu0 %v15133_v55  ;;  %11282 = vmatprep.subr.bf16.mxu1 %v15136_v56  ;;  %v15224_v55 = vld [vmem:[%s21657_s1 + $0x1764] ss:$16 sps:$4 sm:$0xff]   ;;  %v15227_v56 = vld [vmem:[%s21657_s1 + $0x176c] ss:$16 sps:$4 sm:$0xff]  }
 0x2b3   :  { %10258 = vmatpush1.bf16.msra.mxu0 %v15131_v47  ;;  %11283 = vmatpush1.bf16.msra.mxu1 %v15134_v57  ;;  %v15222_v47 = vld [vmem:[%s21657_s1 + $0x1760] ss:$16 sps:$4 sm:$0xff]   ;;  %v15225_v57 = vld [vmem:[%s21657_s1 + $0x1768] ss:$16 sps:$4 sm:$0xff]  }
 0x2b4   :  { %10259 = vmatprep.subr.bf16.mxu0 %v15139_v58  ;;  %11284 = vmatprep.subr.bf16.mxu1 %v15142_v48  ;;  %v15230_v58 = vld [vmem:[%s21657_s1 + $0x1784] ss:$16 sps:$4 sm:$0xff]   ;;  %v15233_v48 = vld [vmem:[%s21657_s1 + $0x178c] ss:$16 sps:$4 sm:$0xff]  }
 0x2b7   :  { %10260 = vmatpush1.bf16.msra.mxu0 %v15137_v61  ;;  %11285 = vmatpush1.bf16.msra.mxu1 %v15140_v62  ;;  %v15228_v61 = vld [vmem:[%s21657_s1 + $0x1780] ss:$16 sps:$4 sm:$0xff]   ;;  %v15231_v62 = vld [vmem:[%s21657_s1 + $0x1788] ss:$16 sps:$4 sm:$0xff]  }
 0x2b8   :  { %10261 = vmatprep.subr.bf16.mxu0 %v15145_v44  ;;  %11286 = vmatprep.subr.bf16.mxu1 %v15148_v0  ;;  %v15236_v44 = vld [vmem:[%s21657_s1 + $0x17a4] ss:$16 sps:$4 sm:$0xff]   ;;  %v15239_v0 = vld [vmem:[%s21657_s1 + $0x17ac] ss:$16 sps:$4 sm:$0xff]  }
 0x2bb   :  { %10262 = vmatpush1.bf16.msra.mxu0 %v15143_v1  ;;  %11287 = vmatpush1.bf16.msra.mxu1 %v15146_v2  ;;  %v15234_v1 = vld [vmem:[%s21657_s1 + $0x17a0] ss:$16 sps:$4 sm:$0xff]   ;;  %v15237_v2 = vld [vmem:[%s21657_s1 + $0x17a8] ss:$16 sps:$4 sm:$0xff]  }
 0x2bc   :  { %10263 = vmatprep.subr.bf16.mxu0 %v15151_v59  ;;  %11288 = vmatprep.subr.bf16.mxu1 %v15154_v3  ;;  %v15242_v59 = vld [vmem:[%s21657_s1 + $0x17c4] ss:$16 sps:$4 sm:$0xff]   ;;  %v15245_v3 = vld [vmem:[%s21657_s1 + $0x17cc] ss:$16 sps:$4 sm:$0xff]  }
 0x2bf   :  { %10264 = vmatpush1.bf16.msra.mxu0 %v15149_v4  ;;  %11289 = vmatpush1.bf16.msra.mxu1 %v15152_v5  ;;  %v18973_v4 = vld.sshfl [vmem:[%s21656_s0 + $0x18] sm:$0xff pattern:$0x75316420]  ;;  %v15240_v5 = vld [vmem:[%s21657_s1 + $0x17c0] ss:$16 sps:$4 sm:$0xff]  }
 0x2c0   :  { %10274 = vmatprep.subr.bf16.mxu0 %v15158_v6  ;;  %11299 = vmatprep.subr.bf16.mxu1 %v15161_v60  ;;  %v15243_v6 = vld [vmem:[%s21657_s1 + $0x17c8] ss:$16 sps:$4 sm:$0xff]   ;;  %v15248_v60 = vld [vmem:[%s21657_s1 + $0x17e4] ss:$16 sps:$4 sm:$0xff]  }
 0x2c2   :  { %10266 = vmatmul.mubr.bf16.vlgmr.msra.gmra.mrb[0].mxu0 %v18796_v8  ;;  %11291 = vmatmul.mubr.bf16.vlgmr.msra.gmra.mrb[0].mxu1 %v18796_v8 }
 0x2c3   :  { %10275 = vmatpush1.bf16.msra.mxu0 %v15156_v9  ;;  %11300 = vmatpush1.bf16.msra.mxu1 %v15159_v10  ;;  %v15251_v9 = vld [vmem:[%s21657_s1 + $0x17ec] ss:$16 sps:$4 sm:$0xff]   ;;  %v15246_v10 = vld [vmem:[%s21657_s1 + $0x17e0] ss:$16 sps:$4 sm:$0xff]  }
 0x2c4   :  { %10276 = vmatprep.subr.bf16.mxu0 %v15164_v11  ;;  %11301 = vmatprep.subr.bf16.mxu1 %v15167_v63  ;;  %v15249_v11 = vld [vmem:[%s21657_s1 + $0x17e8] ss:$16 sps:$4 sm:$0xff]   ;;  %v15254_v63 = vld [vmem:[%s21657_s1 + $0x1804] ss:$16 sps:$4 sm:$0xff]  }
 0x2c5   :  { %10306 = vmatprep.mubr.bf16.mxu0 %v1772_v12  ;;  %11331 = vmatprep.mubr.bf16.mxu1 %v1772_v12  ;;  %v15257_v12 = vld [vmem:[%s21657_s1 + $0x180c] ss:$16 sps:$4 sm:$0xff]  }
 0x2c7   :  { %10277 = vmatpush1.bf16.msra.mxu0 %v15162_v52  ;;  %11302 = vmatpush1.bf16.msra.mxu1 %v15165_v15  ;;  %v1788_v52 = vcombine.high %v18973_v4, %v18973_v4  ;;  %v1770_v15 = vcombine.high %v18796_v8, %v18796_v8  ;;  %v15263_v8 = vld [vmem:[%s21657_s1 + $0x182c] ss:$16 sps:$4 sm:$0xff]  }
 0x2c8   :  { %10278 = vmatprep.subr.bf16.mxu0 %v15170_v7  ;;  %11303 = vmatprep.subr.bf16.mxu1 %v15173_v16  ;;  %v15252_v7 = vld [vmem:[%s21657_s1 + $0x1800] ss:$16 sps:$4 sm:$0xff]   ;;  %v15255_v16 = vld [vmem:[%s21657_s1 + $0x1808] ss:$16 sps:$4 sm:$0xff]  }
 0x2cb   :  { %10279 = vmatpush1.bf16.msra.mxu0 %v15168_v17  ;;  %11304 = vmatpush1.bf16.msra.mxu1 %v15171_v18  ;;  %v15260_v17 = vld [vmem:[%s21657_s1 + $0x1824] ss:$16 sps:$4 sm:$0xff]   ;;  %v19016_v18 = vrot.slane %v1788_v52, %v16689_v49 }
 0x2cc   :  { %10280 = vmatprep.subr.bf16.mxu0 %v15176_v19  ;;  %11305 = vmatprep.subr.bf16.mxu1 %v15179_v20  ;;  %v15258_v19 = vld [vmem:[%s21657_s1 + $0x1820] ss:$16 sps:$4 sm:$0xff]   ;;  %v15261_v20 = vld [vmem:[%s21657_s1 + $0x1828] ss:$16 sps:$4 sm:$0xff]   ;;  %v15344_v52 = vld [vmem:[%s21657_s1 + $0x19e4] ss:$16 sps:$4 sm:$0xff]  }
 0x2cf   :  { %10281 = vmatpush1.bf16.msra.mxu0 %v15174_v22  ;;  %11306 = vmatpush1.bf16.msra.mxu1 %v15177_v23  ;;  %v15266_v22 = vld [vmem:[%s21657_s1 + $0x1844] ss:$16 sps:$4 sm:$0xff]   ;;  %v15269_v23 = vld [vmem:[%s21657_s1 + $0x184c] ss:$16 sps:$4 sm:$0xff]  }
 0x2d0   :  { %10282 = vmatprep.subr.bf16.mxu0 %v15182_v24  ;;  %11307 = vmatprep.subr.bf16.mxu1 %v15185_v13  ;;  %v15264_v24 = vld [vmem:[%s21657_s1 + $0x1840] ss:$16 sps:$4 sm:$0xff]   ;;  %v15267_v13 = vld [vmem:[%s21657_s1 + $0x1848] ss:$16 sps:$4 sm:$0xff]  }
 0x2d3   :  { %10283 = vmatpush1.bf16.msra.mxu0 %v15180_v27  ;;  %11308 = vmatpush1.bf16.msra.mxu1 %v15183_v28  ;;  %v15272_v27 = vld [vmem:[%s21657_s1 + $0x1864] ss:$16 sps:$4 sm:$0xff]   ;;  %v15275_v28 = vld [vmem:[%s21657_s1 + $0x186c] ss:$16 sps:$4 sm:$0xff]  }
 0x2d4   :  { %10284 = vmatprep.subr.bf16.mxu0 %v15188_v29  ;;  %11309 = vmatprep.subr.bf16.mxu1 %v15191_v14  ;;  %v15270_v29 = vld [vmem:[%s21657_s1 + $0x1860] ss:$16 sps:$4 sm:$0xff]   ;;  %v15273_v14 = vld [vmem:[%s21657_s1 + $0x1868] ss:$16 sps:$4 sm:$0xff]  }
 0x2d7   :  { %10285 = vmatpush1.bf16.msra.mxu0 %v15186_v30  ;;  %11310 = vmatpush1.bf16.msra.mxu1 %v15189_v31  ;;  %v15278_v30 = vld [vmem:[%s21657_s1 + $0x1884] ss:$16 sps:$4 sm:$0xff]   ;;  %v15281_v31 = vld [vmem:[%s21657_s1 + $0x188c] ss:$16 sps:$4 sm:$0xff]  }
 0x2d8   :  { %10286 = vmatprep.subr.bf16.mxu0 %v15194_v25  ;;  %11311 = vmatprep.subr.bf16.mxu1 %v15197_v32  ;;  %v15276_v25 = vld [vmem:[%s21657_s1 + $0x1880] ss:$16 sps:$4 sm:$0xff]   ;;  %v15279_v32 = vld [vmem:[%s21657_s1 + $0x1888] ss:$16 sps:$4 sm:$0xff]  }
 0x2db   :  { %10287 = vmatpush1.bf16.msra.mxu0 %v15192_v33  ;;  %11312 = vmatpush1.bf16.msra.mxu1 %v15195_v26  ;;  %v15284_v33 = vld [vmem:[%s21657_s1 + $0x18a4] ss:$16 sps:$4 sm:$0xff]   ;;  %v15287_v26 = vld [vmem:[%s21657_s1 + $0x18ac] ss:$16 sps:$4 sm:$0xff]  }
 0x2dc   :  { %10288 = vmatprep.subr.bf16.mxu0 %v15200_v36  ;;  %11313 = vmatprep.subr.bf16.mxu1 %v15203_v37  ;;  %v15282_v36 = vld [vmem:[%s21657_s1 + $0x18a0] ss:$16 sps:$4 sm:$0xff]   ;;  %v15285_v37 = vld [vmem:[%s21657_s1 + $0x18a8] ss:$16 sps:$4 sm:$0xff]  }
 0x2df   :  { %10289 = vmatpush1.bf16.msra.mxu0 %v15198_v21  ;;  %11314 = vmatpush1.bf16.msra.mxu1 %v15201_v39  ;;  %v15290_v21 = vld [vmem:[%s21657_s1 + $0x18c4] ss:$16 sps:$4 sm:$0xff]   ;;  %v15293_v39 = vld [vmem:[%s21657_s1 + $0x18cc] ss:$16 sps:$4 sm:$0xff]  }
 0x2e0   :  { %10290 = vmatprep.subr.bf16.mxu0 %v15206_v40  ;;  %11315 = vmatprep.subr.bf16.mxu1 %v15209_v41  ;;  %v15288_v40 = vld [vmem:[%s21657_s1 + $0x18c0] ss:$16 sps:$4 sm:$0xff]   ;;  %v15291_v41 = vld [vmem:[%s21657_s1 + $0x18c8] ss:$16 sps:$4 sm:$0xff]  }
 0x2e3   :  { %10291 = vmatpush1.bf16.msra.mxu0 %v15204_v34  ;;  %11316 = vmatpush1.bf16.msra.mxu1 %v15207_v43  ;;  %v15296_v34 = vld [vmem:[%s21657_s1 + $0x18e4] ss:$16 sps:$4 sm:$0xff]   ;;  %v15299_v43 = vld [vmem:[%s21657_s1 + $0x18ec] ss:$16 sps:$4 sm:$0xff]  }
 0x2e4   :  { %10292 = vmatprep.subr.bf16.mxu0 %v15212_v45  ;;  %11317 = vmatprep.subr.bf16.mxu1 %v15215_v46  ;;  %v15294_v45 = vld [vmem:[%s21657_s1 + $0x18e0] ss:$16 sps:$4 sm:$0xff]   ;;  %v15297_v46 = vld [vmem:[%s21657_s1 + $0x18e8] ss:$16 sps:$4 sm:$0xff]  }
 0x2e7   :  { %10293 = vmatpush1.bf16.msra.mxu0 %v15210_v35  ;;  %11318 = vmatpush1.bf16.msra.mxu1 %v15213_v50  ;;  %v15302_v35 = vld [vmem:[%s21657_s1 + $0x1904] ss:$16 sps:$4 sm:$0xff]   ;;  %v15305_v50 = vld [vmem:[%s21657_s1 + $0x190c] ss:$16 sps:$4 sm:$0xff]  }
 0x2e8   :  { %10294 = vmatprep.subr.bf16.mxu0 %v15218_v51  ;;  %11319 = vmatprep.subr.bf16.mxu1 %v15221_v53  ;;  %v15300_v51 = vld [vmem:[%s21657_s1 + $0x1900] ss:$16 sps:$4 sm:$0xff]   ;;  %v15303_v53 = vld [vmem:[%s21657_s1 + $0x1908] ss:$16 sps:$4 sm:$0xff]  }
 0x2eb   :  { %10295 = vmatpush1.bf16.msra.mxu0 %v15216_v38  ;;  %11320 = vmatpush1.bf16.msra.mxu1 %v15219_v54  ;;  %v15308_v38 = vld [vmem:[%s21657_s1 + $0x1924] ss:$16 sps:$4 sm:$0xff]   ;;  %v15311_v54 = vld [vmem:[%s21657_s1 + $0x192c] ss:$16 sps:$4 sm:$0xff]  }
 0x2ec   :  { %10296 = vmatprep.subr.bf16.mxu0 %v15224_v55  ;;  %11321 = vmatprep.subr.bf16.mxu1 %v15227_v56  ;;  %v15306_v55 = vld [vmem:[%s21657_s1 + $0x1920] ss:$16 sps:$4 sm:$0xff]   ;;  %v15309_v56 = vld [vmem:[%s21657_s1 + $0x1928] ss:$16 sps:$4 sm:$0xff]  }
 0x2ef   :  { %10297 = vmatpush1.bf16.msra.mxu0 %v15222_v47  ;;  %11322 = vmatpush1.bf16.msra.mxu1 %v15225_v57  ;;  %v15314_v47 = vld [vmem:[%s21657_s1 + $0x1944] ss:$16 sps:$4 sm:$0xff]   ;;  %v15317_v57 = vld [vmem:[%s21657_s1 + $0x194c] ss:$16 sps:$4 sm:$0xff]  }
 0x2f0   :  { %10298 = vmatprep.subr.bf16.mxu0 %v15230_v58  ;;  %11323 = vmatprep.subr.bf16.mxu1 %v15233_v48  ;;  %v15312_v58 = vld [vmem:[%s21657_s1 + $0x1940] ss:$16 sps:$4 sm:$0xff]   ;;  %v15315_v48 = vld [vmem:[%s21657_s1 + $0x1948] ss:$16 sps:$4 sm:$0xff]  }
 0x2f3   :  { %10299 = vmatpush1.bf16.msra.mxu0 %v15228_v61  ;;  %11324 = vmatpush1.bf16.msra.mxu1 %v15231_v62  ;;  %v15320_v61 = vld [vmem:[%s21657_s1 + $0x1964] ss:$16 sps:$4 sm:$0xff]   ;;  %v15323_v62 = vld [vmem:[%s21657_s1 + $0x196c] ss:$16 sps:$4 sm:$0xff]  }
 0x2f4   :  { %10300 = vmatprep.subr.bf16.mxu0 %v15236_v44  ;;  %11325 = vmatprep.subr.bf16.mxu1 %v15239_v0  ;;  %v15318_v44 = vld [vmem:[%s21657_s1 + $0x1960] ss:$16 sps:$4 sm:$0xff]   ;;  %v15321_v0 = vld [vmem:[%s21657_s1 + $0x1968] ss:$16 sps:$4 sm:$0xff]  }
 0x2f7   :  { %10301 = vmatpush1.bf16.msra.mxu0 %v15234_v1  ;;  %11326 = vmatpush1.bf16.msra.mxu1 %v15237_v2  ;;  %v15326_v1 = vld [vmem:[%s21657_s1 + $0x1984] ss:$16 sps:$4 sm:$0xff]   ;;  %v15329_v2 = vld [vmem:[%s21657_s1 + $0x198c] ss:$16 sps:$4 sm:$0xff]  }
 0x2f8   :  { %10302 = vmatprep.subr.bf16.mxu0 %v15242_v59  ;;  %11327 = vmatprep.subr.bf16.mxu1 %v15245_v3  ;;  %v15324_v59 = vld [vmem:[%s21657_s1 + $0x1980] ss:$16 sps:$4 sm:$0xff]   ;;  %v15327_v3 = vld [vmem:[%s21657_s1 + $0x1988] ss:$16 sps:$4 sm:$0xff]  }
 0x2fb   :  { %10303 = vmatpush1.bf16.msra.mxu0 %v15240_v5  ;;  %11328 = vmatpush1.bf16.msra.mxu1 %v15243_v6  ;;  %v15332_v5 = vld [vmem:[%s21657_s1 + $0x19a4] ss:$16 sps:$4 sm:$0xff]   ;;  %v15335_v6 = vld [vmem:[%s21657_s1 + $0x19ac] ss:$16 sps:$4 sm:$0xff]  }
 0x2fc   :  { %10304 = vmatprep.subr.bf16.mxu0 %v15248_v60  ;;  %11329 = vmatprep.subr.bf16.mxu1 %v15251_v9  ;;  %v15330_v60 = vld [vmem:[%s21657_s1 + $0x19a0] ss:$16 sps:$4 sm:$0xff]   ;;  %v15333_v9 = vld [vmem:[%s21657_s1 + $0x19a8] ss:$16 sps:$4 sm:$0xff]  }
 0x2ff   :  { %10305 = vmatpush1.bf16.msra.mxu0 %v15246_v10  ;;  %11330 = vmatpush1.bf16.msra.mxu1 %v15249_v11  ;;  %v15338_v10 = vld [vmem:[%s21657_s1 + $0x19c4] ss:$16 sps:$4 sm:$0xff]   ;;  %v15341_v11 = vld [vmem:[%s21657_s1 + $0x19cc] ss:$16 sps:$4 sm:$0xff]  }
 0x300   :  { %10315 = vmatprep.subr.bf16.mxu0 %v15254_v63  ;;  %11340 = vmatprep.subr.bf16.mxu1 %v15257_v12  ;;  %v15336_v63 = vld [vmem:[%s21657_s1 + $0x19c0] ss:$16 sps:$4 sm:$0xff]   ;;  %v15339_v12 = vld [vmem:[%s21657_s1 + $0x19c8] ss:$16 sps:$4 sm:$0xff]  }
 0x302   :  { %10307 = vmatmul.mubr.bf16.vlgmr.msra.gmra.mrb[0].mxu0 %v1770_v15  ;;  %11332 = vmatmul.mubr.bf16.vlgmr.msra.gmra.mrb[0].mxu1 %v1770_v15  ;;  %v15347_v15 = vld [vmem:[%s21657_s1 + $0x19ec] ss:$16 sps:$4 sm:$0xff]  }
 0x303   :  { %10316 = vmatpush1.bf16.msra.mxu0 %v15252_v7  ;;  %11341 = vmatpush1.bf16.msra.mxu1 %v15255_v16  ;;  %v15342_v7 = vld [vmem:[%s21657_s1 + $0x19e0] ss:$16 sps:$4 sm:$0xff]   ;;  %v15345_v16 = vld [vmem:[%s21657_s1 + $0x19e8] ss:$16 sps:$4 sm:$0xff]  }
 0x304   :  { %10317 = vmatprep.subr.bf16.mxu0 %v15260_v17  ;;  %11342 = vmatprep.subr.bf16.mxu1 %v15263_v8  ;;  %v15350_v17 = vld [vmem:[%s21657_s1 + $0x1a04] ss:$16 sps:$4 sm:$0xff]   ;;  %v15353_v8 = vld [vmem:[%s21657_s1 + $0x1a0c] ss:$16 sps:$4 sm:$0xff]  }
 0x305   :  { %10347 = vmatprep.mubr.bf16.mxu0 %v19016_v18  ;;  %11372 = vmatprep.mubr.bf16.mxu1 %v19016_v18 }
 0x307   :  { %10318 = vmatpush1.bf16.msra.mxu0 %v15258_v19  ;;  %11343 = vmatpush1.bf16.msra.mxu1 %v15261_v20  ;;  %v19202_v19 = vrot.slane %v18973_v4, %v16689_v49  ;;  %v15348_v20 = vld [vmem:[%s21657_s1 + $0x1a00] ss:$16 sps:$4 sm:$0xff]   ;;  %v15359_v4 = vld [vmem:[%s21657_s1 + $0x1a2c] ss:$16 sps:$4 sm:$0xff]  }
 0x308   :  { %10319 = vmatprep.subr.bf16.mxu0 %v15266_v22  ;;  %11344 = vmatprep.subr.bf16.mxu1 %v15269_v23  ;;  %v15351_v22 = vld [vmem:[%s21657_s1 + $0x1a08] ss:$16 sps:$4 sm:$0xff]   ;;  %v15356_v23 = vld [vmem:[%s21657_s1 + $0x1a24] ss:$16 sps:$4 sm:$0xff]  }
 0x30b   :  { %10320 = vmatpush1.bf16.msra.mxu0 %v15264_v24  ;;  %11345 = vmatpush1.bf16.msra.mxu1 %v15267_v13  ;;  %v1820_v24 = vcombine.high %v19016_v18, %v19016_v18  ;;  %v15354_v13 = vld [vmem:[%s21657_s1 + $0x1a20] ss:$16 sps:$4 sm:$0xff]   ;;  %v15362_v18 = vld [vmem:[%s21657_s1 + $0x1a44] ss:$16 sps:$4 sm:$0xff]  }
 0x30c   :  { %10321 = vmatprep.subr.bf16.mxu0 %v15272_v27  ;;  %11346 = vmatprep.subr.bf16.mxu1 %v15275_v28  ;;  %v15357_v27 = vld [vmem:[%s21657_s1 + $0x1a28] ss:$16 sps:$4 sm:$0xff]   ;;  %v15365_v28 = vld [vmem:[%s21657_s1 + $0x1a4c] ss:$16 sps:$4 sm:$0xff]  }
 0x30f   :  { %10322 = vmatpush1.bf16.msra.mxu0 %v15270_v29  ;;  %11347 = vmatpush1.bf16.msra.mxu1 %v15273_v14  ;;  %v15360_v29 = vld [vmem:[%s21657_s1 + $0x1a40] ss:$16 sps:$4 sm:$0xff]   ;;  %v15363_v14 = vld [vmem:[%s21657_s1 + $0x1a48] ss:$16 sps:$4 sm:$0xff]  }
 0x310   :  { %10323 = vmatprep.subr.bf16.mxu0 %v15278_v30  ;;  %11348 = vmatprep.subr.bf16.mxu1 %v15281_v31  ;;  %v15368_v30 = vld [vmem:[%s21657_s1 + $0x1a64] ss:$16 sps:$4 sm:$0xff]   ;;  %v15371_v31 = vld [vmem:[%s21657_s1 + $0x1a6c] ss:$16 sps:$4 sm:$0xff]  }
 0x313   :  { %10324 = vmatpush1.bf16.msra.mxu0 %v15276_v25  ;;  %11349 = vmatpush1.bf16.msra.mxu1 %v15279_v32  ;;  %v15366_v25 = vld [vmem:[%s21657_s1 + $0x1a60] ss:$16 sps:$4 sm:$0xff]   ;;  %v15369_v32 = vld [vmem:[%s21657_s1 + $0x1a68] ss:$16 sps:$4 sm:$0xff]  }
 0x314   :  { %10325 = vmatprep.subr.bf16.mxu0 %v15284_v33  ;;  %11350 = vmatprep.subr.bf16.mxu1 %v15287_v26  ;;  %v15374_v33 = vld [vmem:[%s21657_s1 + $0x1a84] ss:$16 sps:$4 sm:$0xff]   ;;  %v15377_v26 = vld [vmem:[%s21657_s1 + $0x1a8c] ss:$16 sps:$4 sm:$0xff]  }
 0x317   :  { %10326 = vmatpush1.bf16.msra.mxu0 %v15282_v36  ;;  %11351 = vmatpush1.bf16.msra.mxu1 %v15285_v37  ;;  %v15372_v36 = vld [vmem:[%s21657_s1 + $0x1a80] ss:$16 sps:$4 sm:$0xff]   ;;  %v15375_v37 = vld [vmem:[%s21657_s1 + $0x1a88] ss:$16 sps:$4 sm:$0xff]  }
 0x318   :  { %10327 = vmatprep.subr.bf16.mxu0 %v15290_v21  ;;  %11352 = vmatprep.subr.bf16.mxu1 %v15293_v39  ;;  %v15380_v21 = vld [vmem:[%s21657_s1 + $0x1aa4] ss:$16 sps:$4 sm:$0xff]   ;;  %v15383_v39 = vld [vmem:[%s21657_s1 + $0x1aac] ss:$16 sps:$4 sm:$0xff]  }
 0x31b   :  { %10328 = vmatpush1.bf16.msra.mxu0 %v15288_v40  ;;  %11353 = vmatpush1.bf16.msra.mxu1 %v15291_v41  ;;  %v15378_v40 = vld [vmem:[%s21657_s1 + $0x1aa0] ss:$16 sps:$4 sm:$0xff]   ;;  %v15381_v41 = vld [vmem:[%s21657_s1 + $0x1aa8] ss:$16 sps:$4 sm:$0xff]  }
 0x31c   :  { %10329 = vmatprep.subr.bf16.mxu0 %v15296_v34  ;;  %11354 = vmatprep.subr.bf16.mxu1 %v15299_v43  ;;  %v15386_v34 = vld [vmem:[%s21657_s1 + $0x1ac4] ss:$16 sps:$4 sm:$0xff]   ;;  %v15389_v43 = vld [vmem:[%s21657_s1 + $0x1acc] ss:$16 sps:$4 sm:$0xff]  }
 0x31f   :  { %10330 = vmatpush1.bf16.msra.mxu0 %v15294_v45  ;;  %11355 = vmatpush1.bf16.msra.mxu1 %v15297_v46  ;;  %v15384_v45 = vld [vmem:[%s21657_s1 + $0x1ac0] ss:$16 sps:$4 sm:$0xff]   ;;  %v15387_v46 = vld [vmem:[%s21657_s1 + $0x1ac8] ss:$16 sps:$4 sm:$0xff]  }
 0x320   :  { %10331 = vmatprep.subr.bf16.mxu0 %v15302_v35  ;;  %11356 = vmatprep.subr.bf16.mxu1 %v15305_v50  ;;  %v15392_v35 = vld [vmem:[%s21657_s1 + $0x1ae4] ss:$16 sps:$4 sm:$0xff]   ;;  %v15395_v50 = vld [vmem:[%s21657_s1 + $0x1aec] ss:$16 sps:$4 sm:$0xff]  }
 0x323   :  { %10332 = vmatpush1.bf16.msra.mxu0 %v15300_v51  ;;  %11357 = vmatpush1.bf16.msra.mxu1 %v15303_v53  ;;  %v15390_v51 = vld [vmem:[%s21657_s1 + $0x1ae0] ss:$16 sps:$4 sm:$0xff]   ;;  %v15393_v53 = vld [vmem:[%s21657_s1 + $0x1ae8] ss:$16 sps:$4 sm:$0xff]  }
 0x324   :  { %10333 = vmatprep.subr.bf16.mxu0 %v15308_v38  ;;  %11358 = vmatprep.subr.bf16.mxu1 %v15311_v54  ;;  %v15398_v38 = vld [vmem:[%s21657_s1 + $0x1b04] ss:$16 sps:$4 sm:$0xff]   ;;  %v15401_v54 = vld [vmem:[%s21657_s1 + $0x1b0c] ss:$16 sps:$4 sm:$0xff]  }
 0x327   :  { %10334 = vmatpush1.bf16.msra.mxu0 %v15306_v55  ;;  %11359 = vmatpush1.bf16.msra.mxu1 %v15309_v56  ;;  %v15396_v55 = vld [vmem:[%s21657_s1 + $0x1b00] ss:$16 sps:$4 sm:$0xff]   ;;  %v15399_v56 = vld [vmem:[%s21657_s1 + $0x1b08] ss:$16 sps:$4 sm:$0xff]  }
 0x328   :  { %10335 = vmatprep.subr.bf16.mxu0 %v15314_v47  ;;  %11360 = vmatprep.subr.bf16.mxu1 %v15317_v57  ;;  %v15404_v47 = vld [vmem:[%s21657_s1 + $0x1b24] ss:$16 sps:$4 sm:$0xff]   ;;  %v15407_v57 = vld [vmem:[%s21657_s1 + $0x1b2c] ss:$16 sps:$4 sm:$0xff]  }
 0x32b   :  { %10336 = vmatpush1.bf16.msra.mxu0 %v15312_v58  ;;  %11361 = vmatpush1.bf16.msra.mxu1 %v15315_v48  ;;  %v15402_v58 = vld [vmem:[%s21657_s1 + $0x1b20] ss:$16 sps:$4 sm:$0xff]   ;;  %v15405_v48 = vld [vmem:[%s21657_s1 + $0x1b28] ss:$16 sps:$4 sm:$0xff]  }
 0x32c   :  { %10337 = vmatprep.subr.bf16.mxu0 %v15320_v61  ;;  %11362 = vmatprep.subr.bf16.mxu1 %v15323_v62  ;;  %v15410_v61 = vld [vmem:[%s21657_s1 + $0x1b44] ss:$16 sps:$4 sm:$0xff]   ;;  %v15413_v62 = vld [vmem:[%s21657_s1 + $0x1b4c] ss:$16 sps:$4 sm:$0xff]  }
 0x32f   :  { %10338 = vmatpush1.bf16.msra.mxu0 %v15318_v44  ;;  %11363 = vmatpush1.bf16.msra.mxu1 %v15321_v0  ;;  %v15408_v44 = vld [vmem:[%s21657_s1 + $0x1b40] ss:$16 sps:$4 sm:$0xff]   ;;  %v15411_v0 = vld [vmem:[%s21657_s1 + $0x1b48] ss:$16 sps:$4 sm:$0xff]  }
 0x330   :  { %10339 = vmatprep.subr.bf16.mxu0 %v15326_v1  ;;  %11364 = vmatprep.subr.bf16.mxu1 %v15329_v2  ;;  %v15416_v1 = vld [vmem:[%s21657_s1 + $0x1b64] ss:$16 sps:$4 sm:$0xff]   ;;  %v15419_v2 = vld [vmem:[%s21657_s1 + $0x1b6c] ss:$16 sps:$4 sm:$0xff]  }
 0x333   :  { %10340 = vmatpush1.bf16.msra.mxu0 %v15324_v59  ;;  %11365 = vmatpush1.bf16.msra.mxu1 %v15327_v3  ;;  %v15414_v59 = vld [vmem:[%s21657_s1 + $0x1b60] ss:$16 sps:$4 sm:$0xff]   ;;  %v15417_v3 = vld [vmem:[%s21657_s1 + $0x1b68] ss:$16 sps:$4 sm:$0xff]  }
 0x334   :  { %10341 = vmatprep.subr.bf16.mxu0 %v15332_v5  ;;  %11366 = vmatprep.subr.bf16.mxu1 %v15335_v6  ;;  %v15422_v5 = vld [vmem:[%s21657_s1 + $0x1b84] ss:$16 sps:$4 sm:$0xff]   ;;  %v15425_v6 = vld [vmem:[%s21657_s1 + $0x1b8c] ss:$16 sps:$4 sm:$0xff]  }
 0x337   :  { %10342 = vmatpush1.bf16.msra.mxu0 %v15330_v60  ;;  %11367 = vmatpush1.bf16.msra.mxu1 %v15333_v9  ;;  %v15420_v60 = vld [vmem:[%s21657_s1 + $0x1b80] ss:$16 sps:$4 sm:$0xff]   ;;  %v15423_v9 = vld [vmem:[%s21657_s1 + $0x1b88] ss:$16 sps:$4 sm:$0xff]  }
 0x338   :  { %10343 = vmatprep.subr.bf16.mxu0 %v15338_v10  ;;  %11368 = vmatprep.subr.bf16.mxu1 %v15341_v11  ;;  %v15428_v10 = vld [vmem:[%s21657_s1 + $0x1ba4] ss:$16 sps:$4 sm:$0xff]   ;;  %v15431_v11 = vld [vmem:[%s21657_s1 + $0x1bac] ss:$16 sps:$4 sm:$0xff]  }
 0x33b   :  { %10344 = vmatpush1.bf16.msra.mxu0 %v15336_v63  ;;  %11369 = vmatpush1.bf16.msra.mxu1 %v15339_v12 }
 0x33c   :  { %10345 = vmatprep.subr.bf16.mxu0 %v15344_v52  ;;  %11370 = vmatprep.subr.bf16.mxu1 %v15347_v15 }
 0x33f   :  { %10346 = vmatpush1.bf16.msra.mxu0 %v15342_v7  ;;  %11371 = vmatpush1.bf16.msra.mxu1 %v15345_v16 }
 0x340   :  { %10356 = vmatprep.subr.bf16.mxu0 %v15350_v17  ;;  %11381 = vmatprep.subr.bf16.mxu1 %v15353_v8 }
 0x342   :  { %10348 = vmatmul.mubr.bf16.vlgmr.msra.gmra.mrb[0].mxu0 %v19202_v19  ;;  %11373 = vmatmul.mubr.bf16.vlgmr.msra.gmra.mrb[0].mxu1 %v19202_v19 }
 0x343   :  { %10357 = vmatpush1.bf16.msra.mxu0 %v15348_v20  ;;  %11382 = vmatpush1.bf16.msra.mxu1 %v15351_v22 }
 0x344   :  { %10358 = vmatprep.subr.bf16.mxu0 %v15356_v23  ;;  %11383 = vmatprep.subr.bf16.mxu1 %v15359_v4 }
 0x345   :  { %10388 = vmatprep.mubr.bf16.mxu0 %v1820_v24  ;;  %11413 = vmatprep.mubr.bf16.mxu1 %v1820_v24 }
 0x347   :  { %10359 = vmatpush1.bf16.msra.mxu0 %v15354_v13  ;;  %11384 = vmatpush1.bf16.msra.mxu1 %v15357_v27 }
 0x348   :  { %10360 = vmatprep.subr.bf16.mxu0 %v15362_v18  ;;  %11385 = vmatprep.subr.bf16.mxu1 %v15365_v28 }
 0x34b   :  { %10361 = vmatpush1.bf16.msra.mxu0 %v15360_v29  ;;  %11386 = vmatpush1.bf16.msra.mxu1 %v15363_v14 }
 0x34c   :  { %10362 = vmatprep.subr.bf16.mxu0 %v15368_v30  ;;  %11387 = vmatprep.subr.bf16.mxu1 %v15371_v31 }
 0x34f   :  { %10363 = vmatpush1.bf16.msra.mxu0 %v15366_v25  ;;  %11388 = vmatpush1.bf16.msra.mxu1 %v15369_v32 }
 0x350   :  { %10364 = vmatprep.subr.bf16.mxu0 %v15374_v33  ;;  %11389 = vmatprep.subr.bf16.mxu1 %v15377_v26 }
 0x353   :  { %10365 = vmatpush1.bf16.msra.mxu0 %v15372_v36  ;;  %11390 = vmatpush1.bf16.msra.mxu1 %v15375_v37 }
 0x354   :  { %10366 = vmatprep.subr.bf16.mxu0 %v15380_v21  ;;  %11391 = vmatprep.subr.bf16.mxu1 %v15383_v39 }
 0x357   :  { %10367 = vmatpush1.bf16.msra.mxu0 %v15378_v40  ;;  %11392 = vmatpush1.bf16.msra.mxu1 %v15381_v41 }
 0x358   :  { %10368 = vmatprep.subr.bf16.mxu0 %v15386_v34  ;;  %11393 = vmatprep.subr.bf16.mxu1 %v15389_v43 }
 0x35b   :  { %10369 = vmatpush1.bf16.msra.mxu0 %v15384_v45  ;;  %11394 = vmatpush1.bf16.msra.mxu1 %v15387_v46 }
 0x35c   :  { %10370 = vmatprep.subr.bf16.mxu0 %v15392_v35  ;;  %11395 = vmatprep.subr.bf16.mxu1 %v15395_v50 }
 0x35f   :  { %10371 = vmatpush1.bf16.msra.mxu0 %v15390_v51  ;;  %11396 = vmatpush1.bf16.msra.mxu1 %v15393_v53 }
 0x360   :  { %10372 = vmatprep.subr.bf16.mxu0 %v15398_v38  ;;  %11397 = vmatprep.subr.bf16.mxu1 %v15401_v54 }
 0x363   :  { %10373 = vmatpush1.bf16.msra.mxu0 %v15396_v55  ;;  %11398 = vmatpush1.bf16.msra.mxu1 %v15399_v56 }
 0x364   :  { %10374 = vmatprep.subr.bf16.mxu0 %v15404_v47  ;;  %11399 = vmatprep.subr.bf16.mxu1 %v15407_v57 }
 0x367   :  { %10375 = vmatpush1.bf16.msra.mxu0 %v15402_v58  ;;  %11400 = vmatpush1.bf16.msra.mxu1 %v15405_v48 }
 0x368   :  { %10376 = vmatprep.subr.bf16.mxu0 %v15410_v61  ;;  %11401 = vmatprep.subr.bf16.mxu1 %v15413_v62 }
 0x36b   :  { %10377 = vmatpush1.bf16.msra.mxu0 %v15408_v44  ;;  %11402 = vmatpush1.bf16.msra.mxu1 %v15411_v0 }
 0x36c   :  { %10378 = vmatprep.subr.bf16.mxu0 %v15416_v1  ;;  %11403 = vmatprep.subr.bf16.mxu1 %v15419_v2 }
 0x36f   :  { %10379 = vmatpush1.bf16.msra.mxu0 %v15414_v59  ;;  %11404 = vmatpush1.bf16.msra.mxu1 %v15417_v3 }
 0x370   :  { %10380 = vmatprep.subr.bf16.mxu0 %v15422_v5  ;;  %11405 = vmatprep.subr.bf16.mxu1 %v15425_v6 }
 0x371   :  { %10 = vsyncpa [#allocation3], 0  ;;  %v15426_v63 = vld [vmem:[%s21657_s1 + $0x1ba0] ss:$16 sps:$4 sm:$0xff]   ;;  %v15429_v12 = vld [vmem:[%s21657_s1 + $0x1ba8] ss:$16 sps:$4 sm:$0xff]   ;;  %v1818_v28 = vcombine.high %v19202_v19, %v19202_v19 }
 0x372   :  { %v15434_v52 = vld [vmem:[%s21657_s1 + $0x1bc4] ss:$16 sps:$4 sm:$0xff]   ;;  %v15437_v15 = vld [vmem:[%s21657_s1 + $0x1bcc] ss:$16 sps:$4 sm:$0xff]   ;;  %v15432_v17 = vld [vmem:[%s21657_s1 + $0x1bc0] ss:$16 sps:$4 sm:$0xff]  }
 0x373   :  { %10381 = vmatpush1.bf16.msra.mxu0 %v15420_v60  ;;  %11406 = vmatpush1.bf16.msra.mxu1 %v15423_v9  ;;  %v16493_v7 = vld [vmem:[%s21656_s0 + $0x18] sm:$0xff]  ;;  %v15440_v20 = vld [vmem:[%s21657_s1 + $0x1be4] ss:$16 sps:$4 sm:$0xff]   ;;  %v15438_v4 = vld [vmem:[%s21657_s1 + $0x1be0] ss:$16 sps:$4 sm:$0xff]   ;;  %vm12224_vm0 = vcmask 74752  }
 0x374   :  { %10382 = vmatprep.subr.bf16.mxu0 %v15428_v10  ;;  %11407 = vmatprep.subr.bf16.mxu1 %v15431_v11  ;;  %v1773_v16 = vcombine.high %v16493_v7, %v16493_v7  ;;  %v15435_v8 = vld [vmem:[%s21657_s1 + $0x1bc8] ss:$16 sps:$4 sm:$0xff]   ;;  %v15443_v22 = vld [vmem:[%s21657_s1 + $0x1bec] ss:$16 sps:$4 sm:$0xff]   ;;  %v15446_v13 = vld [vmem:[%s21657_s1 + $0x1c04] ss:$16 sps:$4 sm:$0xff]  }
 0x375   :  { %v15441_v24 = vld [vmem:[%s21657_s1 + $0x1be8] ss:$16 sps:$4 sm:$0xff]   ;;  %v15449_v27 = vld [vmem:[%s21657_s1 + $0x1c0c] ss:$16 sps:$4 sm:$0xff]   ;;  %v15444_v29 = vld [vmem:[%s21657_s1 + $0x1c00] ss:$16 sps:$4 sm:$0xff]  }
 0x376   :  { %v19392_v23 = vrot.slane %v1773_v16, %v16689_v49  ;;  %v15447_v14 = vld [vmem:[%s21657_s1 + $0x1c08] ss:$16 sps:$4 sm:$0xff]   ;;  %v15452_v30 = vld [vmem:[%s21657_s1 + $0x1c24] ss:$16 sps:$4 sm:$0xff]   ;;  %v15455_v19 = vld [vmem:[%s21657_s1 + $0x1c2c] ss:$16 sps:$4 sm:$0xff]  }
 0x377   :  { %10383 = vmatpush1.bf16.msra.mxu0 %v15426_v63  ;;  %11408 = vmatpush1.bf16.msra.mxu1 %v15429_v12  ;;  %v15450_v25 = vld [vmem:[%s21657_s1 + $0x1c20] ss:$16 sps:$4 sm:$0xff]   ;;  %v15453_v32 = vld [vmem:[%s21657_s1 + $0x1c28] ss:$16 sps:$4 sm:$0xff]   ;;  %v15458_v33 = vld [vmem:[%s21657_s1 + $0x1c44] ss:$16 sps:$4 sm:$0xff]  }
 0x378   :  { %10384 = vmatprep.subr.bf16.mxu0 %v15434_v52  ;;  %11409 = vmatprep.subr.bf16.mxu1 %v15437_v15  ;;  %v1789_v18 = vcombine.high %v19392_v23, %v19392_v23  ;;  %v15461_v26 = vld [vmem:[%s21657_s1 + $0x1c4c] ss:$16 sps:$4 sm:$0xff]   ;;  %v15456_v36 = vld [vmem:[%s21657_s1 + $0x1c40] ss:$16 sps:$4 sm:$0xff]   ;;  %v15459_v37 = vld [vmem:[%s21657_s1 + $0x1c48] ss:$16 sps:$4 sm:$0xff]  }
 0x379   :  { %v15464_v21 = vld [vmem:[%s21657_s1 + $0x1c64] ss:$16 sps:$4 sm:$0xff]   ;;  %v15467_v39 = vld [vmem:[%s21657_s1 + $0x1c6c] ss:$16 sps:$4 sm:$0xff]   ;;  %v15462_v40 = vld [vmem:[%s21657_s1 + $0x1c60] ss:$16 sps:$4 sm:$0xff]  }
 0x37a   :  { %v19423_v31 = vrot.slane %v1789_v18, %v16689_v49  ;;  %v15465_v41 = vld [vmem:[%s21657_s1 + $0x1c68] ss:$16 sps:$4 sm:$0xff]   ;;  %v15470_v34 = vld [vmem:[%s21657_s1 + $0x1c84] ss:$16 sps:$4 sm:$0xff]   ;;  %v15473_v43 = vld [vmem:[%s21657_s1 + $0x1c8c] ss:$16 sps:$4 sm:$0xff]  }
 0x37b   :  { %10385 = vmatpush1.bf16.msra.mxu0 %v15432_v17  ;;  %11410 = vmatpush1.bf16.msra.mxu1 %v15435_v8  ;;  %v15468_v45 = vld [vmem:[%s21657_s1 + $0x1c80] ss:$16 sps:$4 sm:$0xff]   ;;  %v15471_v46 = vld [vmem:[%s21657_s1 + $0x1c88] ss:$16 sps:$4 sm:$0xff]   ;;  %v15476_v35 = vld [vmem:[%s21657_s1 + $0x1ca4] ss:$16 sps:$4 sm:$0xff]  }
 0x37c   :  { %10386 = vmatprep.subr.bf16.mxu0 %v15440_v20  ;;  %11411 = vmatprep.subr.bf16.mxu1 %v15443_v22  ;;  %v15479_v50 = vld [vmem:[%s21657_s1 + $0x1cac] ss:$16 sps:$4 sm:$0xff]   ;;  %v15474_v51 = vld [vmem:[%s21657_s1 + $0x1ca0] ss:$16 sps:$4 sm:$0xff]   ;;  %v15477_v53 = vld [vmem:[%s21657_s1 + $0x1ca8] ss:$16 sps:$4 sm:$0xff]  }
 0x37d   :  { %v15482_v38 = vld [vmem:[%s21657_s1 + $0x1cc4] ss:$16 sps:$4 sm:$0xff]   ;;  %v15485_v54 = vld [vmem:[%s21657_s1 + $0x1ccc] ss:$16 sps:$4 sm:$0xff]   ;;  %v15480_v55 = vld [vmem:[%s21657_s1 + $0x1cc0] ss:$16 sps:$4 sm:$0xff]  }
 0x37e   :  { %v15483_v56 = vld [vmem:[%s21657_s1 + $0x1cc8] ss:$16 sps:$4 sm:$0xff]   ;;  %v15488_v47 = vld [vmem:[%s21657_s1 + $0x1ce4] ss:$16 sps:$4 sm:$0xff]   ;;  %v15491_v57 = vld [vmem:[%s21657_s1 + $0x1cec] ss:$16 sps:$4 sm:$0xff]  }
 0x37f   :  { %10387 = vmatpush1.bf16.msra.mxu0 %v15438_v4  ;;  %11412 = vmatpush1.bf16.msra.mxu1 %v15441_v24  ;;  %v15486_v58 = vld [vmem:[%s21657_s1 + $0x1ce0] ss:$16 sps:$4 sm:$0xff]   ;;  %v15489_v48 = vld [vmem:[%s21657_s1 + $0x1ce8] ss:$16 sps:$4 sm:$0xff]   ;;  %v15494_v61 = vld [vmem:[%s21657_s1 + $0x1d04] ss:$16 sps:$4 sm:$0xff]  }
 0x380   :  { %10397 = vmatprep.subr.bf16.mxu0 %v15446_v13  ;;  %11422 = vmatprep.subr.bf16.mxu1 %v15449_v27  ;;  %v15497_v62 = vld [vmem:[%s21657_s1 + $0x1d0c] ss:$16 sps:$4 sm:$0xff]   ;;  %v15492_v44 = vld [vmem:[%s21657_s1 + $0x1d00] ss:$16 sps:$4 sm:$0xff]   ;;  %v15495_v0 = vld [vmem:[%s21657_s1 + $0x1d08] ss:$16 sps:$4 sm:$0xff]  }
 0x381   :  { %v15500_v1 = vld [vmem:[%s21657_s1 + $0x1d24] ss:$16 sps:$4 sm:$0xff]   ;;  %v15503_v2 = vld [vmem:[%s21657_s1 + $0x1d2c] ss:$16 sps:$4 sm:$0xff]   ;;  %v15498_v59 = vld [vmem:[%s21657_s1 + $0x1d20] ss:$16 sps:$4 sm:$0xff]  }
 0x382   :  { %10389 = vmatmul.mubr.bf16.vlgmr.msra.gmra.mrb[0].mxu0 %v1818_v28  ;;  %11414 = vmatmul.mubr.bf16.vlgmr.msra.gmra.mrb[0].mxu1 %v1818_v28  ;;  %v15501_v3 = vld [vmem:[%s21657_s1 + $0x1d28] ss:$16 sps:$4 sm:$0xff]   ;;  %v15506_v5 = vld [vmem:[%s21657_s1 + $0x1d44] ss:$16 sps:$4 sm:$0xff]   ;;  %v15509_v6 = vld [vmem:[%s21657_s1 + $0x1d4c] ss:$16 sps:$4 sm:$0xff]  }
 0x383   :  { %10398 = vmatpush1.bf16.msra.mxu0 %v15444_v29  ;;  %11423 = vmatpush1.bf16.msra.mxu1 %v15447_v14  ;;  %v15504_v60 = vld [vmem:[%s21657_s1 + $0x1d40] ss:$16 sps:$4 sm:$0xff]   ;;  %v15507_v9 = vld [vmem:[%s21657_s1 + $0x1d48] ss:$16 sps:$4 sm:$0xff]   ;;  %v15512_v10 = vld [vmem:[%s21657_s1 + $0x1d64] ss:$16 sps:$4 sm:$0xff]  }
 0x384   :  { %10399 = vmatprep.subr.bf16.mxu0 %v15452_v30  ;;  %11424 = vmatprep.subr.bf16.mxu1 %v15455_v19  ;;  %v15515_v11 = vld [vmem:[%s21657_s1 + $0x1d6c] ss:$16 sps:$4 sm:$0xff]   ;;  %v15510_v63 = vld [vmem:[%s21657_s1 + $0x1d60] ss:$16 sps:$4 sm:$0xff]   ;;  %v15513_v12 = vld [vmem:[%s21657_s1 + $0x1d68] ss:$16 sps:$4 sm:$0xff]  }
 0x385   :  { %10429 = vmatprep.mubr.bf16.mxu0 %v19423_v31  ;;  %11454 = vmatprep.mubr.bf16.mxu1 %v19423_v31  ;;  %v15518_v52 = vld [vmem:[%s21657_s1 + $0x1d84] ss:$16 sps:$4 sm:$0xff]   ;;  %v15521_v15 = vld [vmem:[%s21657_s1 + $0x1d8c] ss:$16 sps:$4 sm:$0xff]   ;;  %v15516_v7 = vld [vmem:[%s21657_s1 + $0x1d80] ss:$16 sps:$4 sm:$0xff]  }
 0x386   :  { %v15519_v16 = vld [vmem:[%s21657_s1 + $0x1d88] ss:$16 sps:$4 sm:$0xff]   ;;  %v15524_v17 = vld [vmem:[%s21657_s1 + $0x1da4] ss:$16 sps:$4 sm:$0xff]   ;;  %v15527_v8 = vld [vmem:[%s21657_s1 + $0x1dac] ss:$16 sps:$4 sm:$0xff]  }
 0x387   :  { %10400 = vmatpush1.bf16.msra.mxu0 %v15450_v25  ;;  %11425 = vmatpush1.bf16.msra.mxu1 %v15453_v32  ;;  %v15522_v20 = vld [vmem:[%s21657_s1 + $0x1da0] ss:$16 sps:$4 sm:$0xff]   ;;  %v15525_v22 = vld [vmem:[%s21657_s1 + $0x1da8] ss:$16 sps:$4 sm:$0xff]   ;;  %v15530_v4 = vld [vmem:[%s21657_s1 + $0x1dc4] ss:$16 sps:$4 sm:$0xff]   ;;  %v19609_v25 = vrot.slane %v19392_v23, %v16689_v49 }
 0x388   :  { %10401 = vmatprep.subr.bf16.mxu0 %v15458_v33  ;;  %11426 = vmatprep.subr.bf16.mxu1 %v15461_v26  ;;  %v15533_v24 = vld [vmem:[%s21657_s1 + $0x1dcc] ss:$16 sps:$4 sm:$0xff]   ;;  %v15528_v13 = vld [vmem:[%s21657_s1 + $0x1dc0] ss:$16 sps:$4 sm:$0xff]   ;;  %v15531_v27 = vld [vmem:[%s21657_s1 + $0x1dc8] ss:$16 sps:$4 sm:$0xff]  }
 0x389   :  { %v15536_v18 = vld [vmem:[%s21657_s1 + $0x1de4] ss:$16 sps:$4 sm:$0xff]   ;;  %v15539_v28 = vld [vmem:[%s21657_s1 + $0x1dec] ss:$16 sps:$4 sm:$0xff]   ;;  %v15534_v29 = vld [vmem:[%s21657_s1 + $0x1de0] ss:$16 sps:$4 sm:$0xff]  }
 0x38a   :  { %v15537_v14 = vld [vmem:[%s21657_s1 + $0x1de8] ss:$16 sps:$4 sm:$0xff]   ;;  %v15543_v30 = vld [vmem:[%s21657_s1 + $0x1e04] ss:$16 sps:$4 sm:$0xff]   ;;  %v15546_v19 = vld [vmem:[%s21657_s1 + $0x1e0c] ss:$16 sps:$4 sm:$0xff]  }
 0x38b   :  { %10402 = vmatpush1.bf16.msra.mxu0 %v15456_v36  ;;  %11427 = vmatpush1.bf16.msra.mxu1 %v15459_v37  ;;  %v15541_v32 = vld [vmem:[%s21657_s1 + $0x1e00] ss:$16 sps:$4 sm:$0xff]   ;;  %v15544_v33 = vld [vmem:[%s21657_s1 + $0x1e08] ss:$16 sps:$4 sm:$0xff]   ;;  %v15549_v26 = vld [vmem:[%s21657_s1 + $0x1e24] ss:$16 sps:$4 sm:$0xff]   ;;  %v1821_v36 = vcombine.high %v19423_v31, %v19423_v31 }
 0x38c   :  { %10403 = vmatprep.subr.bf16.mxu0 %v15464_v21  ;;  %11428 = vmatprep.subr.bf16.mxu1 %v15467_v39  ;;  %v15552_v23 = vld [vmem:[%s21657_s1 + $0x1e2c] ss:$16 sps:$4 sm:$0xff]   ;;  %v15547_v37 = vld [vmem:[%s21657_s1 + $0x1e20] ss:$16 sps:$4 sm:$0xff]   ;;  %v15550_v21 = vld [vmem:[%s21657_s1 + $0x1e28] ss:$16 sps:$4 sm:$0xff]  }
 0x38d   :  { %v15555_v31 = vld [vmem:[%s21657_s1 + $0x1e44] ss:$16 sps:$4 sm:$0xff]   ;;  %v15558_v39 = vld [vmem:[%s21657_s1 + $0x1e4c] ss:$16 sps:$4 sm:$0xff]  }
 0x38f   :  { %10404 = vmatpush1.bf16.msra.mxu0 %v15462_v40  ;;  %11429 = vmatpush1.bf16.msra.mxu1 %v15465_v41  ;;  %v15553_v40 = vld [vmem:[%s21657_s1 + $0x1e40] ss:$16 sps:$4 sm:$0xff]   ;;  %v15556_v41 = vld [vmem:[%s21657_s1 + $0x1e48] ss:$16 sps:$4 sm:$0xff]  }
 0x390   :  { %10405 = vmatprep.subr.bf16.mxu0 %v15470_v34  ;;  %11430 = vmatprep.subr.bf16.mxu1 %v15473_v43  ;;  %v15561_v34 = vld [vmem:[%s21657_s1 + $0x1e64] ss:$16 sps:$4 sm:$0xff]   ;;  %v15564_v43 = vld [vmem:[%s21657_s1 + $0x1e6c] ss:$16 sps:$4 sm:$0xff]  }
 0x393   :  { %10406 = vmatpush1.bf16.msra.mxu0 %v15468_v45  ;;  %11431 = vmatpush1.bf16.msra.mxu1 %v15471_v46  ;;  %v15559_v45 = vld [vmem:[%s21657_s1 + $0x1e60] ss:$16 sps:$4 sm:$0xff]   ;;  %v15562_v46 = vld [vmem:[%s21657_s1 + $0x1e68] ss:$16 sps:$4 sm:$0xff]  }
 0x394   :  { %10407 = vmatprep.subr.bf16.mxu0 %v15476_v35  ;;  %11432 = vmatprep.subr.bf16.mxu1 %v15479_v50  ;;  %v15567_v35 = vld [vmem:[%s21657_s1 + $0x1e84] ss:$16 sps:$4 sm:$0xff]   ;;  %v15570_v50 = vld [vmem:[%s21657_s1 + $0x1e8c] ss:$16 sps:$4 sm:$0xff]  }
 0x397   :  { %10408 = vmatpush1.bf16.msra.mxu0 %v15474_v51  ;;  %11433 = vmatpush1.bf16.msra.mxu1 %v15477_v53  ;;  %v15565_v51 = vld [vmem:[%s21657_s1 + $0x1e80] ss:$16 sps:$4 sm:$0xff]   ;;  %v15568_v53 = vld [vmem:[%s21657_s1 + $0x1e88] ss:$16 sps:$4 sm:$0xff]  }
 0x398   :  { %10409 = vmatprep.subr.bf16.mxu0 %v15482_v38  ;;  %11434 = vmatprep.subr.bf16.mxu1 %v15485_v54  ;;  %v15573_v38 = vld [vmem:[%s21657_s1 + $0x1ea4] ss:$16 sps:$4 sm:$0xff]   ;;  %v15576_v54 = vld [vmem:[%s21657_s1 + $0x1eac] ss:$16 sps:$4 sm:$0xff]  }
 0x39b   :  { %10410 = vmatpush1.bf16.msra.mxu0 %v15480_v55  ;;  %11435 = vmatpush1.bf16.msra.mxu1 %v15483_v56  ;;  %v15571_v55 = vld [vmem:[%s21657_s1 + $0x1ea0] ss:$16 sps:$4 sm:$0xff]   ;;  %v15574_v56 = vld [vmem:[%s21657_s1 + $0x1ea8] ss:$16 sps:$4 sm:$0xff]  }
 0x39c   :  { %10411 = vmatprep.subr.bf16.mxu0 %v15488_v47  ;;  %11436 = vmatprep.subr.bf16.mxu1 %v15491_v57  ;;  %v15579_v47 = vld [vmem:[%s21657_s1 + $0x1ec4] ss:$16 sps:$4 sm:$0xff]   ;;  %v15582_v57 = vld [vmem:[%s21657_s1 + $0x1ecc] ss:$16 sps:$4 sm:$0xff]  }
 0x39f   :  { %10412 = vmatpush1.bf16.msra.mxu0 %v15486_v58  ;;  %11437 = vmatpush1.bf16.msra.mxu1 %v15489_v48  ;;  %v15577_v58 = vld [vmem:[%s21657_s1 + $0x1ec0] ss:$16 sps:$4 sm:$0xff]   ;;  %v15580_v48 = vld [vmem:[%s21657_s1 + $0x1ec8] ss:$16 sps:$4 sm:$0xff]  }
 0x3a0   :  { %10413 = vmatprep.subr.bf16.mxu0 %v15494_v61  ;;  %11438 = vmatprep.subr.bf16.mxu1 %v15497_v62  ;;  %v15585_v61 = vld [vmem:[%s21657_s1 + $0x1ee4] ss:$16 sps:$4 sm:$0xff]   ;;  %v15588_v62 = vld [vmem:[%s21657_s1 + $0x1eec] ss:$16 sps:$4 sm:$0xff]  }
 0x3a3   :  { %10414 = vmatpush1.bf16.msra.mxu0 %v15492_v44  ;;  %11439 = vmatpush1.bf16.msra.mxu1 %v15495_v0  ;;  %v15583_v44 = vld [vmem:[%s21657_s1 + $0x1ee0] ss:$16 sps:$4 sm:$0xff]   ;;  %v15586_v0 = vld [vmem:[%s21657_s1 + $0x1ee8] ss:$16 sps:$4 sm:$0xff]  }
 0x3a4   :  { %10415 = vmatprep.subr.bf16.mxu0 %v15500_v1  ;;  %11440 = vmatprep.subr.bf16.mxu1 %v15503_v2  ;;  %v15591_v1 = vld [vmem:[%s21657_s1 + $0x1f04] ss:$16 sps:$4 sm:$0xff]   ;;  %v15594_v2 = vld [vmem:[%s21657_s1 + $0x1f0c] ss:$16 sps:$4 sm:$0xff]  }
 0x3a7   :  { %10416 = vmatpush1.bf16.msra.mxu0 %v15498_v59  ;;  %11441 = vmatpush1.bf16.msra.mxu1 %v15501_v3  ;;  %v15589_v59 = vld [vmem:[%s21657_s1 + $0x1f00] ss:$16 sps:$4 sm:$0xff]   ;;  %v15592_v3 = vld [vmem:[%s21657_s1 + $0x1f08] ss:$16 sps:$4 sm:$0xff]  }
 0x3a8   :  { %10417 = vmatprep.subr.bf16.mxu0 %v15506_v5  ;;  %11442 = vmatprep.subr.bf16.mxu1 %v15509_v6  ;;  %v15597_v5 = vld [vmem:[%s21657_s1 + $0x1f24] ss:$16 sps:$4 sm:$0xff]   ;;  %v15600_v6 = vld [vmem:[%s21657_s1 + $0x1f2c] ss:$16 sps:$4 sm:$0xff]  }
 0x3ab   :  { %10418 = vmatpush1.bf16.msra.mxu0 %v15504_v60  ;;  %11443 = vmatpush1.bf16.msra.mxu1 %v15507_v9  ;;  %v15595_v60 = vld [vmem:[%s21657_s1 + $0x1f20] ss:$16 sps:$4 sm:$0xff]   ;;  %v15598_v9 = vld [vmem:[%s21657_s1 + $0x1f28] ss:$16 sps:$4 sm:$0xff]  }
 0x3ac   :  { %10419 = vmatprep.subr.bf16.mxu0 %v15512_v10  ;;  %11444 = vmatprep.subr.bf16.mxu1 %v15515_v11  ;;  %v15603_v10 = vld [vmem:[%s21657_s1 + $0x1f44] ss:$16 sps:$4 sm:$0xff]   ;;  %v15606_v11 = vld [vmem:[%s21657_s1 + $0x1f4c] ss:$16 sps:$4 sm:$0xff]  }
 0x3af   :  { %10420 = vmatpush1.bf16.msra.mxu0 %v15510_v63  ;;  %11445 = vmatpush1.bf16.msra.mxu1 %v15513_v12  ;;  %v15601_v63 = vld [vmem:[%s21657_s1 + $0x1f40] ss:$16 sps:$4 sm:$0xff]   ;;  %v15604_v12 = vld [vmem:[%s21657_s1 + $0x1f48] ss:$16 sps:$4 sm:$0xff]  }
 0x3b0   :  { %10421 = vmatprep.subr.bf16.mxu0 %v15518_v52  ;;  %11446 = vmatprep.subr.bf16.mxu1 %v15521_v15  ;;  %v15609_v52 = vld [vmem:[%s21657_s1 + $0x1f64] ss:$16 sps:$4 sm:$0xff]   ;;  %v15612_v15 = vld [vmem:[%s21657_s1 + $0x1f6c] ss:$16 sps:$4 sm:$0xff]  }
 0x3b3   :  { %10422 = vmatpush1.bf16.msra.mxu0 %v15516_v7  ;;  %11447 = vmatpush1.bf16.msra.mxu1 %v15519_v16  ;;  %v15607_v7 = vld [vmem:[%s21657_s1 + $0x1f60] ss:$16 sps:$4 sm:$0xff]   ;;  %v15610_v16 = vld [vmem:[%s21657_s1 + $0x1f68] ss:$16 sps:$4 sm:$0xff]  }
 0x3b4   :  { %10423 = vmatprep.subr.bf16.mxu0 %v15524_v17  ;;  %11448 = vmatprep.subr.bf16.mxu1 %v15527_v8  ;;  %v15615_v17 = vld [vmem:[%s21657_s1 + $0x1f84] ss:$16 sps:$4 sm:$0xff]   ;;  %v15618_v8 = vld [vmem:[%s21657_s1 + $0x1f8c] ss:$16 sps:$4 sm:$0xff]  }
 0x3b7   :  { %10424 = vmatpush1.bf16.msra.mxu0 %v15522_v20  ;;  %11449 = vmatpush1.bf16.msra.mxu1 %v15525_v22  ;;  %v15613_v20 = vld [vmem:[%s21657_s1 + $0x1f80] ss:$16 sps:$4 sm:$0xff]   ;;  %v15616_v22 = vld [vmem:[%s21657_s1 + $0x1f88] ss:$16 sps:$4 sm:$0xff]  }
 0x3b8   :  { %10425 = vmatprep.subr.bf16.mxu0 %v15530_v4  ;;  %11450 = vmatprep.subr.bf16.mxu1 %v15533_v24  ;;  %v15621_v4 = vld [vmem:[%s21657_s1 + $0x1fa4] ss:$16 sps:$4 sm:$0xff]   ;;  %v15624_v24 = vld [vmem:[%s21657_s1 + $0x1fac] ss:$16 sps:$4 sm:$0xff]  }
 0x3bb   :  { %10426 = vmatpush1.bf16.msra.mxu0 %v15528_v13  ;;  %11451 = vmatpush1.bf16.msra.mxu1 %v15531_v27  ;;  %v15619_v13 = vld [vmem:[%s21657_s1 + $0x1fa0] ss:$16 sps:$4 sm:$0xff]   ;;  %v15622_v27 = vld [vmem:[%s21657_s1 + $0x1fa8] ss:$16 sps:$4 sm:$0xff]  }
 0x3bc   :  { %10427 = vmatprep.subr.bf16.mxu0 %v15536_v18  ;;  %11452 = vmatprep.subr.bf16.mxu1 %v15539_v28  ;;  %v15627_v18 = vld [vmem:[%s21657_s1 + $0x1fc4] ss:$16 sps:$4 sm:$0xff]   ;;  %v15630_v28 = vld [vmem:[%s21657_s1 + $0x1fcc] ss:$16 sps:$4 sm:$0xff]  }
 0x3bf   :  { %10428 = vmatpush1.bf16.msra.mxu0 %v15534_v29  ;;  %11453 = vmatpush1.bf16.msra.mxu1 %v15537_v14  ;;  %v19786_v29 = vld [vmem:[%s21656_s0 + $0x20] sm:$0xff] }
 0x3c0   :  { %10438 = vmatprep.subr.bf16.mxu0 %v15543_v30  ;;  %11463 = vmatprep.subr.bf16.mxu1 %v15546_v19  ;;  %v15625_v14 = vld [vmem:[%s21657_s1 + $0x1fc0] ss:$16 sps:$4 sm:$0xff]   ;;  %v15628_v30 = vld [vmem:[%s21657_s1 + $0x1fc8] ss:$16 sps:$4 sm:$0xff]   ;;  %v15633_v19 = vld [vmem:[%s21657_s1 + $0x1fe4] ss:$16 sps:$4 sm:$0xff]  }
 0x3c2   :  { %10430 = vmatmul.mubr.bf16.vlgmr.msra.gmra.mrb[0].mxu0 %v19609_v25  ;;  %11455 = vmatmul.mubr.bf16.vlgmr.msra.gmra.mrb[0].mxu1 %v19609_v25 }
 0x3c3   :  { %10439 = vmatpush1.bf16.msra.mxu0 %v15541_v32  ;;  %11464 = vmatpush1.bf16.msra.mxu1 %v15544_v33  ;;  %v15636_v32 = vld [vmem:[%s21657_s1 + $0x1fec] ss:$16 sps:$4 sm:$0xff]   ;;  %v19802_v33 = vrot.slane %v19786_v29, %v16689_v49 }
 0x3c4   :  { %10440 = vmatprep.subr.bf16.mxu0 %v15549_v26  ;;  %11465 = vmatprep.subr.bf16.mxu1 %v15552_v23  ;;  %v15631_v26 = vld [vmem:[%s21657_s1 + $0x1fe0] ss:$16 sps:$4 sm:$0xff]   ;;  %v15634_v23 = vld [vmem:[%s21657_s1 + $0x1fe8] ss:$16 sps:$4 sm:$0xff]  }
 0x3c5   :  { %10470 = vmatprep.mubr.bf16.mxu0 %v1821_v36  ;;  %11495 = vmatprep.mubr.bf16.mxu1 %v1821_v36  ;;  %v15639_v36 = vld [vmem:[%s21657_s1 + $0x2004] ss:$16 sps:$4 sm:$0xff]  }
 0x3c7   :  { %10441 = vmatpush1.bf16.msra.mxu0 %v15547_v37  ;;  %11466 = vmatpush1.bf16.msra.mxu1 %v15550_v21  ;;  %v15642_v37 = vld [vmem:[%s21657_s1 + $0x200c] ss:$16 sps:$4 sm:$0xff]   ;;  %v1837_v21 = vcombine.high %v19802_v33, %v19802_v33 }
 0x3c8   :  { %10442 = vmatprep.subr.bf16.mxu0 %v15555_v31  ;;  %11467 = vmatprep.subr.bf16.mxu1 %v15558_v39  ;;  %v1819_v31 = vcombine.high %v19609_v25, %v19609_v25  ;;  %v15637_v39 = vld [vmem:[%s21657_s1 + $0x2000] ss:$16 sps:$4 sm:$0xff]   ;;  %v15648_v25 = vld [vmem:[%s21657_s1 + $0x202c] ss:$16 sps:$4 sm:$0xff]  }
 0x3cb   :  { %10443 = vmatpush1.bf16.msra.mxu0 %v15553_v40  ;;  %11468 = vmatpush1.bf16.msra.mxu1 %v15556_v41  ;;  %v15640_v40 = vld [vmem:[%s21657_s1 + $0x2008] ss:$16 sps:$4 sm:$0xff]   ;;  %v15645_v41 = vld [vmem:[%s21657_s1 + $0x2024] ss:$16 sps:$4 sm:$0xff]  }
 0x3cc   :  { %10444 = vmatprep.subr.bf16.mxu0 %v15561_v34  ;;  %11469 = vmatprep.subr.bf16.mxu1 %v15564_v43  ;;  %v19833_v34 = vrot.slane %v1837_v21, %v16689_v49  ;;  %v15643_v43 = vld [vmem:[%s21657_s1 + $0x2020] ss:$16 sps:$4 sm:$0xff]   ;;  %v15724_v21 = vld [vmem:[%s21657_s1 + $0x21c8] ss:$16 sps:$4 sm:$0xff]  }
 0x3cf   :  { %10445 = vmatpush1.bf16.msra.mxu0 %v15559_v45  ;;  %11470 = vmatpush1.bf16.msra.mxu1 %v15562_v46  ;;  %v15646_v45 = vld [vmem:[%s21657_s1 + $0x2028] ss:$16 sps:$4 sm:$0xff]   ;;  %v15651_v46 = vld [vmem:[%s21657_s1 + $0x2044] ss:$16 sps:$4 sm:$0xff]  }
 0x3d0   :  { %10446 = vmatprep.subr.bf16.mxu0 %v15567_v35  ;;  %11471 = vmatprep.subr.bf16.mxu1 %v15570_v50  ;;  %v15654_v35 = vld [vmem:[%s21657_s1 + $0x204c] ss:$16 sps:$4 sm:$0xff]   ;;  %v15649_v50 = vld [vmem:[%s21657_s1 + $0x2040] ss:$16 sps:$4 sm:$0xff]  }
 0x3d3   :  { %10447 = vmatpush1.bf16.msra.mxu0 %v15565_v51  ;;  %11472 = vmatpush1.bf16.msra.mxu1 %v15568_v53  ;;  %v15652_v51 = vld [vmem:[%s21657_s1 + $0x2048] ss:$16 sps:$4 sm:$0xff]   ;;  %v15657_v53 = vld [vmem:[%s21657_s1 + $0x2064] ss:$16 sps:$4 sm:$0xff]  }
 0x3d4   :  { %10448 = vmatprep.subr.bf16.mxu0 %v15573_v38  ;;  %11473 = vmatprep.subr.bf16.mxu1 %v15576_v54  ;;  %v15660_v38 = vld [vmem:[%s21657_s1 + $0x206c] ss:$16 sps:$4 sm:$0xff]   ;;  %v15655_v54 = vld [vmem:[%s21657_s1 + $0x2060] ss:$16 sps:$4 sm:$0xff]  }
 0x3d7   :  { %10449 = vmatpush1.bf16.msra.mxu0 %v15571_v55  ;;  %11474 = vmatpush1.bf16.msra.mxu1 %v15574_v56  ;;  %v15658_v55 = vld [vmem:[%s21657_s1 + $0x2068] ss:$16 sps:$4 sm:$0xff]   ;;  %v15663_v56 = vld [vmem:[%s21657_s1 + $0x2084] ss:$16 sps:$4 sm:$0xff]  }
 0x3d8   :  { %10450 = vmatprep.subr.bf16.mxu0 %v15579_v47  ;;  %11475 = vmatprep.subr.bf16.mxu1 %v15582_v57  ;;  %v15666_v47 = vld [vmem:[%s21657_s1 + $0x208c] ss:$16 sps:$4 sm:$0xff]   ;;  %v15661_v57 = vld [vmem:[%s21657_s1 + $0x2080] ss:$16 sps:$4 sm:$0xff]  }
 0x3db   :  { %10451 = vmatpush1.bf16.msra.mxu0 %v15577_v58  ;;  %11476 = vmatpush1.bf16.msra.mxu1 %v15580_v48  ;;  %v15664_v58 = vld [vmem:[%s21657_s1 + $0x2088] ss:$16 sps:$4 sm:$0xff]   ;;  %v15669_v48 = vld [vmem:[%s21657_s1 + $0x20a4] ss:$16 sps:$4 sm:$0xff]  }
 0x3dc   :  { %10452 = vmatprep.subr.bf16.mxu0 %v15585_v61  ;;  %11477 = vmatprep.subr.bf16.mxu1 %v15588_v62  ;;  %v15672_v61 = vld [vmem:[%s21657_s1 + $0x20ac] ss:$16 sps:$4 sm:$0xff]   ;;  %v15667_v62 = vld [vmem:[%s21657_s1 + $0x20a0] ss:$16 sps:$4 sm:$0xff]  }
 0x3df   :  { %10453 = vmatpush1.bf16.msra.mxu0 %v15583_v44  ;;  %11478 = vmatpush1.bf16.msra.mxu1 %v15586_v0  ;;  %v15670_v44 = vld [vmem:[%s21657_s1 + $0x20a8] ss:$16 sps:$4 sm:$0xff]   ;;  %v15675_v0 = vld [vmem:[%s21657_s1 + $0x20c4] ss:$16 sps:$4 sm:$0xff]  }
 0x3e0   :  { %10454 = vmatprep.subr.bf16.mxu0 %v15591_v1  ;;  %11479 = vmatprep.subr.bf16.mxu1 %v15594_v2  ;;  %v15678_v1 = vld [vmem:[%s21657_s1 + $0x20cc] ss:$16 sps:$4 sm:$0xff]   ;;  %v15673_v2 = vld [vmem:[%s21657_s1 + $0x20c0] ss:$16 sps:$4 sm:$0xff]  }
 0x3e3   :  { %10455 = vmatpush1.bf16.msra.mxu0 %v15589_v59  ;;  %11480 = vmatpush1.bf16.msra.mxu1 %v15592_v3  ;;  %v15676_v59 = vld [vmem:[%s21657_s1 + $0x20c8] ss:$16 sps:$4 sm:$0xff]   ;;  %v15681_v3 = vld [vmem:[%s21657_s1 + $0x20e4] ss:$16 sps:$4 sm:$0xff]  }
 0x3e4   :  { %10456 = vmatprep.subr.bf16.mxu0 %v15597_v5  ;;  %11481 = vmatprep.subr.bf16.mxu1 %v15600_v6  ;;  %v15684_v5 = vld [vmem:[%s21657_s1 + $0x20ec] ss:$16 sps:$4 sm:$0xff]   ;;  %v15679_v6 = vld [vmem:[%s21657_s1 + $0x20e0] ss:$16 sps:$4 sm:$0xff]  }
 0x3e7   :  { %10457 = vmatpush1.bf16.msra.mxu0 %v15595_v60  ;;  %11482 = vmatpush1.bf16.msra.mxu1 %v15598_v9  ;;  %v15682_v60 = vld [vmem:[%s21657_s1 + $0x20e8] ss:$16 sps:$4 sm:$0xff]   ;;  %v15687_v9 = vld [vmem:[%s21657_s1 + $0x2104] ss:$16 sps:$4 sm:$0xff]  }
 0x3e8   :  { %10458 = vmatprep.subr.bf16.mxu0 %v15603_v10  ;;  %11483 = vmatprep.subr.bf16.mxu1 %v15606_v11  ;;  %v15690_v10 = vld [vmem:[%s21657_s1 + $0x210c] ss:$16 sps:$4 sm:$0xff]   ;;  %v15685_v11 = vld [vmem:[%s21657_s1 + $0x2100] ss:$16 sps:$4 sm:$0xff]  }
 0x3eb   :  { %10459 = vmatpush1.bf16.msra.mxu0 %v15601_v63  ;;  %11484 = vmatpush1.bf16.msra.mxu1 %v15604_v12  ;;  %v15688_v63 = vld [vmem:[%s21657_s1 + $0x2108] ss:$16 sps:$4 sm:$0xff]   ;;  %v15693_v12 = vld [vmem:[%s21657_s1 + $0x2124] ss:$16 sps:$4 sm:$0xff]  }
 0x3ec   :  { %10460 = vmatprep.subr.bf16.mxu0 %v15609_v52  ;;  %11485 = vmatprep.subr.bf16.mxu1 %v15612_v15  ;;  %v15696_v52 = vld [vmem:[%s21657_s1 + $0x212c] ss:$16 sps:$4 sm:$0xff]   ;;  %v15691_v15 = vld [vmem:[%s21657_s1 + $0x2120] ss:$16 sps:$4 sm:$0xff]  }
 0x3ef   :  { %10461 = vmatpush1.bf16.msra.mxu0 %v15607_v7  ;;  %11486 = vmatpush1.bf16.msra.mxu1 %v15610_v16  ;;  %v15694_v7 = vld [vmem:[%s21657_s1 + $0x2128] ss:$16 sps:$4 sm:$0xff]   ;;  %v15699_v16 = vld [vmem:[%s21657_s1 + $0x2144] ss:$16 sps:$4 sm:$0xff]  }
 0x3f0   :  { %10462 = vmatprep.subr.bf16.mxu0 %v15615_v17  ;;  %11487 = vmatprep.subr.bf16.mxu1 %v15618_v8  ;;  %v15702_v17 = vld [vmem:[%s21657_s1 + $0x214c] ss:$16 sps:$4 sm:$0xff]   ;;  %v15697_v8 = vld [vmem:[%s21657_s1 + $0x2140] ss:$16 sps:$4 sm:$0xff]  }
 0x3f3   :  { %10463 = vmatpush1.bf16.msra.mxu0 %v15613_v20  ;;  %11488 = vmatpush1.bf16.msra.mxu1 %v15616_v22  ;;  %v15700_v20 = vld [vmem:[%s21657_s1 + $0x2148] ss:$16 sps:$4 sm:$0xff]   ;;  %v15705_v22 = vld [vmem:[%s21657_s1 + $0x2164] ss:$16 sps:$4 sm:$0xff]  }
 0x3f4   :  { %10464 = vmatprep.subr.bf16.mxu0 %v15621_v4  ;;  %11489 = vmatprep.subr.bf16.mxu1 %v15624_v24  ;;  %v15708_v4 = vld [vmem:[%s21657_s1 + $0x216c] ss:$16 sps:$4 sm:$0xff]   ;;  %v15703_v24 = vld [vmem:[%s21657_s1 + $0x2160] ss:$16 sps:$4 sm:$0xff]  }
 0x3f7   :  { %10465 = vmatpush1.bf16.msra.mxu0 %v15619_v13  ;;  %11490 = vmatpush1.bf16.msra.mxu1 %v15622_v27  ;;  %v15706_v13 = vld [vmem:[%s21657_s1 + $0x2168] ss:$16 sps:$4 sm:$0xff]   ;;  %v15711_v27 = vld [vmem:[%s21657_s1 + $0x2184] ss:$16 sps:$4 sm:$0xff]  }
 0x3f8   :  { %10466 = vmatprep.subr.bf16.mxu0 %v15627_v18  ;;  %11491 = vmatprep.subr.bf16.mxu1 %v15630_v28  ;;  %v15714_v18 = vld [vmem:[%s21657_s1 + $0x218c] ss:$16 sps:$4 sm:$0xff]   ;;  %v15709_v28 = vld [vmem:[%s21657_s1 + $0x2180] ss:$16 sps:$4 sm:$0xff]  }
 0x3fb   :  { %10467 = vmatpush1.bf16.msra.mxu0 %v15625_v14  ;;  %11492 = vmatpush1.bf16.msra.mxu1 %v15628_v30  ;;  %v15712_v14 = vld [vmem:[%s21657_s1 + $0x2188] ss:$16 sps:$4 sm:$0xff]   ;;  %v15717_v30 = vld [vmem:[%s21657_s1 + $0x21a4] ss:$16 sps:$4 sm:$0xff]  }
 0x3fc   :  { %10468 = vmatprep.subr.bf16.mxu0 %v15633_v19  ;;  %11493 = vmatprep.subr.bf16.mxu1 %v15636_v32  ;;  %v15720_v19 = vld [vmem:[%s21657_s1 + $0x21ac] ss:$16 sps:$4 sm:$0xff]   ;;  %v15715_v32 = vld [vmem:[%s21657_s1 + $0x21a0] ss:$16 sps:$4 sm:$0xff]  }
 0x3ff   :  { %10469 = vmatpush1.bf16.msra.mxu0 %v15631_v26  ;;  %11494 = vmatpush1.bf16.msra.mxu1 %v15634_v23  ;;  %v15718_v26 = vld [vmem:[%s21657_s1 + $0x21a8] ss:$16 sps:$4 sm:$0xff]   ;;  %v15723_v23 = vld [vmem:[%s21657_s1 + $0x21c4] ss:$16 sps:$4 sm:$0xff]  }
 0x400   :  { %10479 = vmatprep.subr.bf16.mxu0 %v15639_v36  ;;  %11504 = vmatprep.subr.bf16.mxu1 %v15642_v37  ;;  %v15726_v36 = vld [vmem:[%s21657_s1 + $0x21cc] ss:$16 sps:$4 sm:$0xff]   ;;  %v15721_v37 = vld [vmem:[%s21657_s1 + $0x21c0] ss:$16 sps:$4 sm:$0xff]  }
 0x402   :  { %10471 = vmatmul.mubr.bf16.vlgmr.msra.gmra.mrb[0].mxu0 %v1819_v31  ;;  %11496 = vmatmul.mubr.bf16.vlgmr.msra.gmra.mrb[0].mxu1 %v1819_v31  ;;  %v15729_v31 = vld [vmem:[%s21657_s1 + $0x21e4] ss:$16 sps:$4 sm:$0xff]  }
 0x403   :  { %10480 = vmatpush1.bf16.msra.mxu0 %v15637_v39  ;;  %11505 = vmatpush1.bf16.msra.mxu1 %v15640_v40  ;;  %v15732_v39 = vld [vmem:[%s21657_s1 + $0x21ec] ss:$16 sps:$4 sm:$0xff]   ;;  %v15727_v40 = vld [vmem:[%s21657_s1 + $0x21e0] ss:$16 sps:$4 sm:$0xff]  }
 0x404   :  { %10481 = vmatprep.subr.bf16.mxu0 %v15645_v41  ;;  %11506 = vmatprep.subr.bf16.mxu1 %v15648_v25  ;;  %v15730_v41 = vld [vmem:[%s21657_s1 + $0x21e8] ss:$16 sps:$4 sm:$0xff]   ;;  %v15735_v25 = vld [vmem:[%s21657_s1 + $0x2204] ss:$16 sps:$4 sm:$0xff]  }
 0x405   :  { %10511 = vmatprep.mubr.bf16.mxu0 %v19833_v34  ;;  %11536 = vmatprep.mubr.bf16.mxu1 %v19833_v34 }
 0x407   :  { %10482 = vmatpush1.bf16.msra.mxu0 %v15643_v43  ;;  %11507 = vmatpush1.bf16.msra.mxu1 %v15646_v45  ;;  %v15738_v43 = vld [vmem:[%s21657_s1 + $0x220c] ss:$16 sps:$4 sm:$0xff]   ;;  %v20019_v45 = vrot.slane %v19802_v33, %v16689_v49 }
 0x408   :  { %10483 = vmatprep.subr.bf16.mxu0 %v15651_v46  ;;  %11508 = vmatprep.subr.bf16.mxu1 %v15654_v35  ;;  %v15733_v46 = vld [vmem:[%s21657_s1 + $0x2200] ss:$16 sps:$4 sm:$0xff]   ;;  %v15736_v35 = vld [vmem:[%s21657_s1 + $0x2208] ss:$16 sps:$4 sm:$0xff]   ;;  %v15744_v33 = vld [vmem:[%s21657_s1 + $0x222c] ss:$16 sps:$4 sm:$0xff]  }
 0x40b   :  { %10484 = vmatpush1.bf16.msra.mxu0 %v15649_v50  ;;  %11509 = vmatpush1.bf16.msra.mxu1 %v15652_v51  ;;  %v15741_v50 = vld [vmem:[%s21657_s1 + $0x2224] ss:$16 sps:$4 sm:$0xff]   ;;  %v1869_v51 = vcombine.high %v19833_v34, %v19833_v34 }
 0x40c   :  { %10485 = vmatprep.subr.bf16.mxu0 %v15657_v53  ;;  %11510 = vmatprep.subr.bf16.mxu1 %v15660_v38  ;;  %v15739_v53 = vld [vmem:[%s21657_s1 + $0x2220] ss:$16 sps:$4 sm:$0xff]   ;;  %v15742_v38 = vld [vmem:[%s21657_s1 + $0x2228] ss:$16 sps:$4 sm:$0xff]   ;;  %v15747_v34 = vld [vmem:[%s21657_s1 + $0x2244] ss:$16 sps:$4 sm:$0xff]  }
 0x40f   :  { %10486 = vmatpush1.bf16.msra.mxu0 %v15655_v54  ;;  %11511 = vmatpush1.bf16.msra.mxu1 %v15658_v55  ;;  %v15750_v54 = vld [vmem:[%s21657_s1 + $0x224c] ss:$16 sps:$4 sm:$0xff]   ;;  %v15745_v55 = vld [vmem:[%s21657_s1 + $0x2240] ss:$16 sps:$4 sm:$0xff]  }
 0x410   :  { %10487 = vmatprep.subr.bf16.mxu0 %v15663_v56  ;;  %11512 = vmatprep.subr.bf16.mxu1 %v15666_v47  ;;  %v15748_v56 = vld [vmem:[%s21657_s1 + $0x2248] ss:$16 sps:$4 sm:$0xff]   ;;  %v15753_v47 = vld [vmem:[%s21657_s1 + $0x2264] ss:$16 sps:$4 sm:$0xff]  }
 0x413   :  { %10488 = vmatpush1.bf16.msra.mxu0 %v15661_v57  ;;  %11513 = vmatpush1.bf16.msra.mxu1 %v15664_v58  ;;  %v15756_v57 = vld [vmem:[%s21657_s1 + $0x226c] ss:$16 sps:$4 sm:$0xff]   ;;  %v15751_v58 = vld [vmem:[%s21657_s1 + $0x2260] ss:$16 sps:$4 sm:$0xff]  }
 0x414   :  { %10489 = vmatprep.subr.bf16.mxu0 %v15669_v48  ;;  %11514 = vmatprep.subr.bf16.mxu1 %v15672_v61  ;;  %v15754_v48 = vld [vmem:[%s21657_s1 + $0x2268] ss:$16 sps:$4 sm:$0xff]   ;;  %v15759_v61 = vld [vmem:[%s21657_s1 + $0x2284] ss:$16 sps:$4 sm:$0xff]  }
 0x417   :  { %10490 = vmatpush1.bf16.msra.mxu0 %v15667_v62  ;;  %11515 = vmatpush1.bf16.msra.mxu1 %v15670_v44  ;;  %v15762_v62 = vld [vmem:[%s21657_s1 + $0x228c] ss:$16 sps:$4 sm:$0xff]   ;;  %v15757_v44 = vld [vmem:[%s21657_s1 + $0x2280] ss:$16 sps:$4 sm:$0xff]  }
 0x418   :  { %10491 = vmatprep.subr.bf16.mxu0 %v15675_v0  ;;  %11516 = vmatprep.subr.bf16.mxu1 %v15678_v1  ;;  %v15760_v0 = vld [vmem:[%s21657_s1 + $0x2288] ss:$16 sps:$4 sm:$0xff]   ;;  %v15765_v1 = vld [vmem:[%s21657_s1 + $0x22a4] ss:$16 sps:$4 sm:$0xff]  }
 0x41b   :  { %10492 = vmatpush1.bf16.msra.mxu0 %v15673_v2  ;;  %11517 = vmatpush1.bf16.msra.mxu1 %v15676_v59  ;;  %v15768_v2 = vld [vmem:[%s21657_s1 + $0x22ac] ss:$16 sps:$4 sm:$0xff]   ;;  %v15763_v59 = vld [vmem:[%s21657_s1 + $0x22a0] ss:$16 sps:$4 sm:$0xff]  }
 0x41c   :  { %10493 = vmatprep.subr.bf16.mxu0 %v15681_v3  ;;  %11518 = vmatprep.subr.bf16.mxu1 %v15684_v5  ;;  %v15766_v3 = vld [vmem:[%s21657_s1 + $0x22a8] ss:$16 sps:$4 sm:$0xff]   ;;  %v15771_v5 = vld [vmem:[%s21657_s1 + $0x22c4] ss:$16 sps:$4 sm:$0xff]  }
 0x41f   :  { %10494 = vmatpush1.bf16.msra.mxu0 %v15679_v6  ;;  %11519 = vmatpush1.bf16.msra.mxu1 %v15682_v60  ;;  %v15774_v6 = vld [vmem:[%s21657_s1 + $0x22cc] ss:$16 sps:$4 sm:$0xff]   ;;  %v15769_v60 = vld [vmem:[%s21657_s1 + $0x22c0] ss:$16 sps:$4 sm:$0xff]  }
 0x420   :  { %10495 = vmatprep.subr.bf16.mxu0 %v15687_v9  ;;  %11520 = vmatprep.subr.bf16.mxu1 %v15690_v10  ;;  %v15772_v9 = vld [vmem:[%s21657_s1 + $0x22c8] ss:$16 sps:$4 sm:$0xff]   ;;  %v15777_v10 = vld [vmem:[%s21657_s1 + $0x22e4] ss:$16 sps:$4 sm:$0xff]  }
 0x423   :  { %10496 = vmatpush1.bf16.msra.mxu0 %v15685_v11  ;;  %11521 = vmatpush1.bf16.msra.mxu1 %v15688_v63  ;;  %v15780_v11 = vld [vmem:[%s21657_s1 + $0x22ec] ss:$16 sps:$4 sm:$0xff]   ;;  %v15775_v63 = vld [vmem:[%s21657_s1 + $0x22e0] ss:$16 sps:$4 sm:$0xff]  }
 0x424   :  { %10497 = vmatprep.subr.bf16.mxu0 %v15693_v12  ;;  %11522 = vmatprep.subr.bf16.mxu1 %v15696_v52  ;;  %v15778_v12 = vld [vmem:[%s21657_s1 + $0x22e8] ss:$16 sps:$4 sm:$0xff]   ;;  %v15783_v52 = vld [vmem:[%s21657_s1 + $0x2304] ss:$16 sps:$4 sm:$0xff]  }
 0x427   :  { %10498 = vmatpush1.bf16.msra.mxu0 %v15691_v15  ;;  %11523 = vmatpush1.bf16.msra.mxu1 %v15694_v7  ;;  %v15786_v15 = vld [vmem:[%s21657_s1 + $0x230c] ss:$16 sps:$4 sm:$0xff]   ;;  %v15781_v7 = vld [vmem:[%s21657_s1 + $0x2300] ss:$16 sps:$4 sm:$0xff]  }
 0x428   :  { %10499 = vmatprep.subr.bf16.mxu0 %v15699_v16  ;;  %11524 = vmatprep.subr.bf16.mxu1 %v15702_v17  ;;  %v15784_v16 = vld [vmem:[%s21657_s1 + $0x2308] ss:$16 sps:$4 sm:$0xff]   ;;  %v15789_v17 = vld [vmem:[%s21657_s1 + $0x2324] ss:$16 sps:$4 sm:$0xff]  }
 0x42b   :  { %10500 = vmatpush1.bf16.msra.mxu0 %v15697_v8  ;;  %11525 = vmatpush1.bf16.msra.mxu1 %v15700_v20  ;;  %v15792_v8 = vld [vmem:[%s21657_s1 + $0x232c] ss:$16 sps:$4 sm:$0xff]   ;;  %v15787_v20 = vld [vmem:[%s21657_s1 + $0x2320] ss:$16 sps:$4 sm:$0xff]  }
 0x42c   :  { %10501 = vmatprep.subr.bf16.mxu0 %v15705_v22  ;;  %11526 = vmatprep.subr.bf16.mxu1 %v15708_v4  ;;  %v15790_v22 = vld [vmem:[%s21657_s1 + $0x2328] ss:$16 sps:$4 sm:$0xff]   ;;  %v15795_v4 = vld [vmem:[%s21657_s1 + $0x2344] ss:$16 sps:$4 sm:$0xff]  }
 0x42f   :  { %10502 = vmatpush1.bf16.msra.mxu0 %v15703_v24  ;;  %11527 = vmatpush1.bf16.msra.mxu1 %v15706_v13  ;;  %v15798_v24 = vld [vmem:[%s21657_s1 + $0x234c] ss:$16 sps:$4 sm:$0xff]   ;;  %v15793_v13 = vld [vmem:[%s21657_s1 + $0x2340] ss:$16 sps:$4 sm:$0xff]  }
 0x430   :  { %10503 = vmatprep.subr.bf16.mxu0 %v15711_v27  ;;  %11528 = vmatprep.subr.bf16.mxu1 %v15714_v18  ;;  %v15796_v27 = vld [vmem:[%s21657_s1 + $0x2348] ss:$16 sps:$4 sm:$0xff]   ;;  %v15801_v18 = vld [vmem:[%s21657_s1 + $0x2364] ss:$16 sps:$4 sm:$0xff]  }
 0x433   :  { %10504 = vmatpush1.bf16.msra.mxu0 %v15709_v28  ;;  %11529 = vmatpush1.bf16.msra.mxu1 %v15712_v14  ;;  %v15804_v28 = vld [vmem:[%s21657_s1 + $0x236c] ss:$16 sps:$4 sm:$0xff]   ;;  %v15799_v14 = vld [vmem:[%s21657_s1 + $0x2360] ss:$16 sps:$4 sm:$0xff]  }
 0x434   :  { %10505 = vmatprep.subr.bf16.mxu0 %v15717_v30  ;;  %11530 = vmatprep.subr.bf16.mxu1 %v15720_v19  ;;  %v15802_v30 = vld [vmem:[%s21657_s1 + $0x2368] ss:$16 sps:$4 sm:$0xff]   ;;  %v15807_v19 = vld [vmem:[%s21657_s1 + $0x2384] ss:$16 sps:$4 sm:$0xff]  }
 0x437   :  { %10506 = vmatpush1.bf16.msra.mxu0 %v15715_v32  ;;  %11531 = vmatpush1.bf16.msra.mxu1 %v15718_v26  ;;  %v15810_v32 = vld [vmem:[%s21657_s1 + $0x238c] ss:$16 sps:$4 sm:$0xff]   ;;  %v15805_v26 = vld [vmem:[%s21657_s1 + $0x2380] ss:$16 sps:$4 sm:$0xff]  }
 0x438   :  { %10507 = vmatprep.subr.bf16.mxu0 %v15723_v23  ;;  %11532 = vmatprep.subr.bf16.mxu1 %v15726_v36  ;;  %v15808_v23 = vld [vmem:[%s21657_s1 + $0x2388] ss:$16 sps:$4 sm:$0xff]   ;;  %v15813_v36 = vld [vmem:[%s21657_s1 + $0x23a4] ss:$16 sps:$4 sm:$0xff]  }
 0x43b   :  { %10508 = vmatpush1.bf16.msra.mxu0 %v15721_v37  ;;  %11533 = vmatpush1.bf16.msra.mxu1 %v15724_v21  ;;  %v15816_v37 = vld [vmem:[%s21657_s1 + $0x23ac] ss:$16 sps:$4 sm:$0xff]   ;;  %v15811_v21 = vld [vmem:[%s21657_s1 + $0x23a0] ss:$16 sps:$4 sm:$0xff]  }
 0x43c   :  { %10509 = vmatprep.subr.bf16.mxu0 %v15729_v31  ;;  %11534 = vmatprep.subr.bf16.mxu1 %v15732_v39  ;;  %v15814_v31 = vld [vmem:[%s21657_s1 + $0x23a8] ss:$16 sps:$4 sm:$0xff]   ;;  %v15819_v39 = vld [vmem:[%s21657_s1 + $0x23c4] ss:$16 sps:$4 sm:$0xff]  }
 0x43f   :  { %10510 = vmatpush1.bf16.msra.mxu0 %v15727_v40  ;;  %11535 = vmatpush1.bf16.msra.mxu1 %v15730_v41  ;;  %v15822_v40 = vld [vmem:[%s21657_s1 + $0x23cc] ss:$16 sps:$4 sm:$0xff]   ;;  %v1822_v41 = vcombine.high %v19786_v29, %v19786_v29 }
 0x440   :  { %10520 = vmatprep.subr.bf16.mxu0 %v15735_v25  ;;  %11545 = vmatprep.subr.bf16.mxu1 %v15738_v43  ;;  %v15817_v25 = vld [vmem:[%s21657_s1 + $0x23c0] ss:$16 sps:$4 sm:$0xff]   ;;  %v15820_v43 = vld [vmem:[%s21657_s1 + $0x23c8] ss:$16 sps:$4 sm:$0xff]   ;;  %v15828_v29 = vld [vmem:[%s21657_s1 + $0x23ec] ss:$16 sps:$4 sm:$0xff]  }
 0x442   :  { %10512 = vmatmul.mubr.bf16.vlgmr.msra.gmra.mrb[0].mxu0 %v20019_v45  ;;  %11537 = vmatmul.mubr.bf16.vlgmr.msra.gmra.mrb[0].mxu1 %v20019_v45 }
 0x443   :  { %10521 = vmatpush1.bf16.msra.mxu0 %v15733_v46  ;;  %11546 = vmatpush1.bf16.msra.mxu1 %v15736_v35  ;;  %v15825_v46 = vld [vmem:[%s21657_s1 + $0x23e4] ss:$16 sps:$4 sm:$0xff]   ;;  %v20208_v35 = vrot.slane %v1822_v41, %v16689_v49  ;;  %v15904_v41 = vld [vmem:[%s21657_s1 + $0x2588] ss:$16 sps:$4 sm:$0xff]  }
 0x444   :  { %10522 = vmatprep.subr.bf16.mxu0 %v15741_v50  ;;  %11547 = vmatprep.subr.bf16.mxu1 %v15744_v33  ;;  %v15823_v50 = vld [vmem:[%s21657_s1 + $0x23e0] ss:$16 sps:$4 sm:$0xff]   ;;  %v15826_v33 = vld [vmem:[%s21657_s1 + $0x23e8] ss:$16 sps:$4 sm:$0xff]  }
 0x445   :  { %10552 = vmatprep.mubr.bf16.mxu0 %v1869_v51  ;;  %11577 = vmatprep.mubr.bf16.mxu1 %v1869_v51  ;;  %v15831_v51 = vld [vmem:[%s21657_s1 + $0x2404] ss:$16 sps:$4 sm:$0xff]  }
 0x447   :  { %10523 = vmatpush1.bf16.msra.mxu0 %v15739_v53  ;;  %11548 = vmatpush1.bf16.msra.mxu1 %v15742_v38  ;;  %v15834_v53 = vld [vmem:[%s21657_s1 + $0x240c] ss:$16 sps:$4 sm:$0xff]   ;;  %v1838_v38 = vcombine.high %v20208_v35, %v20208_v35 }
 0x448   :  { %10524 = vmatprep.subr.bf16.mxu0 %v15747_v34  ;;  %11549 = vmatprep.subr.bf16.mxu1 %v15750_v54  ;;  %v1867_v34 = vcombine.high %v20019_v45, %v20019_v45  ;;  %v15829_v54 = vld [vmem:[%s21657_s1 + $0x2400] ss:$16 sps:$4 sm:$0xff]   ;;  %v15840_v45 = vld [vmem:[%s21657_s1 + $0x242c] ss:$16 sps:$4 sm:$0xff]  }
 0x44b   :  { %10525 = vmatpush1.bf16.msra.mxu0 %v15745_v55  ;;  %11550 = vmatpush1.bf16.msra.mxu1 %v15748_v56  ;;  %v15832_v55 = vld [vmem:[%s21657_s1 + $0x2408] ss:$16 sps:$4 sm:$0xff]   ;;  %v15837_v56 = vld [vmem:[%s21657_s1 + $0x2424] ss:$16 sps:$4 sm:$0xff]  }
 0x44c   :  { %10526 = vmatprep.subr.bf16.mxu0 %v15753_v47  ;;  %11551 = vmatprep.subr.bf16.mxu1 %v15756_v57  ;;  %v20239_v47 = vrot.slane %v1838_v38, %v16689_v49  ;;  %v15835_v57 = vld [vmem:[%s21657_s1 + $0x2420] ss:$16 sps:$4 sm:$0xff]   ;;  %v15921_v38 = vld [vmem:[%s21657_s1 + $0x25e4] ss:$16 sps:$4 sm:$0xff]  }
 0x44f   :  { %10527 = vmatpush1.bf16.msra.mxu0 %v15751_v58  ;;  %11552 = vmatpush1.bf16.msra.mxu1 %v15754_v48  ;;  %v15838_v58 = vld [vmem:[%s21657_s1 + $0x2428] ss:$16 sps:$4 sm:$0xff]   ;;  %v15843_v48 = vld [vmem:[%s21657_s1 + $0x2444] ss:$16 sps:$4 sm:$0xff]  }
 0x450   :  { %10528 = vmatprep.subr.bf16.mxu0 %v15759_v61  ;;  %11553 = vmatprep.subr.bf16.mxu1 %v15762_v62  ;;  %v15846_v61 = vld [vmem:[%s21657_s1 + $0x244c] ss:$16 sps:$4 sm:$0xff]   ;;  %v15841_v62 = vld [vmem:[%s21657_s1 + $0x2440] ss:$16 sps:$4 sm:$0xff]  }
 0x453   :  { %10529 = vmatpush1.bf16.msra.mxu0 %v15757_v44  ;;  %11554 = vmatpush1.bf16.msra.mxu1 %v15760_v0  ;;  %v15844_v44 = vld [vmem:[%s21657_s1 + $0x2448] ss:$16 sps:$4 sm:$0xff]   ;;  %v15849_v0 = vld [vmem:[%s21657_s1 + $0x2464] ss:$16 sps:$4 sm:$0xff]  }
 0x454   :  { %10530 = vmatprep.subr.bf16.mxu0 %v15765_v1  ;;  %11555 = vmatprep.subr.bf16.mxu1 %v15768_v2  ;;  %v15852_v1 = vld [vmem:[%s21657_s1 + $0x246c] ss:$16 sps:$4 sm:$0xff]   ;;  %v15847_v2 = vld [vmem:[%s21657_s1 + $0x2460] ss:$16 sps:$4 sm:$0xff]  }
 0x457   :  { %10531 = vmatpush1.bf16.msra.mxu0 %v15763_v59  ;;  %11556 = vmatpush1.bf16.msra.mxu1 %v15766_v3  ;;  %v15850_v59 = vld [vmem:[%s21657_s1 + $0x2468] ss:$16 sps:$4 sm:$0xff]   ;;  %v15855_v3 = vld [vmem:[%s21657_s1 + $0x2484] ss:$16 sps:$4 sm:$0xff]  }
 0x458   :  { %10532 = vmatprep.subr.bf16.mxu0 %v15771_v5  ;;  %11557 = vmatprep.subr.bf16.mxu1 %v15774_v6  ;;  %v15858_v5 = vld [vmem:[%s21657_s1 + $0x248c] ss:$16 sps:$4 sm:$0xff]   ;;  %v15853_v6 = vld [vmem:[%s21657_s1 + $0x2480] ss:$16 sps:$4 sm:$0xff]  }
 0x45b   :  { %10533 = vmatpush1.bf16.msra.mxu0 %v15769_v60  ;;  %11558 = vmatpush1.bf16.msra.mxu1 %v15772_v9  ;;  %v15856_v60 = vld [vmem:[%s21657_s1 + $0x2488] ss:$16 sps:$4 sm:$0xff]   ;;  %v15861_v9 = vld [vmem:[%s21657_s1 + $0x24a4] ss:$16 sps:$4 sm:$0xff]  }
 0x45c   :  { %10534 = vmatprep.subr.bf16.mxu0 %v15777_v10  ;;  %11559 = vmatprep.subr.bf16.mxu1 %v15780_v11  ;;  %v15864_v10 = vld [vmem:[%s21657_s1 + $0x24ac] ss:$16 sps:$4 sm:$0xff]   ;;  %v15859_v11 = vld [vmem:[%s21657_s1 + $0x24a0] ss:$16 sps:$4 sm:$0xff]  }
 0x45f   :  { %10535 = vmatpush1.bf16.msra.mxu0 %v15775_v63  ;;  %11560 = vmatpush1.bf16.msra.mxu1 %v15778_v12  ;;  %v15862_v63 = vld [vmem:[%s21657_s1 + $0x24a8] ss:$16 sps:$4 sm:$0xff]   ;;  %v15867_v12 = vld [vmem:[%s21657_s1 + $0x24c4] ss:$16 sps:$4 sm:$0xff]  }
 0x460   :  { %10536 = vmatprep.subr.bf16.mxu0 %v15783_v52  ;;  %11561 = vmatprep.subr.bf16.mxu1 %v15786_v15  ;;  %v15870_v52 = vld [vmem:[%s21657_s1 + $0x24cc] ss:$16 sps:$4 sm:$0xff]   ;;  %v15865_v15 = vld [vmem:[%s21657_s1 + $0x24c0] ss:$16 sps:$4 sm:$0xff]  }
 0x463   :  { %10537 = vmatpush1.bf16.msra.mxu0 %v15781_v7  ;;  %11562 = vmatpush1.bf16.msra.mxu1 %v15784_v16  ;;  %v15868_v7 = vld [vmem:[%s21657_s1 + $0x24c8] ss:$16 sps:$4 sm:$0xff]   ;;  %v15873_v16 = vld [vmem:[%s21657_s1 + $0x24e4] ss:$16 sps:$4 sm:$0xff]  }
 0x464   :  { %10538 = vmatprep.subr.bf16.mxu0 %v15789_v17  ;;  %11563 = vmatprep.subr.bf16.mxu1 %v15792_v8  ;;  %v15876_v17 = vld [vmem:[%s21657_s1 + $0x24ec] ss:$16 sps:$4 sm:$0xff]   ;;  %v15871_v8 = vld [vmem:[%s21657_s1 + $0x24e0] ss:$16 sps:$4 sm:$0xff]  }
 0x467   :  { %10539 = vmatpush1.bf16.msra.mxu0 %v15787_v20  ;;  %11564 = vmatpush1.bf16.msra.mxu1 %v15790_v22  ;;  %v15874_v20 = vld [vmem:[%s21657_s1 + $0x24e8] ss:$16 sps:$4 sm:$0xff]   ;;  %v15879_v22 = vld [vmem:[%s21657_s1 + $0x2504] ss:$16 sps:$4 sm:$0xff]  }
 0x468   :  { %10540 = vmatprep.subr.bf16.mxu0 %v15795_v4  ;;  %11565 = vmatprep.subr.bf16.mxu1 %v15798_v24  ;;  %v15882_v4 = vld [vmem:[%s21657_s1 + $0x250c] ss:$16 sps:$4 sm:$0xff]   ;;  %v15877_v24 = vld [vmem:[%s21657_s1 + $0x2500] ss:$16 sps:$4 sm:$0xff]  }
 0x46b   :  { %10541 = vmatpush1.bf16.msra.mxu0 %v15793_v13  ;;  %11566 = vmatpush1.bf16.msra.mxu1 %v15796_v27  ;;  %v15880_v13 = vld [vmem:[%s21657_s1 + $0x2508] ss:$16 sps:$4 sm:$0xff]   ;;  %v15885_v27 = vld [vmem:[%s21657_s1 + $0x2524] ss:$16 sps:$4 sm:$0xff]  }
 0x46c   :  { %10542 = vmatprep.subr.bf16.mxu0 %v15801_v18  ;;  %11567 = vmatprep.subr.bf16.mxu1 %v15804_v28  ;;  %v15888_v18 = vld [vmem:[%s21657_s1 + $0x252c] ss:$16 sps:$4 sm:$0xff]   ;;  %v15883_v28 = vld [vmem:[%s21657_s1 + $0x2520] ss:$16 sps:$4 sm:$0xff]  }
 0x46f   :  { %10543 = vmatpush1.bf16.msra.mxu0 %v15799_v14  ;;  %11568 = vmatpush1.bf16.msra.mxu1 %v15802_v30  ;;  %v15886_v14 = vld [vmem:[%s21657_s1 + $0x2528] ss:$16 sps:$4 sm:$0xff]   ;;  %v15891_v30 = vld [vmem:[%s21657_s1 + $0x2544] ss:$16 sps:$4 sm:$0xff]  }
 0x470   :  { %10544 = vmatprep.subr.bf16.mxu0 %v15807_v19  ;;  %11569 = vmatprep.subr.bf16.mxu1 %v15810_v32  ;;  %v15894_v19 = vld [vmem:[%s21657_s1 + $0x254c] ss:$16 sps:$4 sm:$0xff]   ;;  %v15889_v32 = vld [vmem:[%s21657_s1 + $0x2540] ss:$16 sps:$4 sm:$0xff]  }
 0x473   :  { %10545 = vmatpush1.bf16.msra.mxu0 %v15805_v26  ;;  %11570 = vmatpush1.bf16.msra.mxu1 %v15808_v23  ;;  %v15892_v26 = vld [vmem:[%s21657_s1 + $0x2548] ss:$16 sps:$4 sm:$0xff]   ;;  %v15897_v23 = vld [vmem:[%s21657_s1 + $0x2564] ss:$16 sps:$4 sm:$0xff]  }
 0x474   :  { %10546 = vmatprep.subr.bf16.mxu0 %v15813_v36  ;;  %11571 = vmatprep.subr.bf16.mxu1 %v15816_v37  ;;  %v15900_v36 = vld [vmem:[%s21657_s1 + $0x256c] ss:$16 sps:$4 sm:$0xff]   ;;  %v15895_v37 = vld [vmem:[%s21657_s1 + $0x2560] ss:$16 sps:$4 sm:$0xff]  }
 0x477   :  { %10547 = vmatpush1.bf16.msra.mxu0 %v15811_v21  ;;  %11572 = vmatpush1.bf16.msra.mxu1 %v15814_v31  ;;  %v15898_v21 = vld [vmem:[%s21657_s1 + $0x2568] ss:$16 sps:$4 sm:$0xff]   ;;  %v15903_v31 = vld [vmem:[%s21657_s1 + $0x2584] ss:$16 sps:$4 sm:$0xff]  }
 0x478   :  { %10548 = vmatprep.subr.bf16.mxu0 %v15819_v39  ;;  %11573 = vmatprep.subr.bf16.mxu1 %v15822_v40  ;;  %v15906_v39 = vld [vmem:[%s21657_s1 + $0x258c] ss:$16 sps:$4 sm:$0xff]   ;;  %v15901_v40 = vld [vmem:[%s21657_s1 + $0x2580] ss:$16 sps:$4 sm:$0xff]  }
 0x47b   :  { %10549 = vmatpush1.bf16.msra.mxu0 %v15817_v25  ;;  %11574 = vmatpush1.bf16.msra.mxu1 %v15820_v43  ;;  %v15909_v25 = vld [vmem:[%s21657_s1 + $0x25a4] ss:$16 sps:$4 sm:$0xff]   ;;  %v15912_v43 = vld [vmem:[%s21657_s1 + $0x25ac] ss:$16 sps:$4 sm:$0xff]  }
 0x47c   :  { %10550 = vmatprep.subr.bf16.mxu0 %v15825_v46  ;;  %11575 = vmatprep.subr.bf16.mxu1 %v15828_v29  ;;  %v15907_v46 = vld [vmem:[%s21657_s1 + $0x25a0] ss:$16 sps:$4 sm:$0xff]   ;;  %v15910_v29 = vld [vmem:[%s21657_s1 + $0x25a8] ss:$16 sps:$4 sm:$0xff]  }
 0x47f   :  { %10551 = vmatpush1.bf16.msra.mxu0 %v15823_v50  ;;  %11576 = vmatpush1.bf16.msra.mxu1 %v15826_v33  ;;  %v15915_v50 = vld [vmem:[%s21657_s1 + $0x25c4] ss:$16 sps:$4 sm:$0xff]   ;;  %v15918_v33 = vld [vmem:[%s21657_s1 + $0x25cc] ss:$16 sps:$4 sm:$0xff]  }
 0x480   :  { %10561 = vmatprep.subr.bf16.mxu0 %v15831_v51  ;;  %11586 = vmatprep.subr.bf16.mxu1 %v15834_v53  ;;  %v15913_v51 = vld [vmem:[%s21657_s1 + $0x25c0] ss:$16 sps:$4 sm:$0xff]   ;;  %v15916_v53 = vld [vmem:[%s21657_s1 + $0x25c8] ss:$16 sps:$4 sm:$0xff]  }
 0x482   :  { %10553 = vmatmul.mubr.bf16.vlgmr.msra.gmra.mrb[0].mxu0 %v1867_v34  ;;  %11578 = vmatmul.mubr.bf16.vlgmr.msra.gmra.mrb[0].mxu1 %v1867_v34  ;;  %v15924_v34 = vld [vmem:[%s21657_s1 + $0x25ec] ss:$16 sps:$4 sm:$0xff]  }
 0x483   :  { %10562 = vmatpush1.bf16.msra.mxu0 %v15829_v54  ;;  %11587 = vmatpush1.bf16.msra.mxu1 %v15832_v55  ;;  %v15919_v54 = vld [vmem:[%s21657_s1 + $0x25e0] ss:$16 sps:$4 sm:$0xff]   ;;  %v15922_v55 = vld [vmem:[%s21657_s1 + $0x25e8] ss:$16 sps:$4 sm:$0xff]  }
 0x484   :  { %10563 = vmatprep.subr.bf16.mxu0 %v15837_v56  ;;  %11588 = vmatprep.subr.bf16.mxu1 %v15840_v45  ;;  %v15928_v56 = vld [vmem:[%s21657_s1 + $0x2604] ss:$16 sps:$4 sm:$0xff]   ;;  %v15931_v45 = vld [vmem:[%s21657_s1 + $0x260c] ss:$16 sps:$4 sm:$0xff]  }
 0x485   :  { %10593 = vmatprep.mubr.bf16.mxu0 %v20239_v47  ;;  %11618 = vmatprep.mubr.bf16.mxu1 %v20239_v47 }
 0x487   :  { %10564 = vmatpush1.bf16.msra.mxu0 %v15835_v57  ;;  %11589 = vmatpush1.bf16.msra.mxu1 %v15838_v58  ;;  %v20425_v57 = vrot.slane %v20208_v35, %v16689_v49  ;;  %v15926_v58 = vld [vmem:[%s21657_s1 + $0x2600] ss:$16 sps:$4 sm:$0xff]   ;;  %v15937_v35 = vld [vmem:[%s21657_s1 + $0x262c] ss:$16 sps:$4 sm:$0xff]  }
 0x488   :  { %10565 = vmatprep.subr.bf16.mxu0 %v15843_v48  ;;  %11590 = vmatprep.subr.bf16.mxu1 %v15846_v61  ;;  %v15929_v48 = vld [vmem:[%s21657_s1 + $0x2608] ss:$16 sps:$4 sm:$0xff]   ;;  %v15934_v61 = vld [vmem:[%s21657_s1 + $0x2624] ss:$16 sps:$4 sm:$0xff]  }
 0x48b   :  { %10566 = vmatpush1.bf16.msra.mxu0 %v15841_v62  ;;  %11591 = vmatpush1.bf16.msra.mxu1 %v15844_v44  ;;  %v1870_v62 = vcombine.high %v20239_v47, %v20239_v47  ;;  %v15932_v44 = vld [vmem:[%s21657_s1 + $0x2620] ss:$16 sps:$4 sm:$0xff]   ;;  %v15940_v47 = vld [vmem:[%s21657_s1 + $0x2644] ss:$16 sps:$4 sm:$0xff]  }
 0x48c   :  { %10567 = vmatprep.subr.bf16.mxu0 %v15849_v0  ;;  %11592 = vmatprep.subr.bf16.mxu1 %v15852_v1  ;;  %v15935_v0 = vld [vmem:[%s21657_s1 + $0x2628] ss:$16 sps:$4 sm:$0xff]   ;;  %v15943_v1 = vld [vmem:[%s21657_s1 + $0x264c] ss:$16 sps:$4 sm:$0xff]  }
 0x48f   :  { %10568 = vmatpush1.bf16.msra.mxu0 %v15847_v2  ;;  %11593 = vmatpush1.bf16.msra.mxu1 %v15850_v59  ;;  %v15938_v2 = vld [vmem:[%s21657_s1 + $0x2640] ss:$16 sps:$4 sm:$0xff]   ;;  %v15941_v59 = vld [vmem:[%s21657_s1 + $0x2648] ss:$16 sps:$4 sm:$0xff]  }
 0x490   :  { %10569 = vmatprep.subr.bf16.mxu0 %v15855_v3  ;;  %11594 = vmatprep.subr.bf16.mxu1 %v15858_v5  ;;  %v15946_v3 = vld [vmem:[%s21657_s1 + $0x2664] ss:$16 sps:$4 sm:$0xff]   ;;  %v15949_v5 = vld [vmem:[%s21657_s1 + $0x266c] ss:$16 sps:$4 sm:$0xff]  }
 0x493   :  { %10570 = vmatpush1.bf16.msra.mxu0 %v15853_v6  ;;  %11595 = vmatpush1.bf16.msra.mxu1 %v15856_v60  ;;  %v15944_v6 = vld [vmem:[%s21657_s1 + $0x2660] ss:$16 sps:$4 sm:$0xff]   ;;  %v15947_v60 = vld [vmem:[%s21657_s1 + $0x2668] ss:$16 sps:$4 sm:$0xff]  }
 0x494   :  { %10571 = vmatprep.subr.bf16.mxu0 %v15861_v9  ;;  %11596 = vmatprep.subr.bf16.mxu1 %v15864_v10  ;;  %v15952_v9 = vld [vmem:[%s21657_s1 + $0x2684] ss:$16 sps:$4 sm:$0xff]   ;;  %v15955_v10 = vld [vmem:[%s21657_s1 + $0x268c] ss:$16 sps:$4 sm:$0xff]  }
 0x497   :  { %10572 = vmatpush1.bf16.msra.mxu0 %v15859_v11  ;;  %11597 = vmatpush1.bf16.msra.mxu1 %v15862_v63  ;;  %v15950_v11 = vld [vmem:[%s21657_s1 + $0x2680] ss:$16 sps:$4 sm:$0xff]   ;;  %v15953_v63 = vld [vmem:[%s21657_s1 + $0x2688] ss:$16 sps:$4 sm:$0xff]  }
 0x498   :  { %10573 = vmatprep.subr.bf16.mxu0 %v15867_v12  ;;  %11598 = vmatprep.subr.bf16.mxu1 %v15870_v52  ;;  %v15958_v12 = vld [vmem:[%s21657_s1 + $0x26a4] ss:$16 sps:$4 sm:$0xff]   ;;  %v15961_v52 = vld [vmem:[%s21657_s1 + $0x26ac] ss:$16 sps:$4 sm:$0xff]  }
 0x49b   :  { %10574 = vmatpush1.bf16.msra.mxu0 %v15865_v15  ;;  %11599 = vmatpush1.bf16.msra.mxu1 %v15868_v7  ;;  %v15956_v15 = vld [vmem:[%s21657_s1 + $0x26a0] ss:$16 sps:$4 sm:$0xff]   ;;  %v15959_v7 = vld [vmem:[%s21657_s1 + $0x26a8] ss:$16 sps:$4 sm:$0xff]  }
 0x49c   :  { %10575 = vmatprep.subr.bf16.mxu0 %v15873_v16  ;;  %11600 = vmatprep.subr.bf16.mxu1 %v15876_v17  ;;  %v15964_v16 = vld [vmem:[%s21657_s1 + $0x26c4] ss:$16 sps:$4 sm:$0xff]   ;;  %v15967_v17 = vld [vmem:[%s21657_s1 + $0x26cc] ss:$16 sps:$4 sm:$0xff]  }
 0x49f   :  { %10576 = vmatpush1.bf16.msra.mxu0 %v15871_v8  ;;  %11601 = vmatpush1.bf16.msra.mxu1 %v15874_v20  ;;  %v15962_v8 = vld [vmem:[%s21657_s1 + $0x26c0] ss:$16 sps:$4 sm:$0xff]   ;;  %v15965_v20 = vld [vmem:[%s21657_s1 + $0x26c8] ss:$16 sps:$4 sm:$0xff]  }
 0x4a0   :  { %10577 = vmatprep.subr.bf16.mxu0 %v15879_v22  ;;  %11602 = vmatprep.subr.bf16.mxu1 %v15882_v4  ;;  %v15970_v22 = vld [vmem:[%s21657_s1 + $0x26e4] ss:$16 sps:$4 sm:$0xff]   ;;  %v15973_v4 = vld [vmem:[%s21657_s1 + $0x26ec] ss:$16 sps:$4 sm:$0xff]  }
 0x4a3   :  { %10578 = vmatpush1.bf16.msra.mxu0 %v15877_v24  ;;  %11603 = vmatpush1.bf16.msra.mxu1 %v15880_v13  ;;  %v15968_v24 = vld [vmem:[%s21657_s1 + $0x26e0] ss:$16 sps:$4 sm:$0xff]   ;;  %v15971_v13 = vld [vmem:[%s21657_s1 + $0x26e8] ss:$16 sps:$4 sm:$0xff]  }
 0x4a4   :  { %10579 = vmatprep.subr.bf16.mxu0 %v15885_v27  ;;  %11604 = vmatprep.subr.bf16.mxu1 %v15888_v18  ;;  %v15976_v27 = vld [vmem:[%s21657_s1 + $0x2704] ss:$16 sps:$4 sm:$0xff]   ;;  %v15979_v18 = vld [vmem:[%s21657_s1 + $0x270c] ss:$16 sps:$4 sm:$0xff]  }
 0x4a7   :  { %10580 = vmatpush1.bf16.msra.mxu0 %v15883_v28  ;;  %11605 = vmatpush1.bf16.msra.mxu1 %v15886_v14  ;;  %v15974_v28 = vld [vmem:[%s21657_s1 + $0x2700] ss:$16 sps:$4 sm:$0xff]   ;;  %v15977_v14 = vld [vmem:[%s21657_s1 + $0x2708] ss:$16 sps:$4 sm:$0xff]  }
 0x4a8   :  { %10581 = vmatprep.subr.bf16.mxu0 %v15891_v30  ;;  %11606 = vmatprep.subr.bf16.mxu1 %v15894_v19  ;;  %v15982_v30 = vld [vmem:[%s21657_s1 + $0x2724] ss:$16 sps:$4 sm:$0xff]   ;;  %v15985_v19 = vld [vmem:[%s21657_s1 + $0x272c] ss:$16 sps:$4 sm:$0xff]  }
 0x4ab   :  { %10582 = vmatpush1.bf16.msra.mxu0 %v15889_v32  ;;  %11607 = vmatpush1.bf16.msra.mxu1 %v15892_v26  ;;  %v15980_v32 = vld [vmem:[%s21657_s1 + $0x2720] ss:$16 sps:$4 sm:$0xff]   ;;  %v15983_v26 = vld [vmem:[%s21657_s1 + $0x2728] ss:$16 sps:$4 sm:$0xff]  }
 0x4ac   :  { %10583 = vmatprep.subr.bf16.mxu0 %v15897_v23  ;;  %11608 = vmatprep.subr.bf16.mxu1 %v15900_v36  ;;  %v15988_v23 = vld [vmem:[%s21657_s1 + $0x2744] ss:$16 sps:$4 sm:$0xff]   ;;  %v15991_v36 = vld [vmem:[%s21657_s1 + $0x274c] ss:$16 sps:$4 sm:$0xff]  }
 0x4af   :  { %10584 = vmatpush1.bf16.msra.mxu0 %v15895_v37  ;;  %11609 = vmatpush1.bf16.msra.mxu1 %v15898_v21  ;;  %v15986_v37 = vld [vmem:[%s21657_s1 + $0x2740] ss:$16 sps:$4 sm:$0xff]   ;;  %v15989_v21 = vld [vmem:[%s21657_s1 + $0x2748] ss:$16 sps:$4 sm:$0xff]  }
 0x4b0   :  { %10585 = vmatprep.subr.bf16.mxu0 %v15903_v31  ;;  %11610 = vmatprep.subr.bf16.mxu1 %v15906_v39  ;;  %v15994_v31 = vld [vmem:[%s21657_s1 + $0x2764] ss:$16 sps:$4 sm:$0xff]   ;;  %v15997_v39 = vld [vmem:[%s21657_s1 + $0x276c] ss:$16 sps:$4 sm:$0xff]  }
 0x4b3   :  { %10586 = vmatpush1.bf16.msra.mxu0 %v15901_v40  ;;  %11611 = vmatpush1.bf16.msra.mxu1 %v15904_v41  ;;  %v15992_v40 = vld [vmem:[%s21657_s1 + $0x2760] ss:$16 sps:$4 sm:$0xff]   ;;  %v15995_v41 = vld [vmem:[%s21657_s1 + $0x2768] ss:$16 sps:$4 sm:$0xff]  }
 0x4b4   :  { %10587 = vmatprep.subr.bf16.mxu0 %v15909_v25  ;;  %11612 = vmatprep.subr.bf16.mxu1 %v15912_v43  ;;  %v16000_v25 = vld [vmem:[%s21657_s1 + $0x2784] ss:$16 sps:$4 sm:$0xff]   ;;  %v16003_v43 = vld [vmem:[%s21657_s1 + $0x278c] ss:$16 sps:$4 sm:$0xff]  }
 0x4b7   :  { %10588 = vmatpush1.bf16.msra.mxu0 %v15907_v46  ;;  %11613 = vmatpush1.bf16.msra.mxu1 %v15910_v29  ;;  %v15998_v46 = vld [vmem:[%s21657_s1 + $0x2780] ss:$16 sps:$4 sm:$0xff]   ;;  %v16001_v29 = vld [vmem:[%s21657_s1 + $0x2788] ss:$16 sps:$4 sm:$0xff]  }
 0x4b8   :  { %10589 = vmatprep.subr.bf16.mxu0 %v15915_v50  ;;  %11614 = vmatprep.subr.bf16.mxu1 %v15918_v33  ;;  %v16006_v50 = vld [vmem:[%s21657_s1 + $0x27a4] ss:$16 sps:$4 sm:$0xff]   ;;  %v16009_v33 = vld [vmem:[%s21657_s1 + $0x27ac] ss:$16 sps:$4 sm:$0xff]  }
 0x4bb   :  { %10590 = vmatpush1.bf16.msra.mxu0 %v15913_v51  ;;  %11615 = vmatpush1.bf16.msra.mxu1 %v15916_v53  ;;  %v16004_v51 = vld [vmem:[%s21657_s1 + $0x27a0] ss:$16 sps:$4 sm:$0xff]   ;;  %v16007_v53 = vld [vmem:[%s21657_s1 + $0x27a8] ss:$16 sps:$4 sm:$0xff]  }
 0x4bc   :  { %10591 = vmatprep.subr.bf16.mxu0 %v15921_v38  ;;  %11616 = vmatprep.subr.bf16.mxu1 %v15924_v34  ;;  %v16012_v38 = vld [vmem:[%s21657_s1 + $0x27c4] ss:$16 sps:$4 sm:$0xff]   ;;  %v16015_v34 = vld [vmem:[%s21657_s1 + $0x27cc] ss:$16 sps:$4 sm:$0xff]  }
 0x4bf   :  { %10592 = vmatpush1.bf16.msra.mxu0 %v15919_v54  ;;  %11617 = vmatpush1.bf16.msra.mxu1 %v15922_v55  ;;  %v20602_v54 = vld [vmem:[%s21656_s0 + $0x28] sm:$0xff]  ;;  %v16010_v55 = vld [vmem:[%s21657_s1 + $0x27c0] ss:$16 sps:$4 sm:$0xff]  }
 0x4c0   :  { %10602 = vmatprep.subr.bf16.mxu0 %v15928_v56  ;;  %11627 = vmatprep.subr.bf16.mxu1 %v15931_v45  ;;  %v16013_v56 = vld [vmem:[%s21657_s1 + $0x27c8] ss:$16 sps:$4 sm:$0xff]   ;;  %v16018_v45 = vld [vmem:[%s21657_s1 + $0x27e4] ss:$16 sps:$4 sm:$0xff]  }
 0x4c2   :  { %10594 = vmatmul.mubr.bf16.vlgmr.msra.gmra.mrb[0].mxu0 %v20425_v57  ;;  %11619 = vmatmul.mubr.bf16.vlgmr.msra.gmra.mrb[0].mxu1 %v20425_v57 }
 0x4c3   :  { %10603 = vmatpush1.bf16.msra.mxu0 %v15926_v58  ;;  %11628 = vmatpush1.bf16.msra.mxu1 %v15929_v48  ;;  %v16021_v58 = vld [vmem:[%s21657_s1 + $0x27ec] ss:$16 sps:$4 sm:$0xff]   ;;  %v20618_v48 = vrot.slane %v20602_v54, %v16689_v49 }
 0x4c4   :  { %10604 = vmatprep.subr.bf16.mxu0 %v15934_v61  ;;  %11629 = vmatprep.subr.bf16.mxu1 %v15937_v35  ;;  %v16016_v61 = vld [vmem:[%s21657_s1 + $0x27e0] ss:$16 sps:$4 sm:$0xff]   ;;  %v16019_v35 = vld [vmem:[%s21657_s1 + $0x27e8] ss:$16 sps:$4 sm:$0xff]  }
 0x4c5   :  { %10634 = vmatprep.mubr.bf16.mxu0 %v1870_v62  ;;  %11659 = vmatprep.mubr.bf16.mxu1 %v1870_v62  ;;  %v16024_v62 = vld [vmem:[%s21657_s1 + $0x2804] ss:$16 sps:$4 sm:$0xff]  }
 0x4c7   :  { %10605 = vmatpush1.bf16.msra.mxu0 %v15932_v44  ;;  %11630 = vmatpush1.bf16.msra.mxu1 %v15935_v0  ;;  %v16027_v44 = vld [vmem:[%s21657_s1 + $0x280c] ss:$16 sps:$4 sm:$0xff]   ;;  %v1886_v0 = vcombine.high %v20618_v48, %v20618_v48 }
 0x4c8   :  { %10606 = vmatprep.subr.bf16.mxu0 %v15940_v47  ;;  %11631 = vmatprep.subr.bf16.mxu1 %v15943_v1  ;;  %v1868_v47 = vcombine.high %v20425_v57, %v20425_v57  ;;  %v16022_v1 = vld [vmem:[%s21657_s1 + $0x2800] ss:$16 sps:$4 sm:$0xff]   ;;  %v16033_v57 = vld [vmem:[%s21657_s1 + $0x282c] ss:$16 sps:$4 sm:$0xff]  }
 0x4cb   :  { %10607 = vmatpush1.bf16.msra.mxu0 %v15938_v2  ;;  %11632 = vmatpush1.bf16.msra.mxu1 %v15941_v59  ;;  %v16025_v2 = vld [vmem:[%s21657_s1 + $0x2808] ss:$16 sps:$4 sm:$0xff]   ;;  %v16030_v59 = vld [vmem:[%s21657_s1 + $0x2824] ss:$16 sps:$4 sm:$0xff]  }
 0x4cc   :  { %10608 = vmatprep.subr.bf16.mxu0 %v15946_v3  ;;  %11633 = vmatprep.subr.bf16.mxu1 %v15949_v5  ;;  %v20649_v3 = vrot.slane %v1886_v0, %v16689_v49  ;;  %v16028_v5 = vld [vmem:[%s21657_s1 + $0x2820] ss:$16 sps:$4 sm:$0xff]   ;;  %v16109_v0 = vld [vmem:[%s21657_s1 + $0x29c8] ss:$16 sps:$4 sm:$0xff]  }
 0x4cf   :  { %10609 = vmatpush1.bf16.msra.mxu0 %v15944_v6  ;;  %11634 = vmatpush1.bf16.msra.mxu1 %v15947_v60  ;;  %v16031_v6 = vld [vmem:[%s21657_s1 + $0x2828] ss:$16 sps:$4 sm:$0xff]   ;;  %v16036_v60 = vld [vmem:[%s21657_s1 + $0x2844] ss:$16 sps:$4 sm:$0xff]  }
 0x4d0   :  { %10610 = vmatprep.subr.bf16.mxu0 %v15952_v9  ;;  %11635 = vmatprep.subr.bf16.mxu1 %v15955_v10  ;;  %v16039_v9 = vld [vmem:[%s21657_s1 + $0x284c] ss:$16 sps:$4 sm:$0xff]   ;;  %v16034_v10 = vld [vmem:[%s21657_s1 + $0x2840] ss:$16 sps:$4 sm:$0xff]  }
 0x4d3   :  { %10611 = vmatpush1.bf16.msra.mxu0 %v15950_v11  ;;  %11636 = vmatpush1.bf16.msra.mxu1 %v15953_v63  ;;  %v16037_v11 = vld [vmem:[%s21657_s1 + $0x2848] ss:$16 sps:$4 sm:$0xff]   ;;  %v16042_v63 = vld [vmem:[%s21657_s1 + $0x2864] ss:$16 sps:$4 sm:$0xff]  }
 0x4d4   :  { %10612 = vmatprep.subr.bf16.mxu0 %v15958_v12  ;;  %11637 = vmatprep.subr.bf16.mxu1 %v15961_v52  ;;  %v16045_v12 = vld [vmem:[%s21657_s1 + $0x286c] ss:$16 sps:$4 sm:$0xff]   ;;  %v16040_v52 = vld [vmem:[%s21657_s1 + $0x2860] ss:$16 sps:$4 sm:$0xff]  }
 0x4d7   :  { %10613 = vmatpush1.bf16.msra.mxu0 %v15956_v15  ;;  %11638 = vmatpush1.bf16.msra.mxu1 %v15959_v7  ;;  %v16043_v15 = vld [vmem:[%s21657_s1 + $0x2868] ss:$16 sps:$4 sm:$0xff]   ;;  %v16048_v7 = vld [vmem:[%s21657_s1 + $0x2884] ss:$16 sps:$4 sm:$0xff]  }
 0x4d8   :  { %10614 = vmatprep.subr.bf16.mxu0 %v15964_v16  ;;  %11639 = vmatprep.subr.bf16.mxu1 %v15967_v17  ;;  %v16051_v16 = vld [vmem:[%s21657_s1 + $0x288c] ss:$16 sps:$4 sm:$0xff]   ;;  %v16046_v17 = vld [vmem:[%s21657_s1 + $0x2880] ss:$16 sps:$4 sm:$0xff]  }
 0x4db   :  { %10615 = vmatpush1.bf16.msra.mxu0 %v15962_v8  ;;  %11640 = vmatpush1.bf16.msra.mxu1 %v15965_v20  ;;  %v16049_v8 = vld [vmem:[%s21657_s1 + $0x2888] ss:$16 sps:$4 sm:$0xff]   ;;  %v16054_v20 = vld [vmem:[%s21657_s1 + $0x28a4] ss:$16 sps:$4 sm:$0xff]  }
 0x4dc   :  { %10616 = vmatprep.subr.bf16.mxu0 %v15970_v22  ;;  %11641 = vmatprep.subr.bf16.mxu1 %v15973_v4  ;;  %v16057_v22 = vld [vmem:[%s21657_s1 + $0x28ac] ss:$16 sps:$4 sm:$0xff]   ;;  %v16052_v4 = vld [vmem:[%s21657_s1 + $0x28a0] ss:$16 sps:$4 sm:$0xff]  }
 0x4df   :  { %10617 = vmatpush1.bf16.msra.mxu0 %v15968_v24  ;;  %11642 = vmatpush1.bf16.msra.mxu1 %v15971_v13  ;;  %v16055_v24 = vld [vmem:[%s21657_s1 + $0x28a8] ss:$16 sps:$4 sm:$0xff]   ;;  %v16060_v13 = vld [vmem:[%s21657_s1 + $0x28c4] ss:$16 sps:$4 sm:$0xff]  }
 0x4e0   :  { %10618 = vmatprep.subr.bf16.mxu0 %v15976_v27  ;;  %11643 = vmatprep.subr.bf16.mxu1 %v15979_v18  ;;  %v16063_v27 = vld [vmem:[%s21657_s1 + $0x28cc] ss:$16 sps:$4 sm:$0xff]   ;;  %v16058_v18 = vld [vmem:[%s21657_s1 + $0x28c0] ss:$16 sps:$4 sm:$0xff]  }
 0x4e3   :  { %10619 = vmatpush1.bf16.msra.mxu0 %v15974_v28  ;;  %11644 = vmatpush1.bf16.msra.mxu1 %v15977_v14  ;;  %v16061_v28 = vld [vmem:[%s21657_s1 + $0x28c8] ss:$16 sps:$4 sm:$0xff]   ;;  %v16066_v14 = vld [vmem:[%s21657_s1 + $0x28e4] ss:$16 sps:$4 sm:$0xff]  }
 0x4e4   :  { %10620 = vmatprep.subr.bf16.mxu0 %v15982_v30  ;;  %11645 = vmatprep.subr.bf16.mxu1 %v15985_v19  ;;  %v16069_v30 = vld [vmem:[%s21657_s1 + $0x28ec] ss:$16 sps:$4 sm:$0xff]   ;;  %v16064_v19 = vld [vmem:[%s21657_s1 + $0x28e0] ss:$16 sps:$4 sm:$0xff]  }
 0x4e7   :  { %10621 = vmatpush1.bf16.msra.mxu0 %v15980_v32  ;;  %11646 = vmatpush1.bf16.msra.mxu1 %v15983_v26  ;;  %v16067_v32 = vld [vmem:[%s21657_s1 + $0x28e8] ss:$16 sps:$4 sm:$0xff]   ;;  %v16072_v26 = vld [vmem:[%s21657_s1 + $0x2904] ss:$16 sps:$4 sm:$0xff]  }
 0x4e8   :  { %10622 = vmatprep.subr.bf16.mxu0 %v15988_v23  ;;  %11647 = vmatprep.subr.bf16.mxu1 %v15991_v36  ;;  %v16075_v23 = vld [vmem:[%s21657_s1 + $0x290c] ss:$16 sps:$4 sm:$0xff]   ;;  %v16070_v36 = vld [vmem:[%s21657_s1 + $0x2900] ss:$16 sps:$4 sm:$0xff]  }
 0x4eb   :  { %10623 = vmatpush1.bf16.msra.mxu0 %v15986_v37  ;;  %11648 = vmatpush1.bf16.msra.mxu1 %v15989_v21  ;;  %v16073_v37 = vld [vmem:[%s21657_s1 + $0x2908] ss:$16 sps:$4 sm:$0xff]   ;;  %v16078_v21 = vld [vmem:[%s21657_s1 + $0x2924] ss:$16 sps:$4 sm:$0xff]  }
 0x4ec   :  { %10624 = vmatprep.subr.bf16.mxu0 %v15994_v31  ;;  %11649 = vmatprep.subr.bf16.mxu1 %v15997_v39  ;;  %v16081_v31 = vld [vmem:[%s21657_s1 + $0x292c] ss:$16 sps:$4 sm:$0xff]   ;;  %v16076_v39 = vld [vmem:[%s21657_s1 + $0x2920] ss:$16 sps:$4 sm:$0xff]  }
 0x4ef   :  { %10625 = vmatpush1.bf16.msra.mxu0 %v15992_v40  ;;  %11650 = vmatpush1.bf16.msra.mxu1 %v15995_v41  ;;  %v16079_v40 = vld [vmem:[%s21657_s1 + $0x2928] ss:$16 sps:$4 sm:$0xff]   ;;  %v16084_v41 = vld [vmem:[%s21657_s1 + $0x2944] ss:$16 sps:$4 sm:$0xff]  }
 0x4f0   :  { %10626 = vmatprep.subr.bf16.mxu0 %v16000_v25  ;;  %11651 = vmatprep.subr.bf16.mxu1 %v16003_v43  ;;  %v16087_v25 = vld [vmem:[%s21657_s1 + $0x294c] ss:$16 sps:$4 sm:$0xff]   ;;  %v16082_v43 = vld [vmem:[%s21657_s1 + $0x2940] ss:$16 sps:$4 sm:$0xff]  }
 0x4f3   :  { %10627 = vmatpush1.bf16.msra.mxu0 %v15998_v46  ;;  %11652 = vmatpush1.bf16.msra.mxu1 %v16001_v29  ;;  %v16085_v46 = vld [vmem:[%s21657_s1 + $0x2948] ss:$16 sps:$4 sm:$0xff]   ;;  %v16090_v29 = vld [vmem:[%s21657_s1 + $0x2964] ss:$16 sps:$4 sm:$0xff]  }
 0x4f4   :  { %10628 = vmatprep.subr.bf16.mxu0 %v16006_v50  ;;  %11653 = vmatprep.subr.bf16.mxu1 %v16009_v33  ;;  %v16093_v50 = vld [vmem:[%s21657_s1 + $0x296c] ss:$16 sps:$4 sm:$0xff]   ;;  %v16088_v33 = vld [vmem:[%s21657_s1 + $0x2960] ss:$16 sps:$4 sm:$0xff]  }
 0x4f7   :  { %10629 = vmatpush1.bf16.msra.mxu0 %v16004_v51  ;;  %11654 = vmatpush1.bf16.msra.mxu1 %v16007_v53  ;;  %v16091_v51 = vld [vmem:[%s21657_s1 + $0x2968] ss:$16 sps:$4 sm:$0xff]   ;;  %v16096_v53 = vld [vmem:[%s21657_s1 + $0x2984] ss:$16 sps:$4 sm:$0xff]  }
 0x4f8   :  { %10630 = vmatprep.subr.bf16.mxu0 %v16012_v38  ;;  %11655 = vmatprep.subr.bf16.mxu1 %v16015_v34  ;;  %v16099_v38 = vld [vmem:[%s21657_s1 + $0x298c] ss:$16 sps:$4 sm:$0xff]   ;;  %v16094_v34 = vld [vmem:[%s21657_s1 + $0x2980] ss:$16 sps:$4 sm:$0xff]  }
 0x4fb   :  { %10631 = vmatpush1.bf16.msra.mxu0 %v16010_v55  ;;  %11656 = vmatpush1.bf16.msra.mxu1 %v16013_v56  ;;  %v16097_v55 = vld [vmem:[%s21657_s1 + $0x2988] ss:$16 sps:$4 sm:$0xff]   ;;  %v16102_v56 = vld [vmem:[%s21657_s1 + $0x29a4] ss:$16 sps:$4 sm:$0xff]  }
 0x4fc   :  { %10632 = vmatprep.subr.bf16.mxu0 %v16018_v45  ;;  %11657 = vmatprep.subr.bf16.mxu1 %v16021_v58  ;;  %v16105_v45 = vld [vmem:[%s21657_s1 + $0x29ac] ss:$16 sps:$4 sm:$0xff]   ;;  %v16100_v58 = vld [vmem:[%s21657_s1 + $0x29a0] ss:$16 sps:$4 sm:$0xff]  }
 0x4ff   :  { %10633 = vmatpush1.bf16.msra.mxu0 %v16016_v61  ;;  %11658 = vmatpush1.bf16.msra.mxu1 %v16019_v35  ;;  %v16103_v61 = vld [vmem:[%s21657_s1 + $0x29a8] ss:$16 sps:$4 sm:$0xff]   ;;  %v16108_v35 = vld [vmem:[%s21657_s1 + $0x29c4] ss:$16 sps:$4 sm:$0xff]  }
 0x500   :  { %10643 = vmatprep.subr.bf16.mxu0 %v16024_v62  ;;  %11668 = vmatprep.subr.bf16.mxu1 %v16027_v44  ;;  %v16111_v62 = vld [vmem:[%s21657_s1 + $0x29cc] ss:$16 sps:$4 sm:$0xff]   ;;  %v16106_v44 = vld [vmem:[%s21657_s1 + $0x29c0] ss:$16 sps:$4 sm:$0xff]  }
 0x502   :  { %10635 = vmatmul.mubr.bf16.vlgmr.msra.gmra.mrb[0].mxu0 %v1868_v47  ;;  %11660 = vmatmul.mubr.bf16.vlgmr.msra.gmra.mrb[0].mxu1 %v1868_v47  ;;  %v16114_v47 = vld [vmem:[%s21657_s1 + $0x29e4] ss:$16 sps:$4 sm:$0xff]  }
 0x503   :  { %10644 = vmatpush1.bf16.msra.mxu0 %v16022_v1  ;;  %11669 = vmatpush1.bf16.msra.mxu1 %v16025_v2  ;;  %v16117_v1 = vld [vmem:[%s21657_s1 + $0x29ec] ss:$16 sps:$4 sm:$0xff]   ;;  %v16112_v2 = vld [vmem:[%s21657_s1 + $0x29e0] ss:$16 sps:$4 sm:$0xff]  }
 0x504   :  { %10645 = vmatprep.subr.bf16.mxu0 %v16030_v59  ;;  %11670 = vmatprep.subr.bf16.mxu1 %v16033_v57  ;;  %v16115_v59 = vld [vmem:[%s21657_s1 + $0x29e8] ss:$16 sps:$4 sm:$0xff]   ;;  %v16120_v57 = vld [vmem:[%s21657_s1 + $0x2a04] ss:$16 sps:$4 sm:$0xff]  }
 0x505   :  { %10675 = vmatprep.mubr.bf16.mxu0 %v20649_v3  ;;  %11700 = vmatprep.mubr.bf16.mxu1 %v20649_v3 }
 0x507   :  { %10646 = vmatpush1.bf16.msra.mxu0 %v16028_v5  ;;  %11671 = vmatpush1.bf16.msra.mxu1 %v16031_v6  ;;  %v16123_v5 = vld [vmem:[%s21657_s1 + $0x2a0c] ss:$16 sps:$4 sm:$0xff]   ;;  %v20835_v6 = vrot.slane %v20618_v48, %v16689_v49 }
 0x508   :  { %10647 = vmatprep.subr.bf16.mxu0 %v16036_v60  ;;  %11672 = vmatprep.subr.bf16.mxu1 %v16039_v9  ;;  %v16118_v60 = vld [vmem:[%s21657_s1 + $0x2a00] ss:$16 sps:$4 sm:$0xff]   ;;  %v16121_v9 = vld [vmem:[%s21657_s1 + $0x2a08] ss:$16 sps:$4 sm:$0xff]   ;;  %v16129_v48 = vld [vmem:[%s21657_s1 + $0x2a2c] ss:$16 sps:$4 sm:$0xff]  }
 0x50b   :  { %10648 = vmatpush1.bf16.msra.mxu0 %v16034_v10  ;;  %11673 = vmatpush1.bf16.msra.mxu1 %v16037_v11  ;;  %v16126_v10 = vld [vmem:[%s21657_s1 + $0x2a24] ss:$16 sps:$4 sm:$0xff]   ;;  %v1918_v11 = vcombine.high %v20649_v3, %v20649_v3 }
 0x50c   :  { %10649 = vmatprep.subr.bf16.mxu0 %v16042_v63  ;;  %11674 = vmatprep.subr.bf16.mxu1 %v16045_v12  ;;  %v16124_v63 = vld [vmem:[%s21657_s1 + $0x2a20] ss:$16 sps:$4 sm:$0xff]   ;;  %v16127_v12 = vld [vmem:[%s21657_s1 + $0x2a28] ss:$16 sps:$4 sm:$0xff]   ;;  %v16132_v3 = vld [vmem:[%s21657_s1 + $0x2a44] ss:$16 sps:$4 sm:$0xff]  }
 0x50f   :  { %10650 = vmatpush1.bf16.msra.mxu0 %v16040_v52  ;;  %11675 = vmatpush1.bf16.msra.mxu1 %v16043_v15  ;;  %v16135_v52 = vld [vmem:[%s21657_s1 + $0x2a4c] ss:$16 sps:$4 sm:$0xff]   ;;  %v16130_v15 = vld [vmem:[%s21657_s1 + $0x2a40] ss:$16 sps:$4 sm:$0xff]  }
 0x510   :  { %10651 = vmatprep.subr.bf16.mxu0 %v16048_v7  ;;  %11676 = vmatprep.subr.bf16.mxu1 %v16051_v16  ;;  %v16133_v7 = vld [vmem:[%s21657_s1 + $0x2a48] ss:$16 sps:$4 sm:$0xff]   ;;  %v16138_v16 = vld [vmem:[%s21657_s1 + $0x2a64] ss:$16 sps:$4 sm:$0xff]  }
 0x513   :  { %10652 = vmatpush1.bf16.msra.mxu0 %v16046_v17  ;;  %11677 = vmatpush1.bf16.msra.mxu1 %v16049_v8  ;;  %v16141_v17 = vld [vmem:[%s21657_s1 + $0x2a6c] ss:$16 sps:$4 sm:$0xff]   ;;  %v16136_v8 = vld [vmem:[%s21657_s1 + $0x2a60] ss:$16 sps:$4 sm:$0xff]  }
 0x514   :  { %10653 = vmatprep.subr.bf16.mxu0 %v16054_v20  ;;  %11678 = vmatprep.subr.bf16.mxu1 %v16057_v22  ;;  %v16139_v20 = vld [vmem:[%s21657_s1 + $0x2a68] ss:$16 sps:$4 sm:$0xff]   ;;  %v16144_v22 = vld [vmem:[%s21657_s1 + $0x2a84] ss:$16 sps:$4 sm:$0xff]  }
 0x517   :  { %10654 = vmatpush1.bf16.msra.mxu0 %v16052_v4  ;;  %11679 = vmatpush1.bf16.msra.mxu1 %v16055_v24  ;;  %v16147_v4 = vld [vmem:[%s21657_s1 + $0x2a8c] ss:$16 sps:$4 sm:$0xff]   ;;  %v16142_v24 = vld [vmem:[%s21657_s1 + $0x2a80] ss:$16 sps:$4 sm:$0xff]  }
 0x518   :  { %10655 = vmatprep.subr.bf16.mxu0 %v16060_v13  ;;  %11680 = vmatprep.subr.bf16.mxu1 %v16063_v27  ;;  %v16145_v13 = vld [vmem:[%s21657_s1 + $0x2a88] ss:$16 sps:$4 sm:$0xff]   ;;  %v16150_v27 = vld [vmem:[%s21657_s1 + $0x2aa4] ss:$16 sps:$4 sm:$0xff]  }
 0x51b   :  { %10656 = vmatpush1.bf16.msra.mxu0 %v16058_v18  ;;  %11681 = vmatpush1.bf16.msra.mxu1 %v16061_v28  ;;  %v16153_v18 = vld [vmem:[%s21657_s1 + $0x2aac] ss:$16 sps:$4 sm:$0xff]   ;;  %v16148_v28 = vld [vmem:[%s21657_s1 + $0x2aa0] ss:$16 sps:$4 sm:$0xff]  }
 0x51c   :  { %10657 = vmatprep.subr.bf16.mxu0 %v16066_v14  ;;  %11682 = vmatprep.subr.bf16.mxu1 %v16069_v30  ;;  %v16151_v14 = vld [vmem:[%s21657_s1 + $0x2aa8] ss:$16 sps:$4 sm:$0xff]   ;;  %v16156_v30 = vld [vmem:[%s21657_s1 + $0x2ac4] ss:$16 sps:$4 sm:$0xff]  }
 0x51f   :  { %10658 = vmatpush1.bf16.msra.mxu0 %v16064_v19  ;;  %11683 = vmatpush1.bf16.msra.mxu1 %v16067_v32  ;;  %v16159_v19 = vld [vmem:[%s21657_s1 + $0x2acc] ss:$16 sps:$4 sm:$0xff]   ;;  %v16154_v32 = vld [vmem:[%s21657_s1 + $0x2ac0] ss:$16 sps:$4 sm:$0xff]  }
 0x520   :  { %10659 = vmatprep.subr.bf16.mxu0 %v16072_v26  ;;  %11684 = vmatprep.subr.bf16.mxu1 %v16075_v23  ;;  %v16157_v26 = vld [vmem:[%s21657_s1 + $0x2ac8] ss:$16 sps:$4 sm:$0xff]   ;;  %v16162_v23 = vld [vmem:[%s21657_s1 + $0x2ae4] ss:$16 sps:$4 sm:$0xff]  }
 0x523   :  { %10660 = vmatpush1.bf16.msra.mxu0 %v16070_v36  ;;  %11685 = vmatpush1.bf16.msra.mxu1 %v16073_v37  ;;  %v16165_v36 = vld [vmem:[%s21657_s1 + $0x2aec] ss:$16 sps:$4 sm:$0xff]   ;;  %v16160_v37 = vld [vmem:[%s21657_s1 + $0x2ae0] ss:$16 sps:$4 sm:$0xff]  }
 0x524   :  { %10661 = vmatprep.subr.bf16.mxu0 %v16078_v21  ;;  %11686 = vmatprep.subr.bf16.mxu1 %v16081_v31  ;;  %v16163_v21 = vld [vmem:[%s21657_s1 + $0x2ae8] ss:$16 sps:$4 sm:$0xff]   ;;  %v16168_v31 = vld [vmem:[%s21657_s1 + $0x2b04] ss:$16 sps:$4 sm:$0xff]  }
 0x527   :  { %10662 = vmatpush1.bf16.msra.mxu0 %v16076_v39  ;;  %11687 = vmatpush1.bf16.msra.mxu1 %v16079_v40  ;;  %v16171_v39 = vld [vmem:[%s21657_s1 + $0x2b0c] ss:$16 sps:$4 sm:$0xff]   ;;  %v16166_v40 = vld [vmem:[%s21657_s1 + $0x2b00] ss:$16 sps:$4 sm:$0xff]  }
 0x528   :  { %10663 = vmatprep.subr.bf16.mxu0 %v16084_v41  ;;  %11688 = vmatprep.subr.bf16.mxu1 %v16087_v25  ;;  %v16169_v41 = vld [vmem:[%s21657_s1 + $0x2b08] ss:$16 sps:$4 sm:$0xff]   ;;  %v16174_v25 = vld [vmem:[%s21657_s1 + $0x2b24] ss:$16 sps:$4 sm:$0xff]  }
 0x52b   :  { %10664 = vmatpush1.bf16.msra.mxu0 %v16082_v43  ;;  %11689 = vmatpush1.bf16.msra.mxu1 %v16085_v46  ;;  %v16177_v43 = vld [vmem:[%s21657_s1 + $0x2b2c] ss:$16 sps:$4 sm:$0xff]   ;;  %v16172_v46 = vld [vmem:[%s21657_s1 + $0x2b20] ss:$16 sps:$4 sm:$0xff]  }
 0x52c   :  { %10665 = vmatprep.subr.bf16.mxu0 %v16090_v29  ;;  %11690 = vmatprep.subr.bf16.mxu1 %v16093_v50  ;;  %v16175_v29 = vld [vmem:[%s21657_s1 + $0x2b28] ss:$16 sps:$4 sm:$0xff]   ;;  %v16180_v50 = vld [vmem:[%s21657_s1 + $0x2b44] ss:$16 sps:$4 sm:$0xff]  }
 0x52f   :  { %10666 = vmatpush1.bf16.msra.mxu0 %v16088_v33  ;;  %11691 = vmatpush1.bf16.msra.mxu1 %v16091_v51  ;;  %v16183_v33 = vld [vmem:[%s21657_s1 + $0x2b4c] ss:$16 sps:$4 sm:$0xff]   ;;  %v16178_v51 = vld [vmem:[%s21657_s1 + $0x2b40] ss:$16 sps:$4 sm:$0xff]  }
 0x530   :  { %10667 = vmatprep.subr.bf16.mxu0 %v16096_v53  ;;  %11692 = vmatprep.subr.bf16.mxu1 %v16099_v38  ;;  %v16181_v53 = vld [vmem:[%s21657_s1 + $0x2b48] ss:$16 sps:$4 sm:$0xff]   ;;  %v16186_v38 = vld [vmem:[%s21657_s1 + $0x2b64] ss:$16 sps:$4 sm:$0xff]  }
 0x533   :  { %10668 = vmatpush1.bf16.msra.mxu0 %v16094_v34  ;;  %11693 = vmatpush1.bf16.msra.mxu1 %v16097_v55  ;;  %v16189_v34 = vld [vmem:[%s21657_s1 + $0x2b6c] ss:$16 sps:$4 sm:$0xff]   ;;  %v16184_v55 = vld [vmem:[%s21657_s1 + $0x2b60] ss:$16 sps:$4 sm:$0xff]  }
 0x534   :  { %10669 = vmatprep.subr.bf16.mxu0 %v16102_v56  ;;  %11694 = vmatprep.subr.bf16.mxu1 %v16105_v45  ;;  %v16187_v56 = vld [vmem:[%s21657_s1 + $0x2b68] ss:$16 sps:$4 sm:$0xff]   ;;  %v16192_v45 = vld [vmem:[%s21657_s1 + $0x2b84] ss:$16 sps:$4 sm:$0xff]  }
 0x537   :  { %10670 = vmatpush1.bf16.msra.mxu0 %v16100_v58  ;;  %11695 = vmatpush1.bf16.msra.mxu1 %v16103_v61  ;;  %v16195_v58 = vld [vmem:[%s21657_s1 + $0x2b8c] ss:$16 sps:$4 sm:$0xff]   ;;  %v16190_v61 = vld [vmem:[%s21657_s1 + $0x2b80] ss:$16 sps:$4 sm:$0xff]  }
 0x538   :  { %10671 = vmatprep.subr.bf16.mxu0 %v16108_v35  ;;  %11696 = vmatprep.subr.bf16.mxu1 %v16111_v62  ;;  %v16193_v35 = vld [vmem:[%s21657_s1 + $0x2b88] ss:$16 sps:$4 sm:$0xff]   ;;  %v16198_v62 = vld [vmem:[%s21657_s1 + $0x2ba4] ss:$16 sps:$4 sm:$0xff]  }
 0x53b   :  { %10672 = vmatpush1.bf16.msra.mxu0 %v16106_v44  ;;  %11697 = vmatpush1.bf16.msra.mxu1 %v16109_v0  ;;  %v16201_v44 = vld [vmem:[%s21657_s1 + $0x2bac] ss:$16 sps:$4 sm:$0xff]   ;;  %v16196_v0 = vld [vmem:[%s21657_s1 + $0x2ba0] ss:$16 sps:$4 sm:$0xff]  }
 0x53c   :  { %10673 = vmatprep.subr.bf16.mxu0 %v16114_v47  ;;  %11698 = vmatprep.subr.bf16.mxu1 %v16117_v1  ;;  %v16199_v47 = vld [vmem:[%s21657_s1 + $0x2ba8] ss:$16 sps:$4 sm:$0xff]   ;;  %v16204_v1 = vld [vmem:[%s21657_s1 + $0x2bc4] ss:$16 sps:$4 sm:$0xff]  }
 0x53f   :  { %10674 = vmatpush1.bf16.msra.mxu0 %v16112_v2  ;;  %11699 = vmatpush1.bf16.msra.mxu1 %v16115_v59  ;;  %v16207_v2 = vld [vmem:[%s21657_s1 + $0x2bcc] ss:$16 sps:$4 sm:$0xff]   ;;  %v1871_v59 = vcombine.high %v20602_v54, %v20602_v54 }
 0x540   :  { %10684 = vmatprep.subr.bf16.mxu0 %v16120_v57  ;;  %11709 = vmatprep.subr.bf16.mxu1 %v16123_v5  ;;  %v16202_v57 = vld [vmem:[%s21657_s1 + $0x2bc0] ss:$16 sps:$4 sm:$0xff]   ;;  %v16205_v5 = vld [vmem:[%s21657_s1 + $0x2bc8] ss:$16 sps:$4 sm:$0xff]   ;;  %v16213_v54 = vld [vmem:[%s21657_s1 + $0x2bec] ss:$16 sps:$4 sm:$0xff]  }
 0x542   :  { %10676 = vmatmul.mubr.bf16.vlgmr.msra.gmra.mrb[0].mxu0 %v20835_v6  ;;  %11701 = vmatmul.mubr.bf16.vlgmr.msra.gmra.mrb[0].mxu1 %v20835_v6 }
 0x543   :  { %10685 = vmatpush1.bf16.msra.mxu0 %v16118_v60  ;;  %11710 = vmatpush1.bf16.msra.mxu1 %v16121_v9  ;;  %v16210_v60 = vld [vmem:[%s21657_s1 + $0x2be4] ss:$16 sps:$4 sm:$0xff]   ;;  %v21024_v9 = vrot.slane %v1871_v59, %v16689_v49  ;;  %v16289_v59 = vld [vmem:[%s21657_s1 + $0x2d88] ss:$16 sps:$4 sm:$0xff]  }
 0x544   :  { %10686 = vmatprep.subr.bf16.mxu0 %v16126_v10  ;;  %11711 = vmatprep.subr.bf16.mxu1 %v16129_v48  ;;  %v16208_v10 = vld [vmem:[%s21657_s1 + $0x2be0] ss:$16 sps:$4 sm:$0xff]   ;;  %v16211_v48 = vld [vmem:[%s21657_s1 + $0x2be8] ss:$16 sps:$4 sm:$0xff]  }
 0x545   :  { %10716 = vmatprep.mubr.bf16.mxu0 %v1918_v11  ;;  %11741 = vmatprep.mubr.bf16.mxu1 %v1918_v11  ;;  %v16216_v11 = vld [vmem:[%s21657_s1 + $0x2c04] ss:$16 sps:$4 sm:$0xff]  }
 0x547   :  { %10687 = vmatpush1.bf16.msra.mxu0 %v16124_v63  ;;  %11712 = vmatpush1.bf16.msra.mxu1 %v16127_v12  ;;  %v16219_v63 = vld [vmem:[%s21657_s1 + $0x2c0c] ss:$16 sps:$4 sm:$0xff]   ;;  %v1887_v12 = vcombine.high %v21024_v9, %v21024_v9 }
 0x548   :  { %10688 = vmatprep.subr.bf16.mxu0 %v16132_v3  ;;  %11713 = vmatprep.subr.bf16.mxu1 %v16135_v52  ;;  %v1916_v3 = vcombine.high %v20835_v6, %v20835_v6  ;;  %v16214_v52 = vld [vmem:[%s21657_s1 + $0x2c00] ss:$16 sps:$4 sm:$0xff]   ;;  %v16225_v6 = vld [vmem:[%s21657_s1 + $0x2c2c] ss:$16 sps:$4 sm:$0xff]  }
 0x54b   :  { %10689 = vmatpush1.bf16.msra.mxu0 %v16130_v15  ;;  %11714 = vmatpush1.bf16.msra.mxu1 %v16133_v7  ;;  %v16217_v15 = vld [vmem:[%s21657_s1 + $0x2c08] ss:$16 sps:$4 sm:$0xff]   ;;  %v16222_v7 = vld [vmem:[%s21657_s1 + $0x2c24] ss:$16 sps:$4 sm:$0xff]  }
 0x54c   :  { %10690 = vmatprep.subr.bf16.mxu0 %v16138_v16  ;;  %11715 = vmatprep.subr.bf16.mxu1 %v16141_v17  ;;  %v21055_v16 = vrot.slane %v1887_v12, %v16689_v49  ;;  %v16220_v17 = vld [vmem:[%s21657_s1 + $0x2c20] ss:$16 sps:$4 sm:$0xff]   ;;  %v16306_v12 = vld [vmem:[%s21657_s1 + $0x2de4] ss:$16 sps:$4 sm:$0xff]  }
 0x54f   :  { %10691 = vmatpush1.bf16.msra.mxu0 %v16136_v8  ;;  %11716 = vmatpush1.bf16.msra.mxu1 %v16139_v20  ;;  %v16223_v8 = vld [vmem:[%s21657_s1 + $0x2c28] ss:$16 sps:$4 sm:$0xff]   ;;  %v16228_v20 = vld [vmem:[%s21657_s1 + $0x2c44] ss:$16 sps:$4 sm:$0xff]  }
 0x550   :  { %10692 = vmatprep.subr.bf16.mxu0 %v16144_v22  ;;  %11717 = vmatprep.subr.bf16.mxu1 %v16147_v4  ;;  %v16231_v22 = vld [vmem:[%s21657_s1 + $0x2c4c] ss:$16 sps:$4 sm:$0xff]   ;;  %v16226_v4 = vld [vmem:[%s21657_s1 + $0x2c40] ss:$16 sps:$4 sm:$0xff]  }
 0x553   :  { %10693 = vmatpush1.bf16.msra.mxu0 %v16142_v24  ;;  %11718 = vmatpush1.bf16.msra.mxu1 %v16145_v13  ;;  %v16229_v24 = vld [vmem:[%s21657_s1 + $0x2c48] ss:$16 sps:$4 sm:$0xff]   ;;  %v16234_v13 = vld [vmem:[%s21657_s1 + $0x2c64] ss:$16 sps:$4 sm:$0xff]  }
 0x554   :  { %10694 = vmatprep.subr.bf16.mxu0 %v16150_v27  ;;  %11719 = vmatprep.subr.bf16.mxu1 %v16153_v18  ;;  %v16237_v27 = vld [vmem:[%s21657_s1 + $0x2c6c] ss:$16 sps:$4 sm:$0xff]   ;;  %v16232_v18 = vld [vmem:[%s21657_s1 + $0x2c60] ss:$16 sps:$4 sm:$0xff]  }
 0x557   :  { %10695 = vmatpush1.bf16.msra.mxu0 %v16148_v28  ;;  %11720 = vmatpush1.bf16.msra.mxu1 %v16151_v14  ;;  %v16235_v28 = vld [vmem:[%s21657_s1 + $0x2c68] ss:$16 sps:$4 sm:$0xff]   ;;  %v16240_v14 = vld [vmem:[%s21657_s1 + $0x2c84] ss:$16 sps:$4 sm:$0xff]  }
 0x558   :  { %10696 = vmatprep.subr.bf16.mxu0 %v16156_v30  ;;  %11721 = vmatprep.subr.bf16.mxu1 %v16159_v19  ;;  %v16243_v30 = vld [vmem:[%s21657_s1 + $0x2c8c] ss:$16 sps:$4 sm:$0xff]   ;;  %v16238_v19 = vld [vmem:[%s21657_s1 + $0x2c80] ss:$16 sps:$4 sm:$0xff]  }
 0x55b   :  { %10697 = vmatpush1.bf16.msra.mxu0 %v16154_v32  ;;  %11722 = vmatpush1.bf16.msra.mxu1 %v16157_v26  ;;  %v16241_v32 = vld [vmem:[%s21657_s1 + $0x2c88] ss:$16 sps:$4 sm:$0xff]   ;;  %v16246_v26 = vld [vmem:[%s21657_s1 + $0x2ca4] ss:$16 sps:$4 sm:$0xff]  }
 0x55c   :  { %10698 = vmatprep.subr.bf16.mxu0 %v16162_v23  ;;  %11723 = vmatprep.subr.bf16.mxu1 %v16165_v36  ;;  %v16249_v23 = vld [vmem:[%s21657_s1 + $0x2cac] ss:$16 sps:$4 sm:$0xff]   ;;  %v16244_v36 = vld [vmem:[%s21657_s1 + $0x2ca0] ss:$16 sps:$4 sm:$0xff]  }
 0x55f   :  { %10699 = vmatpush1.bf16.msra.mxu0 %v16160_v37  ;;  %11724 = vmatpush1.bf16.msra.mxu1 %v16163_v21  ;;  %v16247_v37 = vld [vmem:[%s21657_s1 + $0x2ca8] ss:$16 sps:$4 sm:$0xff]   ;;  %v16252_v21 = vld [vmem:[%s21657_s1 + $0x2cc4] ss:$16 sps:$4 sm:$0xff]  }
 0x560   :  { %10700 = vmatprep.subr.bf16.mxu0 %v16168_v31  ;;  %11725 = vmatprep.subr.bf16.mxu1 %v16171_v39  ;;  %v16255_v31 = vld [vmem:[%s21657_s1 + $0x2ccc] ss:$16 sps:$4 sm:$0xff]   ;;  %v16250_v39 = vld [vmem:[%s21657_s1 + $0x2cc0] ss:$16 sps:$4 sm:$0xff]  }
 0x563   :  { %10701 = vmatpush1.bf16.msra.mxu0 %v16166_v40  ;;  %11726 = vmatpush1.bf16.msra.mxu1 %v16169_v41  ;;  %v16253_v40 = vld [vmem:[%s21657_s1 + $0x2cc8] ss:$16 sps:$4 sm:$0xff]   ;;  %v16258_v41 = vld [vmem:[%s21657_s1 + $0x2ce4] ss:$16 sps:$4 sm:$0xff]  }
 0x564   :  { %10702 = vmatprep.subr.bf16.mxu0 %v16174_v25  ;;  %11727 = vmatprep.subr.bf16.mxu1 %v16177_v43  ;;  %v16261_v25 = vld [vmem:[%s21657_s1 + $0x2cec] ss:$16 sps:$4 sm:$0xff]   ;;  %v16256_v43 = vld [vmem:[%s21657_s1 + $0x2ce0] ss:$16 sps:$4 sm:$0xff]  }
 0x567   :  { %10703 = vmatpush1.bf16.msra.mxu0 %v16172_v46  ;;  %11728 = vmatpush1.bf16.msra.mxu1 %v16175_v29  ;;  %v16259_v46 = vld [vmem:[%s21657_s1 + $0x2ce8] ss:$16 sps:$4 sm:$0xff]   ;;  %v16264_v29 = vld [vmem:[%s21657_s1 + $0x2d04] ss:$16 sps:$4 sm:$0xff]  }
 0x568   :  { %10704 = vmatprep.subr.bf16.mxu0 %v16180_v50  ;;  %11729 = vmatprep.subr.bf16.mxu1 %v16183_v33  ;;  %v16267_v50 = vld [vmem:[%s21657_s1 + $0x2d0c] ss:$16 sps:$4 sm:$0xff]   ;;  %v16262_v33 = vld [vmem:[%s21657_s1 + $0x2d00] ss:$16 sps:$4 sm:$0xff]  }
 0x56b   :  { %10705 = vmatpush1.bf16.msra.mxu0 %v16178_v51  ;;  %11730 = vmatpush1.bf16.msra.mxu1 %v16181_v53  ;;  %v16265_v51 = vld [vmem:[%s21657_s1 + $0x2d08] ss:$16 sps:$4 sm:$0xff]   ;;  %v16270_v53 = vld [vmem:[%s21657_s1 + $0x2d24] ss:$16 sps:$4 sm:$0xff]  }
 0x56c   :  { %10706 = vmatprep.subr.bf16.mxu0 %v16186_v38  ;;  %11731 = vmatprep.subr.bf16.mxu1 %v16189_v34  ;;  %v16273_v38 = vld [vmem:[%s21657_s1 + $0x2d2c] ss:$16 sps:$4 sm:$0xff]   ;;  %v16268_v34 = vld [vmem:[%s21657_s1 + $0x2d20] ss:$16 sps:$4 sm:$0xff]  }
 0x56f   :  { %10707 = vmatpush1.bf16.msra.mxu0 %v16184_v55  ;;  %11732 = vmatpush1.bf16.msra.mxu1 %v16187_v56  ;;  %v16271_v55 = vld [vmem:[%s21657_s1 + $0x2d28] ss:$16 sps:$4 sm:$0xff]   ;;  %v16276_v56 = vld [vmem:[%s21657_s1 + $0x2d44] ss:$16 sps:$4 sm:$0xff]  }
 0x570   :  { %10708 = vmatprep.subr.bf16.mxu0 %v16192_v45  ;;  %11733 = vmatprep.subr.bf16.mxu1 %v16195_v58  ;;  %v16279_v45 = vld [vmem:[%s21657_s1 + $0x2d4c] ss:$16 sps:$4 sm:$0xff]   ;;  %v16274_v58 = vld [vmem:[%s21657_s1 + $0x2d40] ss:$16 sps:$4 sm:$0xff]  }
 0x573   :  { %10709 = vmatpush1.bf16.msra.mxu0 %v16190_v61  ;;  %11734 = vmatpush1.bf16.msra.mxu1 %v16193_v35  ;;  %v16277_v61 = vld [vmem:[%s21657_s1 + $0x2d48] ss:$16 sps:$4 sm:$0xff]   ;;  %v16282_v35 = vld [vmem:[%s21657_s1 + $0x2d64] ss:$16 sps:$4 sm:$0xff]  }
 0x574   :  { %10710 = vmatprep.subr.bf16.mxu0 %v16198_v62  ;;  %11735 = vmatprep.subr.bf16.mxu1 %v16201_v44  ;;  %v16285_v62 = vld [vmem:[%s21657_s1 + $0x2d6c] ss:$16 sps:$4 sm:$0xff]   ;;  %v16280_v44 = vld [vmem:[%s21657_s1 + $0x2d60] ss:$16 sps:$4 sm:$0xff]  }
 0x577   :  { %10711 = vmatpush1.bf16.msra.mxu0 %v16196_v0  ;;  %11736 = vmatpush1.bf16.msra.mxu1 %v16199_v47  ;;  %v16283_v0 = vld [vmem:[%s21657_s1 + $0x2d68] ss:$16 sps:$4 sm:$0xff]   ;;  %v16288_v47 = vld [vmem:[%s21657_s1 + $0x2d84] ss:$16 sps:$4 sm:$0xff]  }
 0x578   :  { %10712 = vmatprep.subr.bf16.mxu0 %v16204_v1  ;;  %11737 = vmatprep.subr.bf16.mxu1 %v16207_v2  ;;  %v16291_v1 = vld [vmem:[%s21657_s1 + $0x2d8c] ss:$16 sps:$4 sm:$0xff]   ;;  %v16286_v2 = vld [vmem:[%s21657_s1 + $0x2d80] ss:$16 sps:$4 sm:$0xff]  }
 0x57b   :  { %10713 = vmatpush1.bf16.msra.mxu0 %v16202_v57  ;;  %11738 = vmatpush1.bf16.msra.mxu1 %v16205_v5  ;;  %v16294_v57 = vld [vmem:[%s21657_s1 + $0x2da4] ss:$16 sps:$4 sm:$0xff]   ;;  %v16297_v5 = vld [vmem:[%s21657_s1 + $0x2dac] ss:$16 sps:$4 sm:$0xff]  }
 0x57c   :  { %10714 = vmatprep.subr.bf16.mxu0 %v16210_v60  ;;  %11739 = vmatprep.subr.bf16.mxu1 %v16213_v54  ;;  %v16292_v60 = vld [vmem:[%s21657_s1 + $0x2da0] ss:$16 sps:$4 sm:$0xff]   ;;  %v16295_v54 = vld [vmem:[%s21657_s1 + $0x2da8] ss:$16 sps:$4 sm:$0xff]  }
 0x57f   :  { %10715 = vmatpush1.bf16.msra.mxu0 %v16208_v10  ;;  %11740 = vmatpush1.bf16.msra.mxu1 %v16211_v48  ;;  %v16300_v10 = vld [vmem:[%s21657_s1 + $0x2dc4] ss:$16 sps:$4 sm:$0xff]   ;;  %v16303_v48 = vld [vmem:[%s21657_s1 + $0x2dcc] ss:$16 sps:$4 sm:$0xff]  }
 0x580   :  { %10725 = vmatprep.subr.bf16.mxu0 %v16216_v11  ;;  %11750 = vmatprep.subr.bf16.mxu1 %v16219_v63  ;;  %v16298_v11 = vld [vmem:[%s21657_s1 + $0x2dc0] ss:$16 sps:$4 sm:$0xff]   ;;  %v16301_v63 = vld [vmem:[%s21657_s1 + $0x2dc8] ss:$16 sps:$4 sm:$0xff]  }
 0x582   :  { %10717 = vmatmul.mubr.bf16.vlgmr.msra.gmra.mrb[0].mxu0 %v1916_v3  ;;  %11742 = vmatmul.mubr.bf16.vlgmr.msra.gmra.mrb[0].mxu1 %v1916_v3  ;;  %v16309_v3 = vld [vmem:[%s21657_s1 + $0x2dec] ss:$16 sps:$4 sm:$0xff]  }
 0x583   :  { %10726 = vmatpush1.bf16.msra.mxu0 %v16214_v52  ;;  %11751 = vmatpush1.bf16.msra.mxu1 %v16217_v15  ;;  %v16304_v52 = vld [vmem:[%s21657_s1 + $0x2de0] ss:$16 sps:$4 sm:$0xff]   ;;  %v16307_v15 = vld [vmem:[%s21657_s1 + $0x2de8] ss:$16 sps:$4 sm:$0xff]  }
 0x584   :  { %10727 = vmatprep.subr.bf16.mxu0 %v16222_v7  ;;  %11752 = vmatprep.subr.bf16.mxu1 %v16225_v6  ;;  %v16313_v7 = vld [vmem:[%s21657_s1 + $0x2e04] ss:$16 sps:$4 sm:$0xff]   ;;  %v16316_v6 = vld [vmem:[%s21657_s1 + $0x2e0c] ss:$16 sps:$4 sm:$0xff]  }
 0x585   :  { %10757 = vmatprep.mubr.bf16.mxu0 %v21055_v16  ;;  %11782 = vmatprep.mubr.bf16.mxu1 %v21055_v16 }
 0x587   :  { %10728 = vmatpush1.bf16.msra.mxu0 %v16220_v17  ;;  %11753 = vmatpush1.bf16.msra.mxu1 %v16223_v8  ;;  %v21241_v17 = vrot.slane %v21024_v9, %v16689_v49  ;;  %v16311_v8 = vld [vmem:[%s21657_s1 + $0x2e00] ss:$16 sps:$4 sm:$0xff]   ;;  %v16322_v9 = vld [vmem:[%s21657_s1 + $0x2e2c] ss:$16 sps:$4 sm:$0xff]  }
 0x588   :  { %10729 = vmatprep.subr.bf16.mxu0 %v16228_v20  ;;  %11754 = vmatprep.subr.bf16.mxu1 %v16231_v22  ;;  %v16314_v20 = vld [vmem:[%s21657_s1 + $0x2e08] ss:$16 sps:$4 sm:$0xff]   ;;  %v16319_v22 = vld [vmem:[%s21657_s1 + $0x2e24] ss:$16 sps:$4 sm:$0xff]  }
 0x58b   :  { %10730 = vmatpush1.bf16.msra.mxu0 %v16226_v4  ;;  %11755 = vmatpush1.bf16.msra.mxu1 %v16229_v24  ;;  %v1919_v4 = vcombine.high %v21055_v16, %v21055_v16  ;;  %v16317_v24 = vld [vmem:[%s21657_s1 + $0x2e20] ss:$16 sps:$4 sm:$0xff]   ;;  %v16325_v16 = vld [vmem:[%s21657_s1 + $0x2e44] ss:$16 sps:$4 sm:$0xff]  }
 0x58c   :  { %10731 = vmatprep.subr.bf16.mxu0 %v16234_v13  ;;  %11756 = vmatprep.subr.bf16.mxu1 %v16237_v27  ;;  %v16320_v13 = vld [vmem:[%s21657_s1 + $0x2e28] ss:$16 sps:$4 sm:$0xff]   ;;  %v16328_v27 = vld [vmem:[%s21657_s1 + $0x2e4c] ss:$16 sps:$4 sm:$0xff]  }
 0x58f   :  { %10732 = vmatpush1.bf16.msra.mxu0 %v16232_v18  ;;  %11757 = vmatpush1.bf16.msra.mxu1 %v16235_v28  ;;  %v16323_v18 = vld [vmem:[%s21657_s1 + $0x2e40] ss:$16 sps:$4 sm:$0xff]   ;;  %v16326_v28 = vld [vmem:[%s21657_s1 + $0x2e48] ss:$16 sps:$4 sm:$0xff]  }
 0x590   :  { %10733 = vmatprep.subr.bf16.mxu0 %v16240_v14  ;;  %11758 = vmatprep.subr.bf16.mxu1 %v16243_v30  ;;  %v16331_v14 = vld [vmem:[%s21657_s1 + $0x2e64] ss:$16 sps:$4 sm:$0xff]   ;;  %v16334_v30 = vld [vmem:[%s21657_s1 + $0x2e6c] ss:$16 sps:$4 sm:$0xff]  }
 0x593   :  { %10734 = vmatpush1.bf16.msra.mxu0 %v16238_v19  ;;  %11759 = vmatpush1.bf16.msra.mxu1 %v16241_v32  ;;  %v16329_v19 = vld [vmem:[%s21657_s1 + $0x2e60] ss:$16 sps:$4 sm:$0xff]   ;;  %v16332_v32 = vld [vmem:[%s21657_s1 + $0x2e68] ss:$16 sps:$4 sm:$0xff]  }
 0x594   :  { %10735 = vmatprep.subr.bf16.mxu0 %v16246_v26  ;;  %11760 = vmatprep.subr.bf16.mxu1 %v16249_v23  ;;  %v16337_v26 = vld [vmem:[%s21657_s1 + $0x2e84] ss:$16 sps:$4 sm:$0xff]   ;;  %v16340_v23 = vld [vmem:[%s21657_s1 + $0x2e8c] ss:$16 sps:$4 sm:$0xff]  }
 0x597   :  { %10736 = vmatpush1.bf16.msra.mxu0 %v16244_v36  ;;  %11761 = vmatpush1.bf16.msra.mxu1 %v16247_v37  ;;  %v16335_v36 = vld [vmem:[%s21657_s1 + $0x2e80] ss:$16 sps:$4 sm:$0xff]   ;;  %v16338_v37 = vld [vmem:[%s21657_s1 + $0x2e88] ss:$16 sps:$4 sm:$0xff]  }
 0x598   :  { %10737 = vmatprep.subr.bf16.mxu0 %v16252_v21  ;;  %11762 = vmatprep.subr.bf16.mxu1 %v16255_v31  ;;  %v16343_v21 = vld [vmem:[%s21657_s1 + $0x2ea4] ss:$16 sps:$4 sm:$0xff]   ;;  %v16346_v31 = vld [vmem:[%s21657_s1 + $0x2eac] ss:$16 sps:$4 sm:$0xff]  }
 0x59b   :  { %10738 = vmatpush1.bf16.msra.mxu0 %v16250_v39  ;;  %11763 = vmatpush1.bf16.msra.mxu1 %v16253_v40  ;;  %v16341_v39 = vld [vmem:[%s21657_s1 + $0x2ea0] ss:$16 sps:$4 sm:$0xff]   ;;  %v16344_v40 = vld [vmem:[%s21657_s1 + $0x2ea8] ss:$16 sps:$4 sm:$0xff]  }
 0x59c   :  { %10739 = vmatprep.subr.bf16.mxu0 %v16258_v41  ;;  %11764 = vmatprep.subr.bf16.mxu1 %v16261_v25  ;;  %v16349_v41 = vld [vmem:[%s21657_s1 + $0x2ec4] ss:$16 sps:$4 sm:$0xff]   ;;  %v16352_v25 = vld [vmem:[%s21657_s1 + $0x2ecc] ss:$16 sps:$4 sm:$0xff]  }
 0x59f   :  { %10740 = vmatpush1.bf16.msra.mxu0 %v16256_v43  ;;  %11765 = vmatpush1.bf16.msra.mxu1 %v16259_v46  ;;  %v16347_v43 = vld [vmem:[%s21657_s1 + $0x2ec0] ss:$16 sps:$4 sm:$0xff]   ;;  %v16350_v46 = vld [vmem:[%s21657_s1 + $0x2ec8] ss:$16 sps:$4 sm:$0xff]  }
 0x5a0   :  { %10741 = vmatprep.subr.bf16.mxu0 %v16264_v29  ;;  %11766 = vmatprep.subr.bf16.mxu1 %v16267_v50  ;;  %v16355_v29 = vld [vmem:[%s21657_s1 + $0x2ee4] ss:$16 sps:$4 sm:$0xff]   ;;  %v16358_v50 = vld [vmem:[%s21657_s1 + $0x2eec] ss:$16 sps:$4 sm:$0xff]  }
 0x5a3   :  { %10742 = vmatpush1.bf16.msra.mxu0 %v16262_v33  ;;  %11767 = vmatpush1.bf16.msra.mxu1 %v16265_v51  ;;  %v16353_v33 = vld [vmem:[%s21657_s1 + $0x2ee0] ss:$16 sps:$4 sm:$0xff]   ;;  %v16356_v51 = vld [vmem:[%s21657_s1 + $0x2ee8] ss:$16 sps:$4 sm:$0xff]  }
 0x5a4   :  { %10743 = vmatprep.subr.bf16.mxu0 %v16270_v53  ;;  %11768 = vmatprep.subr.bf16.mxu1 %v16273_v38  ;;  %v16361_v53 = vld [vmem:[%s21657_s1 + $0x2f04] ss:$16 sps:$4 sm:$0xff]   ;;  %v16364_v38 = vld [vmem:[%s21657_s1 + $0x2f0c] ss:$16 sps:$4 sm:$0xff]  }
 0x5a7   :  { %10744 = vmatpush1.bf16.msra.mxu0 %v16268_v34  ;;  %11769 = vmatpush1.bf16.msra.mxu1 %v16271_v55  ;;  %v16359_v34 = vld [vmem:[%s21657_s1 + $0x2f00] ss:$16 sps:$4 sm:$0xff]   ;;  %v16362_v55 = vld [vmem:[%s21657_s1 + $0x2f08] ss:$16 sps:$4 sm:$0xff]  }
 0x5a8   :  { %10745 = vmatprep.subr.bf16.mxu0 %v16276_v56  ;;  %11770 = vmatprep.subr.bf16.mxu1 %v16279_v45  ;;  %v16367_v56 = vld [vmem:[%s21657_s1 + $0x2f24] ss:$16 sps:$4 sm:$0xff]   ;;  %v16370_v45 = vld [vmem:[%s21657_s1 + $0x2f2c] ss:$16 sps:$4 sm:$0xff]  }
 0x5ab   :  { %10746 = vmatpush1.bf16.msra.mxu0 %v16274_v58  ;;  %11771 = vmatpush1.bf16.msra.mxu1 %v16277_v61  ;;  %v16365_v58 = vld [vmem:[%s21657_s1 + $0x2f20] ss:$16 sps:$4 sm:$0xff]   ;;  %v16368_v61 = vld [vmem:[%s21657_s1 + $0x2f28] ss:$16 sps:$4 sm:$0xff]  }
 0x5ac   :  { %10747 = vmatprep.subr.bf16.mxu0 %v16282_v35  ;;  %11772 = vmatprep.subr.bf16.mxu1 %v16285_v62  ;;  %v16373_v35 = vld [vmem:[%s21657_s1 + $0x2f44] ss:$16 sps:$4 sm:$0xff]   ;;  %v16376_v62 = vld [vmem:[%s21657_s1 + $0x2f4c] ss:$16 sps:$4 sm:$0xff]  }
 0x5af   :  { %10748 = vmatpush1.bf16.msra.mxu0 %v16280_v44  ;;  %11773 = vmatpush1.bf16.msra.mxu1 %v16283_v0  ;;  %v16371_v44 = vld [vmem:[%s21657_s1 + $0x2f40] ss:$16 sps:$4 sm:$0xff]   ;;  %v16374_v0 = vld [vmem:[%s21657_s1 + $0x2f48] ss:$16 sps:$4 sm:$0xff]  }
 0x5b0   :  { %10749 = vmatprep.subr.bf16.mxu0 %v16288_v47  ;;  %11774 = vmatprep.subr.bf16.mxu1 %v16291_v1  ;;  %v16379_v47 = vld [vmem:[%s21657_s1 + $0x2f64] ss:$16 sps:$4 sm:$0xff]   ;;  %v16382_v1 = vld [vmem:[%s21657_s1 + $0x2f6c] ss:$16 sps:$4 sm:$0xff]  }
 0x5b3   :  { %10750 = vmatpush1.bf16.msra.mxu0 %v16286_v2  ;;  %11775 = vmatpush1.bf16.msra.mxu1 %v16289_v59  ;;  %v16377_v2 = vld [vmem:[%s21657_s1 + $0x2f60] ss:$16 sps:$4 sm:$0xff]   ;;  %v16380_v59 = vld [vmem:[%s21657_s1 + $0x2f68] ss:$16 sps:$4 sm:$0xff]  }
 0x5b4   :  { %10751 = vmatprep.subr.bf16.mxu0 %v16294_v57  ;;  %11776 = vmatprep.subr.bf16.mxu1 %v16297_v5  ;;  %v16385_v57 = vld [vmem:[%s21657_s1 + $0x2f84] ss:$16 sps:$4 sm:$0xff]   ;;  %v16388_v5 = vld [vmem:[%s21657_s1 + $0x2f8c] ss:$16 sps:$4 sm:$0xff]  }
 0x5b7   :  { %10752 = vmatpush1.bf16.msra.mxu0 %v16292_v60  ;;  %11777 = vmatpush1.bf16.msra.mxu1 %v16295_v54  ;;  %v16383_v60 = vld [vmem:[%s21657_s1 + $0x2f80] ss:$16 sps:$4 sm:$0xff]   ;;  %v16386_v54 = vld [vmem:[%s21657_s1 + $0x2f88] ss:$16 sps:$4 sm:$0xff]  }
 0x5b8   :  { %10753 = vmatprep.subr.bf16.mxu0 %v16300_v10  ;;  %11778 = vmatprep.subr.bf16.mxu1 %v16303_v48  ;;  %v16391_v10 = vld [vmem:[%s21657_s1 + $0x2fa4] ss:$16 sps:$4 sm:$0xff]   ;;  %v16394_v48 = vld [vmem:[%s21657_s1 + $0x2fac] ss:$16 sps:$4 sm:$0xff]  }
 0x5bb   :  { %10754 = vmatpush1.bf16.msra.mxu0 %v16298_v11  ;;  %11779 = vmatpush1.bf16.msra.mxu1 %v16301_v63  ;;  %v16389_v11 = vld [vmem:[%s21657_s1 + $0x2fa0] ss:$16 sps:$4 sm:$0xff]   ;;  %v16392_v63 = vld [vmem:[%s21657_s1 + $0x2fa8] ss:$16 sps:$4 sm:$0xff]  }
 0x5bc   :  { %10755 = vmatprep.subr.bf16.mxu0 %v16306_v12  ;;  %11780 = vmatprep.subr.bf16.mxu1 %v16309_v3  ;;  %v16397_v12 = vld [vmem:[%s21657_s1 + $0x2fc4] ss:$16 sps:$4 sm:$0xff]   ;;  %v16400_v3 = vld [vmem:[%s21657_s1 + $0x2fcc] ss:$16 sps:$4 sm:$0xff]  }
 0x5bf   :  { %10756 = vmatpush1.bf16.msra.mxu0 %v16304_v52  ;;  %11781 = vmatpush1.bf16.msra.mxu1 %v16307_v15  ;;  %v16395_v52 = vld [vmem:[%s21657_s1 + $0x2fc0] ss:$16 sps:$4 sm:$0xff]   ;;  %v16398_v15 = vld [vmem:[%s21657_s1 + $0x2fc8] ss:$16 sps:$4 sm:$0xff]  }
 0x5c0   :  { %10766 = vmatprep.subr.bf16.mxu0 %v16313_v7  ;;  %11791 = vmatprep.subr.bf16.mxu1 %v16316_v6  ;;  %v16403_v7 = vld [vmem:[%s21657_s1 + $0x2fe4] ss:$16 sps:$4 sm:$0xff]   ;;  %v16406_v6 = vld [vmem:[%s21657_s1 + $0x2fec] ss:$16 sps:$4 sm:$0xff]  }
 0x5c2   :  { %10758 = vmatmul.mubr.bf16.vlgmr.msra.gmra.mrb[0].mxu0 %v21241_v17  ;;  %11783 = vmatmul.mubr.bf16.vlgmr.msra.gmra.mrb[0].mxu1 %v21241_v17 }
 0x5c3   :  { %10767 = vmatpush1.bf16.msra.mxu0 %v16311_v8  ;;  %11792 = vmatpush1.bf16.msra.mxu1 %v16314_v20  ;;  %v16401_v8 = vld [vmem:[%s21657_s1 + $0x2fe0] ss:$16 sps:$4 sm:$0xff]   ;;  %v16404_v20 = vld [vmem:[%s21657_s1 + $0x2fe8] ss:$16 sps:$4 sm:$0xff]  }
 0x5c4   :  { %10768 = vmatprep.subr.bf16.mxu0 %v16319_v22  ;;  %11793 = vmatprep.subr.bf16.mxu1 %v16322_v9  ;;  %v16409_v22 = vld [vmem:[%s21657_s1 + $0x3004] ss:$16 sps:$4 sm:$0xff]   ;;  %v16412_v9 = vld [vmem:[%s21657_s1 + $0x300c] ss:$16 sps:$4 sm:$0xff]  }
 0x5c5   :  { %10798 = vmatprep.mubr.bf16.mxu0 %v1919_v4  ;;  %11823 = vmatprep.mubr.bf16.mxu1 %v1919_v4  ;;  %v1917_v4 = vcombine.high %v21241_v17, %v21241_v17  ;;  %v16418_v17 = vld [vmem:[%s21657_s1 + $0x302c] ss:$16 sps:$4 sm:$0xff]  }
 0x5c7   :  { %10769 = vmatpush1.bf16.msra.mxu0 %v16317_v24  ;;  %11794 = vmatpush1.bf16.msra.mxu1 %v16320_v13  ;;  %v16407_v24 = vld [vmem:[%s21657_s1 + $0x3000] ss:$16 sps:$4 sm:$0xff]   ;;  %v16410_v13 = vld [vmem:[%s21657_s1 + $0x3008] ss:$16 sps:$4 sm:$0xff]  }
 0x5c8   :  { %10770 = vmatprep.subr.bf16.mxu0 %v16325_v16  ;;  %11795 = vmatprep.subr.bf16.mxu1 %v16328_v27  ;;  %v16415_v16 = vld [vmem:[%s21657_s1 + $0x3024] ss:$16 sps:$4 sm:$0xff]   ;;  %v16413_v27 = vld [vmem:[%s21657_s1 + $0x3020] ss:$16 sps:$4 sm:$0xff]  }
 0x5cb   :  { %10771 = vmatpush1.bf16.msra.mxu0 %v16323_v18  ;;  %11796 = vmatpush1.bf16.msra.mxu1 %v16326_v28  ;;  %v16416_v18 = vld [vmem:[%s21657_s1 + $0x3028] ss:$16 sps:$4 sm:$0xff]   ;;  %v16421_v28 = vld [vmem:[%s21657_s1 + $0x3044] ss:$16 sps:$4 sm:$0xff]  }
 0x5cc   :  { %10772 = vmatprep.subr.bf16.mxu0 %v16331_v14  ;;  %11797 = vmatprep.subr.bf16.mxu1 %v16334_v30  ;;  %v16424_v14 = vld [vmem:[%s21657_s1 + $0x304c] ss:$16 sps:$4 sm:$0xff]   ;;  %v16522_v30 = vmov 0  }
 0x5cf   :  { %10773 = vmatpush1.bf16.msra.mxu0 %v16329_v19  ;;  %11798 = vmatpush1.bf16.msra.mxu1 %v16332_v32  ;;  %v16419_v19 = vld [vmem:[%s21657_s1 + $0x3040] ss:$16 sps:$4 sm:$0xff]   ;;  %v16422_v32 = vld [vmem:[%s21657_s1 + $0x3048] ss:$16 sps:$4 sm:$0xff]  }
 0x5d0   :  { %10774 = vmatprep.subr.bf16.mxu0 %v16337_v26  ;;  %11799 = vmatprep.subr.bf16.mxu1 %v16340_v23  ;;  %v16427_v26 = vld [vmem:[%s21657_s1 + $0x3064] ss:$16 sps:$4 sm:$0xff]   ;;  %v16430_v23 = vld [vmem:[%s21657_s1 + $0x306c] ss:$16 sps:$4 sm:$0xff]  }
 0x5d3   :  { %10775 = vmatpush1.bf16.msra.mxu0 %v16335_v36  ;;  %11800 = vmatpush1.bf16.msra.mxu1 %v16338_v37  ;;  %v16425_v36 = vld [vmem:[%s21657_s1 + $0x3060] ss:$16 sps:$4 sm:$0xff]   ;;  %v16428_v37 = vld [vmem:[%s21657_s1 + $0x3068] ss:$16 sps:$4 sm:$0xff]  }
 0x5d4   :  { %10776 = vmatprep.subr.bf16.mxu0 %v16343_v21  ;;  %11801 = vmatprep.subr.bf16.mxu1 %v16346_v31  ;;  %v16433_v21 = vld [vmem:[%s21657_s1 + $0x3084] ss:$16 sps:$4 sm:$0xff]   ;;  %v16436_v31 = vld [vmem:[%s21657_s1 + $0x308c] ss:$16 sps:$4 sm:$0xff]  }
 0x5d7   :  { %10777 = vmatpush1.bf16.msra.mxu0 %v16341_v39  ;;  %11802 = vmatpush1.bf16.msra.mxu1 %v16344_v40  ;;  %v16431_v39 = vld [vmem:[%s21657_s1 + $0x3080] ss:$16 sps:$4 sm:$0xff]   ;;  %v16434_v40 = vld [vmem:[%s21657_s1 + $0x3088] ss:$16 sps:$4 sm:$0xff]  }
 0x5d8   :  { %10778 = vmatprep.subr.bf16.mxu0 %v16349_v41  ;;  %11803 = vmatprep.subr.bf16.mxu1 %v16352_v25  ;;  %v16439_v41 = vld [vmem:[%s21657_s1 + $0x30a4] ss:$16 sps:$4 sm:$0xff]   ;;  %v16442_v25 = vld [vmem:[%s21657_s1 + $0x30ac] ss:$16 sps:$4 sm:$0xff]  }
 0x5db   :  { %10779 = vmatpush1.bf16.msra.mxu0 %v16347_v43  ;;  %11804 = vmatpush1.bf16.msra.mxu1 %v16350_v46  ;;  %v16437_v43 = vld [vmem:[%s21657_s1 + $0x30a0] ss:$16 sps:$4 sm:$0xff]   ;;  %v16440_v46 = vld [vmem:[%s21657_s1 + $0x30a8] ss:$16 sps:$4 sm:$0xff]  }
 0x5dc   :  { %10780 = vmatprep.subr.bf16.mxu0 %v16355_v29  ;;  %11805 = vmatprep.subr.bf16.mxu1 %v16358_v50  ;;  %v16445_v29 = vld [vmem:[%s21657_s1 + $0x30c4] ss:$16 sps:$4 sm:$0xff]   ;;  %v16448_v50 = vld [vmem:[%s21657_s1 + $0x30cc] ss:$16 sps:$4 sm:$0xff]  }
 0x5df   :  { %10781 = vmatpush1.bf16.msra.mxu0 %v16353_v33  ;;  %11806 = vmatpush1.bf16.msra.mxu1 %v16356_v51  ;;  %v16443_v33 = vld [vmem:[%s21657_s1 + $0x30c0] ss:$16 sps:$4 sm:$0xff]   ;;  %v16446_v51 = vld [vmem:[%s21657_s1 + $0x30c8] ss:$16 sps:$4 sm:$0xff]  }
 0x5e0   :  { %10782 = vmatprep.subr.bf16.mxu0 %v16361_v53  ;;  %11807 = vmatprep.subr.bf16.mxu1 %v16364_v38  ;;  %v16451_v53 = vld [vmem:[%s21657_s1 + $0x30e4] ss:$16 sps:$4 sm:$0xff]   ;;  %v16454_v38 = vld [vmem:[%s21657_s1 + $0x30ec] ss:$16 sps:$4 sm:$0xff]  }
 0x5e3   :  { %10783 = vmatpush1.bf16.msra.mxu0 %v16359_v34  ;;  %11808 = vmatpush1.bf16.msra.mxu1 %v16362_v55  ;;  %v16449_v34 = vld [vmem:[%s21657_s1 + $0x30e0] ss:$16 sps:$4 sm:$0xff]   ;;  %v16452_v55 = vld [vmem:[%s21657_s1 + $0x30e8] ss:$16 sps:$4 sm:$0xff]  }
 0x5e4   :  { %10784 = vmatprep.subr.bf16.mxu0 %v16367_v56  ;;  %11809 = vmatprep.subr.bf16.mxu1 %v16370_v45  ;;  %v12252_v56 = vld.sshfl [vmem:[%s21656_s0 + $0x30] sm:$0x1 pattern:$0x75316420]  ;;  %v16455_v45 = vld [vmem:[%s21659_s3 + $0x40] sm:$0xff]  }
 0x5e7   :  { %10785 = vmatpush1.bf16.msra.mxu0 %v16365_v58  ;;  %11810 = vmatpush1.bf16.msra.mxu1 %v16368_v61  ;;  %v16456_v58 = vld [vmem:[%s21659_s3 + $0xc0] sm:$0xff]   ;;  %v1933_v61 = vrot.slane %v12252_v56, %v16689_v49  ;;  %v16460_v49 = vld [vmem:[%s21659_s3 + $0xc8] sm:$0xff]  }
 0x5e8   :  { %10786 = vmatprep.subr.bf16.mxu0 %v16373_v35  ;;  %11811 = vmatprep.subr.bf16.mxu1 %v16376_v62  ;;  %v16457_v35 = vld [vmem:[%s21659_s3] sm:$0xff]  }
 0x5e9   :  { %v16458_v62 = vld [vmem:[%s21659_s3 + $0x80] sm:$0xff]  }
 0x5eb   :  { %10787 = vmatpush1.bf16.msra.mxu0 %v16371_v44  ;;  %11812 = vmatpush1.bf16.msra.mxu1 %v16374_v0  ;;  %v16459_v44 = vld [vmem:[%s21659_s3 + $0x48] sm:$0xff]  }
 0x5ec   :  { %10788 = vmatprep.subr.bf16.mxu0 %v16379_v47  ;;  %11813 = vmatprep.subr.bf16.mxu1 %v16382_v1  ;;  %v16461_v0 = vld [vmem:[%s21659_s3 + $0x8] sm:$0xff]   ;;  %v16463_v1 = vld [vmem:[%s21659_s3 + $0x50] sm:$0xff]  }
 0x5ed   :  { %v16462_v47 = vld [vmem:[%s21659_s3 + $0x88] sm:$0xff]  }
 0x5ef   :  { %10789 = vmatpush1.bf16.msra.mxu0 %v16377_v2  ;;  %11814 = vmatpush1.bf16.msra.mxu1 %v16380_v59  ;;  %v16464_v2 = vld [vmem:[%s21659_s3 + $0xd0] sm:$0xff]  }
 0x5f0   :  { %10790 = vmatprep.subr.bf16.mxu0 %v16385_v57  ;;  %11815 = vmatprep.subr.bf16.mxu1 %v16388_v5  ;;  %v16465_v59 = vld [vmem:[%s21659_s3 + $0x10] sm:$0xff]   ;;  %v16467_v5 = vld [vmem:[%s21659_s3 + $0x58] sm:$0xff]  }
 0x5f1   :  { %v16466_v57 = vld [vmem:[%s21659_s3 + $0x90] sm:$0xff]  }
 0x5f3   :  { %10791 = vmatpush1.bf16.msra.mxu0 %v16383_v60  ;;  %11816 = vmatpush1.bf16.msra.mxu1 %v16386_v54  ;;  %v16468_v60 = vld [vmem:[%s21659_s3 + $0xd8] sm:$0xff]  }
 0x5f4   :  { %10792 = vmatprep.subr.bf16.mxu0 %v16391_v10  ;;  %11817 = vmatprep.subr.bf16.mxu1 %v16394_v48  ;;  %v16469_v54 = vld [vmem:[%s21659_s3 + $0x18] sm:$0xff]   ;;  %v16471_v48 = vld [vmem:[%s21659_s3 + $0x60] sm:$0xff]  }
 0x5f5   :  { %v16470_v10 = vld [vmem:[%s21659_s3 + $0x98] sm:$0xff]  }
 0x5f7   :  { %10793 = vmatpush1.bf16.msra.mxu0 %v16389_v11  ;;  %11818 = vmatpush1.bf16.msra.mxu1 %v16392_v63  ;;  %v16472_v11 = vld [vmem:[%s21659_s3 + $0xe0] sm:$0xff]  }
 0x5f8   :  { %10794 = vmatprep.subr.bf16.mxu0 %v16397_v12  ;;  %11819 = vmatprep.subr.bf16.mxu1 %v16400_v3  ;;  %v16473_v63 = vld [vmem:[%s21659_s3 + $0x20] sm:$0xff]   ;;  %v16475_v3 = vld [vmem:[%s21659_s3 + $0x68] sm:$0xff]  }
 0x5f9   :  { %v16474_v12 = vld [vmem:[%s21659_s3 + $0xa0] sm:$0xff]  }
 0x5fb   :  { %10795 = vmatpush1.bf16.msra.mxu0 %v16395_v52  ;;  %11820 = vmatpush1.bf16.msra.mxu1 %v16398_v15  ;;  %v16476_v52 = vld [vmem:[%s21659_s3 + $0xe8] sm:$0xff]  }
 0x5fc   :  { %10796 = vmatprep.subr.bf16.mxu0 %v16403_v7  ;;  %11821 = vmatprep.subr.bf16.mxu1 %v16406_v6  ;;  %v16477_v15 = vld [vmem:[%s21659_s3 + $0x28] sm:$0xff]   ;;  %v16479_v6 = vld [vmem:[%s21659_s3 + $0x70] sm:$0xff]  }
 0x5fd   :  { %v16478_v7 = vld [vmem:[%s21659_s3 + $0xa8] sm:$0xff]  }
 0x5ff   :  { %10797 = vmatpush1.bf16.msra.mxu0 %v16401_v8  ;;  %11822 = vmatpush1.bf16.msra.mxu1 %v16404_v20  ;;  %v16480_v8 = vld [vmem:[%s21659_s3 + $0xf0] sm:$0xff]  }
 0x600   :  { %10807 = vmatprep.subr.bf16.mxu0 %v16409_v22  ;;  %11832 = vmatprep.subr.bf16.mxu1 %v16412_v9  ;;  %v16481_v20 = vld [vmem:[%s21659_s3 + $0x30] sm:$0xff]   ;;  %v16483_v9 = vld [vmem:[%s21659_s3 + $0x78] sm:$0xff]  }
 0x601   :  { %v16482_v22 = vld [vmem:[%s21659_s3 + $0xb0] sm:$0xff]  }
 0x602   :  { %10799 = vmatmul.mubr.bf16.vlgmr.msra.gmra.mrb[0].mxu0 %v1917_v4  ;;  %11824 = vmatmul.mubr.bf16.vlgmr.msra.gmra.mrb[0].mxu1 %v1917_v4  ;;  %v16484_v4 = vld [vmem:[%s21659_s3 + $0xf8] sm:$0xff]  }
 0x603   :  { %10808 = vmatpush1.bf16.msra.mxu0 %v16407_v24  ;;  %11833 = vmatpush1.bf16.msra.mxu1 %v16410_v13  ;;  %v16485_v24 = vld [vmem:[%s21659_s3 + $0x38] sm:$0xff]  }
 0x604   :  { %10809 = vmatprep.subr.bf16.mxu0 %v16415_v16  ;;  %11834 = vmatprep.subr.bf16.mxu1 %v16418_v17  ;;  %v16486_v13 = vld [vmem:[%s21659_s3 + $0xb8] sm:$0xff]   ;;  %v1601_v16 = vsub.s32 0, %v16671_v42  ;;  %v1609_v17 = vsub.s32 2, %v16671_v42 }
 0x605   :  { %10839 = vmatprep.mubr.bf16.mxu0 %v16522_v30  ;;  %11864 = vmatprep.mubr.bf16.mxu1 %v16522_v30 }
 0x607   :  { %10810 = vmatpush1.bf16.msra.mxu0 %v16413_v27  ;;  %11835 = vmatpush1.bf16.msra.mxu1 %v16416_v18  ;;  %v1597_v27 = vld [vmem:[%s21658_s2] sm:$0xf]  ;;  %v1605_v18 = vsub.s32 1, %v16671_v42 }
 0x608   :  { %10811 = vmatprep.subr.bf16.mxu0 %v16421_v28  ;;  %11836 = vmatprep.subr.bf16.mxu1 %v16424_v14  ;;  %v1613_v28 = vsub.s32 3, %v16671_v42  ;;  %v1602_v14 = vrot.slane %v1597_v27, %v1601_v16  ;;  %v1610_v30 = vrot.slane %v1597_v27, %v1609_v17 }
 0x60b   :  { %10812 = vmatpush1.bf16.msra.mxu0 %v16419_v19  ;;  %11837 = vmatpush1.bf16.msra.mxu1 %v16422_v32  ;;  %v1606_v19 = vrot.slane %v1597_v27, %v1605_v18  ;;  %v1614_v32 = vrot.slane %v1597_v27, %v1613_v28 }
 0x60c   :  { %10813 = vmatprep.subr.bf16.mxu0 %v16427_v26  ;;  %11838 = vmatprep.subr.bf16.mxu1 %v16430_v23 }
 0x60f   :  { %10814 = vmatpush1.bf16.msra.mxu0 %v16425_v36  ;;  %11839 = vmatpush1.bf16.msra.mxu1 %v16428_v37 }
 0x610   :  { %10815 = vmatprep.subr.bf16.mxu0 %v16433_v21  ;;  %11840 = vmatprep.subr.bf16.mxu1 %v16436_v31 }
 0x613   :  { %10816 = vmatpush1.bf16.msra.mxu0 %v16431_v39  ;;  %11841 = vmatpush1.bf16.msra.mxu1 %v16434_v40 }
 0x614   :  { %10817 = vmatprep.subr.bf16.mxu0 %v16439_v41  ;;  %11842 = vmatprep.subr.bf16.mxu1 %v16442_v25 }
 0x617   :  { %10818 = vmatpush1.bf16.msra.mxu0 %v16437_v43  ;;  %11843 = vmatpush1.bf16.msra.mxu1 %v16440_v46 }
 0x618   :  { %10819 = vmatprep.subr.bf16.mxu0 %v16445_v29  ;;  %11844 = vmatprep.subr.bf16.mxu1 %v16448_v50 }
 0x61b   :  { %10820 = vmatpush1.bf16.msra.mxu0 %v16443_v33  ;;  %11845 = vmatpush1.bf16.msra.mxu1 %v16446_v51 }
 0x61c   :  { %10821 = vmatprep.subr.bf16.mxu0 %v16451_v53  ;;  %11846 = vmatprep.subr.bf16.mxu1 %v16454_v38 }
 0x61f   :  { %10822 = vmatpush1.bf16.msra.mxu0 %v16449_v34  ;;  %11847 = vmatpush1.bf16.msra.mxu1 %v16452_v55 }
 0x620   :  { %13854 = vmatprep.subr.bf16.mxu0 %v16455_v45  ;;  %13876 = vmatprep.subr.bf16.mxu1 %v16456_v58  ;;  %v13821_v45 = vld [vmem:[%s21660_s4] ss:$0 sm:$0xff]  ;;  %s16523_s4 = smov [#allocation2]  }
 0x621   :  { %s12244_s9 = sshll.u32 %s16523_s4, 4  ;;  %s12245_s9 = int_to_ptr.vmem [resolvable:$true] %s12244_s9 }
 0x622   :  { %10840 = vmatmul.mubr.bf16.vlgmr.msra.gmra.mrb[0].mxu0 %v1933_v61  ;;  %11865 = vmatmul.mubr.bf16.vlgmr.msra.gmra.mrb[0].mxu1 %v1933_v61  ;;  %s16497_s10 = scalar_lea.vmem %s12245_s9, 32  ;;  %p16502_p1 = scmp.lt.s32.totalorder %s12245_s9, %s12245_s9 }
 0x623   :  { %13855 = vmatpush3.bf16.msra.mxu0 %v16457_v35  ;;  %13877 = vmatpush3.bf16.msra.mxu1 %v16458_v62  ;;  %p16498_p0 = scmp.ne.s32.totalorder %s12245_s9, %s16497_s10  ;;  %p16503_p2 = scmp.lt.s32.totalorder %s16497_s10, %s16497_s10 }
 0x624   :  { %13856 = vmatprep.subr.bf16.mxu0 %v16459_v44  ;;  %13878 = vmatprep.subr.bf16.mxu1 %v16460_v49 }
 0x625   :  { %p16504_p3 = por %p16503_p2, %p16502_p1 }
 0x627   :  { %13857 = vmatpush3.bf16.msra.mxu0 %v16461_v0  ;;  %13879 = vmatpush3.bf16.msra.mxu1 %v16462_v47  ;;  %p16505_p4 = pnand %p16504_p3, %p16498_p0 }
 0x628   :  { %13858 = vmatprep.subr.bf16.mxu0 %v16463_v1  ;;  %13880 = vmatprep.subr.bf16.mxu1 %v16464_v2 }
 0x62b   :  { %13859 = vmatpush3.bf16.msra.mxu0 %v16465_v59  ;;  %13881 = vmatpush3.bf16.msra.mxu1 %v16466_v57 }
 0x62c   :  { %13860 = vmatprep.subr.bf16.mxu0 %v16467_v5  ;;  %13882 = vmatprep.subr.bf16.mxu1 %v16468_v60 }
 0x62f   :  { %13861 = vmatpush3.bf16.msra.mxu0 %v16469_v54  ;;  %13883 = vmatpush3.bf16.msra.mxu1 %v16470_v10 }
 0x630   :  { %13862 = vmatprep.subr.bf16.mxu0 %v16471_v48  ;;  %13884 = vmatprep.subr.bf16.mxu1 %v16472_v11 }
 0x633   :  { %13863 = vmatpush3.bf16.msra.mxu0 %v16473_v63  ;;  %13885 = vmatpush3.bf16.msra.mxu1 %v16474_v12 }
 0x634   :  { %13864 = vmatprep.subr.bf16.mxu0 %v16475_v3  ;;  %13886 = vmatprep.subr.bf16.mxu1 %v16476_v52 }
 0x637   :  { %13865 = vmatpush3.bf16.msra.mxu0 %v16477_v15  ;;  %13887 = vmatpush3.bf16.msra.mxu1 %v16478_v7 }
 0x638   :  { %13866 = vmatprep.subr.bf16.mxu0 %v16479_v6  ;;  %13888 = vmatprep.subr.bf16.mxu1 %v16480_v8 }
 0x63b   :  { %13867 = vmatpush3.bf16.msra.mxu0 %v16481_v20  ;;  %13889 = vmatpush3.bf16.msra.mxu1 %v16482_v22 }
 0x63c   :  { %13868 = vmatprep.subr.bf16.mxu0 %v16483_v9  ;;  %13890 = vmatprep.subr.bf16.mxu1 %v16484_v4 }
 0x63f   :  { %13869 = vmatpush3.bf16.msra.mxu0 %v16485_v24  ;;  %13891 = vmatpush3.bf16.msra.mxu1 %v16486_v13 }
 0x6f5   :  { %v10841_v26 = vpop.f32.mrb[0].mxu0  ;;  %v11866_v23 = vpop.f32.mrb[0].mxu1 }
 0x6f6   :  { %v13898_v36 = vadd.f32 %v10841_v26, %v1602_v14  ;;  %v13900_v37 = vadd.f32 %v11866_v23, %v1610_v30  ;;  %v10843_v21 = vpop.f32.mrb[1].mxu0  ;;  %v11868_v31 = vpop.f32.mrb[1].mxu1 }
 0x6f7   :  { %v13899_v39 = vadd.f32 %v10843_v21, %v1606_v19  ;;  %v13901_v40 = vadd.f32 %v11868_v31, %v1614_v32  ;;  %v10845_v41 = vpop.f32.mrb[2].mxu0  ;;  %v11870_v25 = vpop.f32.mrb[2].mxu1 }
 0x6f8   :  { %v11873_v43 = vmax.f32 %v13898_v36, 0.0  ;;  %v11875_v46 = vmax.f32 %v13900_v37, 0.0  ;;  %v10846_v29 = vpop.f32.mrb[3].mxu0  ;;  %v11871_v50 = vpop.f32.mrb[3].mxu1 }
 0x6f9   :  { %v11874_v33 = vmax.f32 %v13899_v39, 0.0  ;;  %v11876_v42 = vmax.f32 %v13901_v40, 0.0 }
 0x6fa   :  { %v11877_v38 = vpack.c.bf16 %v11873_v43, %v11873_v43  ;;  %v11879_v34 = vpack.c.bf16 %v11875_v46, %v11875_v46 }
 0x6fb   :  { %v11878_v51 = vpack.c.bf16 %v11874_v33, %v11874_v33  ;;  %v11880_v53 = vpack.c.bf16 %v11876_v42, %v11876_v42 }
 0x6fd   :  { %12176 = vmatprep.mubr.bf16.mxu0 %v11878_v51  ;;  %12216 = vmatprep.mubr.bf16.mxu1 %v11880_v53 }
 0x6fe   :  { %12177 = vmatmul.mubr.bf16.vlgmr.msra.gmra.mrb[4].mxu0 %v11877_v38  ;;  %12217 = vmatmul.mubr.bf16.vlgmr.msra.gmra.mrb[4].mxu1 %v11879_v34 }
 0x7d1   :  { %v13870_v55 = vpop.f32.mrb[4].mxu0  ;;  %v13892_v56 = vpop.f32.mrb[4].mxu1 }
 0x7d2   :  { %v13871_v58 = vpop.f32.mrb[5].mxu0  ;;  %v13893_v61 = vpop.f32.mrb[5].mxu1 }
 0x7d3   :  { %v13872_v35 = vadd.f32 %v13871_v58, %v13870_v55  ;;  %v13894_v62 = vadd.f32 %v13893_v61, %v13892_v56  ;;  %v13873_v44 = vpop.f32.mrb[6].mxu0  ;;  %v13895_v49 = vpop.f32.mrb[6].mxu1 }
 0x7d4   :  { %v13874_v0 = vpop.f32.mrb[7].mxu0  ;;  %v13896_v47 = vpop.f32.mrb[7].mxu1 }
 0x7d5   :  { %v12179_v1 = vadd.f32 %v13872_v35, %v13821_v45 }
 0x7d7   :  { %v12219_v2 = vadd.f32 %v13894_v62, %v12179_v1 }
 0x7d9   :  { %v12225_v59 = vsel %vm12224_vm0, %v12219_v2, -inf }
 0x7da   :  { %12226 = vmax.xlane.f32.xlu0 %v12225_v59 }
 0x867   :  { %v12227_v57 = vpop.xlane.xlu0 %12226 }
 0x868   :  { %v12228_v5 = vsub.f32 %v12219_v2, %v12227_v57 }
 0x86a   :  { %v12229_v60 = vmul.f32 1.442695, %v12228_v5 }
 0x86c   :  { %16487 = vpow2.f32 %v12229_v60 }
 0x876   :  { %v16488_v54 = vpop.eup %16487 }
 0x877   :  { %v12231_v10 = vsel %vm12224_vm0, %v16488_v54, 0.0 }
 0x878   :  { %12232 = vadd.xlane.f32.xlu0 %v12231_v10 }
 0x905   :  { %v12233_v48 = vpop.xlane.xlu0 %12232 }
 0x906   :  { %16489 = vlog2.f32 %v12233_v48 }
 0x910   :  { %v16490_v11 = vpop.eup %16489 }
 0x911   :  { %v12235_v63 = vmul.f32 0.6931472, %v16490_v11 }
 0x913   :  { %v12236_v12 = vsub.f32 %v12228_v5, %v12235_v63 }
 0x915   :  { %12237 = vst.msk [vmem:[#allocation2] sm:$0x3] %vm12224_vm0, %v12236_v12 }
 0x916   :  { %16508 = shalt.err (!%p16505_p4)
}
 0x917   :  { %s16509_s13 = scalar_lea.hbm %s21661_s5, 32 }
 0x918   :  { %p16510_p5 = scmp.ne.s32.totalorder %s21661_s5, %s16509_s13  ;;  %p16513_p6 = scmp.lt.u32.totalorder %s16509_s13, %s21661_s5 }
 0x91a   :  { %p16515_p7 = pnand %p16513_p6, %p16510_p5 }
 0x91c   :  { %16518 = shalt.err (!%p16515_p7)
}
 0x91d   :  { %12247 = dma.vmem_to_hbm [thread:$0]  %s12245_s9, 32, %s21661_s5, [#allocation3]  }
 0x91e   :  { %16519 = dma.done.wait [#allocation3], 32  }
 0x91f   :  { %16520 = vsyncadd [#allocation3], 4294967264 }
 0x920   :  { %12251 = vsyncpa [#allocation3], 1 }

</bundles_post_ra>
